<compile_context>
chip_gen: v6e
topology: v6e:2x2x1
jax: 0.10.0
libtpu: 0.0.40
codegen_flags: <defaults>
</compile_context>

<pallas_src>
import functools

import jax
import jax.numpy as jnp
from jax.experimental import pallas as pl
from jax.experimental.pallas import tpu as pltpu

BN_EPS = 1e-3  # nn.BatchNorm2d(..., eps=0.001)


def _round_up(a, b):
    return (a + b - 1) // b * b


def fold_bn(gamma, beta, mean, var, eps=BN_EPS):
    # TODO(synk): BatchNorm is eval-mode only (running stats folded into scale/shift);
    # training-mode batch statistics are not reproduced.
    scale = gamma / jnp.sqrt(var + eps)
    shift = beta - mean * scale
    return scale, shift


def _fold2d(p):
    s, b = fold_bn(p["gamma"], p["beta"], p["mean"], p["var"])
    return (s.reshape(1, -1).astype(jnp.float32),
            b.reshape(1, -1).astype(jnp.float32))


# ---------------------------------------------------------------------------
# The single fused kernel
# ---------------------------------------------------------------------------
def _inception_b_kernel(x_ref, w1_ref, s1_ref, b1_ref, g2_ref, s2_ref, b2_ref,
                        w3_ref, s3_ref, b3_ref, w4_ref, s4_ref, b4_ref,
                        o_ref, y1_ref, *, h, w):
    hc = x_ref.shape[1]          # even-padded input height
    w2x = x_ref.shape[2]         # number of column pairs of x
    cin2 = x_ref.shape[3]        # 2 * Cin (column-pair folded channels)
    cin = cin2 // 2
    q = y1_ref.shape[1]          # padded pair-column count of the y1 scratch
    oh, ow = o_ref.shape[1], o_ref.shape[2]
    w2 = (w + 1) // 2            # real (unpadded) pair count

    xb = x_ref[0]                # (hc, w2x, 2*cin) f32, column-pair folded

    # --- stage 1: branch3x3dbl_1 = 1x1 conv + BN + ReLU (kept pair-folded) -------
    # block-diagonal weight keeps even/odd columns in lanes 0:64 / 64:128
    y1 = jnp.dot(xb.reshape(hc * w2x, cin2).astype(jnp.bfloat16), w1_ref[...],
                 preferred_element_type=jnp.float32)
    y1 = jnp.maximum(y1 * s1_ref[...] + b1_ref[...], 0.0)           # (hc*w2x, 128)

    # y1 with a one-pixel zero halo for the 3x3/pad-1 conv, resident in VMEM only
    y1_ref[...] = jnp.zeros_like(y1_ref)
    y1_ref[1:h + 1, 1:w2 + 1, :] = y1.reshape(hc, w2x, 128)[0:h, 0:w2, :]
    if w % 2 == 1:
        # odd width: the last pair's odd half is spatial zero padding, not data
        y1_ref[1:h + 1, w2:w2 + 1, 64:128] = jnp.zeros((h, 1, 64), jnp.float32)

    # --- stage 2: branch3x3dbl_2 = 3x3 / pad 1 conv + BN + ReLU -------------------
    # flattened (row*Q + paircol) view: every tap operand is a contiguous row window.
    # output stays pair-folded: lanes 0:96 = even columns, 96:192 = odd columns.
    yv = y1_ref[...].reshape((hc + 3) * q, 128)
    acc2 = jnp.zeros((hc * q, 192), jnp.float32)
    for dh in range(3):
        for s in range(3):
            acc2 = acc2 + jnp.dot(
                yv[dh * q + s: dh * q + s + hc * q, :].astype(jnp.bfloat16),
                g2_ref[dh * 3 + s], preferred_element_type=jnp.float32)
    y2 = jnp.maximum(acc2 * s2_ref[...] + b2_ref[...], 0.0)         # (hc*q, 192)

    # --- stage 3: both 3x3 stride-2 convs + 3x3 stride-2 max pool -----------------
    # double-row views turn the row-stride-2 access into plain leading-dim slices;
    # the column stride-2 is already absorbed by the pair fold (6 taps per conv).
    xd = xb.reshape(hc // 2, 2 * w2x, cin2)
    y2d = y2.reshape(hc // 2, 2 * q, 192)
    m = oh * ow
    acc3 = jnp.zeros((m, 384), jnp.float32)
    acc4 = jnp.zeros((m, 96), jnp.float32)
    pool = jnp.full((oh, ow, cin), -jnp.inf, jnp.float32)
    for dh in range(3):
        r0 = dh // 2
        for cs in range(2):
            t = dh * 2 + cs
            cx = (dh % 2) * w2x + cs
            cy = (dh % 2) * q + cs
            xt = xd[r0:r0 + oh, cx:cx + ow, :]                       # (oh, ow, 2cin) f32
            acc3 = acc3 + jnp.dot(xt.reshape(m, cin2).astype(jnp.bfloat16),
                                  w3_ref[t], preferred_element_type=jnp.float32)
            yt = y2d[r0:r0 + oh, cy:cy + ow, :]                      # (oh, ow, 192) f32
            acc4 = acc4 + jnp.dot(yt.reshape(m, 192).astype(jnp.bfloat16),
                                  w4_ref[t], preferred_element_type=jnp.float32)
            if cs == 0:   # taps dw = 0, 1 (even/odd halves of the same pair)
                pool = jnp.maximum(pool,
                                   jnp.maximum(xt[:, :, 0:cin], xt[:, :, cin:cin2]))
            else:         # tap dw = 2 (even half of the next pair)
                pool = jnp.maximum(pool, xt[:, :, 0:cin])

    # --- lane-dense concatenated output: [branch3x3 | branch3x3dbl | branch_pool] --
    o_ref[0, :, :, 0:384] = jnp.maximum(
        acc3 * s3_ref[...] + b3_ref[...], 0.0).reshape(oh, ow, 384)
    o_ref[0, :, :, 384:480] = jnp.maximum(
        acc4 * s4_ref[...] + b4_ref[...], 0.0).reshape(oh, ow, 96)
    o_ref[0, :, :, 480:480 + cin] = pool


def _const_spec(a):
    nd = a.ndim
    return pl.BlockSpec(a.shape, lambda i: (0,) * nd)


def _inception_b_call(x2, ws, *, h, w, cin):
    n, hc, w2x, cin2 = x2.shape
    oh, ow = (h - 3) // 2 + 1, (w - 3) // 2 + 1
    q = _round_up(w2x + 2, 8)
    ctot = 480 + cin
    return pl.pallas_call(
        functools.partial(_inception_b_kernel, h=h, w=w),
        grid=(n,),
        in_specs=[pl.BlockSpec((1, hc, w2x, cin2), lambda i: (i, 0, 0, 0))]
                 + [_const_spec(a) for a in ws],
        out_specs=pl.BlockSpec((1, oh, ow, ctot), lambda i: (i, 0, 0, 0)),
        out_shape=jax.ShapeDtypeStruct((n, oh, ow, ctot), jnp.float32),
        scratch_shapes=[pltpu.VMEM((hc + 3, q, 128), jnp.float32)],
        compiler_params=pltpu.CompilerParams(dimension_semantics=("parallel",)),
    )(x2, *ws)


# ---------------------------------------------------------------------------
# Weight preparation (all done once in the wrapper, outside the kernel)
# ---------------------------------------------------------------------------
def _prep_weights(params, cin):
    s1, b1 = _fold2d(params["dbl1"])
    s2, b2 = _fold2d(params["dbl2"])
    s3, b3 = _fold2d(params["b3x3"])
    s4, b4 = _fold2d(params["dbl3"])

    # 1x1 conv: block-diagonal over the column-pair fold -> output lanes 0:64 / 64:128
    w1m = params["dbl1"]["w"].reshape(64, cin).T.astype(jnp.float32)   # (cin, 64)
    z = jnp.zeros((cin, 64), jnp.float32)
    w1p = jnp.concatenate([jnp.concatenate([w1m, z], axis=1),
                           jnp.concatenate([z, w1m], axis=1)], axis=0)  # (2cin, 128)
    s1p = jnp.concatenate([s1, s1], axis=1)
    b1p = jnp.concatenate([b1, b1], axis=1)

    # 3x3 / pad-1 conv on the pair-folded y1, producing pair-folded y2.
    # For each row tap dh and pair-column shift s in {0,1,2} one (128, 192) weight:
    #   even-column output (lanes 0:96) uses  s=0: [0; W(dh,0)]      s=1: [W(dh,1); W(dh,2)]
    #   odd-column  output (lanes 96:192) uses s=1: [W(dh,0); W(dh,1)] s=2: [W(dh,2); 0]
    wt2 = jnp.transpose(params["dbl2"]["w"], (2, 3, 1, 0)).astype(jnp.float32)  # (3,3,64,96)
    z96 = jnp.zeros((64, 96), jnp.float32)
    zz = jnp.zeros((128, 96), jnp.float32)
    g_list = []
    for dh in range(3):
        wa = jnp.concatenate([z96, wt2[dh, 0]], axis=0)
        wb = jnp.concatenate([wt2[dh, 1], wt2[dh, 2]], axis=0)
        wc = jnp.concatenate([wt2[dh, 0], wt2[dh, 1]], axis=0)
        wd = jnp.concatenate([wt2[dh, 2], z96], axis=0)
        g_list += [jnp.concatenate([wa, zz], axis=1),
                   jnp.concatenate([wb, wc], axis=1),
                   jnp.concatenate([zz, wd], axis=1)]
    g2 = jnp.stack(g_list, axis=0)                                   # (9, 128, 192)
    s2p = jnp.concatenate([s2, s2], axis=1)
    b2p = jnp.concatenate([b2, b2], axis=1)

    # 3x3 stride-2 convs: 6 K-folded taps per conv on pair-folded inputs
    def s2pair(w_oihw, c):
        wt = jnp.transpose(w_oihw, (2, 3, 1, 0)).astype(jnp.float32)  # (3,3,c,co)
        co = wt.shape[-1]
        zc = jnp.zeros((c, co), jnp.float32)
        lst = []
        for dh in range(3):
            lst += [jnp.concatenate([wt[dh, 0], wt[dh, 1]], axis=0),   # cs = 0
                    jnp.concatenate([wt[dh, 2], zc], axis=0)]          # cs = 1
        return jnp.stack(lst, axis=0)                                  # (6, 2c, co)

    w3p = s2pair(params["b3x3"]["w"], cin)     # (6, 2cin, 384)
    w4p = s2pair(params["dbl3"]["w"], 96)      # (6, 192, 96)

    bf = jnp.bfloat16
    return (w1p.astype(bf), s1p, b1p, g2.astype(bf), s2p, b2p,
            w3p.astype(bf), s3, b3, w4p.astype(bf), s4, b4)


# ---------------------------------------------------------------------------
# Parameter setup / glue
# ---------------------------------------------------------------------------
def init_params(key, in_channels):
    def conv_bn(k, cout, cin, ksize, wscale):
        ks = jax.random.split(k, 5)
        return {
            "w": jax.random.normal(ks[0], (cout, cin, ksize, ksize), jnp.float32) * wscale,
            "gamma": 1.0 + 0.1 * jax.random.normal(ks[1], (cout,), jnp.float32),
            "beta": 0.1 * jax.random.normal(ks[2], (cout,), jnp.float32),
            "mean": 0.1 * jax.random.normal(ks[3], (cout,), jnp.float32),
            "var": 0.5 + jnp.abs(jax.random.normal(ks[4], (cout,), jnp.float32)),
        }

    k1, k2, k3, k4 = jax.random.split(key, 4)
    return {
        "b3x3": conv_bn(k1, 384, in_channels, 3, 0.1),   # branch3x3:      3x3 stride 2
        "dbl1": conv_bn(k2, 64, in_channels, 1, 0.3),    # branch3x3dbl_1: 1x1
        "dbl2": conv_bn(k3, 96, 64, 3, 0.05),            # branch3x3dbl_2: 3x3 pad 1
        "dbl3": conv_bn(k4, 96, 96, 3, 0.05),            # branch3x3dbl_3: 3x3 stride 2
    }


def inception_b_forward(x_nchw, params):
    n, cin, h, w = x_nchw.shape
    x = jnp.transpose(x_nchw, (0, 2, 3, 1)).astype(jnp.float32)       # NCHW -> NHWC
    hc, wev = h + (h % 2), w + (w % 2)
    if (hc, wev) != (h, w):
        # odd spatial dims (e.g. the real 35x35 InceptionB input): pad to even sizes.
        # The padding never reaches a valid output of the three stride-2 branches.
        x = jnp.pad(x, ((0, 0), (0, hc - h), (0, wev - w), (0, 0)))
    # column-pair fold: pure metadata reshape, no HBM copy
    x2 = x.reshape(n, hc, wev // 2, 2 * cin)
    ws = _prep_weights(params, cin)
    out_nhwc = _inception_b_call(x2, ws, h=h, w=w, cin=cin)
    return jnp.transpose(out_nhwc, (0, 3, 1, 2))                      # NHWC -> NCHW


def reference_forward(x_nchw, params):
    # Pure-JAX mirror of the same math (bf16 matmul operands, f32 accumulation).
    x = jnp.transpose(x_nchw, (0, 2, 3, 1)).astype(jnp.float32)

    def conv_bn_relu(inp, p, stride, padding):
        wk = jnp.transpose(p["w"], (2, 3, 1, 0)).astype(jnp.bfloat16)  # HWIO
        y = jax.lax.conv_general_dilated(
            inp.astype(jnp.bfloat16), wk, window_strides=(stride, stride),
            padding=padding, dimension_numbers=("NHWC", "HWIO", "NHWC"),
            preferred_element_type=jnp.float32)
        s, b = fold_bn(p["gamma"], p["beta"], p["mean"], p["var"])
        return jnp.maximum(y * s + b, 0.0)

    br3 = conv_bn_relu(x, params["b3x3"], 2, "VALID")
    y1 = conv_bn_relu(x, params["dbl1"], 1, "VALID")
    y2 = conv_bn_relu(y1, params["dbl2"], 1, ((1, 1), (1, 1)))
    br_dbl = conv_bn_relu(y2, params["dbl3"], 2, "VALID")
    pool = jax.lax.reduce_window(x, -jnp.inf, jax.lax.max,
                                 (1, 3, 3, 1), (1, 2, 2, 1), "VALID")
    out = jnp.concatenate([br3, br_dbl, pool], axis=-1)
    return jnp.transpose(out, (0, 3, 1, 2))


if __name__ == "__main__":
    key = jax.random.PRNGKey(0)
    k_in, k_par = jax.random.split(key)

    in_channels, height, width = 8, 16, 16
    x = jax.random.normal(k_in, (2, in_channels, height, width), jnp.float32)
    params = init_params(k_par, in_channels)

    fwd = jax.jit(inception_b_forward)
    out = jax.block_until_ready(fwd(x, params))

    oh = (height - 3) // 2 + 1
    ow = (width - 3) // 2 + 1
    assert out.shape == (2, 384 + 96 + in_channels, oh, ow), out.shape

    ref = reference_forward(x, params)
    if not jnp.allclose(out, ref, rtol=1e-2, atol=1e-2):
        raise AssertionError(
            "Pallas output mismatch vs JAX reference "
            f"(max abs err = {jnp.max(jnp.abs(out - ref)):.3e})")
    print("KERNEL_OK")
</pallas_src>

<mosaic_0001>
module attributes {stable_mosaic.version = 11 : i64} {
  func.func @_inception_b_kernel(%arg0: i32, %arg1: memref<1x16x8x16xf32, #tpu.memory_space<vmem>>, %arg2: memref<16x128xbf16, #tpu.memory_space<vmem>>, %arg3: memref<1x128xf32, #tpu.memory_space<vmem>>, %arg4: memref<1x128xf32, #tpu.memory_space<vmem>>, %arg5: memref<9x128x192xbf16, #tpu.memory_space<vmem>>, %arg6: memref<1x192xf32, #tpu.memory_space<vmem>>, %arg7: memref<1x192xf32, #tpu.memory_space<vmem>>, %arg8: memref<6x16x384xbf16, #tpu.memory_space<vmem>>, %arg9: memref<1x384xf32, #tpu.memory_space<vmem>>, %arg10: memref<1x384xf32, #tpu.memory_space<vmem>>, %arg11: memref<6x192x96xbf16, #tpu.memory_space<vmem>>, %arg12: memref<1x96xf32, #tpu.memory_space<vmem>>, %arg13: memref<1x96xf32, #tpu.memory_space<vmem>>, %arg14: memref<1x7x7x488xf32, #tpu.memory_space<vmem>>, %arg15: memref<19x16x128xf32, #tpu.memory_space<vmem>>) attributes {dimension_semantics = [#tpu.dimension_semantics<parallel>], iteration_bounds = array<i64: 2>, scalar_prefetch = 0 : i64, scratch_operands = 1 : i64, tpu.core_type = #tpu.core_type<tc>, window_params = [{transform_indices = @transform_0, window_bounds = array<i64: 1, 16, 8, 16>}, {pipeline_mode = #tpu.pipeline_mode<synchronous>, transform_indices = @transform_1, window_bounds = array<i64: 16, 128>}, {pipeline_mode = #tpu.pipeline_mode<synchronous>, transform_indices = @transform_2, window_bounds = array<i64: 1, 128>}, {pipeline_mode = #tpu.pipeline_mode<synchronous>, transform_indices = @transform_3, window_bounds = array<i64: 1, 128>}, {pipeline_mode = #tpu.pipeline_mode<synchronous>, transform_indices = @transform_4, window_bounds = array<i64: 9, 128, 192>}, {pipeline_mode = #tpu.pipeline_mode<synchronous>, transform_indices = @transform_5, window_bounds = array<i64: 1, 192>}, {pipeline_mode = #tpu.pipeline_mode<synchronous>, transform_indices = @transform_6, window_bounds = array<i64: 1, 192>}, {pipeline_mode = #tpu.pipeline_mode<synchronous>, transform_indices = @transform_7, window_bounds = array<i64: 6, 16, 384>}, {pipeline_mode = #tpu.pipeline_mode<synchronous>, transform_indices = @transform_8, window_bounds = array<i64: 1, 384>}, {pipeline_mode = #tpu.pipeline_mode<synchronous>, transform_indices = @transform_9, window_bounds = array<i64: 1, 384>}, {pipeline_mode = #tpu.pipeline_mode<synchronous>, transform_indices = @transform_10, window_bounds = array<i64: 6, 192, 96>}, {pipeline_mode = #tpu.pipeline_mode<synchronous>, transform_indices = @transform_11, window_bounds = array<i64: 1, 96>}, {pipeline_mode = #tpu.pipeline_mode<synchronous>, transform_indices = @transform_12, window_bounds = array<i64: 1, 96>}, {transform_indices = @transform_13, window_bounds = array<i64: 1, 7, 7, 488>}]} {
    %c0 = arith.constant 0 : index
    %c0_0 = arith.constant 0 : index
    %c0_1 = arith.constant 0 : index
    %c0_2 = arith.constant 0 : index
    %0 = vector.load %arg1[%c0, %c0_0, %c0_1, %c0_2] : memref<1x16x8x16xf32, #tpu.memory_space<vmem>>, vector<1x16x8x16xf32>
    %1 = vector.shape_cast %0 : vector<1x16x8x16xf32> to vector<16x8x16xf32>
    %2 = vector.shape_cast %1 : vector<16x8x16xf32> to vector<128x16xf32>
    %3 = arith.truncf %2 : vector<128x16xf32> to vector<128x16xbf16>
    %c0_3 = arith.constant 0 : index
    %c0_4 = arith.constant 0 : index
    %4 = vector.load %arg2[%c0_3, %c0_4] : memref<16x128xbf16, #tpu.memory_space<vmem>>, vector<16x128xbf16>
    %cst = arith.constant dense<0.000000e+00> : vector<128x128xf32>
    %5 = tpu.matmul %3, %4, %cst {dimension_numbers = #tpu.dot_dimension_numbers<[1], [0], [0], [1], [0, 0, 1, 1], [], []>} : vector<128x16xbf16>, vector<16x128xbf16>, vector<128x128xf32> -> vector<128x128xf32>
    %c0_5 = arith.constant 0 : index
    %c0_6 = arith.constant 0 : index
    %6 = vector.load %arg3[%c0_5, %c0_6] : memref<1x128xf32, #tpu.memory_space<vmem>>, vector<1x128xf32>
    %7 = vector.broadcast %6 : vector<1x128xf32> to vector<128x128xf32>
    %8 = arith.mulf %5, %7 : vector<128x128xf32>
    %c0_7 = arith.constant 0 : index
    %c0_8 = arith.constant 0 : index
    %9 = vector.load %arg4[%c0_7, %c0_8] : memref<1x128xf32, #tpu.memory_space<vmem>>, vector<1x128xf32>
    %10 = vector.broadcast %9 : vector<1x128xf32> to vector<128x128xf32>
    %11 = arith.addf %8, %10 : vector<128x128xf32>
    %cst_9 = arith.constant 0.000000e+00 : f32
    %12 = vector.broadcast %cst_9 : f32 to vector<128x128xf32>
    %13 = arith.maximumf %11, %12 : vector<128x128xf32>
    %cst_10 = arith.constant 0.000000e+00 : f32
    %14 = vector.broadcast %cst_10 : f32 to vector<19x16x128xf32>
    %c0_11 = arith.constant 0 : index
    %c0_12 = arith.constant 0 : index
    %c0_13 = arith.constant 0 : index
    %15 = vector.load %arg15[%c0_11, %c0_12, %c0_13] : memref<19x16x128xf32, #tpu.memory_space<vmem>>, vector<19x16x128xf32>
    tpu.vector_store %arg15[%c0_11, %c0_12, %c0_13], %14 {strides = array<i32>} : memref<19x16x128xf32, #tpu.memory_space<vmem>>, vector<19x16x128xf32>,
    %16 = vector.shape_cast %13 : vector<128x128xf32> to vector<16x8x128xf32>
    %c1 = arith.constant 1 : index
    %c1_14 = arith.constant 1 : index
    %c0_15 = arith.constant 0 : index
    %17 = vector.load %arg15[%c1, %c1_14, %c0_15] : memref<19x16x128xf32, #tpu.memory_space<vmem>>, vector<16x8x128xf32>
    tpu.vector_store %arg15[%c1, %c1_14, %c0_15], %16 {strides = array<i32>} : memref<19x16x128xf32, #tpu.memory_space<vmem>>, vector<16x8x128xf32>,
    %c0_16 = arith.constant 0 : index
    %c0_17 = arith.constant 0 : index
    %c0_18 = arith.constant 0 : index
    %18 = vector.load %arg15[%c0_16, %c0_17, %c0_18] : memref<19x16x128xf32, #tpu.memory_space<vmem>>, vector<19x16x128xf32>
    %19 = vector.shape_cast %18 : vector<19x16x128xf32> to vector<304x128xf32>
    %cst_19 = arith.constant 0.000000e+00 : f32
    %20 = vector.broadcast %cst_19 : f32 to vector<256x192xf32>
    %21 = vector.extract_strided_slice %19 {offsets = [0, 0], sizes = [256, 128], strides = [1, 1]} : vector<304x128xf32> to vector<256x128xf32>
    %22 = arith.truncf %21 : vector<256x128xf32> to vector<256x128xbf16>
    %c0_20 = arith.constant 0 : index
    %c0_21 = arith.constant 0 : index
    %c0_22 = arith.constant 0 : index
    %23 = vector.load %arg5[%c0_20, %c0_21, %c0_22] : memref<9x128x192xbf16, #tpu.memory_space<vmem>>, vector<1x128x192xbf16>
    %24 = vector.shape_cast %23 : vector<1x128x192xbf16> to vector<128x192xbf16>
    %cst_23 = arith.constant dense<0.000000e+00> : vector<256x192xf32>
    %25 = tpu.matmul %22, %24, %cst_23 {dimension_numbers = #tpu.dot_dimension_numbers<[1], [0], [0], [1], [0, 0, 1, 1], [], []>} : vector<256x128xbf16>, vector<128x192xbf16>, vector<256x192xf32> -> vector<256x192xf32>
    %26 = arith.addf %20, %25 : vector<256x192xf32>
    %27 = vector.extract_strided_slice %19 {offsets = [1, 0], sizes = [256, 128], strides = [1, 1]} : vector<304x128xf32> to vector<256x128xf32>
    %28 = arith.truncf %27 : vector<256x128xf32> to vector<256x128xbf16>
    %c1_24 = arith.constant 1 : index
    %c0_25 = arith.constant 0 : index
    %c0_26 = arith.constant 0 : index
    %29 = vector.load %arg5[%c1_24, %c0_25, %c0_26] : memref<9x128x192xbf16, #tpu.memory_space<vmem>>, vector<1x128x192xbf16>
    %30 = vector.shape_cast %29 : vector<1x128x192xbf16> to vector<128x192xbf16>
    %cst_27 = arith.constant dense<0.000000e+00> : vector<256x192xf32>
    %31 = tpu.matmul %28, %30, %cst_27 {dimension_numbers = #tpu.dot_dimension_numbers<[1], [0], [0], [1], [0, 0, 1, 1], [], []>} : vector<256x128xbf16>, vector<128x192xbf16>, vector<256x192xf32> -> vector<256x192xf32>
    %32 = arith.addf %26, %31 : vector<256x192xf32>
    %33 = vector.extract_strided_slice %19 {offsets = [2, 0], sizes = [256, 128], strides = [1, 1]} : vector<304x128xf32> to vector<256x128xf32>
    %34 = arith.truncf %33 : vector<256x128xf32> to vector<256x128xbf16>
    %c2 = arith.constant 2 : index
    %c0_28 = arith.constant 0 : index
    %c0_29 = arith.constant 0 : index
    %35 = vector.load %arg5[%c2, %c0_28, %c0_29] : memref<9x128x192xbf16, #tpu.memory_space<vmem>>, vector<1x128x192xbf16>
    %36 = vector.shape_cast %35 : vector<1x128x192xbf16> to vector<128x192xbf16>
    %cst_30 = arith.constant dense<0.000000e+00> : vector<256x192xf32>
    %37 = tpu.matmul %34, %36, %cst_30 {dimension_numbers = #tpu.dot_dimension_numbers<[1], [0], [0], [1], [0, 0, 1, 1], [], []>} : vector<256x128xbf16>, vector<128x192xbf16>, vector<256x192xf32> -> vector<256x192xf32>
    %38 = arith.addf %32, %37 : vector<256x192xf32>
    %39 = vector.extract_strided_slice %19 {offsets = [16, 0], sizes = [256, 128], strides = [1, 1]} : vector<304x128xf32> to vector<256x128xf32>
    %40 = arith.truncf %39 : vector<256x128xf32> to vector<256x128xbf16>
    %c3 = arith.constant 3 : index
    %c0_31 = arith.constant 0 : index
    %c0_32 = arith.constant 0 : index
    %41 = vector.load %arg5[%c3, %c0_31, %c0_32] : memref<9x128x192xbf16, #tpu.memory_space<vmem>>, vector<1x128x192xbf16>
    %42 = vector.shape_cast %41 : vector<1x128x192xbf16> to vector<128x192xbf16>
    %cst_33 = arith.constant dense<0.000000e+00> : vector<256x192xf32>
    %43 = tpu.matmul %40, %42, %cst_33 {dimension_numbers = #tpu.dot_dimension_numbers<[1], [0], [0], [1], [0, 0, 1, 1], [], []>} : vector<256x128xbf16>, vector<128x192xbf16>, vector<256x192xf32> -> vector<256x192xf32>
    %44 = arith.addf %38, %43 : vector<256x192xf32>
    %45 = vector.extract_strided_slice %19 {offsets = [17, 0], sizes = [256, 128], strides = [1, 1]} : vector<304x128xf32> to vector<256x128xf32>
    %46 = arith.truncf %45 : vector<256x128xf32> to vector<256x128xbf16>
    %c4 = arith.constant 4 : index
    %c0_34 = arith.constant 0 : index
    %c0_35 = arith.constant 0 : index
    %47 = vector.load %arg5[%c4, %c0_34, %c0_35] : memref<9x128x192xbf16, #tpu.memory_space<vmem>>, vector<1x128x192xbf16>
    %48 = vector.shape_cast %47 : vector<1x128x192xbf16> to vector<128x192xbf16>
    %cst_36 = arith.constant dense<0.000000e+00> : vector<256x192xf32>
    %49 = tpu.matmul %46, %48, %cst_36 {dimension_numbers = #tpu.dot_dimension_numbers<[1], [0], [0], [1], [0, 0, 1, 1], [], []>} : vector<256x128xbf16>, vector<128x192xbf16>, vector<256x192xf32> -> vector<256x192xf32>
    %50 = arith.addf %44, %49 : vector<256x192xf32>
    %51 = vector.extract_strided_slice %19 {offsets = [18, 0], sizes = [256, 128], strides = [1, 1]} : vector<304x128xf32> to vector<256x128xf32>
    %52 = arith.truncf %51 : vector<256x128xf32> to vector<256x128xbf16>
    %c5 = arith.constant 5 : index
    %c0_37 = arith.constant 0 : index
    %c0_38 = arith.constant 0 : index
    %53 = vector.load %arg5[%c5, %c0_37, %c0_38] : memref<9x128x192xbf16, #tpu.memory_space<vmem>>, vector<1x128x192xbf16>
    %54 = vector.shape_cast %53 : vector<1x128x192xbf16> to vector<128x192xbf16>
    %cst_39 = arith.constant dense<0.000000e+00> : vector<256x192xf32>
    %55 = tpu.matmul %52, %54, %cst_39 {dimension_numbers = #tpu.dot_dimension_numbers<[1], [0], [0], [1], [0, 0, 1, 1], [], []>} : vector<256x128xbf16>, vector<128x192xbf16>, vector<256x192xf32> -> vector<256x192xf32>
    %56 = arith.addf %50, %55 : vector<256x192xf32>
    %57 = vector.extract_strided_slice %19 {offsets = [32, 0], sizes = [256, 128], strides = [1, 1]} : vector<304x128xf32> to vector<256x128xf32>
    %58 = arith.truncf %57 : vector<256x128xf32> to vector<256x128xbf16>
    %c6 = arith.constant 6 : index
    %c0_40 = arith.constant 0 : index
    %c0_41 = arith.constant 0 : index
    %59 = vector.load %arg5[%c6, %c0_40, %c0_41] : memref<9x128x192xbf16, #tpu.memory_space<vmem>>, vector<1x128x192xbf16>
    %60 = vector.shape_cast %59 : vector<1x128x192xbf16> to vector<128x192xbf16>
    %cst_42 = arith.constant dense<0.000000e+00> : vector<256x192xf32>
    %61 = tpu.matmul %58, %60, %cst_42 {dimension_numbers = #tpu.dot_dimension_numbers<[1], [0], [0], [1], [0, 0, 1, 1], [], []>} : vector<256x128xbf16>, vector<128x192xbf16>, vector<256x192xf32> -> vector<256x192xf32>
    %62 = arith.addf %56, %61 : vector<256x192xf32>
    %63 = vector.extract_strided_slice %19 {offsets = [33, 0], sizes = [256, 128], strides = [1, 1]} : vector<304x128xf32> to vector<256x128xf32>
    %64 = arith.truncf %63 : vector<256x128xf32> to vector<256x128xbf16>
    %c7 = arith.constant 7 : index
    %c0_43 = arith.constant 0 : index
    %c0_44 = arith.constant 0 : index
    %65 = vector.load %arg5[%c7, %c0_43, %c0_44] : memref<9x128x192xbf16, #tpu.memory_space<vmem>>, vector<1x128x192xbf16>
    %66 = vector.shape_cast %65 : vector<1x128x192xbf16> to vector<128x192xbf16>
    %cst_45 = arith.constant dense<0.000000e+00> : vector<256x192xf32>
    %67 = tpu.matmul %64, %66, %cst_45 {dimension_numbers = #tpu.dot_dimension_numbers<[1], [0], [0], [1], [0, 0, 1, 1], [], []>} : vector<256x128xbf16>, vector<128x192xbf16>, vector<256x192xf32> -> vector<256x192xf32>
    %68 = arith.addf %62, %67 : vector<256x192xf32>
    %69 = vector.extract_strided_slice %19 {offsets = [34, 0], sizes = [256, 128], strides = [1, 1]} : vector<304x128xf32> to vector<256x128xf32>
    %70 = arith.truncf %69 : vector<256x128xf32> to vector<256x128xbf16>
    %c8 = arith.constant 8 : index
    %c0_46 = arith.constant 0 : index
    %c0_47 = arith.constant 0 : index
    %71 = vector.load %arg5[%c8, %c0_46, %c0_47] : memref<9x128x192xbf16, #tpu.memory_space<vmem>>, vector<1x128x192xbf16>
    %72 = vector.shape_cast %71 : vector<1x128x192xbf16> to vector<128x192xbf16>
    %cst_48 = arith.constant dense<0.000000e+00> : vector<256x192xf32>
    %73 = tpu.matmul %70, %72, %cst_48 {dimension_numbers = #tpu.dot_dimension_numbers<[1], [0], [0], [1], [0, 0, 1, 1], [], []>} : vector<256x128xbf16>, vector<128x192xbf16>, vector<256x192xf32> -> vector<256x192xf32>
    %74 = arith.addf %68, %73 : vector<256x192xf32>
    %c0_49 = arith.constant 0 : index
    %c0_50 = arith.constant 0 : index
    %75 = vector.load %arg6[%c0_49, %c0_50] : memref<1x192xf32, #tpu.memory_space<vmem>>, vector<1x192xf32>
    %76 = vector.broadcast %75 : vector<1x192xf32> to vector<256x192xf32>
    %77 = arith.mulf %74, %76 : vector<256x192xf32>
    %c0_51 = arith.constant 0 : index
    %c0_52 = arith.constant 0 : index
    %78 = vector.load %arg7[%c0_51, %c0_52] : memref<1x192xf32, #tpu.memory_space<vmem>>, vector<1x192xf32>
    %79 = vector.broadcast %78 : vector<1x192xf32> to vector<256x192xf32>
    %80 = arith.addf %77, %79 : vector<256x192xf32>
    %cst_53 = arith.constant 0.000000e+00 : f32
    %81 = vector.broadcast %cst_53 : f32 to vector<256x192xf32>
    %82 = arith.maximumf %80, %81 : vector<256x192xf32>
    %83 = vector.shape_cast %1 : vector<16x8x16xf32> to vector<8x16x16xf32>
    %84 = vector.shape_cast %82 : vector<256x192xf32> to vector<8x32x192xf32>
    %cst_54 = arith.constant 0.000000e+00 : f32
    %85 = vector.broadcast %cst_54 : f32 to vector<49x384xf32>
    %cst_55 = arith.constant 0.000000e+00 : f32
    %86 = vector.broadcast %cst_55 : f32 to vector<49x96xf32>
    %cst_56 = arith.constant 0xFF800000 : f32
    %87 = vector.broadcast %cst_56 : f32 to vector<7x7x8xf32>
    %88 = vector.extract_strided_slice %83 {offsets = [0, 0, 0], sizes = [7, 7, 16], strides = [1, 1, 1]} : vector<8x16x16xf32> to vector<7x7x16xf32>
    %89 = vector.shape_cast %88 : vector<7x7x16xf32> to vector<49x16xf32>
    %90 = arith.truncf %89 : vector<49x16xf32> to vector<49x16xbf16>
    %c0_57 = arith.constant 0 : index
    %c0_58 = arith.constant 0 : index
    %c0_59 = arith.constant 0 : index
    %91 = vector.load %arg8[%c0_57, %c0_58, %c0_59] : memref<6x16x384xbf16, #tpu.memory_space<vmem>>, vector<1x16x384xbf16>
    %92 = vector.shape_cast %91 : vector<1x16x384xbf16> to vector<16x384xbf16>
    %cst_60 = arith.constant dense<0.000000e+00> : vector<49x384xf32>
    %93 = tpu.matmul %90, %92, %cst_60 {dimension_numbers = #tpu.dot_dimension_numbers<[1], [0], [0], [1], [0, 0, 1, 1], [], []>} : vector<49x16xbf16>, vector<16x384xbf16>, vector<49x384xf32> -> vector<49x384xf32>
    %94 = arith.addf %85, %93 : vector<49x384xf32>
    %95 = vector.extract_strided_slice %84 {offsets = [0, 0, 0], sizes = [7, 7, 192], strides = [1, 1, 1]} : vector<8x32x192xf32> to vector<7x7x192xf32>
    %96 = vector.shape_cast %95 : vector<7x7x192xf32> to vector<49x192xf32>
    %97 = arith.truncf %96 : vector<49x192xf32> to vector<49x192xbf16>
    %c0_61 = arith.constant 0 : index
    %c0_62 = arith.constant 0 : index
    %c0_63 = arith.constant 0 : index
    %98 = vector.load %arg11[%c0_61, %c0_62, %c0_63] : memref<6x192x96xbf16, #tpu.memory_space<vmem>>, vector<1x192x96xbf16>
    %99 = vector.shape_cast %98 : vector<1x192x96xbf16> to vector<192x96xbf16>
    %cst_64 = arith.constant dense<0.000000e+00> : vector<49x96xf32>
    %100 = tpu.matmul %97, %99, %cst_64 {dimension_numbers = #tpu.dot_dimension_numbers<[1], [0], [0], [1], [0, 0, 1, 1], [], []>} : vector<49x192xbf16>, vector<192x96xbf16>, vector<49x96xf32> -> vector<49x96xf32>
    %101 = arith.addf %86, %100 : vector<49x96xf32>
    %102 = vector.extract_strided_slice %88 {offsets = [0, 0, 0], sizes = [7, 7, 8], strides = [1, 1, 1]} : vector<7x7x16xf32> to vector<7x7x8xf32>
    %103 = vector.extract_strided_slice %88 {offsets = [0, 0, 8], sizes = [7, 7, 8], strides = [1, 1, 1]} : vector<7x7x16xf32> to vector<7x7x8xf32>
    %104 = arith.maximumf %102, %103 : vector<7x7x8xf32>
    %105 = arith.maximumf %87, %104 : vector<7x7x8xf32>
    %106 = vector.extract_strided_slice %83 {offsets = [0, 1, 0], sizes = [7, 7, 16], strides = [1, 1, 1]} : vector<8x16x16xf32> to vector<7x7x16xf32>
    %107 = vector.shape_cast %106 : vector<7x7x16xf32> to vector<49x16xf32>
    %108 = arith.truncf %107 : vector<49x16xf32> to vector<49x16xbf16>
    %c1_65 = arith.constant 1 : index
    %c0_66 = arith.constant 0 : index
    %c0_67 = arith.constant 0 : index
    %109 = vector.load %arg8[%c1_65, %c0_66, %c0_67] : memref<6x16x384xbf16, #tpu.memory_space<vmem>>, vector<1x16x384xbf16>
    %110 = vector.shape_cast %109 : vector<1x16x384xbf16> to vector<16x384xbf16>
    %cst_68 = arith.constant dense<0.000000e+00> : vector<49x384xf32>
    %111 = tpu.matmul %108, %110, %cst_68 {dimension_numbers = #tpu.dot_dimension_numbers<[1], [0], [0], [1], [0, 0, 1, 1], [], []>} : vector<49x16xbf16>, vector<16x384xbf16>, vector<49x384xf32> -> vector<49x384xf32>
    %112 = arith.addf %94, %111 : vector<49x384xf32>
    %113 = vector.extract_strided_slice %84 {offsets = [0, 1, 0], sizes = [7, 7, 192], strides = [1, 1, 1]} : vector<8x32x192xf32> to vector<7x7x192xf32>
    %114 = vector.shape_cast %113 : vector<7x7x192xf32> to vector<49x192xf32>
    %115 = arith.truncf %114 : vector<49x192xf32> to vector<49x192xbf16>
    %c1_69 = arith.constant 1 : index
    %c0_70 = arith.constant 0 : index
    %c0_71 = arith.constant 0 : index
    %116 = vector.load %arg11[%c1_69, %c0_70, %c0_71] : memref<6x192x96xbf16, #tpu.memory_space<vmem>>, vector<1x192x96xbf16>
    %117 = vector.shape_cast %116 : vector<1x192x96xbf16> to vector<192x96xbf16>
    %cst_72 = arith.constant dense<0.000000e+00> : vector<49x96xf32>
    %118 = tpu.matmul %115, %117, %cst_72 {dimension_numbers = #tpu.dot_dimension_numbers<[1], [0], [0], [1], [0, 0, 1, 1], [], []>} : vector<49x192xbf16>, vector<192x96xbf16>, vector<49x96xf32> -> vector<49x96xf32>
    %119 = arith.addf %101, %118 : vector<49x96xf32>
    %120 = vector.extract_strided_slice %106 {offsets = [0, 0, 0], sizes = [7, 7, 8], strides = [1, 1, 1]} : vector<7x7x16xf32> to vector<7x7x8xf32>
    %121 = arith.maximumf %105, %120 : vector<7x7x8xf32>
    %122 = vector.extract_strided_slice %83 {offsets = [0, 8, 0], sizes = [7, 7, 16], strides = [1, 1, 1]} : vector<8x16x16xf32> to vector<7x7x16xf32>
    %123 = vector.shape_cast %122 : vector<7x7x16xf32> to vector<49x16xf32>
    %124 = arith.truncf %123 : vector<49x16xf32> to vector<49x16xbf16>
    %c2_73 = arith.constant 2 : index
    %c0_74 = arith.constant 0 : index
    %c0_75 = arith.constant 0 : index
    %125 = vector.load %arg8[%c2_73, %c0_74, %c0_75] : memref<6x16x384xbf16, #tpu.memory_space<vmem>>, vector<1x16x384xbf16>
    %126 = vector.shape_cast %125 : vector<1x16x384xbf16> to vector<16x384xbf16>
    %cst_76 = arith.constant dense<0.000000e+00> : vector<49x384xf32>
    %127 = tpu.matmul %124, %126, %cst_76 {dimension_numbers = #tpu.dot_dimension_numbers<[1], [0], [0], [1], [0, 0, 1, 1], [], []>} : vector<49x16xbf16>, vector<16x384xbf16>, vector<49x384xf32> -> vector<49x384xf32>
    %128 = arith.addf %112, %127 : vector<49x384xf32>
    %129 = vector.extract_strided_slice %84 {offsets = [0, 16, 0], sizes = [7, 7, 192], strides = [1, 1, 1]} : vector<8x32x192xf32> to vector<7x7x192xf32>
    %130 = vector.shape_cast %129 : vector<7x7x192xf32> to vector<49x192xf32>
    %131 = arith.truncf %130 : vector<49x192xf32> to vector<49x192xbf16>
    %c2_77 = arith.constant 2 : index
    %c0_78 = arith.constant 0 : index
    %c0_79 = arith.constant 0 : index
    %132 = vector.load %arg11[%c2_77, %c0_78, %c0_79] : memref<6x192x96xbf16, #tpu.memory_space<vmem>>, vector<1x192x96xbf16>
    %133 = vector.shape_cast %132 : vector<1x192x96xbf16> to vector<192x96xbf16>
    %cst_80 = arith.constant dense<0.000000e+00> : vector<49x96xf32>
    %134 = tpu.matmul %131, %133, %cst_80 {dimension_numbers = #tpu.dot_dimension_numbers<[1], [0], [0], [1], [0, 0, 1, 1], [], []>} : vector<49x192xbf16>, vector<192x96xbf16>, vector<49x96xf32> -> vector<49x96xf32>
    %135 = arith.addf %119, %134 : vector<49x96xf32>
    %136 = vector.extract_strided_slice %122 {offsets = [0, 0, 0], sizes = [7, 7, 8], strides = [1, 1, 1]} : vector<7x7x16xf32> to vector<7x7x8xf32>
    %137 = vector.extract_strided_slice %122 {offsets = [0, 0, 8], sizes = [7, 7, 8], strides = [1, 1, 1]} : vector<7x7x16xf32> to vector<7x7x8xf32>
    %138 = arith.maximumf %136, %137 : vector<7x7x8xf32>
    %139 = arith.maximumf %121, %138 : vector<7x7x8xf32>
    %140 = vector.extract_strided_slice %83 {offsets = [0, 9, 0], sizes = [7, 7, 16], strides = [1, 1, 1]} : vector<8x16x16xf32> to vector<7x7x16xf32>
    %141 = vector.shape_cast %140 : vector<7x7x16xf32> to vector<49x16xf32>
    %142 = arith.truncf %141 : vector<49x16xf32> to vector<49x16xbf16>
    %c3_81 = arith.constant 3 : index
    %c0_82 = arith.constant 0 : index
    %c0_83 = arith.constant 0 : index
    %143 = vector.load %arg8[%c3_81, %c0_82, %c0_83] : memref<6x16x384xbf16, #tpu.memory_space<vmem>>, vector<1x16x384xbf16>
    %144 = vector.shape_cast %143 : vector<1x16x384xbf16> to vector<16x384xbf16>
    %cst_84 = arith.constant dense<0.000000e+00> : vector<49x384xf32>
    %145 = tpu.matmul %142, %144, %cst_84 {dimension_numbers = #tpu.dot_dimension_numbers<[1], [0], [0], [1], [0, 0, 1, 1], [], []>} : vector<49x16xbf16>, vector<16x384xbf16>, vector<49x384xf32> -> vector<49x384xf32>
    %146 = arith.addf %128, %145 : vector<49x384xf32>
    %147 = vector.extract_strided_slice %84 {offsets = [0, 17, 0], sizes = [7, 7, 192], strides = [1, 1, 1]} : vector<8x32x192xf32> to vector<7x7x192xf32>
    %148 = vector.shape_cast %147 : vector<7x7x192xf32> to vector<49x192xf32>
    %149 = arith.truncf %148 : vector<49x192xf32> to vector<49x192xbf16>
    %c3_85 = arith.constant 3 : index
    %c0_86 = arith.constant 0 : index
    %c0_87 = arith.constant 0 : index
    %150 = vector.load %arg11[%c3_85, %c0_86, %c0_87] : memref<6x192x96xbf16, #tpu.memory_space<vmem>>, vector<1x192x96xbf16>
    %151 = vector.shape_cast %150 : vector<1x192x96xbf16> to vector<192x96xbf16>
    %cst_88 = arith.constant dense<0.000000e+00> : vector<49x96xf32>
    %152 = tpu.matmul %149, %151, %cst_88 {dimension_numbers = #tpu.dot_dimension_numbers<[1], [0], [0], [1], [0, 0, 1, 1], [], []>} : vector<49x192xbf16>, vector<192x96xbf16>, vector<49x96xf32> -> vector<49x96xf32>
    %153 = arith.addf %135, %152 : vector<49x96xf32>
    %154 = vector.extract_strided_slice %140 {offsets = [0, 0, 0], sizes = [7, 7, 8], strides = [1, 1, 1]} : vector<7x7x16xf32> to vector<7x7x8xf32>
    %155 = arith.maximumf %139, %154 : vector<7x7x8xf32>
    %156 = vector.extract_strided_slice %83 {offsets = [1, 0, 0], sizes = [7, 7, 16], strides = [1, 1, 1]} : vector<8x16x16xf32> to vector<7x7x16xf32>
    %157 = vector.shape_cast %156 : vector<7x7x16xf32> to vector<49x16xf32>
    %158 = arith.truncf %157 : vector<49x16xf32> to vector<49x16xbf16>
    %c4_89 = arith.constant 4 : index
    %c0_90 = arith.constant 0 : index
    %c0_91 = arith.constant 0 : index
    %159 = vector.load %arg8[%c4_89, %c0_90, %c0_91] : memref<6x16x384xbf16, #tpu.memory_space<vmem>>, vector<1x16x384xbf16>
    %160 = vector.shape_cast %159 : vector<1x16x384xbf16> to vector<16x384xbf16>
    %cst_92 = arith.constant dense<0.000000e+00> : vector<49x384xf32>
    %161 = tpu.matmul %158, %160, %cst_92 {dimension_numbers = #tpu.dot_dimension_numbers<[1], [0], [0], [1], [0, 0, 1, 1], [], []>} : vector<49x16xbf16>, vector<16x384xbf16>, vector<49x384xf32> -> vector<49x384xf32>
    %162 = arith.addf %146, %161 : vector<49x384xf32>
    %163 = vector.extract_strided_slice %84 {offsets = [1, 0, 0], sizes = [7, 7, 192], strides = [1, 1, 1]} : vector<8x32x192xf32> to vector<7x7x192xf32>
    %164 = vector.shape_cast %163 : vector<7x7x192xf32> to vector<49x192xf32>
    %165 = arith.truncf %164 : vector<49x192xf32> to vector<49x192xbf16>
    %c4_93 = arith.constant 4 : index
    %c0_94 = arith.constant 0 : index
    %c0_95 = arith.constant 0 : index
    %166 = vector.load %arg11[%c4_93, %c0_94, %c0_95] : memref<6x192x96xbf16, #tpu.memory_space<vmem>>, vector<1x192x96xbf16>
    %167 = vector.shape_cast %166 : vector<1x192x96xbf16> to vector<192x96xbf16>
    %cst_96 = arith.constant dense<0.000000e+00> : vector<49x96xf32>
    %168 = tpu.matmul %165, %167, %cst_96 {dimension_numbers = #tpu.dot_dimension_numbers<[1], [0], [0], [1], [0, 0, 1, 1], [], []>} : vector<49x192xbf16>, vector<192x96xbf16>, vector<49x96xf32> -> vector<49x96xf32>
    %169 = arith.addf %153, %168 : vector<49x96xf32>
    %170 = vector.extract_strided_slice %156 {offsets = [0, 0, 0], sizes = [7, 7, 8], strides = [1, 1, 1]} : vector<7x7x16xf32> to vector<7x7x8xf32>
    %171 = vector.extract_strided_slice %156 {offsets = [0, 0, 8], sizes = [7, 7, 8], strides = [1, 1, 1]} : vector<7x7x16xf32> to vector<7x7x8xf32>
    %172 = arith.maximumf %170, %171 : vector<7x7x8xf32>
    %173 = arith.maximumf %155, %172 : vector<7x7x8xf32>
    %174 = vector.extract_strided_slice %83 {offsets = [1, 1, 0], sizes = [7, 7, 16], strides = [1, 1, 1]} : vector<8x16x16xf32> to vector<7x7x16xf32>
    %175 = vector.shape_cast %174 : vector<7x7x16xf32> to vector<49x16xf32>
    %176 = arith.truncf %175 : vector<49x16xf32> to vector<49x16xbf16>
    %c5_97 = arith.constant 5 : index
    %c0_98 = arith.constant 0 : index
    %c0_99 = arith.constant 0 : index
    %177 = vector.load %arg8[%c5_97, %c0_98, %c0_99] : memref<6x16x384xbf16, #tpu.memory_space<vmem>>, vector<1x16x384xbf16>
    %178 = vector.shape_cast %177 : vector<1x16x384xbf16> to vector<16x384xbf16>
    %cst_100 = arith.constant dense<0.000000e+00> : vector<49x384xf32>
    %179 = tpu.matmul %176, %178, %cst_100 {dimension_numbers = #tpu.dot_dimension_numbers<[1], [0], [0], [1], [0, 0, 1, 1], [], []>} : vector<49x16xbf16>, vector<16x384xbf16>, vector<49x384xf32> -> vector<49x384xf32>
    %180 = arith.addf %162, %179 : vector<49x384xf32>
    %181 = vector.extract_strided_slice %84 {offsets = [1, 1, 0], sizes = [7, 7, 192], strides = [1, 1, 1]} : vector<8x32x192xf32> to vector<7x7x192xf32>
    %182 = vector.shape_cast %181 : vector<7x7x192xf32> to vector<49x192xf32>
    %183 = arith.truncf %182 : vector<49x192xf32> to vector<49x192xbf16>
    %c5_101 = arith.constant 5 : index
    %c0_102 = arith.constant 0 : index
    %c0_103 = arith.constant 0 : index
    %184 = vector.load %arg11[%c5_101, %c0_102, %c0_103] : memref<6x192x96xbf16, #tpu.memory_space<vmem>>, vector<1x192x96xbf16>
    %185 = vector.shape_cast %184 : vector<1x192x96xbf16> to vector<192x96xbf16>
    %cst_104 = arith.constant dense<0.000000e+00> : vector<49x96xf32>
    %186 = tpu.matmul %183, %185, %cst_104 {dimension_numbers = #tpu.dot_dimension_numbers<[1], [0], [0], [1], [0, 0, 1, 1], [], []>} : vector<49x192xbf16>, vector<192x96xbf16>, vector<49x96xf32> -> vector<49x96xf32>
    %187 = arith.addf %169, %186 : vector<49x96xf32>
    %188 = vector.extract_strided_slice %174 {offsets = [0, 0, 0], sizes = [7, 7, 8], strides = [1, 1, 1]} : vector<7x7x16xf32> to vector<7x7x8xf32>
    %189 = arith.maximumf %173, %188 : vector<7x7x8xf32>
    %c0_105 = arith.constant 0 : index
    %c0_106 = arith.constant 0 : index
    %190 = vector.load %arg9[%c0_105, %c0_106] : memref<1x384xf32, #tpu.memory_space<vmem>>, vector<1x384xf32>
    %191 = vector.broadcast %190 : vector<1x384xf32> to vector<49x384xf32>
    %192 = arith.mulf %180, %191 : vector<49x384xf32>
    %c0_107 = arith.constant 0 : index
    %c0_108 = arith.constant 0 : index
    %193 = vector.load %arg10[%c0_107, %c0_108] : memref<1x384xf32, #tpu.memory_space<vmem>>, vector<1x384xf32>
    %194 = vector.broadcast %193 : vector<1x384xf32> to vector<49x384xf32>
    %195 = arith.addf %192, %194 : vector<49x384xf32>
    %cst_109 = arith.constant 0.000000e+00 : f32
    %196 = vector.broadcast %cst_109 : f32 to vector<49x384xf32>
    %197 = arith.maximumf %195, %196 : vector<49x384xf32>
    %198 = vector.shape_cast %197 : vector<49x384xf32> to vector<7x7x384xf32>
    %c0_110 = arith.constant 0 : index
    %c0_111 = arith.constant 0 : index
    %c0_112 = arith.constant 0 : index
    %c0_113 = arith.constant 0 : index
    %199 = vector.load %arg14[%c0_110, %c0_111, %c0_112, %c0_113] : memref<1x7x7x488xf32, #tpu.memory_space<vmem>>, vector<1x7x7x384xf32>
    %200 = vector.shape_cast %199 : vector<1x7x7x384xf32> to vector<7x7x384xf32>
    %201 = vector.shape_cast %198 : vector<7x7x384xf32> to vector<1x7x7x384xf32>
    tpu.vector_store %arg14[%c0_110, %c0_111, %c0_112, %c0_113], %201 {strides = array<i32>} : memref<1x7x7x488xf32, #tpu.memory_space<vmem>>, vector<1x7x7x384xf32>,
    %c0_114 = arith.constant 0 : index
    %c0_115 = arith.constant 0 : index
    %202 = vector.load %arg12[%c0_114, %c0_115] : memref<1x96xf32, #tpu.memory_space<vmem>>, vector<1x96xf32>
    %203 = vector.broadcast %202 : vector<1x96xf32> to vector<49x96xf32>
    %204 = arith.mulf %187, %203 : vector<49x96xf32>
    %c0_116 = arith.constant 0 : index
    %c0_117 = arith.constant 0 : index
    %205 = vector.load %arg13[%c0_116, %c0_117] : memref<1x96xf32, #tpu.memory_space<vmem>>, vector<1x96xf32>
    %206 = vector.broadcast %205 : vector<1x96xf32> to vector<49x96xf32>
    %207 = arith.addf %204, %206 : vector<49x96xf32>
    %cst_118 = arith.constant 0.000000e+00 : f32
    %208 = vector.broadcast %cst_118 : f32 to vector<49x96xf32>
    %209 = arith.maximumf %207, %208 : vector<49x96xf32>
    %210 = vector.shape_cast %209 : vector<49x96xf32> to vector<7x7x96xf32>
    %c0_119 = arith.constant 0 : index
    %c0_120 = arith.constant 0 : index
    %c0_121 = arith.constant 0 : index
    %c384 = arith.constant 384 : index
    %211 = vector.load %arg14[%c0_119, %c0_120, %c0_121, %c384] : memref<1x7x7x488xf32, #tpu.memory_space<vmem>>, vector<1x7x7x96xf32>
    %212 = vector.shape_cast %211 : vector<1x7x7x96xf32> to vector<7x7x96xf32>
    %213 = vector.shape_cast %210 : vector<7x7x96xf32> to vector<1x7x7x96xf32>
    tpu.vector_store %arg14[%c0_119, %c0_120, %c0_121, %c384], %213 {strides = array<i32>} : memref<1x7x7x488xf32, #tpu.memory_space<vmem>>, vector<1x7x7x96xf32>,
    %c0_122 = arith.constant 0 : index
    %c0_123 = arith.constant 0 : index
    %c0_124 = arith.constant 0 : index
    %c480 = arith.constant 480 : index
    %214 = vector.load %arg14[%c0_122, %c0_123, %c0_124, %c480] : memref<1x7x7x488xf32, #tpu.memory_space<vmem>>, vector<1x7x7x8xf32>
    %215 = vector.shape_cast %214 : vector<1x7x7x8xf32> to vector<7x7x8xf32>
    %216 = vector.shape_cast %189 : vector<7x7x8xf32> to vector<1x7x7x8xf32>
    tpu.vector_store %arg14[%c0_122, %c0_123, %c0_124, %c480], %216 {strides = array<i32>} : memref<1x7x7x488xf32, #tpu.memory_space<vmem>>, vector<1x7x7x8xf32>,
    return
  }
  func.func @transform_0(%arg0: i32) -> (i32, i32, i32, i32) {
    %c0_i32 = arith.constant 0 : i32
    %c0_i32_0 = arith.constant 0 : i32
    %c0_i32_1 = arith.constant 0 : i32
    %c0_i32_2 = arith.constant 0 : i32
    return %arg0, %c0_i32, %c0_i32_0, %c0_i32_1 : i32, i32, i32, i32
  }
  func.func @transform_1(%arg0: i32) -> (i32, i32) {
    %c0_i32 = arith.constant 0 : i32
    %c0_i32_0 = arith.constant 0 : i32
    %c0_i32_1 = arith.constant 0 : i32
    return %c0_i32, %c0_i32_0 : i32, i32
  }
  func.func @transform_2(%arg0: i32) -> (i32, i32) {
    %c0_i32 = arith.constant 0 : i32
    %c0_i32_0 = arith.constant 0 : i32
    %c0_i32_1 = arith.constant 0 : i32
    return %c0_i32, %c0_i32_0 : i32, i32
  }
  func.func @transform_3(%arg0: i32) -> (i32, i32) {
    %c0_i32 = arith.constant 0 : i32
    %c0_i32_0 = arith.constant 0 : i32
    %c0_i32_1 = arith.constant 0 : i32
    return %c0_i32, %c0_i32_0 : i32, i32
  }
  func.func @transform_4(%arg0: i32) -> (i32, i32, i32) {
    %c0_i32 = arith.constant 0 : i32
    %c0_i32_0 = arith.constant 0 : i32
    %c0_i32_1 = arith.constant 0 : i32
    %c0_i32_2 = arith.constant 0 : i32
    return %c0_i32, %c0_i32_0, %c0_i32_1 : i32, i32, i32
  }
  func.func @transform_5(%arg0: i32) -> (i32, i32) {
    %c0_i32 = arith.constant 0 : i32
    %c0_i32_0 = arith.constant 0 : i32
    %c0_i32_1 = arith.constant 0 : i32
    return %c0_i32, %c0_i32_0 : i32, i32
  }
  func.func @transform_6(%arg0: i32) -> (i32, i32) {
    %c0_i32 = arith.constant 0 : i32
    %c0_i32_0 = arith.constant 0 : i32
    %c0_i32_1 = arith.constant 0 : i32
    return %c0_i32, %c0_i32_0 : i32, i32
  }
  func.func @transform_7(%arg0: i32) -> (i32, i32, i32) {
    %c0_i32 = arith.constant 0 : i32
    %c0_i32_0 = arith.constant 0 : i32
    %c0_i32_1 = arith.constant 0 : i32
    %c0_i32_2 = arith.constant 0 : i32
    return %c0_i32, %c0_i32_0, %c0_i32_1 : i32, i32, i32
  }
  func.func @transform_8(%arg0: i32) -> (i32, i32) {
    %c0_i32 = arith.constant 0 : i32
    %c0_i32_0 = arith.constant 0 : i32
    %c0_i32_1 = arith.constant 0 : i32
    return %c0_i32, %c0_i32_0 : i32, i32
  }
  func.func @transform_9(%arg0: i32) -> (i32, i32) {
    %c0_i32 = arith.constant 0 : i32
    %c0_i32_0 = arith.constant 0 : i32
    %c0_i32_1 = arith.constant 0 : i32
    return %c0_i32, %c0_i32_0 : i32, i32
  }
  func.func @transform_10(%arg0: i32) -> (i32, i32, i32) {
    %c0_i32 = arith.constant 0 : i32
    %c0_i32_0 = arith.constant 0 : i32
    %c0_i32_1 = arith.constant 0 : i32
    %c0_i32_2 = arith.constant 0 : i32
    return %c0_i32, %c0_i32_0, %c0_i32_1 : i32, i32, i32
  }
  func.func @transform_11(%arg0: i32) -> (i32, i32) {
    %c0_i32 = arith.constant 0 : i32
    %c0_i32_0 = arith.constant 0 : i32
    %c0_i32_1 = arith.constant 0 : i32
    return %c0_i32, %c0_i32_0 : i32, i32
  }
  func.func @transform_12(%arg0: i32) -> (i32, i32) {
    %c0_i32 = arith.constant 0 : i32
    %c0_i32_0 = arith.constant 0 : i32
    %c0_i32_1 = arith.constant 0 : i32
    return %c0_i32, %c0_i32_0 : i32, i32
  }
  func.func @transform_13(%arg0: i32) -> (i32, i32, i32, i32) {
    %c0_i32 = arith.constant 0 : i32
    %c0_i32_0 = arith.constant 0 : i32
    %c0_i32_1 = arith.constant 0 : i32
    %c0_i32_2 = arith.constant 0 : i32
    return %arg0, %c0_i32, %c0_i32_0, %c0_i32_1 : i32, i32, i32, i32
  }
}

</mosaic_0001>

<bundles_post_ra>
// kernel: inception_b_forward.1
= control target key start
LH: loop header
LB: loop body
LE: loop exit
PB: predicated region body
PF: predicated region fallthrough
CT: control target
= control target key end

     0   :  { %s14510_s25 = smov 0   ;;  %s20095_s0 = inlined_call_operand.vmem [shape: f32[2,16,8,16], index: 0, kind: input, shape index: {}]   ;;  %s20096_s1 = inlined_call_operand.vmem [shape: bf16[16,128], index: 1, kind: input, shape index: {}]   ;;  %s20097_s2 = inlined_call_operand.vmem [shape: f32[1,128], index: 2, kind: input, shape index: {}]   ;;  %s20098_s3 = inlined_call_operand.vmem [shape: f32[1,128], index: 3, kind: input, shape index: {}]   ;;  %s20099_s4 = inlined_call_operand.vmem [shape: bf16[9,128,192], index: 4, kind: input, shape index: {}]   ;;  %s20100_s5 = inlined_call_operand.vmem [shape: f32[1,192], index: 5, kind: input, shape index: {}]   ;;  %s20101_s6 = inlined_call_operand.vmem [shape: f32[1,192], index: 6, kind: input, shape index: {}]   ;;  %s20102_s7 = inlined_call_operand.vmem [shape: bf16[6,16,384], index: 7, kind: input, shape index: {}]   ;;  %s20103_s8 = inlined_call_operand.vmem [shape: f32[1,384], index: 8, kind: input, shape index: {}]   ;;  %s20104_s9 = inlined_call_operand.vmem [shape: f32[1,384], index: 9, kind: input, shape index: {}]   ;;  %s20105_s10 = inlined_call_operand.vmem [shape: bf16[6,192,96], index: 10, kind: input, shape index: {}]   ;;  %s20106_s11 = inlined_call_operand.vmem [shape: f32[1,96], index: 11, kind: input, shape index: {}]   ;;  %s20107_s12 = inlined_call_operand.vmem [shape: f32[1,96], index: 12, kind: input, shape index: {}]   ;;  %s20108_s13 = inlined_call_operand.vmem [shape: f32[2,7,7,488], index: 13, kind: output, shape index: {}]  }
   0x1 LB: > { %s13265_s26 = sadd.s32 4294967295, %s14432_s25   ;;  %p13269_p0 = scmp.ge.s32.totalorder %s14432_s25, 1  ;;  %s14432_s25 = sphi %s14510_s25, %s23_s25  }
   0x2   : > { %p387_p1 = scmp.lt.s32.totalorder %s14432_s25, 3 }
   0x4   : > { %p388_p2 = pnand %p13269_p0, %p387_p1 }
   0x6   : > { %391 = sbr.rel (%p388_p2) target bundleno = 1624 (0x658), region = 72 }
   0xb   : > { %v14054_v0 = vld [vmem:[%s20096_s1] sm:$0xff]   ;;  %p431_p3 = scmp.lt.s32.totalorder %s13265_s26, 1  ;;  %v3548_v1 = vlaneseq  ;;  %v14434_v3 = vmov 1966171168   ;;  %v14072_v5 = vld [vmem:[%s20099_s4 + $0x74] ss:$8 sps:$4 sm:$0xff]  }
   0xc   : > { %13962 = vmatprep.subr.bf16.mxu0 %v14054_v0  ;;  %v3669_v4 = vunpack.c.l.s4 %v14434_v3  ;;  %vm474_vm0 = vcmask 130048   ;;  %v14070_v14 = vld [vmem:[%s20099_s4 + $0x70] ss:$8 sps:$4 sm:$0xff]   ;;  %v14075_v17 = vld [vmem:[%s20099_s4 + $0x64] ss:$8 sps:$4 sm:$0xff]   ;;  %v14435_v63 = vmov 0.0  }
   0xd   : > { %s20998_s26 = smov (!%p431_p3, %s13265_s26), 1  ;;  %v14523_v2 = vshrl.u32 %v3548_v1, 7  ;;  %13963 = vmatpush3.bf16.msra.mxu0 %v14054_v0  ;;  %v14073_v20 = vld [vmem:[%s20099_s4 + $0x60] ss:$8 sps:$4 sm:$0xff]   ;;  %v14079_v21 = vld [vmem:[%s20099_s4 + $0xf4] ss:$8 sps:$4 sm:$0xff]  }
   0xe   : > { %s13922_s14 = sshll.u32 %s20998_s26, 7  ;;  %v3670_v6 = vunpack.c.0.s8 %v3669_v4  ;;  %1268 = vmatprep.subr.bf16.mxu0 %v14072_v5  ;;  %v14078_v23 = vld [vmem:[%s20099_s4 + $0x54] ss:$8 sps:$4 sm:$0xff]   ;;  %1029 = vmatprep.subr.bf16.mxu1 %v14079_v21  ;;  %v14084_v27 = vld [vmem:[%s20099_s4 + $0xf0] ss:$8 sps:$4 sm:$0xff]   ;;  %664 = vst [vmem:[#allocation2 + $0x30] sm:$0xff] %v14435_v63 }
   0xf   : > { %20365 = vst [vmem:[#allocation3_spill] sm:$0xff] %v14523_v2  ;;  %s14532_s17 = scalar_lea.vmem %s20095_s0, %s13922_s14  ;;  %v14085_v29 = vld [vmem:[%s20099_s4 + $0xe4] ss:$8 sps:$4 sm:$0xff]   ;;  %v14076_v31 = vld [vmem:[%s20099_s4 + $0x50] ss:$8 sps:$4 sm:$0xff]   ;;  %1030 = vmatpush1.bf16.msra.mxu1 %v14084_v27  ;;  %665 = vst [vmem:[#allocation2 + $0x38] sm:$0xff] %v14435_v63 }
  0x10   : > { %v442_v7 = vld [vmem:[%s14532_s17] sm:$0xff]  ;;  %v443_v8 = vld [vmem:[%s14532_s17 + $0x8] sm:$0xff]  ;;  %v14537_v9 = vsub.s32 %v3670_v6, %v14523_v2  ;;  %v444_v10 = vld [vmem:[%s14532_s17 + $0x10] sm:$0xff]  ;;  %1031 = vmatprep.subr.bf16.mxu1 %v14085_v29  ;;  %658 = vst [vmem:[#allocation2] sm:$0xff] %v14435_v63  ;;  %vm800_vm1 = vsmask.f32 7424 }
  0x11   : > { %v458_v11 = vpack.c.bf16 %v443_v8, %v442_v7  ;;  %v6629_v12 = vcombine.high %v443_v8, %v443_v8  ;;  %v445_v13 = vld [vmem:[%s14532_s17 + $0x18] sm:$0xff]  ;;  %v14083_v32 = vld [vmem:[%s20099_s4 + $0x44] ss:$8 sps:$4 sm:$0xff]   ;;  %v14081_v37 = vld [vmem:[%s20099_s4 + $0x40] ss:$8 sps:$4 sm:$0xff]   ;;  %660 = vst [vmem:[#allocation2 + $0x10] sm:$0xff] %v14435_v63 }
  0x12   : > { %20366 = vst [vmem:[#allocation4_spill] sm:$0xff] %v14537_v9  ;;  %v6636_v15 = vrot.slane %v443_v8, %v14537_v9  ;;  %v459_v16 = vpack.c.bf16 %v445_v13, %v444_v10  ;;  %v446_v35 = vld [vmem:[%s14532_s17 + $0x20] sm:$0xff]  ;;  %v447_v36 = vld [vmem:[%s14532_s17 + $0x28] sm:$0xff]  ;;  %v14091_v41 = vld [vmem:[%s20099_s4 + $0xd4] ss:$8 sps:$4 sm:$0xff]   ;;  %v14437_v13 = vmov 0.0|0.0  }
  0x13   : > { %13964 = vmatprep.mubr.msk.bf16.mxu0 %vm474_vm0, %v458_v11  ;;  %v6643_v18 = vrot.slane %v6629_v12, %v14537_v9  ;;  %v14090_v38 = vld [vmem:[%s20099_s4 + $0xe0] ss:$8 sps:$4 sm:$0xff]   ;;  %v14089_v43 = vld [vmem:[%s20099_s4 + $0x34] ss:$8 sps:$4 sm:$0xff]   ;;  %v14087_v44 = vld [vmem:[%s20099_s4 + $0x30] ss:$8 sps:$4 sm:$0xff]   ;;  %v460_v45 = vpack.c.bf16 %v447_v36, %v446_v35 }
  0x14   : > { %v6644_v19 = vcombine.high %v6636_v15, %v6636_v15  ;;  %13965 = vmatmul.mubr.msk.bf16.vlgmr.msra.gmra.mxu0 %vm474_vm0, %v459_v16  ;;  %v14558_v22 = vrot.slane %v6636_v15, %v14537_v9  ;;  %1032 = vmatpush1.bf16.msra.mxu1 %v14090_v38  ;;  %v448_v46 = vld [vmem:[%s14532_s17 + $0x30] sm:$0xff]  ;;  %v449_v47 = vld [vmem:[%s14532_s17 + $0x38] sm:$0xff]  ;;  %v14095_v48 = vld [vmem:[%s20099_s4 + $0x24] ss:$8 sps:$4 sm:$0xff]   ;;  %661 = vst [vmem:[#allocation2 + $0x18] sm:$0xff] %v14435_v63  ;;  %v20135_v11 = vmov 0  }
  0x15   : > { %1269 = vmatpush1.bf16.msra.mxu0 %v14070_v14  ;;  %v6645_v24 = vcombine.high %v6643_v18, %v6643_v18  ;;  %v14564_v25 = vrot.slane %v6643_v18, %v14537_v9  ;;  %1033 = vmatprep.subr.bf16.mxu1 %v14091_v41  ;;  %v450_v49 = vld [vmem:[%s14532_s17 + $0x40] sm:$0xff]  ;;  %v451_v50 = vld [vmem:[%s14532_s17 + $0x48] sm:$0xff]  ;;  %v461_v52 = vpack.c.bf16 %v449_v47, %v448_v46  ;;  %v452_v53 = vld [vmem:[%s14532_s17 + $0x50] sm:$0xff]  ;;  %vm1461_vm2 = vcmask 1046528   ;;  %s14438_s28 = smov 120   ;;  %s14439_s18 = smov 96  }
  0x16   : > { %20367 = vst [vmem:[#allocation5_spill] sm:$0xff] %v14558_v22  ;;  %1270 = vmatprep.subr.bf16.mxu0 %v14075_v17  ;;  %v14567_v26 = vrot.slane %v6644_v19, %v14537_v9  ;;  %v6674_v28 = vcombine.high %v14558_v22, %v14558_v22  ;;  %13968 = vmatprep.mubr.msk.bf16.mxu0 %vm474_vm0, %v460_v45  ;;  %v14093_v51 = vld [vmem:[%s20099_s4 + $0x20] ss:$8 sps:$4 sm:$0xff]   ;;  %v453_v54 = vld [vmem:[%s14532_s17 + $0x58] sm:$0xff]  ;;  %v456_v59 = vld [vmem:[%s14532_s17 + $0x70] sm:$0xff]  ;;  %vm6376_vm3 = vcmask 523264  }
  0x17   : > { %20368 = vst [vmem:[#allocation6_spill] sm:$0xff] %v14564_v25  ;;  %v14586_v33 = vrot.slane %v6645_v24, %v14537_v9  ;;  %v14590_v34 = vcombine.high %v14564_v25, %v14564_v25  ;;  %v462_v55 = vpack.c.bf16 %v451_v50, %v450_v49  ;;  %v454_v56 = vld [vmem:[%s14532_s17 + $0x60] sm:$0xff]  ;;  %v455_v57 = vld [vmem:[%s14532_s17 + $0x68] sm:$0xff]  ;;  %v463_v58 = vpack.c.bf16 %v453_v54, %v452_v53  ;;  %v457_v60 = vld [vmem:[%s14532_s17 + $0x78] sm:$0xff]  ;;  %s14040_s29 = smul.u32 224, %s20998_s26 }
  0x18   : > { %20369 = vst [vmem:[#allocation7_spill] sm:$0xff] %v14567_v26  ;;  %v6676_v30 = vcombine.high %v14567_v26, %v14567_v26  ;;  %v14601_v39 = vcombine.low %v14567_v26, %v6674_v28  ;;  %v464_v61 = vpack.c.bf16 %v455_v57, %v454_v56  ;;  %v465_v62 = vpack.c.bf16 %v457_v60, %v456_v59  ;;  %v14096_v0 = vld [vmem:[%s20099_s4 + $0xd0] ss:$8 sps:$4 sm:$0xff]   ;;  %v14097_v1 = vld [vmem:[%s20099_s4 + $0xc4] ss:$8 sps:$4 sm:$0xff]  }
  0x19   : > { %1271 = vmatpush1.bf16.msra.mxu0 %v14073_v20  ;;  %20370 = vst [vmem:[#allocation8_spill] sm:$0xff] %v14586_v33  ;;  %20371 = vst [vmem:[#allocation9_spill] sm:$0xff] %v14590_v34  ;;  %1034 = vmatpush1.bf16.msra.mxu1 %v14096_v0  ;;  %v14099_v3 = vld [vmem:[%s20099_s4 + $0x10] ss:$8 sps:$4 sm:$0xff]   ;;  %v14101_v4 = vld [vmem:[%s20099_s4 + $0x14] ss:$8 sps:$4 sm:$0xff]   ;;  %s19866_s14 = scalar_lea.vmem %s20108_s13, %s14040_s29 }
  0x1a   : > { %1272 = vmatprep.subr.bf16.mxu0 %v14078_v23  ;;  %20372 = vst [vmem:[#allocation10_spill] sm:$0xff] %v14601_v39  ;;  %v14604_v40 = vcombine.low %v6676_v30, %v14564_v25  ;;  %662 = vst [vmem:[#allocation2 + $0x20] sm:$0xff] %v14435_v63  ;;  %1035 = vmatprep.subr.bf16.mxu1 %v14097_v1  ;;  %v14102_v5 = vld [vmem:[%s20099_s4 + $0xc0] ss:$8 sps:$4 sm:$0xff]   ;;  %v14103_v6 = vld [vmem:[%s20099_s4 + $0xb4] ss:$8 sps:$4 sm:$0xff]  }
  0x1b   : > { %663 = vst [vmem:[#allocation2 + $0x28] sm:$0xff] %v14435_v63  ;;  %666 = vst [vmem:[#allocation2 + $0x40] sm:$0xff] %v14435_v63  ;;  %v14105_v7 = vld [vmem:[%s20099_s4] ss:$8 sps:$4 sm:$0xff]   ;;  %v14107_v8 = vld [vmem:[%s20099_s4 + $0x4] ss:$8 sps:$4 sm:$0xff]   ;;  %1061 = vmatprep.mubr.bf16.mxu1 %v20135_v11 }
  0x1c   : > { %20373 = vst [vmem:[#allocation11_spill] sm:$0xff] %v14604_v40  ;;  %13969 = vmatmul.mubr.msk.bf16.gmra.mxu0 %vm474_vm0, %v461_v52  ;;  %667 = vst [vmem:[#allocation2 + $0x48] sm:$0xff] %v14435_v63  ;;  %v14108_v10 = vld [vmem:[%s20099_s4 + $0xb0] ss:$8 sps:$4 sm:$0xff]   ;;  %v14109_v12 = vld [vmem:[%s20099_s4 + $0xa4] ss:$8 sps:$4 sm:$0xff]  }
  0x1d   : > { %1273 = vmatpush1.bf16.msra.mxu0 %v14076_v31  ;;  %13972 = vmatprep.mubr.msk.bf16.mxu0 %vm474_vm0, %v462_v55  ;;  %668 = vst [vmem:[#allocation2 + $0x50] sm:$0xff] %v14435_v63  ;;  %669 = vst [vmem:[#allocation2 + $0x58] sm:$0xff] %v14435_v63  ;;  %v14111_v14 = vld [vmem:[%s20099_s4 + $0xa0] ss:$8 sps:$4 sm:$0xff]   ;;  %v14112_v15 = vld [vmem:[%s20099_s4 + $0x94] ss:$8 sps:$4 sm:$0xff]  }
  0x1e   : > { %1274 = vmatprep.subr.bf16.mxu0 %v14083_v32  ;;  %670 = vst [vmem:[#allocation2 + $0x60] sm:$0xff] %v14435_v63  ;;  %671 = vst [vmem:[#allocation2 + $0x68] sm:$0xff] %v14435_v63  ;;  %1036 = vmatpush1.bf16.msra.mxu1 %v14102_v5  ;;  %v14114_v16 = vld [vmem:[%s20099_s4 + $0x90] ss:$8 sps:$4 sm:$0xff]   ;;  %v14115_v17 = vld [vmem:[%s20099_s4 + $0x84] ss:$8 sps:$4 sm:$0xff]  }
  0x1f   : > { %672 = vst [vmem:[#allocation2 + $0x70] sm:$0xff] %v14435_v63  ;;  %673 = vst [vmem:[#allocation2 + $0x78] sm:$0xff] %v14435_v63  ;;  %1037 = vmatprep.subr.bf16.mxu1 %v14103_v6  ;;  %v14117_v18 = vld [vmem:[%s20099_s4 + $0x80] ss:$8 sps:$4 sm:$0xff]   ;;  %v14120_v19 = vld [vmem:[%s20099_s4 + $0x174] ss:$8 sps:$4 sm:$0xff]  }
  0x20   : > { %674 = vst [vmem:[#allocation2 + $0x80] sm:$0xff] %v14435_v63  ;;  %675 = vst [vmem:[#allocation2 + $0x88] sm:$0xff] %v14435_v63  ;;  %v14136_v20 = vld [vmem:[%s20099_s4 + $0x1f0] ss:$8 sps:$4 sm:$0xff]   ;;  %v14138_v21 = vld [vmem:[%s20099_s4 + $0x1f4] ss:$8 sps:$4 sm:$0xff]  }
  0x21   : > { %1275 = vmatpush1.bf16.msra.mxu0 %v14081_v37  ;;  %676 = vst [vmem:[#allocation2 + $0x90] sm:$0xff] %v14435_v63  ;;  %677 = vst [vmem:[#allocation2 + $0x98] sm:$0xff] %v14435_v63  ;;  %v14141_v23 = vld [vmem:[%s20099_s4 + $0x1e4] ss:$8 sps:$4 sm:$0xff]   ;;  %v14139_v24 = vld [vmem:[%s20099_s4 + $0x1e0] ss:$8 sps:$4 sm:$0xff]  }
  0x22   : > { %1276 = vmatprep.subr.bf16.mxu0 %v14089_v43  ;;  %678 = vst [vmem:[#allocation2 + $0xa0] sm:$0xff] %v14435_v63  ;;  %679 = vst [vmem:[#allocation2 + $0xa8] sm:$0xff] %v14435_v63  ;;  %1038 = vmatpush1.bf16.msra.mxu1 %v14108_v10  ;;  %v14142_v27 = vld [vmem:[%s20099_s4 + $0x1d0] ss:$8 sps:$4 sm:$0xff]   ;;  %v14144_v28 = vld [vmem:[%s20099_s4 + $0x1d4] ss:$8 sps:$4 sm:$0xff]  }
  0x23   : > { %680 = vst [vmem:[#allocation2 + $0xb0] sm:$0xff] %v14435_v63  ;;  %681 = vst [vmem:[#allocation2 + $0xb8] sm:$0xff] %v14435_v63  ;;  %1039 = vmatprep.subr.bf16.mxu1 %v14109_v12  ;;  %v14150_v29 = vld [vmem:[%s20099_s4 + $0x1c4] ss:$8 sps:$4 sm:$0xff]   ;;  %v14148_v30 = vld [vmem:[%s20099_s4 + $0x1c0] ss:$8 sps:$4 sm:$0xff]  }
  0x24   : > { %13973 = vmatmul.mubr.msk.bf16.gmra.mxu0 %vm474_vm0, %v463_v58  ;;  %682 = vst [vmem:[#allocation2 + $0xc0] sm:$0xff] %v14435_v63  ;;  %683 = vst [vmem:[#allocation2 + $0xc8] sm:$0xff] %v14435_v63  ;;  %v14151_v31 = vld [vmem:[%s20099_s4 + $0x1b0] ss:$8 sps:$4 sm:$0xff]   ;;  %v14153_v32 = vld [vmem:[%s20099_s4 + $0x1b4] ss:$8 sps:$4 sm:$0xff]  }
  0x25   : > { %1277 = vmatpush1.bf16.msra.mxu0 %v14087_v44  ;;  %13976 = vmatprep.mubr.msk.bf16.mxu0 %vm474_vm0, %v464_v61  ;;  %684 = vst [vmem:[#allocation2 + $0xd0] sm:$0xff] %v14435_v63  ;;  %685 = vst [vmem:[#allocation2 + $0xd8] sm:$0xff] %v14435_v63  ;;  %v14156_v35 = vld [vmem:[%s20099_s4 + $0x1a4] ss:$8 sps:$4 sm:$0xff]   ;;  %v14727_v36 = vld [vmem:[%s20097_s2] ss:$0 sm:$0xff] }
  0x26   : > { %1278 = vmatprep.subr.bf16.mxu0 %v14095_v48  ;;  %686 = vst [vmem:[#allocation2 + $0xe0] sm:$0xff] %v14435_v63  ;;  %687 = vst [vmem:[#allocation2 + $0xe8] sm:$0xff] %v14435_v63  ;;  %1040 = vmatpush1.bf16.msra.mxu1 %v14111_v14  ;;  %v14154_v37 = vld [vmem:[%s20099_s4 + $0x1a0] ss:$8 sps:$4 sm:$0xff]   ;;  %v14157_v47 = vld [vmem:[%s20099_s4 + $0x190] ss:$8 sps:$4 sm:$0xff]  }
  0x27   : > { %688 = vst [vmem:[#allocation2 + $0xf0] sm:$0xff] %v14435_v63  ;;  %689 = vst [vmem:[#allocation2 + $0xf8] sm:$0xff] %v14435_v63  ;;  %1041 = vmatprep.subr.bf16.mxu1 %v14112_v15  ;;  %v14735_v41 = vld [vmem:[%s20098_s3] ss:$0 sm:$0xff]  ;;  %v14159_v48 = vld [vmem:[%s20099_s4 + $0x194] ss:$8 sps:$4 sm:$0xff]  }
  0x28   : > { %690 = vst [vmem:[#allocation2 + $0x100] sm:$0xff] %v14435_v63  ;;  %691 = vst [vmem:[#allocation2 + $0x108] sm:$0xff] %v14435_v63  ;;  %v14165_v50 = vld [vmem:[%s20099_s4 + $0x184] ss:$8 sps:$4 sm:$0xff]   ;;  %v14163_v55 = vld [vmem:[%s20099_s4 + $0x180] ss:$8 sps:$4 sm:$0xff]  }
  0x29   : > { %1279 = vmatpush1.bf16.msra.mxu0 %v14093_v51  ;;  %v14118_v10 = vld [vmem:[%s20099_s4 + $0x170] ss:$8 sps:$4 sm:$0xff]   ;;  %vm13202_vm4 = vcmask 850688   ;;  %vm13166_vm5 = vcmask 784384  }
  0x2a   : > { %1280 = vmatprep.subr.bf16.mxu0 %v14101_v4  ;;  %1042 = vmatpush1.bf16.msra.mxu1 %v14114_v16 }
  0x2b   : > { %1043 = vmatprep.subr.bf16.mxu1 %v14115_v17  ;;  %v14123_v17 = vld [vmem:[%s20099_s4 + $0x164] ss:$8 sps:$4 sm:$0xff]  }
  0x2c   : > { %13977 = vmatmul.mubr.msk.bf16.gmra.mxu0 %vm474_vm0, %v465_v62  ;;  %v806_v62 = vrot.slane %v20135_v11, 1 }
  0x2d   : > { %1281 = vmatpush1.bf16.msra.mxu0 %v14099_v3  ;;  %1300 = vmatprep.mubr.bf16.mxu0 %v20135_v11 }
  0x2e   : > { %1282 = vmatprep.subr.bf16.mxu0 %v14107_v8  ;;  %1044 = vmatpush1.bf16.msra.mxu1 %v14117_v18 }
  0x2f   : > { %1591 = vmatprep.subr.bf16.mxu1 %v14120_v19 }
  0x31   : > { %1283 = vmatpush1.bf16.msra.mxu0 %v14105_v7 }
  0x32   : > { %1878 = vmatprep.subr.bf16.mxu0 %v14138_v21 }
  0x34   : > { %1301 = vmatmul.mubr.bf16.vlgmr.msra.gmra.mxu0 %v14437_v13 }
  0x35   : > { %1308 = vmatprep.mubr.bf16.mxu0 %v20135_v11  ;;  %1879 = vmatpush1.bf16.msra.mxu0 %v14136_v20 }
  0x36   : > { %1880 = vmatprep.subr.bf16.mxu0 %v14141_v23 }
  0x39   : > { %1881 = vmatpush1.bf16.msra.mxu0 %v14139_v24 }
  0x3a   : > { %1882 = vmatprep.subr.bf16.mxu0 %v14144_v28  ;;  %v14121_v28 = vld [vmem:[%s20099_s4 + $0x160] ss:$8 sps:$4 sm:$0xff]  }
  0x3d   : > { %1883 = vmatpush1.bf16.msra.mxu0 %v14142_v27 }
  0x3e   : > { %1884 = vmatprep.subr.bf16.mxu0 %v14150_v29 }
  0x41   : > { %1885 = vmatpush1.bf16.msra.mxu0 %v14148_v30 }
  0x42   : > { %1886 = vmatprep.subr.bf16.mxu0 %v14153_v32 }
  0x45   : > { %1887 = vmatpush1.bf16.msra.mxu0 %v14151_v31 }
  0x46   : > { %1888 = vmatprep.subr.bf16.mxu0 %v14156_v35 }
  0x49   : > { %1889 = vmatpush1.bf16.msra.mxu0 %v14154_v37  ;;  %v14126_v37 = vld [vmem:[%s20099_s4 + $0x154] ss:$8 sps:$4 sm:$0xff]  }
  0x4a   : > { %1890 = vmatprep.subr.bf16.mxu0 %v14159_v48 }
  0x4d   : > { %1891 = vmatpush1.bf16.msra.mxu0 %v14157_v47 }
  0x4e   : > { %1892 = vmatprep.subr.bf16.mxu0 %v14165_v50 }
  0x51   : > { %1893 = vmatpush1.bf16.msra.mxu0 %v14163_v55  ;;  %v14129_v55 = vld [vmem:[%s20099_s4 + $0x144] ss:$8 sps:$4 sm:$0xff]  }
  0xd4   : > { %v13966_v38 = vpop.f32.mrf.mxu0 }
  0xd5   : > { %v605_v43 = vmul.f32 %v13966_v38, %v14727_v36 }
  0xd6   : > { %v533_v44 = vpop.f32.mrf.mxu0 }
  0xd7   : > { %v628_v45 = vadd.f32 %v14735_v41, %v605_v43  ;;  %v603_v46 = vmul.f32 %v14727_v36, %v533_v44 }
  0xd8   : > { %v13967_v49 = vpop.f32.mrf.mxu0 }
  0xd9   : > { %v644_v51 = vmax.f32 %v628_v45, 0.0  ;;  %v626_v52 = vadd.f32 %v14735_v41, %v603_v46  ;;  %v606_v53 = vmul.f32 %v13967_v49, %v14727_v36 }
  0xda   : > { %v536_v54 = vpop.f32.mrf.mxu0 }
  0xdb   : > { %699 = vst [vmem:[#allocation2 + $0x31] sm:$0xff] %v644_v51  ;;  %v642_v56 = vmax.f32 %v626_v52, 0.0  ;;  %v629_v57 = vadd.f32 %v14735_v41, %v606_v53  ;;  %v604_v58 = vmul.f32 %v14727_v36, %v536_v54  ;;  %v14124_v51 = vld [vmem:[%s20099_s4 + $0x150] ss:$8 sps:$4 sm:$0xff]  }
  0xdc   : > { %v13970_v3 = vpop.f32.mrf.mxu0 }
  0xdd   : > { %697 = vst [vmem:[#allocation2 + $0x11] sm:$0xff] %v642_v56  ;;  %v645_v59 = vmax.f32 %v629_v57, 0.0  ;;  %v627_v60 = vadd.f32 %v14735_v41, %v604_v58  ;;  %v609_v5 = vmul.f32 %v13970_v3, %v14727_v36 }
  0xde   : > { %v549_v8 = vpop.f32.mrf.mxu0 }
  0xdf   : > { %700 = vst [vmem:[#allocation2 + $0x41] sm:$0xff] %v645_v59  ;;  %v643_v61 = vmax.f32 %v627_v60, 0.0  ;;  %v632_v15 = vadd.f32 %v14735_v41, %v609_v5  ;;  %v607_v16 = vmul.f32 %v14727_v36, %v549_v8  ;;  %v14132_v8 = vld [vmem:[%s20099_s4 + $0x134] ss:$8 sps:$4 sm:$0xff]  }
  0xe0   : > { %v13971_v19 = vpop.f32.mrf.mxu0 }
  0xe1   : > { %698 = vst [vmem:[#allocation2 + $0x21] sm:$0xff] %v643_v61  ;;  %v648_v21 = vmax.f32 %v632_v15, 0.0  ;;  %v630_v23 = vadd.f32 %v14735_v41, %v607_v16  ;;  %v610_v24 = vmul.f32 %v13971_v19, %v14727_v36 }
  0xe2   : > { %v552_v27 = vpop.f32.mrf.mxu0  ;;  %v719_v32 = vld [vmem:[#allocation2 + $0x30] sm:$0xff]  ;;  %v720_v35 = vld [vmem:[#allocation2 + $0x38] sm:$0xff] }
  0xe3   : > { %703 = vst [vmem:[#allocation2 + $0x71] sm:$0xff] %v648_v21  ;;  %v646_v29 = vmax.f32 %v630_v23, 0.0  ;;  %v633_v30 = vadd.f32 %v14735_v41, %v610_v24  ;;  %v608_v31 = vmul.f32 %v14727_v36, %v552_v27  ;;  %v14792_v50 = vpack.c.bf16 %v720_v35, %v719_v32  ;;  %v14130_v21 = vld [vmem:[%s20099_s4 + $0x130] ss:$8 sps:$4 sm:$0xff]  }
  0xe4   : > { %v715_v63 = vld [vmem:[#allocation2 + $0x10] sm:$0xff]  ;;  %v716_v0 = vld [vmem:[#allocation2 + $0x18] sm:$0xff]  ;;  %v13974_v38 = vpop.f32.mrf.mxu0 }
  0xe5   : > { %v14758_v1 = vpack.c.bf16 %v716_v0, %v715_v63  ;;  %701 = vst [vmem:[#allocation2 + $0x51] sm:$0xff] %v646_v29  ;;  %v649_v45 = vmax.f32 %v633_v30, 0.0  ;;  %v631_v46 = vadd.f32 %v14735_v41, %v608_v31  ;;  %v613_v47 = vmul.f32 %v13974_v38, %v14727_v36  ;;  %20374 = vst [vmem:[#allocation12_spill] sm:$0xff] %v14792_v50 }
  0xe6   : > { %v565_v48 = vpop.f32.mrf.mxu0  ;;  %v721_v60 = vld [vmem:[#allocation2 + $0x40] sm:$0xff]  ;;  %v722_v61 = vld [vmem:[#allocation2 + $0x48] sm:$0xff]  ;;  %v825_v0 = vshll.u32 %v14792_v50, 16 }
  0xe7   : > { %1309 = vmatmul.mubr.bf16.gmra.mxu0 %v14758_v1  ;;  %v809_v4 = vshll.u32 %v14758_v1, 16  ;;  %v813_v43 = vshrl.u32 %v14758_v1, 16  ;;  %704 = vst [vmem:[#allocation2 + $0x81] sm:$0xff] %v649_v45  ;;  %v647_v52 = vmax.f32 %v631_v46, 0.0  ;;  %v636_v53 = vadd.f32 %v14735_v41, %v613_v47  ;;  %v14133_v45 = vld [vmem:[%s20099_s4 + $0x120] ss:$8 sps:$4 sm:$0xff]  }
  0xe8   : > { %1316 = vmatprep.mubr.bf16.mxu0 %v20135_v11  ;;  %v717_v6 = vld [vmem:[#allocation2 + $0x20] sm:$0xff]  ;;  %v718_v7 = vld [vmem:[#allocation2 + $0x28] sm:$0xff]  ;;  %v611_v54 = vmul.f32 %v14727_v36, %v565_v48  ;;  %v13975_v57 = vpop.f32.mrf.mxu0  ;;  %v827_v19 = vrot.slane %v825_v0, 1  ;;  %v829_v46 = vshrl.u32 %v14792_v50, 16  ;;  %v14147_v48 = vld [vmem:[%s20099_s4 + $0x114] ss:$8 sps:$4 sm:$0xff]  }
  0xe9   : > { %v811_v12 = vrot.slane %v809_v4, 1  ;;  %v14767_v14 = vpack.c.bf16 %v718_v7, %v717_v6  ;;  %702 = vst [vmem:[#allocation2 + $0x61] sm:$0xff] %v647_v52  ;;  %v652_v58 = vmax.f32 %v636_v53, 0.0  ;;  %v14127_v4 = vld [vmem:[%s20099_s4 + $0x140] ss:$8 sps:$4 sm:$0xff]  }
  0xea   : > { %v634_v59 = vadd.f32 %v14735_v41, %v611_v54  ;;  %v568_v3 = vpop.f32.mrf.mxu0  ;;  %v831_v54 = vor.u32 %v829_v46, %v827_v19  ;;  %v14168_v0 = vld [vmem:[%s20099_s4 + $0x274] ss:$8 sps:$4 sm:$0xff]  }
  0xeb   : > { %v812_v18 = vsel %vm800_vm1, %v806_v62, %v811_v12  ;;  %v817_v20 = vshll.u32 %v14767_v14, 16  ;;  %v815_v49 = vor.u32 %v813_v43, %v811_v12  ;;  %v614_v62 = vmul.f32 %v13975_v57, %v14727_v36  ;;  %707 = vst [vmem:[#allocation2 + $0xb1] sm:$0xff] %v652_v58  ;;  %v14145_v58 = vld [vmem:[%s20099_s4 + $0x110] ss:$8 sps:$4 sm:$0xff]  }
  0xec   : > { %1062 = vmatmul.mubr.bf16.vlgmr.msra.gmra.mxu1 %v812_v18  ;;  %v821_v63 = vshrl.u32 %v14767_v14, 16  ;;  %v650_v5 = vmax.f32 %v634_v59, 0.0  ;;  %v612_v7 = vmul.f32 %v14727_v36, %v568_v3  ;;  %v14820_v12 = vpack.c.bf16 %v722_v61, %v721_v60  ;;  %v13978_v15 = vpop.f32.mrf.mxu0  ;;  %v723_v32 = vld [vmem:[#allocation2 + $0x50] sm:$0xff]  ;;  %v724_v35 = vld [vmem:[#allocation2 + $0x58] sm:$0xff]  ;;  %v14162_v59 = vld [vmem:[%s20099_s4 + $0x104] ss:$8 sps:$4 sm:$0xff]  }
  0xed   : > { %1592 = vmatpush1.bf16.msra.mxu1 %v14118_v10  ;;  %1069 = vmatprep.mubr.bf16.mxu1 %v20135_v11  ;;  %v819_v44 = vrot.slane %v817_v20, 1  ;;  %v637_v6 = vadd.f32 %v14735_v41, %v614_v62  ;;  %v617_v18 = vmul.f32 %v13978_v15, %v14727_v36  ;;  %v727_v15 = vld [vmem:[#allocation2 + $0x70] sm:$0xff] }
  0xee   : > { %1593 = vmatprep.subr.bf16.mxu1 %v14123_v17  ;;  %20375 = vst [vmem:[#allocation13_spill] sm:$0xff] %v14820_v12  ;;  %705 = vst [vmem:[#allocation2 + $0x91] sm:$0xff] %v650_v5  ;;  %v635_v17 = vadd.f32 %v14735_v41, %v612_v7  ;;  %v581_v20 = vpop.f32.mrf.mxu0  ;;  %v833_v30 = vshll.u32 %v14820_v12, 16  ;;  %v837_v3 = vshrl.u32 %v14820_v12, 16 }
  0xef   : > { %1317 = vmatmul.mubr.bf16.gmra.mxu0 %v14767_v14  ;;  %v14803_v56 = vsel %vm800_vm1, %v815_v49, %v819_v44  ;;  %v823_v10 = vor.u32 %v821_v63, %v819_v44  ;;  %v653_v16 = vmax.f32 %v637_v6, 0.0  ;;  %v640_v24 = vadd.f32 %v14735_v41, %v617_v18 }
  0xf0   : > { %1324 = vmatprep.mubr.bf16.mxu0 %v20135_v11  ;;  %v651_v23 = vmax.f32 %v635_v17, 0.0  ;;  %v615_v27 = vmul.f32 %v14727_v36, %v581_v20  ;;  %v13979_v31 = vpop.f32.mrf.mxu0  ;;  %v835_v49 = vrot.slane %v833_v30, 1  ;;  %v725_v62 = vld [vmem:[#allocation2 + $0x60] sm:$0xff]  ;;  %v726_v63 = vld [vmem:[#allocation2 + $0x68] sm:$0xff] }
  0xf1   : > { %1594 = vmatpush1.bf16.msra.mxu1 %v14121_v28  ;;  %708 = vst [vmem:[#allocation2 + $0xc1] sm:$0xff] %v653_v16  ;;  %v14135_v28 = vld [vmem:[%s20099_s4 + $0x124] ss:$8 sps:$4 sm:$0xff]   ;;  %v14834_v29 = vsel %vm800_vm1, %v823_v10, %v827_v19  ;;  %v618_v43 = vmul.f32 %v13979_v31, %v14727_v36  ;;  %v14876_v6 = vpack.c.bf16 %v726_v63, %v725_v62  ;;  %v728_v16 = vld [vmem:[#allocation2 + $0x78] sm:$0xff] }
  0xf2   : > { %1595 = vmatprep.subr.bf16.mxu1 %v14126_v37  ;;  %706 = vst [vmem:[#allocation2 + $0xa1] sm:$0xff] %v651_v23  ;;  %v656_v37 = vmax.f32 %v640_v24, 0.0  ;;  %v638_v38 = vadd.f32 %v14735_v41, %v615_v27  ;;  %v584_v44 = vpop.f32.mrf.mxu0  ;;  %v14862_v60 = vsel %vm800_vm1, %v831_v54, %v835_v49  ;;  %v839_v5 = vor.u32 %v837_v3, %v835_v49  ;;  %v729_v24 = vld [vmem:[#allocation2 + $0x80] sm:$0xff]  ;;  %v730_v27 = vld [vmem:[#allocation2 + $0x88] sm:$0xff]  ;;  %v735_v62 = vld [vmem:[#allocation2 + $0xb0] sm:$0xff] }
  0xf3   : > { %v641_v52 = vadd.f32 %v14735_v41, %v618_v43  ;;  %v616_v53 = vmul.f32 %v14727_v36, %v584_v44  ;;  %20377 = vst [vmem:[#allocation15_spill] sm:$0xff] %v14876_v6  ;;  %v849_v10 = vshll.u32 %v14876_v6, 16  ;;  %v14887_v19 = vpack.c.bf16 %v728_v16, %v727_v15  ;;  %v736_v63 = vld [vmem:[#allocation2 + $0xb8] sm:$0xff] }
  0xf4   : > { %1070 = vmatmul.mubr.bf16.gmra.mxu1 %v14803_v56  ;;  %711 = vst [vmem:[#allocation2 + $0xf1] sm:$0xff] %v656_v37  ;;  %v654_v47 = vmax.f32 %v638_v38, 0.0  ;;  %v14898_v31 = vpack.c.bf16 %v730_v27, %v729_v24 }
  0xf5   : > { %1077 = vmatprep.mubr.bf16.mxu1 %v20135_v11  ;;  %1596 = vmatpush1.bf16.msra.mxu1 %v14124_v51  ;;  %v14849_v51 = vpack.c.bf16 %v724_v35, %v723_v32  ;;  %v639_v57 = vadd.f32 %v14735_v41, %v616_v53  ;;  %v14160_v41 = vld [vmem:[%s20099_s4 + $0x100] ss:$8 sps:$4 sm:$0xff]   ;;  %v851_v18 = vrot.slane %v849_v10, 1  ;;  %20378 = vst [vmem:[#allocation16_spill] sm:$0xff] %v14887_v19  ;;  %v857_v23 = vshll.u32 %v14887_v19, 16  ;;  %v731_v37 = vld [vmem:[#allocation2 + $0x90] sm:$0xff] }
  0xf6   : > { %1597 = vmatprep.subr.bf16.mxu1 %v14129_v55  ;;  %709 = vst [vmem:[#allocation2 + $0xd1] sm:$0xff] %v654_v47  ;;  %v657_v55 = vmax.f32 %v641_v52, 0.0  ;;  %20379 = vst [vmem:[#allocation17_spill] sm:$0xff] %v14898_v31  ;;  %v861_v35 = vshrl.u32 %v14887_v19, 16  ;;  %v732_v38 = vld [vmem:[#allocation2 + $0x98] sm:$0xff]  ;;  %v865_v43 = vshll.u32 %v14898_v31, 16 }
  0xf7   : > { %1325 = vmatmul.mubr.bf16.gmra.mxu0 %v14792_v50  ;;  %20376 = vst [vmem:[#allocation14_spill] sm:$0xff] %v14849_v51  ;;  %v841_v36 = vshll.u32 %v14849_v51, 16  ;;  %v655_v61 = vmax.f32 %v639_v57, 0.0  ;;  %v859_v30 = vrot.slane %v857_v23, 1 }
  0xf8   : > { %1332 = vmatprep.mubr.bf16.mxu0 %v20135_v11  ;;  %712 = vst [vmem:[#allocation2 + $0x101] sm:$0xff] %v657_v55  ;;  %v867_v46 = vrot.slane %v865_v43, 1 }
  0xf9   : > { %1598 = vmatpush1.bf16.msra.mxu1 %v14127_v4  ;;  %710 = vst [vmem:[#allocation2 + $0xe1] sm:$0xff] %v655_v61  ;;  %v843_v4 = vrot.slane %v841_v36, 1  ;;  %v863_v44 = vor.u32 %v861_v35, %v859_v30  ;;  %v733_v52 = vld [vmem:[#allocation2 + $0xa0] sm:$0xff]  ;;  %v734_v53 = vld [vmem:[#allocation2 + $0xa8] sm:$0xff] }
  0xfa   : > { %1599 = vmatprep.subr.bf16.mxu1 %v14132_v8  ;;  %v845_v8 = vshrl.u32 %v14849_v51, 16  ;;  %v14920_v57 = vpack.c.bf16 %v734_v53, %v733_v52 }
  0xfb   : > { %v14879_v7 = vsel %vm800_vm1, %v839_v5, %v843_v4  ;;  %v14912_v47 = vsel %vm800_vm1, %v863_v44, %v867_v46  ;;  %v14186_v44 = vld [vmem:[%s20099_s4 + $0x2f4] ss:$8 sps:$4 sm:$0xff]  }
  0xfc   : > { %1078 = vmatmul.mubr.bf16.gmra.mxu1 %v14834_v29  ;;  %v847_v17 = vor.u32 %v845_v8, %v843_v4  ;;  %20381 = vst [vmem:[#allocation19_spill] sm:$0xff] %v14920_v57  ;;  %v14935_v8 = vpack.c.bf16 %v736_v63, %v735_v62  ;;  %v885_v15 = vshrl.u32 %v14920_v57, 16  ;;  %2474 = vmatprep.subr.bf16.mxu0 %v14186_v44 }
  0xfd   : > { %1085 = vmatprep.mubr.bf16.mxu1 %v20135_v11  ;;  %1600 = vmatpush1.bf16.msra.mxu1 %v14130_v21  ;;  %v853_v21 = vshrl.u32 %v14876_v6, 16  ;;  %v740_v35 = vld [vmem:[#allocation2 + $0xd8] sm:$0xff] }
  0xfe   : > { %1601 = vmatprep.subr.bf16.mxu1 %v14135_v28  ;;  %v14890_v20 = vsel %vm800_vm1, %v847_v17, %v851_v18  ;;  %20382 = vst [vmem:[#allocation20_spill] sm:$0xff] %v14935_v8  ;;  %v889_v16 = vshll.u32 %v14935_v8, 16  ;;  %v737_v17 = vld [vmem:[#allocation2 + $0xc0] sm:$0xff] }
  0xff   : > { %1333 = vmatmul.mubr.bf16.gmra.mxu0 %v14820_v12  ;;  %v855_v28 = vor.u32 %v853_v21, %v851_v18  ;;  %v738_v18 = vld [vmem:[#allocation2 + $0xc8] sm:$0xff] }
 0x100   : > { %1340 = vmatprep.mubr.bf16.mxu0 %v20135_v11  ;;  %v891_v23 = vrot.slane %v889_v16, 1  ;;  %v14946_v24 = vpack.c.bf16 %v738_v18, %v737_v17  ;;  %v741_v53 = vld [vmem:[#allocation2 + $0xe0] sm:$0xff] }
 0x101   : > { %1602 = vmatpush1.bf16.msra.mxu1 %v14133_v45  ;;  %v14901_v32 = vsel %vm800_vm1, %v855_v28, %v859_v30  ;;  %v14908_v45 = vpack.c.bf16 %v732_v38, %v731_v37  ;;  %v893_v28 = vshrl.u32 %v14935_v8, 16  ;;  %v739_v30 = vld [vmem:[#allocation2 + $0xd0] sm:$0xff] }
 0x102   : > { %1603 = vmatprep.subr.bf16.mxu1 %v14147_v48  ;;  %v869_v48 = vshrl.u32 %v14898_v31, 16  ;;  %20383 = vst [vmem:[#allocation21_spill] sm:$0xff] %v14946_v24  ;;  %v897_v37 = vshll.u32 %v14946_v24, 16  ;;  %v14956_v43 = vpack.c.bf16 %v740_v35, %v739_v30 }
 0x103   : > { %20380 = vst [vmem:[#allocation18_spill] sm:$0xff] %v14908_v45  ;;  %v873_v49 = vshll.u32 %v14908_v45, 16  ;;  %v877_v36 = vshrl.u32 %v14908_v45, 16  ;;  %v895_v38 = vor.u32 %v893_v28, %v891_v23 }
 0x104   : > { %1086 = vmatmul.mubr.bf16.gmra.mxu1 %v14862_v60  ;;  %v871_v54 = vor.u32 %v869_v48, %v867_v46  ;;  %20384 = vst [vmem:[#allocation22_spill] sm:$0xff] %v14956_v43  ;;  %v899_v46 = vrot.slane %v897_v37, 1  ;;  %v905_v52 = vshll.u32 %v14956_v43, 16  ;;  %v909_v63 = vshrl.u32 %v14956_v43, 16 }
 0x105   : > { %1093 = vmatprep.mubr.bf16.mxu1 %v20135_v11  ;;  %1604 = vmatpush1.bf16.msra.mxu1 %v14145_v58  ;;  %v875_v55 = vrot.slane %v873_v49, 1  ;;  %v14922_v58 = vpop.f32.mrf.mxu0  ;;  %v901_v49 = vshrl.u32 %v14946_v24, 16 }
 0x106   : > { %1605 = vmatprep.subr.bf16.mxu1 %v14162_v59  ;;  %v14963_v48 = vsel %vm800_vm1, %v895_v38, %v899_v46 }
 0x107   : > { %1341 = vmatmul.mubr.bf16.gmra.mxu0 %v14849_v51  ;;  %v14925_v59 = vsel %vm800_vm1, %v871_v54, %v875_v55  ;;  %v14929_v61 = vpop.f32.mrf.mxu0  ;;  %v879_v3 = vor.u32 %v877_v36, %v875_v55  ;;  %v742_v54 = vld [vmem:[#allocation2 + $0xe8] sm:$0xff]  ;;  %v903_v55 = vor.u32 %v901_v49, %v899_v46  ;;  %v907_v36 = vrot.slane %v905_v52, 1  ;;  %v14184_v46 = vld [vmem:[%s20099_s4 + $0x2f0] ss:$8 sps:$4 sm:$0xff]  }
 0x108   : > { %1348 = vmatprep.mubr.bf16.mxu0 %v20135_v11  ;;  %v14189_v49 = vld [vmem:[%s20099_s4 + $0x2e4] ss:$8 sps:$4 sm:$0xff]  }
 0x109   : > { %1606 = vmatpush1.bf16.msra.mxu1 %v14160_v41  ;;  %v881_v41 = vshll.u32 %v14920_v57, 16  ;;  %v14974_v62 = vsel %vm800_vm1, %v903_v55, %v907_v36  ;;  %v14192_v55 = vld [vmem:[%s20099_s4 + $0x2d4] ss:$8 sps:$4 sm:$0xff]  }
 0x10a   : > { %2180 = vmatprep.subr.bf16.mxu1 %v14168_v0  ;;  %v1306_v0 = vpop.f32.mrf.mxu0 }
 0x10b   : > { %v883_v5 = vrot.slane %v881_v41, 1  ;;  %v14971_v41 = vpack.c.bf16 %v742_v54, %v741_v53  ;;  %v14187_v54 = vld [vmem:[%s20099_s4 + $0x2e0] ss:$8 sps:$4 sm:$0xff]  }
 0x10c   : > { %1094 = vmatmul.mubr.bf16.gmra.mxu1 %v14879_v7  ;;  %v1307_v4 = vpop.f32.mrf.mxu0 }
 0x10d   : > { %1101 = vmatprep.mubr.bf16.mxu1 %v20135_v11  ;;  %v14938_v10 = vsel %vm800_vm1, %v879_v3, %v883_v5  ;;  %v887_v21 = vor.u32 %v885_v15, %v883_v5  ;;  %20385 = vst [vmem:[#allocation23_spill] sm:$0xff] %v14971_v41  ;;  %v913_v0 = vshll.u32 %v14971_v41, 16  ;;  %v743_v3 = vld [vmem:[#allocation2 + $0xf0] sm:$0xff]  ;;  %v744_v4 = vld [vmem:[#allocation2 + $0xf8] sm:$0xff]  ;;  %v911_v5 = vor.u32 %v909_v63, %v907_v36 }
 0x10e   : > { %v14982_v16 = vpack.c.bf16 %v744_v4, %v743_v3  ;;  %v917_v18 = vshrl.u32 %v14971_v41, 16  ;;  %v14190_v63 = vld [vmem:[%s20099_s4 + $0x2d0] ss:$8 sps:$4 sm:$0xff]   ;;  %v1462_v3 = vrot.slane %v14437_v13, 1  ;;  %v1463_v4 = vrot.slane %v14758_v1, 1 }
 0x10f   : > { %1349 = vmatmul.mubr.bf16.gmra.mxu0 %v14876_v6  ;;  %v14949_v27 = vsel %vm800_vm1, %v887_v21, %v891_v23  ;;  %v915_v15 = vrot.slane %v913_v0, 1  ;;  %v14991_v23 = vld [vmem:[#allocation2 + $0x100] sm:$0xff]  ;;  %v14201_v13 = vld [vmem:[%s20099_s4 + $0x2b4] ss:$8 sps:$4 sm:$0xff]  }
 0x110   : > { %1356 = vmatprep.mubr.bf16.mxu0 %v20135_v11  ;;  %20386 = vst [vmem:[#allocation24_spill] sm:$0xff] %v14982_v16  ;;  %v921_v21 = vshll.u32 %v14982_v16, 16  ;;  %v14996_v30 = vpack.c.bf16 %v14991_v23, %v14991_v23  ;;  %v925_v38 = vshrl.u32 %v14982_v16, 16  ;;  %v14198_v0 = vld [vmem:[%s20099_s4 + $0x2c4] ss:$8 sps:$4 sm:$0xff]  }
 0x111   : > { %v14985_v17 = vsel %vm800_vm1, %v911_v5, %v915_v15  ;;  %v919_v28 = vor.u32 %v917_v18, %v915_v15  ;;  %v14196_v5 = vld [vmem:[%s20099_s4 + $0x2c0] ss:$8 sps:$4 sm:$0xff]   ;;  %v14166_v15 = vld [vmem:[%s20099_s4 + $0x270] ss:$8 sps:$4 sm:$0xff]   ;;  %v14171_v18 = vld [vmem:[%s20099_s4 + $0x264] ss:$8 sps:$4 sm:$0xff]  }
 0x112   : > { %v923_v35 = vrot.slane %v921_v21, 1  ;;  %v929_v44 = vshll.u32 %v14996_v30, 16  ;;  %v14199_v21 = vld [vmem:[%s20099_s4 + $0x2b0] ss:$8 sps:$4 sm:$0xff]  }
 0x114   : > { %1102 = vmatmul.mubr.bf16.gmra.mxu1 %v14890_v20  ;;  %v15000_v37 = vsel %vm800_vm1, %v919_v28, %v923_v35  ;;  %v15013_v52 = vor.u32 %v925_v38, %v923_v35  ;;  %v931_v53 = vrot.slane %v929_v44, 1  ;;  %v14169_v28 = vld [vmem:[%s20099_s4 + $0x260] ss:$8 sps:$4 sm:$0xff]   ;;  %v14204_v35 = vld [vmem:[%s20099_s4 + $0x2a4] ss:$8 sps:$4 sm:$0xff]   ;;  %v1465_v44 = vrot.slane %v14767_v14, 1 }
 0x115   : > { %1109 = vmatprep.mubr.bf16.mxu1 %v20135_v11  ;;  %v14174_v38 = vld [vmem:[%s20099_s4 + $0x254] ss:$8 sps:$4 sm:$0xff]  }
 0x116   : > { %v932_v36 = vsel %vm800_vm1, %v15013_v52, %v931_v53  ;;  %v14177_v53 = vld [vmem:[%s20099_s4 + $0x244] ss:$8 sps:$4 sm:$0xff]  }
 0x117   : > { %1357 = vmatmul.mubr.bf16.gmra.mxu0 %v14887_v19 }
 0x118   : > { %1364 = vmatprep.mubr.bf16.mxu0 %v20135_v11 }
 0x11c   : > { %1110 = vmatmul.mubr.bf16.gmra.mxu1 %v14901_v32 }
 0x11d   : > { %1117 = vmatprep.mubr.bf16.mxu1 %v20135_v11 }
 0x11f   : > { %1365 = vmatmul.mubr.bf16.gmra.mxu0 %v14898_v31 }
 0x120   : > { %1372 = vmatprep.mubr.bf16.mxu0 %v20135_v11 }
 0x124   : > { %1118 = vmatmul.mubr.bf16.gmra.mxu1 %v14912_v47 }
 0x125   : > { %1125 = vmatprep.mubr.bf16.mxu1 %v20135_v11 }
 0x127   : > { %1373 = vmatmul.mubr.bf16.gmra.mxu0 %v14908_v45 }
 0x128   : > { %1380 = vmatprep.mubr.bf16.mxu0 %v20135_v11 }
 0x12c   : > { %1126 = vmatmul.mubr.bf16.gmra.mxu1 %v14925_v59 }
 0x12d   : > { %1133 = vmatprep.mubr.bf16.mxu1 %v20135_v11 }
 0x12f   : > { %1381 = vmatmul.mubr.bf16.gmra.mxu0 %v14920_v57 }
 0x130   : > { %1388 = vmatprep.mubr.bf16.mxu0 %v20135_v11 }
 0x134   : > { %1134 = vmatmul.mubr.bf16.gmra.mxu1 %v14938_v10 }
 0x135   : > { %1141 = vmatprep.mubr.bf16.mxu1 %v20135_v11 }
 0x137   : > { %1389 = vmatmul.mubr.bf16.gmra.mxu0 %v14935_v8 }
 0x138   : > { %1396 = vmatprep.mubr.bf16.mxu0 %v20135_v11 }
 0x13c   : > { %1142 = vmatmul.mubr.bf16.gmra.mxu1 %v14949_v27 }
 0x13d   : > { %1149 = vmatprep.mubr.bf16.mxu1 %v20135_v11 }
 0x13f   : > { %1397 = vmatmul.mubr.bf16.gmra.mxu0 %v14946_v24 }
 0x140   : > { %1404 = vmatprep.mubr.bf16.mxu0 %v20135_v11 }
 0x144   : > { %1150 = vmatmul.mubr.bf16.gmra.mxu1 %v14963_v48 }
 0x145   : > { %1157 = vmatprep.mubr.bf16.mxu1 %v20135_v11 }
 0x147   : > { %1405 = vmatmul.mubr.bf16.gmra.mxu0 %v14956_v43 }
 0x148   : > { %1412 = vmatprep.mubr.bf16.mxu0 %v20135_v11 }
 0x14c   : > { %1158 = vmatmul.mubr.bf16.gmra.mxu1 %v14974_v62 }
 0x14d   : > { %1165 = vmatprep.mubr.bf16.mxu1 %v20135_v11 }
 0x14f   : > { %1413 = vmatmul.mubr.bf16.gmra.mxu0 %v14971_v41 }
 0x150   : > { %1420 = vmatprep.mubr.bf16.mxu0 %v20135_v11 }
 0x154   : > { %1166 = vmatmul.mubr.bf16.gmra.mxu1 %v14985_v17 }
 0x155   : > { %1173 = vmatprep.mubr.bf16.mxu1 %v20135_v11 }
 0x157   : > { %1421 = vmatmul.mubr.bf16.gmra.mxu0 %v14982_v16 }
 0x158   : > { %1910 = vmatprep.mubr.bf16.mxu0 %v20135_v11 }
 0x15c   : > { %1174 = vmatmul.mubr.bf16.gmra.mxu1 %v15000_v37 }
 0x15d   : > { %1181 = vmatprep.mubr.bf16.mxu1 %v20135_v11 }
 0x15f   : > { %1911 = vmatmul.mubr.bf16.vlgmr.msra.gmra.mxu0 %v14758_v1  ;;  %v1464_v1 = vsel %vm1461_vm2, %v1462_v3, %v1463_v4  ;;  %v14180_v3 = vld [vmem:[%s20099_s4 + $0x234] ss:$8 sps:$4 sm:$0xff]  }
 0x160   : > { %1918 = vmatprep.mubr.bf16.mxu0 %v20135_v11  ;;  %2475 = vmatpush1.bf16.msra.mxu0 %v14184_v46  ;;  %v14202_v46 = vld [vmem:[%s20099_s4 + $0x2a0] ss:$8 sps:$4 sm:$0xff]  }
 0x161   : > { %2476 = vmatprep.subr.bf16.mxu0 %v14189_v49  ;;  %v14172_v49 = vld [vmem:[%s20099_s4 + $0x250] ss:$8 sps:$4 sm:$0xff]  }
 0x164   : > { %1182 = vmatmul.mubr.bf16.gmra.mxu1 %v932_v36  ;;  %2477 = vmatpush1.bf16.msra.mxu0 %v14187_v54  ;;  %v14207_v54 = vld [vmem:[%s20099_s4 + $0x294] ss:$8 sps:$4 sm:$0xff]   ;;  %v14205_v36 = vld [vmem:[%s20099_s4 + $0x290] ss:$8 sps:$4 sm:$0xff]  }
 0x165   : > { %1623 = vmatprep.mubr.bf16.mxu1 %v20135_v11  ;;  %2478 = vmatprep.subr.bf16.mxu0 %v14192_v55  ;;  %v15077_v55 = vsel %vm1461_vm2, %v1463_v4, %v1465_v44  ;;  %v14211_v4 = vld [vmem:[%s20099_s4 + $0x280] ss:$8 sps:$4 sm:$0xff]  }
 0x167   : > { %1919 = vmatmul.mubr.bf16.gmra.mxu0 %v14767_v14 }
 0x168   : > { %1926 = vmatprep.mubr.bf16.mxu0 %v20135_v11  ;;  %2479 = vmatpush1.bf16.msra.mxu0 %v14190_v63  ;;  %v14175_v63 = vld [vmem:[%s20099_s4 + $0x240] ss:$8 sps:$4 sm:$0xff]  }
 0x169   : > { %2480 = vmatprep.subr.bf16.mxu0 %v14198_v0  ;;  %v14213_v0 = vld [vmem:[%s20099_s4 + $0x284] ss:$8 sps:$4 sm:$0xff]  }
 0x16c   : > { %1624 = vmatmul.mubr.bf16.vlgmr.msra.gmra.mxu1 %v1464_v1  ;;  %2481 = vmatpush1.bf16.msra.mxu0 %v14196_v5  ;;  %v1467_v5 = vrot.slane %v14792_v50, 1  ;;  %v14181_v1 = vld [vmem:[%s20099_s4 + $0x220] ss:$8 sps:$4 sm:$0xff]  }
 0x16d   : > { %2181 = vmatpush1.bf16.msra.mxu1 %v14166_v15  ;;  %1631 = vmatprep.mubr.bf16.mxu1 %v20135_v11  ;;  %v14178_v15 = vld [vmem:[%s20099_s4 + $0x230] ss:$8 sps:$4 sm:$0xff]  }
 0x16e   : > { %2182 = vmatprep.subr.bf16.mxu1 %v14171_v18  ;;  %2482 = vmatprep.subr.bf16.mxu0 %v14201_v13  ;;  %v14183_v18 = vld [vmem:[%s20099_s4 + $0x224] ss:$8 sps:$4 sm:$0xff]   ;;  %v15106_v13 = vsel %vm1461_vm2, %v1465_v44, %v1467_v5 }
 0x16f   : > { %1927 = vmatmul.mubr.bf16.gmra.mxu0 %v14792_v50  ;;  %20387 = vst [vmem:[#allocation25_spill] sm:$0xff] %v15106_v13 }
 0x170   : > { %1934 = vmatprep.mubr.bf16.mxu0 %v20135_v11  ;;  %2483 = vmatpush1.bf16.msra.mxu0 %v14199_v21  ;;  %v14195_v21 = vld [vmem:[%s20099_s4 + $0x214] ss:$8 sps:$4 sm:$0xff]  }
 0x171   : > { %2183 = vmatpush1.bf16.msra.mxu1 %v14169_v28  ;;  %2484 = vmatprep.subr.bf16.mxu0 %v14204_v35  ;;  %v1469_v28 = vrot.slane %v14820_v12, 1  ;;  %v14193_v35 = vld [vmem:[%s20099_s4 + $0x210] ss:$8 sps:$4 sm:$0xff]  }
 0x172   : > { %2184 = vmatprep.subr.bf16.mxu1 %v14174_v38  ;;  %v14210_v38 = vld [vmem:[%s20099_s4 + $0x204] ss:$8 sps:$4 sm:$0xff]  }
 0x173   : > { %v15126_v44 = vsel %vm1461_vm2, %v1467_v5, %v1469_v28 }
 0x174   : > { %1632 = vmatmul.mubr.bf16.gmra.mxu1 %v15077_v55  ;;  %2485 = vmatpush1.bf16.msra.mxu0 %v14202_v46  ;;  %20388 = vst [vmem:[#allocation26_spill] sm:$0xff] %v15126_v44  ;;  %v14208_v46 = vld [vmem:[%s20099_s4 + $0x200] ss:$8 sps:$4 sm:$0xff]  }
 0x175   : > { %1639 = vmatprep.mubr.bf16.mxu1 %v20135_v11  ;;  %2185 = vmatpush1.bf16.msra.mxu1 %v14172_v49  ;;  %v14216_v49 = vld [vmem:[%s20099_s4 + $0x374] ss:$8 sps:$4 sm:$0xff]  }
 0x176   : > { %2186 = vmatprep.subr.bf16.mxu1 %v14177_v53  ;;  %2486 = vmatprep.subr.bf16.mxu0 %v14207_v54  ;;  %v1471_v53 = vrot.slane %v14849_v51, 1 }
 0x177   : > { %1935 = vmatmul.mubr.bf16.gmra.mxu0 %v14820_v12 }
 0x178   : > { %1942 = vmatprep.mubr.bf16.mxu0 %v20135_v11  ;;  %2487 = vmatpush1.bf16.msra.mxu0 %v14205_v36  ;;  %v15140_v54 = vsel %vm1461_vm2, %v1469_v28, %v1471_v53  ;;  %v1473_v36 = vrot.slane %v14876_v6, 1 }
 0x179   : > { %2187 = vmatpush1.bf16.msra.mxu1 %v14175_v63  ;;  %2488 = vmatprep.subr.bf16.mxu0 %v14213_v0  ;;  %20389 = vst [vmem:[#allocation27_spill] sm:$0xff] %v15140_v54  ;;  %v1475_v0 = vrot.slane %v14887_v19, 1 }
 0x17a   : > { %2188 = vmatprep.subr.bf16.mxu1 %v14180_v3  ;;  %v15148_v63 = vsel %vm1461_vm2, %v1471_v53, %v1473_v36  ;;  %v1481_v53 = vrot.slane %v14920_v57, 1 }
 0x17b   : > { %20390 = vst [vmem:[#allocation28_spill] sm:$0xff] %v15148_v63  ;;  %v15156_v3 = vsel %vm1461_vm2, %v1473_v36, %v1475_v0 }
 0x17c   : > { %1640 = vmatmul.mubr.bf16.gmra.mxu1 %v15106_v13  ;;  %2489 = vmatpush1.bf16.msra.mxu0 %v14211_v4  ;;  %20391 = vst [vmem:[#allocation29_spill] sm:$0xff] %v15156_v3  ;;  %v1477_v4 = vrot.slane %v14898_v31, 1 }
 0x17d   : > { %1647 = vmatprep.mubr.bf16.mxu1 %v20135_v11  ;;  %2189 = vmatpush1.bf16.msra.mxu1 %v14178_v15 }
 0x17e   : > { %2190 = vmatprep.subr.bf16.mxu1 %v14183_v18  ;;  %v15164_v5 = vsel %vm1461_vm2, %v1475_v0, %v1477_v4  ;;  %v1479_v18 = vrot.slane %v14908_v45, 1 }
 0x17f   : > { %1943 = vmatmul.mubr.bf16.gmra.mxu0 %v14849_v51  ;;  %20392 = vst [vmem:[#allocation30_spill] sm:$0xff] %v15164_v5 }
 0x180   : > { %1950 = vmatprep.mubr.bf16.mxu0 %v20135_v11  ;;  %v15172_v28 = vsel %vm1461_vm2, %v1477_v4, %v1479_v18  ;;  %v15184_v42 = vsel %vm1461_vm2, %v1479_v18, %v1481_v53 }
 0x181   : > { %2191 = vmatpush1.bf16.msra.mxu1 %v14181_v1  ;;  %20393 = vst [vmem:[#allocation31_spill] sm:$0xff] %v15172_v28  ;;  %20394 = vst [vmem:[#allocation32_spill] sm:$0xff] %v15184_v42 }
 0x182   : > { %2192 = vmatprep.subr.bf16.mxu1 %v14195_v21 }
 0x184   : > { %1648 = vmatmul.mubr.bf16.gmra.mxu1 %v15126_v44 }
 0x185   : > { %1655 = vmatprep.mubr.bf16.mxu1 %v20135_v11  ;;  %2193 = vmatpush1.bf16.msra.mxu1 %v14193_v35 }
 0x186   : > { %2194 = vmatprep.subr.bf16.mxu1 %v14210_v38 }
 0x187   : > { %1951 = vmatmul.mubr.bf16.gmra.mxu0 %v14876_v6 }
 0x188   : > { %1958 = vmatprep.mubr.bf16.mxu0 %v20135_v11 }
 0x189   : > { %2195 = vmatpush1.bf16.msra.mxu1 %v14208_v46 }
 0x18a   : > { %2761 = vmatprep.subr.bf16.mxu1 %v14216_v49 }
 0x18c   : > { %1656 = vmatmul.mubr.bf16.gmra.mxu1 %v15140_v54 }
 0x18d   : > { %1663 = vmatprep.mubr.bf16.mxu1 %v20135_v11 }
 0x18f   : > { %1959 = vmatmul.mubr.bf16.gmra.mxu0 %v14887_v19 }
 0x190   : > { %1966 = vmatprep.mubr.bf16.mxu0 %v20135_v11 }
 0x194   : > { %1664 = vmatmul.mubr.bf16.gmra.mxu1 %v15148_v63 }
 0x195   : > { %1671 = vmatprep.mubr.bf16.mxu1 %v20135_v11 }
 0x197   : > { %1967 = vmatmul.mubr.bf16.gmra.mxu0 %v14898_v31 }
 0x198   : > { %1974 = vmatprep.mubr.bf16.mxu0 %v20135_v11 }
 0x19c   : > { %1672 = vmatmul.mubr.bf16.gmra.mxu1 %v15156_v3 }
 0x19d   : > { %1679 = vmatprep.mubr.bf16.mxu1 %v20135_v11 }
 0x19f   : > { %1975 = vmatmul.mubr.bf16.gmra.mxu0 %v14908_v45 }
 0x1a0   : > { %1982 = vmatprep.mubr.bf16.mxu0 %v20135_v11 }
 0x1a4   : > { %1680 = vmatmul.mubr.bf16.gmra.mxu1 %v15164_v5 }
 0x1a5   : > { %1687 = vmatprep.mubr.bf16.mxu1 %v20135_v11 }
 0x1a7   : > { %v1310_v15 = vpop.f32.mrf.mxu0  ;;  %1983 = vmatmul.mubr.bf16.gmra.mxu0 %v14920_v57 }
 0x1a8   : > { %1990 = vmatprep.mubr.bf16.mxu0 %v20135_v11 }
 0x1a9   : > { %v1312_v1 = vpop.f32.mrf.mxu0 }
 0x1ab   : > { %v1314_v21 = vpop.f32.mrf.mxu0 }
 0x1ac   : > { %v15174_v35 = vpop.f32.mrf.mxu1  ;;  %1688 = vmatmul.mubr.bf16.gmra.mxu1 %v15172_v28 }
 0x1ad   : > { %v1315_v38 = vpop.f32.mrf.mxu0  ;;  %1695 = vmatprep.mubr.bf16.mxu1 %v20135_v11 }
 0x1ae   : > { %v15178_v46 = vpop.f32.mrf.mxu1 }
 0x1af   : > { %v1318_v49 = vpop.f32.mrf.mxu0  ;;  %1991 = vmatmul.mubr.bf16.gmra.mxu0 %v14935_v8 }
 0x1b0   : > { %v1067_v36 = vpop.f32.mrf.mxu1  ;;  %1998 = vmatprep.mubr.bf16.mxu0 %v20135_v11 }
 0x1b1   : > { %v1320_v0 = vpop.f32.mrf.mxu0 }
 0x1b2   : > { %v1068_v4 = vpop.f32.mrf.mxu1 }
 0x1b3   : > { %v1322_v21 = vpop.f32.mrf.mxu0  ;;  %v1483_v4 = vrot.slane %v14935_v8, 1 }
 0x1b4   : > { %v1071_v40 = vpop.f32.mrf.mxu1  ;;  %1696 = vmatmul.mubr.bf16.gmra.mxu1 %v15184_v42 }
 0x1b5   : > { %v15187_v38 = vadd.f32 %v1310_v15, %v1071_v40  ;;  %v1323_v34 = vpop.f32.mrf.mxu0  ;;  %1703 = vmatprep.mubr.bf16.mxu1 %v20135_v11  ;;  %v15196_v40 = vsel %vm1461_vm2, %v1481_v53, %v1483_v4 }
 0x1b6   : > { %v1073_v39 = vpop.f32.mrf.mxu1  ;;  %20395 = vst [vmem:[#allocation33_spill] sm:$0xff] %v15196_v40 }
 0x1b7   : > { %v15190_v25 = vadd.f32 %v1312_v1, %v1073_v39  ;;  %v1326_v36 = vpop.f32.mrf.mxu0  ;;  %1999 = vmatmul.mubr.bf16.gmra.mxu0 %v14946_v24 }
 0x1b8   : > { %v1075_v21 = vpop.f32.mrf.mxu1  ;;  %2006 = vmatprep.mubr.bf16.mxu0 %v20135_v11 }
 0x1b9   : > { %v1328_v18 = vpop.f32.mrf.mxu0 }
 0x1ba   : > { %v1076_v33 = vpop.f32.mrf.mxu1 }
 0x1bb   : > { %v1330_v22 = vpop.f32.mrf.mxu0  ;;  %v1485_v33 = vrot.slane %v14946_v24, 1 }
 0x1bc   : > { %v1079_v34 = vpop.f32.mrf.mxu1  ;;  %1704 = vmatmul.mubr.bf16.gmra.mxu1 %v15196_v40  ;;  %v14234_v22 = vld [vmem:[%s20099_s4 + $0x3f4] ss:$8 sps:$4 sm:$0xff]  }
 0x1bd   : > { %v15199_v15 = vadd.f32 %v1318_v49, %v1079_v34  ;;  %v1331_v39 = vpop.f32.mrf.mxu0  ;;  %1711 = vmatprep.mubr.bf16.mxu1 %v20135_v11  ;;  %3063 = vmatprep.subr.bf16.mxu0 %v14234_v22  ;;  %v15211_v2 = vsel %vm1461_vm2, %v1483_v4, %v1485_v33  ;;  %v1487_v22 = vrot.slane %v14956_v43, 1 }
 0x1be   : > { %v1081_v1 = vpop.f32.mrf.mxu1  ;;  %20396 = vst [vmem:[#allocation34_spill] sm:$0xff] %v15211_v2 }
 0x1bf   : > { %v15202_v26 = vadd.f32 %v1320_v0, %v1081_v1  ;;  %v1334_v21 = vpop.f32.mrf.mxu0  ;;  %2007 = vmatmul.mubr.bf16.gmra.mxu0 %v14956_v43  ;;  %v746_v43 = vld [vmem:[#allocation2 + $0x108] sm:$0xff] }
 0x1c0   : > { %v1083_v53 = vpop.f32.mrf.mxu1  ;;  %2014 = vmatprep.mubr.bf16.mxu0 %v20135_v11 }
 0x1c1   : > { %v1336_v49 = vpop.f32.mrf.mxu0 }
 0x1c2   : > { %v1084_v34 = vpop.f32.mrf.mxu1 }
 0x1c3   : > { %v1338_v39 = vpop.f32.mrf.mxu0 }
 0x1c4   : > { %v1087_v0 = vpop.f32.mrf.mxu1  ;;  %1712 = vmatmul.mubr.bf16.gmra.mxu1 %v15211_v2 }
 0x1c5   : > { %v15214_v1 = vadd.f32 %v1326_v36, %v1087_v0  ;;  %v1339_v9 = vpop.f32.mrf.mxu0  ;;  %1719 = vmatprep.mubr.bf16.mxu1 %v20135_v11  ;;  %v15223_v36 = vsel %vm1461_vm2, %v1485_v33, %v1487_v22 }
 0x1c6   : > { %v1089_v24 = vpop.f32.mrf.mxu1  ;;  %20397 = vst [vmem:[#allocation35_spill] sm:$0xff] %v15223_v36 }
 0x1c7   : > { %v15217_v8 = vadd.f32 %v1328_v18, %v1089_v24  ;;  %v1342_v53 = vpop.f32.mrf.mxu0  ;;  %2015 = vmatmul.mubr.bf16.gmra.mxu0 %v14971_v41 }
 0x1c8   : > { %v1091_v34 = vpop.f32.mrf.mxu1  ;;  %2022 = vmatprep.mubr.bf16.mxu0 %v20135_v11 }
 0x1c9   : > { %v1344_v4 = vpop.f32.mrf.mxu0 }
 0x1ca   : > { %v1092_v39 = vpop.f32.mrf.mxu1 }
 0x1cb   : > { %v1346_v57 = vpop.f32.mrf.mxu0  ;;  %v1489_v39 = vrot.slane %v14971_v41, 1 }
 0x1cc   : > { %v1095_v9 = vpop.f32.mrf.mxu1  ;;  %1720 = vmatmul.mubr.bf16.gmra.mxu1 %v15223_v36 }
 0x1cd   : > { %v15226_v0 = vadd.f32 %v1334_v21, %v1095_v9  ;;  %v1347_v24 = vpop.f32.mrf.mxu0  ;;  %1727 = vmatprep.mubr.bf16.mxu1 %v20135_v11  ;;  %v15235_v21 = vsel %vm1461_vm2, %v1487_v22, %v1489_v39 }
 0x1ce   : > { %v1097_v18 = vpop.f32.mrf.mxu1  ;;  %20398 = vst [vmem:[#allocation36_spill] sm:$0xff] %v15235_v21 }
 0x1cf   : > { %v15229_v45 = vadd.f32 %v1336_v49, %v1097_v18  ;;  %v1350_v34 = vpop.f32.mrf.mxu0  ;;  %2023 = vmatmul.mubr.bf16.gmra.mxu0 %v14982_v16  ;;  %v15239_v49 = vpack.c.bf16 %v746_v43, %v14991_v23 }
 0x1d0   : > { %v1099_v57 = vpop.f32.mrf.mxu1  ;;  %2030 = vmatprep.mubr.bf16.mxu0 %v20135_v11 }
 0x1d1   : > { %v1352_v33 = vpop.f32.mrf.mxu0 }
 0x1d2   : > { %v1100_v31 = vpop.f32.mrf.mxu1 }
 0x1d3   : > { %v1354_v19 = vpop.f32.mrf.mxu0 }
 0x1d4   : > { %v1103_v9 = vpop.f32.mrf.mxu1  ;;  %1728 = vmatmul.mubr.bf16.gmra.mxu1 %v15235_v21  ;;  %v15248_v19 = vrot.slane %v14982_v16, 1  ;;  %v1493_v16 = vrot.slane %v14996_v30, 1 }
 0x1d5   : > { %v15241_v24 = vadd.f32 %v1342_v53, %v1103_v9  ;;  %v1355_v18 = vpop.f32.mrf.mxu0  ;;  %1735 = vmatprep.mubr.bf16.mxu1 %v20135_v11 }
 0x1d6   : > { %v1105_v57 = vpop.f32.mrf.mxu1  ;;  %v15253_v53 = vsel %vm1461_vm2, %v1489_v39, %v15248_v19 }
 0x1d7   : > { %v15244_v41 = vadd.f32 %v1344_v4, %v1105_v57  ;;  %v1358_v6 = vpop.f32.mrf.mxu0  ;;  %2031 = vmatmul.mubr.bf16.gmra.mxu0 %v15239_v49  ;;  %20399 = vst [vmem:[#allocation37_spill] sm:$0xff] %v15253_v53  ;;  %v14232_v4 = vld [vmem:[%s20099_s4 + $0x3f0] ss:$8 sps:$4 sm:$0xff]  }
 0x1d8   : > { %v1107_v31 = vpop.f32.mrf.mxu1  ;;  %2506 = vmatprep.mubr.bf16.mxu0 %v20135_v11 }
 0x1d9   : > { %v1360_v22 = vpop.f32.mrf.mxu0  ;;  %v14237_v31 = vld [vmem:[%s20099_s4 + $0x3e4] ss:$8 sps:$4 sm:$0xff]  }
 0x1da   : > { %v1108_v43 = vpop.f32.mrf.mxu1 }
 0x1db   : > { %v1362_v23 = vpop.f32.mrf.mxu0 }
 0x1dc   : > { %v1111_v9 = vpop.f32.mrf.mxu1  ;;  %1736 = vmatmul.mubr.bf16.gmra.mxu1 %v15253_v53 }
 0x1dd   : > { %v15259_v18 = vadd.f32 %v1350_v34, %v1111_v9  ;;  %v1363_v57 = vpop.f32.mrf.mxu0  ;;  %1743 = vmatprep.mubr.bf16.mxu1 %v20135_v11  ;;  %v14235_v34 = vld [vmem:[%s20099_s4 + $0x3e0] ss:$8 sps:$4 sm:$0xff]  }
 0x1de   : > { %v1113_v43 = vpop.f32.mrf.mxu1 }
 0x1df   : > { %v15265_v23 = vadd.f32 %v1352_v33, %v1113_v43  ;;  %v1366_v39 = vpop.f32.mrf.mxu0  ;;  %2507 = vmatmul.mubr.bf16.vlgmr.msra.gmra.mxu0 %v15077_v55  ;;  %v14240_v33 = vld [vmem:[%s20099_s4 + $0x3d4] ss:$8 sps:$4 sm:$0xff]   ;;  %v1494_v55 = vsel %vm1461_vm2, %v15248_v19, %v1493_v16 }
 0x1e0   : > { %v1115_v51 = vpop.f32.mrf.mxu1  ;;  %2514 = vmatprep.mubr.bf16.mxu0 %v20135_v11  ;;  %3064 = vmatpush1.bf16.msra.mxu0 %v14232_v4 }
 0x1e1   : > { %v1368_v9 = vpop.f32.mrf.mxu0  ;;  %3065 = vmatprep.subr.bf16.mxu0 %v14237_v31  ;;  %v14238_v51 = vld [vmem:[%s20099_s4 + $0x3d0] ss:$8 sps:$4 sm:$0xff]   ;;  %v20400_v31 = vmov 0  }
 0x1e2   : > { %v1116_v57 = vpop.f32.mrf.mxu1 }
 0x1e3   : > { %v1370_v43 = vpop.f32.mrf.mxu0  ;;  %v14246_v57 = vld [vmem:[%s20099_s4 + $0x3c4] ss:$8 sps:$4 sm:$0xff]  }
 0x1e4   : > { %v1119_v30 = vpop.f32.mrf.mxu1  ;;  %1744 = vmatmul.mubr.bf16.gmra.mxu1 %v1494_v55  ;;  %3066 = vmatpush1.bf16.msra.mxu0 %v14235_v34 }
 0x1e5   : > { %v15281_v4 = vadd.f32 %v1358_v6, %v1119_v30  ;;  %v1371_v11 = vpop.f32.mrf.mxu0  ;;  %2212 = vmatprep.mubr.bf16.mxu1 %v20400_v31  ;;  %3067 = vmatprep.subr.bf16.mxu0 %v14240_v33  ;;  %v14214_v33 = vld [vmem:[%s20099_s4 + $0x370] ss:$8 sps:$4 sm:$0xff]   ;;  %v14249_v30 = vld [vmem:[%s20099_s4 + $0x3b4] ss:$8 sps:$4 sm:$0xff]  }
 0x1e6   : > { %v1121_v43 = vpop.f32.mrf.mxu1  ;;  %v14244_v11 = vld [vmem:[%s20099_s4 + $0x3c0] ss:$8 sps:$4 sm:$0xff]  }
 0x1e7   : > { %v15287_v12 = vadd.f32 %v1360_v22, %v1121_v43  ;;  %v1374_v16 = vpop.f32.mrf.mxu0  ;;  %2515 = vmatmul.mubr.bf16.gmra.mxu0 %v15106_v13  ;;  %v14219_v22 = vld [vmem:[%s20099_s4 + $0x364] ss:$8 sps:$4 sm:$0xff]  }
 0x1e8   : > { %v1123_v34 = vpop.f32.mrf.mxu1  ;;  %2522 = vmatprep.mubr.bf16.mxu0 %v20400_v31  ;;  %3068 = vmatpush1.bf16.msra.mxu0 %v14238_v51 }
 0x1e9   : > { %v1376_v6 = vpop.f32.mrf.mxu0  ;;  %3069 = vmatprep.subr.bf16.mxu0 %v14246_v57  ;;  %v14247_v34 = vld [vmem:[%s20099_s4 + $0x3b0] ss:$8 sps:$4 sm:$0xff]  }
 0x1ea   : > { %v1124_v55 = vpop.f32.mrf.mxu1 }
 0x1eb   : > { %v1378_v51 = vpop.f32.mrf.mxu0  ;;  %v14217_v55 = vld [vmem:[%s20099_s4 + $0x360] ss:$8 sps:$4 sm:$0xff]  }
 0x1ec   : > { %v1127_v43 = vpop.f32.mrf.mxu1  ;;  %2213 = vmatmul.mubr.bf16.vlgmr.msra.gmra.mxu1 %v14803_v56  ;;  %3070 = vmatpush1.bf16.msra.mxu0 %v14244_v11  ;;  %v14252_v51 = vld [vmem:[%s20099_s4 + $0x3a4] ss:$8 sps:$4 sm:$0xff]   ;;  %v14222_v11 = vld [vmem:[%s20099_s4 + $0x354] ss:$8 sps:$4 sm:$0xff]  }
 0x1ed   : > { %v15307_v13 = vadd.f32 %v1366_v39, %v1127_v43  ;;  %2762 = vmatpush1.bf16.msra.mxu1 %v14214_v33  ;;  %v1379_v57 = vpop.f32.mrf.mxu0  ;;  %2220 = vmatprep.mubr.bf16.mxu1 %v20400_v31 }
 0x1ee   : > { %v1129_v56 = vpop.f32.mrf.mxu1  ;;  %2763 = vmatprep.subr.bf16.mxu1 %v14219_v22  ;;  %3071 = vmatprep.subr.bf16.mxu0 %v14249_v30  ;;  %v14250_v57 = vld [vmem:[%s20099_s4 + $0x3a0] ss:$8 sps:$4 sm:$0xff]   ;;  %v14220_v22 = vld [vmem:[%s20099_s4 + $0x350] ss:$8 sps:$4 sm:$0xff]   ;;  %v14225_v30 = vld [vmem:[%s20099_s4 + $0x344] ss:$8 sps:$4 sm:$0xff]  }
 0x1ef   : > { %v15319_v39 = vadd.f32 %v1368_v9, %v1129_v56  ;;  %v1382_v33 = vpop.f32.mrf.mxu0  ;;  %2523 = vmatmul.mubr.bf16.gmra.mxu0 %v15126_v44 }
 0x1f0   : > { %v1131_v43 = vpop.f32.mrf.mxu1  ;;  %2530 = vmatprep.mubr.bf16.mxu0 %v20400_v31  ;;  %3072 = vmatpush1.bf16.msra.mxu0 %v14247_v34  ;;  %v14255_v34 = vld [vmem:[%s20099_s4 + $0x394] ss:$8 sps:$4 sm:$0xff]  }
 0x1f1   : > { %v1384_v50 = vpop.f32.mrf.mxu0  ;;  %2764 = vmatpush1.bf16.msra.mxu1 %v14217_v55  ;;  %3073 = vmatprep.subr.bf16.mxu0 %v14252_v51  ;;  %v14253_v55 = vld [vmem:[%s20099_s4 + $0x390] ss:$8 sps:$4 sm:$0xff]  }
 0x1f2   : > { %v1132_v9 = vpop.f32.mrf.mxu1  ;;  %2765 = vmatprep.subr.bf16.mxu1 %v14222_v11 }
 0x1f3   : > { %v1386_v56 = vpop.f32.mrf.mxu0  ;;  %v14223_v9 = vld [vmem:[%s20099_s4 + $0x340] ss:$8 sps:$4 sm:$0xff]  }
 0x1f4   : > { %v1135_v43 = vpop.f32.mrf.mxu1  ;;  %2221 = vmatmul.mubr.bf16.gmra.mxu1 %v14834_v29  ;;  %3074 = vmatpush1.bf16.msra.mxu0 %v14250_v57  ;;  %v14261_v56 = vld [vmem:[%s20099_s4 + $0x384] ss:$8 sps:$4 sm:$0xff]   ;;  %v14228_v57 = vld [vmem:[%s20099_s4 + $0x334] ss:$8 sps:$4 sm:$0xff]  }
 0x1f5   : > { %v15339_v51 = vadd.f32 %v1374_v16, %v1135_v43  ;;  %v1387_v11 = vpop.f32.mrf.mxu0  ;;  %2228 = vmatprep.mubr.bf16.mxu1 %v20400_v31  ;;  %2766 = vmatpush1.bf16.msra.mxu1 %v14220_v22 }
 0x1f6   : > { %v1137_v44 = vpop.f32.mrf.mxu1  ;;  %2767 = vmatprep.subr.bf16.mxu1 %v14225_v30  ;;  %3075 = vmatprep.subr.bf16.mxu0 %v14255_v34  ;;  %v14259_v11 = vld [vmem:[%s20099_s4 + $0x380] ss:$8 sps:$4 sm:$0xff]   ;;  %v14226_v30 = vld [vmem:[%s20099_s4 + $0x330] ss:$8 sps:$4 sm:$0xff]  }
 0x1f7   : > { %20401 = vst [vmem:[#allocation38_spill] sm:$0xff] %v15339_v51  ;;  %v15351_v16 = vadd.f32 %v1376_v6, %v1137_v44  ;;  %v1390_v43 = vpop.f32.mrf.mxu0  ;;  %2531 = vmatmul.mubr.bf16.gmra.mxu0 %v15140_v54  ;;  %v14231_v6 = vld [vmem:[%s20099_s4 + $0x324] ss:$8 sps:$4 sm:$0xff]  }
 0x1f8   : > { %v1139_v22 = vpop.f32.mrf.mxu1  ;;  %2538 = vmatprep.mubr.bf16.mxu0 %v20400_v31  ;;  %3076 = vmatpush1.bf16.msra.mxu0 %v14253_v55 }
 0x1f9   : > { %v1392_v51 = vpop.f32.mrf.mxu0  ;;  %2768 = vmatpush1.bf16.msra.mxu1 %v14223_v9  ;;  %3077 = vmatprep.subr.bf16.mxu0 %v14261_v56  ;;  %v14229_v9 = vld [vmem:[%s20099_s4 + $0x320] ss:$8 sps:$4 sm:$0xff]  }
 0x1fa   : > { %v1140_v44 = vpop.f32.mrf.mxu1  ;;  %2769 = vmatprep.subr.bf16.mxu1 %v14228_v57  ;;  %v14243_v57 = vld [vmem:[%s20099_s4 + $0x314] ss:$8 sps:$4 sm:$0xff]  }
 0x1fb   : > { %v1394_v34 = vpop.f32.mrf.mxu0 }
 0x1fc   : > { %v1143_v22 = vpop.f32.mrf.mxu1  ;;  %2229 = vmatmul.mubr.bf16.gmra.mxu1 %v14862_v60  ;;  %3078 = vmatpush1.bf16.msra.mxu0 %v14259_v11  ;;  %v14241_v11 = vld [vmem:[%s20099_s4 + $0x310] ss:$8 sps:$4 sm:$0xff]  }
 0x1fd   : > { %v15365_v55 = vadd.f32 %v1382_v33, %v1143_v22  ;;  %v1395_v54 = vpop.f32.mrf.mxu0  ;;  %2236 = vmatprep.mubr.bf16.mxu1 %v20400_v31  ;;  %2770 = vmatpush1.bf16.msra.mxu1 %v14226_v30 }
 0x1fe   : > { %v1145_v56 = vpop.f32.mrf.mxu1  ;;  %2771 = vmatprep.subr.bf16.mxu1 %v14231_v6  ;;  %v14258_v6 = vld [vmem:[%s20099_s4 + $0x304] ss:$8 sps:$4 sm:$0xff]  }
 0x1ff   : > { %v15374_v44 = vadd.f32 %v1384_v50, %v1145_v56  ;;  %v1398_v34 = vpop.f32.mrf.mxu0  ;;  %2539 = vmatmul.mubr.bf16.gmra.mxu0 %v15148_v63 }
 0x200   : > { %v1147_v33 = vpop.f32.mrf.mxu1  ;;  %2546 = vmatprep.mubr.bf16.mxu0 %v20400_v31 }
 0x201   : > { %20402 = vst [vmem:[#allocation39_spill] sm:$0xff] %v15374_v44  ;;  %v1400_v54 = vpop.f32.mrf.mxu0  ;;  %2772 = vmatpush1.bf16.msra.mxu1 %v14229_v9  ;;  %v14256_v9 = vld [vmem:[%s20099_s4 + $0x300] ss:$8 sps:$4 sm:$0xff]  }
 0x202   : > { %v1148_v30 = vpop.f32.mrf.mxu1  ;;  %2773 = vmatprep.subr.bf16.mxu1 %v14243_v57  ;;  %v14264_v57 = vld [vmem:[%s20099_s4 + $0x474] ss:$8 sps:$4 sm:$0xff]  }
 0x203   : > { %v1402_v50 = vpop.f32.mrf.mxu0 }
 0x204   : > { %v1151_v22 = vpop.f32.mrf.mxu1  ;;  %2237 = vmatmul.mubr.bf16.gmra.mxu1 %v14879_v7 }
 0x205   : > { %v15385_v56 = vadd.f32 %v1390_v43, %v1151_v22  ;;  %v1403_v33 = vpop.f32.mrf.mxu0  ;;  %2244 = vmatprep.mubr.bf16.mxu1 %v20400_v31  ;;  %2774 = vmatpush1.bf16.msra.mxu1 %v14241_v11 }
 0x206   : > { %v1153_v30 = vpop.f32.mrf.mxu1  ;;  %2775 = vmatprep.subr.bf16.mxu1 %v14258_v6 }
 0x207   : > { %20403 = vst [vmem:[#allocation40_spill] sm:$0xff] %v15385_v56  ;;  %v15394_v50 = vadd.f32 %v1392_v51, %v1153_v30  ;;  %v1406_v63 = vpop.f32.mrf.mxu0  ;;  %2547 = vmatmul.mubr.bf16.gmra.mxu0 %v15156_v3 }
 0x208   : > { %v1155_v43 = vpop.f32.mrf.mxu1  ;;  %2554 = vmatprep.mubr.bf16.mxu0 %v20400_v31 }
 0x209   : > { %v1408_v22 = vpop.f32.mrf.mxu0  ;;  %2776 = vmatpush1.bf16.msra.mxu1 %v14256_v9 }
 0x20a   : > { %v1156_v11 = vpop.f32.mrf.mxu1  ;;  %3357 = vmatprep.subr.bf16.mxu1 %v14264_v57 }
 0x20b   : > { %v1410_v33 = vpop.f32.mrf.mxu0 }
 0x20c   : > { %v1159_v56 = vpop.f32.mrf.mxu1  ;;  %2245 = vmatmul.mubr.bf16.gmra.mxu1 %v14890_v20 }
 0x20d   : > { %v15399_v6 = vadd.f32 %v1398_v34, %v1159_v56  ;;  %v1411_v44 = vpop.f32.mrf.mxu0  ;;  %2252 = vmatprep.mubr.bf16.mxu1 %v20400_v31 }
 0x20e   : > { %v1161_v51 = vpop.f32.mrf.mxu1 }
 0x20f   : > { %v15402_v30 = vadd.f32 %v1400_v54, %v1161_v51  ;;  %v1414_v3 = vpop.f32.mrf.mxu0  ;;  %2555 = vmatmul.mubr.bf16.gmra.mxu0 %v15164_v5 }
 0x210   : > { %v1163_v43 = vpop.f32.mrf.mxu1  ;;  %2562 = vmatprep.mubr.bf16.mxu0 %v20400_v31 }
 0x211   : > { %20404 = vst [vmem:[#allocation41_spill] sm:$0xff] %v15402_v30  ;;  %v1416_v9 = vpop.f32.mrf.mxu0 }
 0x212   : > { %v1164_v57 = vpop.f32.mrf.mxu1 }
 0x213   : > { %v1418_v11 = vpop.f32.mrf.mxu0 }
 0x214   : > { %v1167_v33 = vpop.f32.mrf.mxu1  ;;  %2253 = vmatmul.mubr.bf16.gmra.mxu1 %v14901_v32 }
 0x215   : > { %v15407_v34 = vadd.f32 %v1406_v63, %v1167_v33  ;;  %v1419_v44 = vpop.f32.mrf.mxu0  ;;  %2260 = vmatprep.mubr.bf16.mxu1 %v20400_v31 }
 0x216   : > { %v1169_v56 = vpop.f32.mrf.mxu1 }
 0x217   : > { %v15410_v54 = vadd.f32 %v1408_v22, %v1169_v56  ;;  %v1422_v51 = vpop.f32.mrf.mxu0  ;;  %2563 = vmatmul.mubr.bf16.gmra.mxu0 %v15172_v28 }
 0x218   : > { %v1171_v43 = vpop.f32.mrf.mxu1  ;;  %2570 = vmatprep.mubr.bf16.mxu0 %v20400_v31 }
 0x219   : > { %v1423_v5 = vpop.f32.mrf.mxu0 }
 0x21a   : > { %v1172_v57 = vpop.f32.mrf.mxu1 }
 0x21b   : > { %v1424_v11 = vpop.f32.mrf.mxu0 }
 0x21c   : > { %v1175_v30 = vpop.f32.mrf.mxu1  ;;  %2261 = vmatmul.mubr.bf16.gmra.mxu1 %v14912_v47 }
 0x21d   : > { %v15415_v63 = vadd.f32 %v1414_v3, %v1175_v30  ;;  %v1425_v33 = vpop.f32.mrf.mxu0  ;;  %2268 = vmatprep.mubr.bf16.mxu1 %v20400_v31 }
 0x21e   : > { %v1177_v44 = vpop.f32.mrf.mxu1 }
 0x21f   : > { %20405 = vst [vmem:[#allocation42_spill] sm:$0xff] %v15415_v63  ;;  %v15418_v22 = vadd.f32 %v1416_v9, %v1177_v44  ;;  %v1912_v56 = vpop.f32.mrf.mxu0  ;;  %2571 = vmatmul.mubr.bf16.gmra.mxu0 %v15184_v42  ;;  %v1303_v42 = vadd.f32 %v14922_v58, %v15174_v35 }
 0x220   : > { %v1179_v51 = vpop.f32.mrf.mxu1  ;;  %2578 = vmatprep.mubr.bf16.mxu0 %v20400_v31 }
 0x221   : > { %20406 = vst [vmem:[#allocation43_spill] sm:$0xff] %v15418_v22  ;;  %v1914_v5 = vpop.f32.mrf.mxu0 }
 0x222   : > { %v1180_v43 = vpop.f32.mrf.mxu1 }
 0x223   : > { %v1916_v57 = vpop.f32.mrf.mxu0 }
 0x224   : > { %v1183_v11 = vpop.f32.mrf.mxu1  ;;  %2269 = vmatmul.mubr.bf16.gmra.mxu1 %v14925_v59 }
 0x225   : > { %v1917_v3 = vpop.f32.mrf.mxu0  ;;  %2276 = vmatprep.mubr.bf16.mxu1 %v20400_v31  ;;  %v1305_v11 = vadd.f32 %v14929_v61, %v15178_v46 }
 0x226   : > { %v1184_v30 = vpop.f32.mrf.mxu1 }
 0x227   : > { %v1920_v33 = vpop.f32.mrf.mxu0  ;;  %2579 = vmatmul.mubr.bf16.gmra.mxu0 %v15196_v40 }
 0x228   : > { %v1185_v9 = vpop.f32.mrf.mxu1  ;;  %2586 = vmatprep.mubr.bf16.mxu0 %v20400_v31 }
 0x229   : > { %v1922_v44 = vpop.f32.mrf.mxu0 }
 0x22a   : > { %v1186_v51 = vpop.f32.mrf.mxu1 }
 0x22b   : > { %v1924_v43 = vpop.f32.mrf.mxu0 }
 0x22c   : > { %v1625_v57 = vpop.f32.mrf.mxu1  ;;  %2277 = vmatmul.mubr.bf16.gmra.mxu1 %v14938_v10 }
 0x22d   : > { %v1750_v3 = vadd.f32 %v1625_v57, %v1303_v42  ;;  %v1925_v30 = vpop.f32.mrf.mxu0  ;;  %2284 = vmatprep.mubr.bf16.mxu1 %v20400_v31 }
 0x22e   : > { %v1627_v40 = vpop.f32.mrf.mxu1 }
 0x22f   : > { %v1751_v9 = vadd.f32 %v1627_v40, %v1305_v11  ;;  %v1928_v28 = vpop.f32.mrf.mxu0  ;;  %2587 = vmatmul.mubr.bf16.gmra.mxu0 %v15211_v2  ;;  %v15433_v51 = vadd.f32 %v1912_v56, %v1750_v3 }
 0x230   : > { %v1629_v22 = vpop.f32.mrf.mxu1  ;;  %2594 = vmatprep.mubr.bf16.mxu0 %v20400_v31 }
 0x231   : > { %v1930_v58 = vpop.f32.mrf.mxu0  ;;  %v15436_v35 = vadd.f32 %v1914_v5, %v1751_v9 }
 0x232   : > { %v1630_v43 = vpop.f32.mrf.mxu1 }
 0x233   : > { %v1932_v63 = vpop.f32.mrf.mxu0 }
 0x234   : > { %v1633_v61 = vpop.f32.mrf.mxu1  ;;  %2285 = vmatmul.mubr.bf16.gmra.mxu1 %v14949_v27 }
 0x235   : > { %v1752_v42 = vadd.f32 %v1633_v61, %v15187_v38  ;;  %v1933_v46 = vpop.f32.mrf.mxu0  ;;  %2292 = vmatprep.mubr.bf16.mxu1 %v20400_v31 }
 0x236   : > { %v1635_v40 = vpop.f32.mrf.mxu1 }
 0x237   : > { %v1753_v56 = vadd.f32 %v1635_v40, %v15190_v25  ;;  %v1936_v57 = vpop.f32.mrf.mxu0  ;;  %2595 = vmatmul.mubr.bf16.gmra.mxu0 %v15223_v36  ;;  %v15443_v22 = vadd.f32 %v1920_v33, %v1752_v42 }
 0x238   : > { %v1637_v5 = vpop.f32.mrf.mxu1  ;;  %2602 = vmatprep.mubr.bf16.mxu0 %v20400_v31 }
 0x239   : > { %v1938_v63 = vpop.f32.mrf.mxu0  ;;  %v15446_v11 = vadd.f32 %v1922_v44, %v1753_v56 }
 0x23a   : > { %v1638_v3 = vpop.f32.mrf.mxu1 }
 0x23b   : > { %v1940_v30 = vpop.f32.mrf.mxu0 }
 0x23c   : > { %v1641_v38 = vpop.f32.mrf.mxu1  ;;  %2293 = vmatmul.mubr.bf16.gmra.mxu1 %v14963_v48 }
 0x23d   : > { %v1754_v9 = vadd.f32 %v1641_v38, %v15199_v15  ;;  %v1941_v43 = vpop.f32.mrf.mxu0  ;;  %2300 = vmatprep.mubr.bf16.mxu1 %v20400_v31 }
 0x23e   : > { %v1643_v25 = vpop.f32.mrf.mxu1 }
 0x23f   : > { %v1755_v33 = vadd.f32 %v1643_v25, %v15202_v26  ;;  %v1944_v61 = vpop.f32.mrf.mxu0  ;;  %2603 = vmatmul.mubr.bf16.gmra.mxu0 %v15235_v21  ;;  %v15453_v42 = vadd.f32 %v1928_v28, %v1754_v9 }
 0x240   : > { %v1645_v44 = vpop.f32.mrf.mxu1  ;;  %2610 = vmatprep.mubr.bf16.mxu0 %v20400_v31 }
 0x241   : > { %v1946_v46 = vpop.f32.mrf.mxu0  ;;  %v15456_v40 = vadd.f32 %v1930_v58, %v1755_v33 }
 0x242   : > { %v1646_v56 = vpop.f32.mrf.mxu1 }
 0x243   : > { %v1948_v5 = vpop.f32.mrf.mxu0 }
 0x244   : > { %v1649_v15 = vpop.f32.mrf.mxu1  ;;  %2301 = vmatmul.mubr.bf16.gmra.mxu1 %v14974_v62 }
 0x245   : > { %v1756_v3 = vadd.f32 %v1649_v15, %v15214_v1  ;;  %v1949_v30 = vpop.f32.mrf.mxu0  ;;  %2308 = vmatprep.mubr.bf16.mxu1 %v20400_v31  ;;  %v2388_v1 = vrot.slane %v15239_v49, 1 }
 0x246   : > { %v1651_v26 = vpop.f32.mrf.mxu1 }
 0x247   : > { %v1757_v28 = vadd.f32 %v1651_v26, %v15217_v8  ;;  %v1952_v38 = vpop.f32.mrf.mxu0  ;;  %2611 = vmatmul.mubr.bf16.gmra.mxu0 %v15253_v53  ;;  %v15463_v9 = vadd.f32 %v1936_v57, %v1756_v3  ;;  %v15474_v15 = vsel %vm1461_vm2, %v15248_v19, %v2388_v1  ;;  %v14382_v3 = vld [vmem:[#allocation2] sm:$0xff] }
 0x248   : > { %v1653_v58 = vpop.f32.mrf.mxu1  ;;  %2618 = vmatprep.mubr.bf16.mxu0 %v20400_v31  ;;  %20407 = vst [vmem:[#allocation44_spill] sm:$0xff] %v15474_v15 }
 0x249   : > { %v1954_v43 = vpop.f32.mrf.mxu0  ;;  %v15466_v25 = vadd.f32 %v1938_v63, %v1757_v28  ;;  %v15476_v63 = vpack.c.bf16 %v14382_v3, %v14382_v3 }
 0x24a   : > { %v1654_v33 = vpop.f32.mrf.mxu1 }
 0x24b   : > { %v1956_v44 = vpop.f32.mrf.mxu0  ;;  %v15486_v19 = vrot.slane %v15476_v63, 1 }
 0x24c   : > { %v1657_v56 = vpop.f32.mrf.mxu1  ;;  %2309 = vmatmul.mubr.bf16.gmra.mxu1 %v14985_v17 }
 0x24d   : > { %v1758_v8 = vadd.f32 %v1657_v56, %v15226_v0  ;;  %v1957_v5 = vpop.f32.mrf.mxu0  ;;  %2316 = vmatprep.mubr.bf16.mxu1 %v20400_v31  ;;  %20408 = vst [vmem:[#allocation45_spill] sm:$0xff] %v15486_v19 }
 0x24e   : > { %v1659_v57 = vpop.f32.mrf.mxu1 }
 0x24f   : > { %v1759_v30 = vadd.f32 %v1659_v57, %v15229_v45  ;;  %v1960_v26 = vpop.f32.mrf.mxu0  ;;  %2619 = vmatmul.mubr.bf16.gmra.mxu0 %v15474_v15  ;;  %v15480_v28 = vadd.f32 %v1944_v61, %v1758_v8  ;;  %v2086_v61 = vshll.u32 %v15239_v49, 16 }
 0x250   : > { %v1661_v58 = vpop.f32.mrf.mxu1  ;;  %2626 = vmatprep.mubr.bf16.mxu0 %v20400_v31 }
 0x251   : > { %v1962_v0 = vpop.f32.mrf.mxu0  ;;  %v15483_v33 = vadd.f32 %v1946_v46, %v1759_v30  ;;  %v15494_v46 = vsel %vm1461_vm2, %v2388_v1, %v15486_v19 }
 0x252   : > { %v1662_v44 = vpop.f32.mrf.mxu1  ;;  %20409 = vst [vmem:[#allocation46_spill] sm:$0xff] %v15494_v46 }
 0x253   : > { %v1964_v56 = vpop.f32.mrf.mxu0 }
 0x254   : > { %v1665_v5 = vpop.f32.mrf.mxu1  ;;  %2317 = vmatmul.mubr.bf16.gmra.mxu1 %v15000_v37  ;;  %v2088_v56 = vrot.slane %v2086_v61, 1 }
 0x255   : > { %v1760_v45 = vadd.f32 %v1665_v5, %v15241_v24  ;;  %v1965_v57 = vpop.f32.mrf.mxu0  ;;  %2324 = vmatprep.mubr.bf16.mxu1 %v20400_v31 }
 0x256   : > { %v1667_v8 = vpop.f32.mrf.mxu1  ;;  %v15505_v1 = vsel %vm800_vm1, %v15013_v52, %v2088_v56 }
 0x257   : > { %v1761_v3 = vadd.f32 %v1667_v8, %v15244_v41  ;;  %v1968_v30 = vpop.f32.mrf.mxu0  ;;  %2627 = vmatmul.mubr.bf16.gmra.mxu0 %v15494_v46  ;;  %v15498_v58 = vadd.f32 %v1952_v38, %v1760_v45  ;;  %v2090_v41 = vshrl.u32 %v15239_v49, 16  ;;  %v2094_v8 = vshll.u32 %v15476_v63, 16 }
 0x258   : > { %v1669_v44 = vpop.f32.mrf.mxu1  ;;  %3095 = vmatprep.mubr.bf16.mxu0 %v20400_v31 }
 0x259   : > { %v1970_v24 = vpop.f32.mrf.mxu0  ;;  %v15501_v5 = vadd.f32 %v1954_v43, %v1761_v3  ;;  %v2092_v52 = vor.u32 %v2090_v41, %v2088_v56  ;;  %v15514_v3 = vrot.slane %v2094_v8, 1 }
 0x25a   : > { %v1670_v57 = vpop.f32.mrf.mxu1 }
 0x25b   : > { %v1972_v15 = vpop.f32.mrf.mxu0 }
 0x25c   : > { %v1673_v19 = vpop.f32.mrf.mxu1  ;;  %2325 = vmatmul.mubr.bf16.gmra.mxu1 %v15505_v1 }
 0x25d   : > { %v1762_v38 = vadd.f32 %v1673_v19, %v15259_v18  ;;  %v1973_v45 = vpop.f32.mrf.mxu0  ;;  %2332 = vmatprep.mubr.bf16.mxu1 %v20400_v31 }
 0x25e   : > { %v1675_v43 = vpop.f32.mrf.mxu1  ;;  %v15523_v45 = vsel %vm800_vm1, %v2092_v52, %v15514_v3 }
 0x25f   : > { %v1763_v61 = vadd.f32 %v1675_v43, %v15265_v23  ;;  %v1976_v15 = vpop.f32.mrf.mxu0  ;;  %3096 = vmatmul.mubr.bf16.vlgmr.msra.gmra.mxu0 %v14834_v29  ;;  %v15516_v44 = vadd.f32 %v1960_v26, %v1762_v38 }
 0x260   : > { %v1677_v57 = vpop.f32.mrf.mxu1  ;;  %3103 = vmatprep.mubr.bf16.mxu0 %v20400_v31 }
 0x261   : > { %v1978_v46 = vpop.f32.mrf.mxu0  ;;  %v15519_v53 = vadd.f32 %v1962_v0, %v1763_v61  ;;  %v14262_v61 = vld [vmem:[%s20099_s4 + $0x470] ss:$8 sps:$4 sm:$0xff]  }
 0x262   : > { %v1678_v18 = vpop.f32.mrf.mxu1 }
 0x263   : > { %v1980_v19 = vpop.f32.mrf.mxu0 }
 0x264   : > { %v1681_v23 = vpop.f32.mrf.mxu1  ;;  %2333 = vmatmul.mubr.bf16.gmra.mxu1 %v15523_v45 }
 0x265   : > { %v1764_v29 = vadd.f32 %v1681_v23, %v15281_v4  ;;  %v1981_v56 = vpop.f32.mrf.mxu0  ;;  %2793 = vmatprep.mubr.bf16.mxu1 %v20400_v31  ;;  %v14270_v23 = vld [vmem:[%s20099_s4 + $0x454] ss:$8 sps:$4 sm:$0xff]  }
 0x266   : > { %v1683_v26 = vpop.f32.mrf.mxu1 }
 0x267   : > { %v1765_v41 = vadd.f32 %v1683_v26, %v15287_v12  ;;  %v1984_v8 = vpop.f32.mrf.mxu0  ;;  %3104 = vmatmul.mubr.bf16.gmra.mxu0 %v14862_v60  ;;  %v15530_v0 = vadd.f32 %v1968_v30, %v1764_v29  ;;  %v14267_v12 = vld [vmem:[%s20099_s4 + $0x464] ss:$8 sps:$4 sm:$0xff]  }
 0x268   : > { %v1685_v38 = vpop.f32.mrf.mxu1  ;;  %3111 = vmatprep.mubr.bf16.mxu0 %v20400_v31 }
 0x269   : > { %v1986_v43 = vpop.f32.mrf.mxu0  ;;  %v15536_v4 = vadd.f32 %v1970_v24, %v1765_v41  ;;  %v14265_v24 = vld [vmem:[%s20099_s4 + $0x460] ss:$8 sps:$4 sm:$0xff]   ;;  %v14268_v41 = vld [vmem:[%s20099_s4 + $0x450] ss:$8 sps:$4 sm:$0xff]  }
 0x26a   : > { %v1686_v52 = vpop.f32.mrf.mxu1 }
 0x26b   : > { %v1988_v57 = vpop.f32.mrf.mxu0  ;;  %v20410_v52 = vld [vmem:[#allocation12_spill] sm:$0xff] }
 0x26c   : > { %v1689_v18 = vpop.f32.mrf.mxu1  ;;  %2794 = vmatmul.mubr.bf16.vlgmr.msra.gmra.mxu1 %v14767_v14 }
 0x26d   : > { %v1766_v60 = vadd.f32 %v1689_v18, %v15307_v13  ;;  %3358 = vmatpush1.bf16.msra.mxu1 %v14262_v61  ;;  %v1989_v30 = vpop.f32.mrf.mxu0  ;;  %2801 = vmatprep.mubr.bf16.mxu1 %v20400_v31 }
 0x26e   : > { %v1691_v19 = vpop.f32.mrf.mxu1  ;;  %3359 = vmatprep.subr.bf16.mxu1 %v14267_v12  ;;  %v20411_v12 = vld [vmem:[#allocation38_spill] sm:$0xff]  ;;  %v14276_v30 = vld [vmem:[%s20099_s4 + $0x434] ss:$8 sps:$4 sm:$0xff]  }
 0x26f   : > { %v1767_v29 = vadd.f32 %v1691_v19, %v15319_v39  ;;  %v1992_v56 = vpop.f32.mrf.mxu0  ;;  %3112 = vmatmul.mubr.bf16.gmra.mxu0 %v14879_v7  ;;  %v15552_v14 = vadd.f32 %v1976_v15, %v1766_v60  ;;  %v14273_v39 = vld [vmem:[%s20099_s4 + $0x444] ss:$8 sps:$4 sm:$0xff]  }
 0x270   : > { %v1693_v13 = vpop.f32.mrf.mxu1  ;;  %3119 = vmatprep.mubr.bf16.mxu0 %v20400_v31 }
 0x271   : > { %v1994_v26 = vpop.f32.mrf.mxu0  ;;  %3360 = vmatpush1.bf16.msra.mxu1 %v14265_v24  ;;  %v15558_v38 = vadd.f32 %v1978_v46, %v1767_v29  ;;  %v14271_v46 = vld [vmem:[%s20099_s4 + $0x440] ss:$8 sps:$4 sm:$0xff]  }
 0x272   : > { %v1694_v61 = vpop.f32.mrf.mxu1  ;;  %3361 = vmatprep.subr.bf16.mxu1 %v14270_v23 }
 0x273   : > { %v1996_v7 = vpop.f32.mrf.mxu0 }
 0x274   : > { %v1697_v15 = vpop.f32.mrf.mxu1  ;;  %2802 = vmatmul.mubr.bf16.gmra.mxu1 %v20410_v52  ;;  %v20412_v7 = vld [vmem:[#allocation13_spill] sm:$0xff] }
 0x275   : > { %v1768_v57 = vadd.f32 %v1697_v15, %v20411_v12  ;;  %v1997_v18 = vpop.f32.mrf.mxu0  ;;  %2809 = vmatprep.mubr.bf16.mxu1 %v20400_v31  ;;  %3362 = vmatpush1.bf16.msra.mxu1 %v14268_v41  ;;  %v14274_v41 = vld [vmem:[%s20099_s4 + $0x430] ss:$8 sps:$4 sm:$0xff]  }
 0x276   : > { %v1699_v60 = vpop.f32.mrf.mxu1  ;;  %3363 = vmatprep.subr.bf16.mxu1 %v14273_v39  ;;  %v20413_v18 = vld [vmem:[#allocation39_spill] sm:$0xff] }
 0x277   : > { %v1769_v24 = vadd.f32 %v1699_v60, %v15351_v16  ;;  %v2000_v19 = vpop.f32.mrf.mxu0  ;;  %3120 = vmatmul.mubr.bf16.gmra.mxu0 %v14890_v20  ;;  %v15574_v23 = vadd.f32 %v1984_v8, %v1768_v57  ;;  %v14279_v16 = vld [vmem:[%s20099_s4 + $0x424] ss:$8 sps:$4 sm:$0xff]   ;;  %v14282_v57 = vld [vmem:[%s20099_s4 + $0x414] ss:$8 sps:$4 sm:$0xff]  }
 0x278   : > { %v1701_v29 = vpop.f32.mrf.mxu1  ;;  %3127 = vmatprep.mubr.bf16.mxu0 %v20400_v31 }
 0x279   : > { %v2002_v13 = vpop.f32.mrf.mxu0  ;;  %3364 = vmatpush1.bf16.msra.mxu1 %v14271_v46  ;;  %v15580_v61 = vadd.f32 %v1986_v43, %v1769_v24  ;;  %v14277_v43 = vld [vmem:[%s20099_s4 + $0x420] ss:$8 sps:$4 sm:$0xff]   ;;  %v14280_v29 = vld [vmem:[%s20099_s4 + $0x410] ss:$8 sps:$4 sm:$0xff]  }
 0x27a   : > { %v1702_v39 = vpop.f32.mrf.mxu1  ;;  %3365 = vmatprep.subr.bf16.mxu1 %v14276_v30 }
 0x27b   : > { %v2004_v20 = vpop.f32.mrf.mxu0 }
 0x27c   : > { %v1705_v8 = vpop.f32.mrf.mxu1  ;;  %2810 = vmatmul.mubr.bf16.gmra.mxu1 %v20412_v7  ;;  %v20414_v20 = vld [vmem:[#allocation14_spill] sm:$0xff] }
 0x27d   : > { %v1770_v15 = vadd.f32 %v1705_v8, %v15365_v55  ;;  %v2005_v52 = vpop.f32.mrf.mxu0  ;;  %2817 = vmatprep.mubr.bf16.mxu1 %v20400_v31  ;;  %3366 = vmatpush1.bf16.msra.mxu1 %v14274_v41  ;;  %v20415_v8 = vld [vmem:[#allocation40_spill] sm:$0xff] }
 0x27e   : > { %v1707_v12 = vpop.f32.mrf.mxu1  ;;  %3367 = vmatprep.subr.bf16.mxu1 %v14279_v16  ;;  %v14285_v16 = vld [vmem:[%s20099_s4 + $0x404] ss:$8 sps:$4 sm:$0xff]  }
 0x27f   : > { %v1771_v46 = vadd.f32 %v1707_v12, %v20413_v18  ;;  %v2008_v60 = vpop.f32.mrf.mxu0  ;;  %3128 = vmatmul.mubr.bf16.gmra.mxu0 %v14901_v32  ;;  %v15596_v55 = vadd.f32 %v1992_v56, %v1770_v15 }
 0x280   : > { %v1709_v30 = vpop.f32.mrf.mxu1  ;;  %3135 = vmatprep.mubr.bf16.mxu0 %v20400_v31 }
 0x281   : > { %v2010_v24 = vpop.f32.mrf.mxu0  ;;  %3368 = vmatpush1.bf16.msra.mxu1 %v14277_v43  ;;  %v15602_v41 = vadd.f32 %v1994_v26, %v1771_v46  ;;  %v14283_v26 = vld [vmem:[%s20099_s4 + $0x400] ss:$8 sps:$4 sm:$0xff]  }
 0x282   : > { %v1710_v39 = vpop.f32.mrf.mxu1  ;;  %3369 = vmatprep.subr.bf16.mxu1 %v14282_v57 }
 0x283   : > { %v2012_v32 = vpop.f32.mrf.mxu0 }
 0x284   : > { %v1713_v56 = vpop.f32.mrf.mxu1  ;;  %2818 = vmatmul.mubr.bf16.gmra.mxu1 %v20414_v20 }
 0x285   : > { %v1772_v7 = vadd.f32 %v1713_v56, %v20415_v8  ;;  %v2013_v15 = vpop.f32.mrf.mxu0  ;;  %2825 = vmatprep.mubr.bf16.mxu1 %v20400_v31  ;;  %3370 = vmatpush1.bf16.msra.mxu1 %v14280_v29 }
 0x286   : > { %v1715_v52 = vpop.f32.mrf.mxu1  ;;  %3371 = vmatprep.subr.bf16.mxu1 %v14285_v16  ;;  %v20416_v16 = vld [vmem:[#allocation15_spill] sm:$0xff] }
 0x287   : > { %v1773_v43 = vadd.f32 %v1715_v52, %v15394_v50  ;;  %v2016_v12 = vpop.f32.mrf.mxu0  ;;  %3136 = vmatmul.mubr.bf16.gmra.mxu0 %v14912_v47  ;;  %v15615_v57 = vadd.f32 %v2000_v19, %v1772_v7  ;;  %v20417_v19 = vld [vmem:[#allocation41_spill] sm:$0xff] }
 0x288   : > { %v1717_v18 = vpop.f32.mrf.mxu1  ;;  %3143 = vmatprep.mubr.bf16.mxu0 %v20400_v31 }
 0x289   : > { %v2018_v46 = vpop.f32.mrf.mxu0  ;;  %3372 = vmatpush1.bf16.msra.mxu1 %v14283_v26  ;;  %v15618_v30 = vadd.f32 %v2002_v13, %v1773_v43  ;;  %v20418_v18 = vld [vmem:[#allocation16_spill] sm:$0xff] }
 0x28a   : > { %v1718_v29 = vpop.f32.mrf.mxu1  ;;  %6389 = vmatprep.subr.bf16.mxu1 %v20400_v31 }
 0x28b   : > { %v2020_v39 = vpop.f32.mrf.mxu0 }
 0x28c   : > { %v1721_v32 = vpop.f32.mrf.mxu1  ;;  %2826 = vmatmul.mubr.bf16.gmra.mxu1 %v20416_v16 }
 0x28d   : > { %v1774_v50 = vadd.f32 %v1721_v32, %v15399_v6  ;;  %v2021_v56 = vpop.f32.mrf.mxu0  ;;  %2833 = vmatprep.mubr.bf16.mxu1 %v20400_v31 }
 0x28e   : > { %v1723_v47 = vpop.f32.mrf.mxu1 }
 0x28f   : > { %v1775_v20 = vadd.f32 %v1723_v47, %v20417_v19  ;;  %v2024_v8 = vpop.f32.mrf.mxu0  ;;  %3144 = vmatmul.mubr.bf16.gmra.mxu0 %v14925_v59  ;;  %v15626_v13 = vadd.f32 %v2008_v60, %v1774_v50 }
 0x290   : > { %v1725_v7 = vpop.f32.mrf.mxu1  ;;  %3151 = vmatprep.mubr.bf16.mxu0 %v20400_v31 }
 0x291   : > { %v2026_v15 = vpop.f32.mrf.mxu0  ;;  %v15629_v26 = vadd.f32 %v2010_v24, %v1775_v20  ;;  %v20419_v20 = vld [vmem:[#allocation17_spill] sm:$0xff]  ;;  %v20420_v7 = vld [vmem:[#allocation42_spill] sm:$0xff] }
 0x292   : > { %v1726_v52 = vpop.f32.mrf.mxu1 }
 0x293   : > { %v2028_v43 = vpop.f32.mrf.mxu0 }
 0x294   : > { %v1729_v6 = vpop.f32.mrf.mxu1  ;;  %2834 = vmatmul.mubr.bf16.gmra.mxu1 %v20418_v18 }
 0x295   : > { %v1776_v29 = vadd.f32 %v1729_v6, %v15407_v34  ;;  %v2029_v39 = vpop.f32.mrf.mxu0  ;;  %2841 = vmatprep.mubr.bf16.mxu1 %v20400_v31 }
 0x296   : > { %v1731_v32 = vpop.f32.mrf.mxu1 }
 0x297   : > { %v1777_v59 = vadd.f32 %v1731_v32, %v15410_v54  ;;  %v2032_v60 = vpop.f32.mrf.mxu0  ;;  %3152 = vmatmul.mubr.bf16.gmra.mxu0 %v14938_v10  ;;  %v15636_v16 = vadd.f32 %v2016_v12, %v1776_v29  ;;  %v14286_v10 = vld [vmem:[%s20102_s7 + $0x18] ss:$12 sps:$4 sm:$0xff]   ;;  %v14288_v54 = vld [vmem:[%s20102_s7 + $0x1c] ss:$12 sps:$4 sm:$0xff]  }
 0x298   : > { %v1733_v24 = vpop.f32.mrf.mxu1  ;;  %3159 = vmatprep.mubr.bf16.mxu0 %v20400_v31  ;;  %5548 = vmatprep.subr.bf16.mxu0 %v14288_v54 }
 0x299   : > { %v2033_v50 = vpop.f32.mrf.mxu0  ;;  %v15639_v56 = vadd.f32 %v2018_v46, %v1777_v59  ;;  %v20421_v46 = vld [vmem:[#allocation43_spill] sm:$0xff]  ;;  %5549 = vmatpush1.bf16.msra.mxu0 %v14286_v10 }
 0x29a   : > { %v1734_v47 = vpop.f32.mrf.mxu1 }
 0x29b   : > { %v2034_v19 = vpop.f32.mrf.mxu0  ;;  %v20422_v47 = vld [vmem:[#allocation18_spill] sm:$0xff] }
 0x29c   : > { %v1737_v34 = vpop.f32.mrf.mxu1  ;;  %2842 = vmatmul.mubr.bf16.gmra.mxu1 %v20419_v20 }
 0x29d   : > { %v1778_v52 = vadd.f32 %v1737_v34, %v20420_v7  ;;  %v2035_v43 = vpop.f32.mrf.mxu0  ;;  %2849 = vmatprep.mubr.bf16.mxu1 %v20400_v31 }
 0x29e   : > { %v1739_v12 = vpop.f32.mrf.mxu1  ;;  %v20423_v43 = vld [vmem:[#allocation19_spill] sm:$0xff] }
 0x29f   : > { %v1779_v6 = vadd.f32 %v1739_v12, %v20421_v46  ;;  %v2508_v18 = vpop.f32.mrf.mxu0  ;;  %3160 = vmatmul.mubr.bf16.gmra.mxu0 %v14949_v27  ;;  %v15652_v29 = vadd.f32 %v2024_v8, %v1778_v52 }
 0x2a0   : > { %v1741_v39 = vpop.f32.mrf.mxu1  ;;  %3167 = vmatprep.mubr.bf16.mxu0 %v20400_v31 }
 0x2a1   : > { %v2510_v32 = vpop.f32.mrf.mxu0  ;;  %v15655_v59 = vadd.f32 %v2026_v15, %v1779_v6 }
 0x2a2   : > { %v1742_v60 = vpop.f32.mrf.mxu1 }
 0x2a3   : > { %v2512_v24 = vpop.f32.mrf.mxu0 }
 0x2a4   : > { %v1745_v50 = vpop.f32.mrf.mxu1  ;;  %2850 = vmatmul.mubr.bf16.gmra.mxu1 %v20422_v47 }
 0x2a5   : > { %v2513_v19 = vpop.f32.mrf.mxu0  ;;  %2857 = vmatprep.mubr.bf16.mxu1 %v20400_v31 }
 0x2a6   : > { %v1746_v34 = vpop.f32.mrf.mxu1  ;;  %v20426_v19 = vld [vmem:[#allocation20_spill] sm:$0xff] }
 0x2a7   : > { %v2516_v27 = vpop.f32.mrf.mxu0  ;;  %3168 = vmatmul.mubr.bf16.gmra.mxu0 %v14963_v48 }
 0x2a8   : > { %v1747_v8 = vpop.f32.mrf.mxu1  ;;  %3175 = vmatprep.mubr.bf16.mxu0 %v20400_v31 }
 0x2a9   : > { %v2518_v20 = vpop.f32.mrf.mxu0 }
 0x2aa   : > { %v1748_v7 = vpop.f32.mrf.mxu1 }
 0x2ab   : > { %v2520_v52 = vpop.f32.mrf.mxu0 }
 0x2ac   : > { %v2214_v15 = vpop.f32.mrf.mxu1  ;;  %2858 = vmatmul.mubr.bf16.gmra.mxu1 %v20423_v43 }
 0x2ad   : > { %v2339_v10 = vadd.f32 %v2214_v15, %v15433_v51  ;;  %v2521_v54 = vpop.f32.mrf.mxu0  ;;  %2865 = vmatprep.mubr.bf16.mxu1 %v20400_v31 }
 0x2ae   : > { %v2216_v12 = vpop.f32.mrf.mxu1  ;;  %v20429_v54 = vld [vmem:[#allocation21_spill] sm:$0xff] }
 0x2af   : > { %v2340_v46 = vadd.f32 %v2216_v12, %v15436_v35  ;;  %v2524_v6 = vpop.f32.mrf.mxu0  ;;  %3176 = vmatmul.mubr.bf16.gmra.mxu0 %v14974_v62  ;;  %v15666_v48 = vadd.f32 %v2508_v18, %v2339_v10 }
 0x2b0   : > { %v2218_v39 = vpop.f32.mrf.mxu1  ;;  %3183 = vmatprep.mubr.bf16.mxu0 %v20400_v31 }
 0x2b1   : > { %20424 = vst [vmem:[#allocation12_spill] sm:$0xff] %v15666_v48  ;;  %v2526_v60 = vpop.f32.mrf.mxu0  ;;  %v15669_v24 = vadd.f32 %v2510_v32, %v2340_v46 }
 0x2b2   : > { %v2219_v50 = vpop.f32.mrf.mxu1 }
 0x2b3   : > { %20425 = vst [vmem:[#allocation38_spill] sm:$0xff] %v15669_v24  ;;  %v2528_v47 = vpop.f32.mrf.mxu0 }
 0x2b4   : > { %v2222_v51 = vpop.f32.mrf.mxu1  ;;  %2866 = vmatmul.mubr.bf16.gmra.mxu1 %v20426_v19 }
 0x2b5   : > { %v2341_v34 = vadd.f32 %v2222_v51, %v15443_v22  ;;  %v2529_v8 = vpop.f32.mrf.mxu0  ;;  %2873 = vmatprep.mubr.bf16.mxu1 %v20400_v31 }
 0x2b6   : > { %v2224_v35 = vpop.f32.mrf.mxu1 }
 0x2b7   : > { %v2342_v62 = vadd.f32 %v2224_v35, %v15446_v11  ;;  %v2532_v18 = vpop.f32.mrf.mxu0  ;;  %3184 = vmatmul.mubr.bf16.gmra.mxu0 %v14985_v17  ;;  %v15676_v7 = vadd.f32 %v2516_v27, %v2341_v34  ;;  %v20432_v34 = vld [vmem:[#allocation22_spill] sm:$0xff] }
 0x2b8   : > { %v2226_v32 = vpop.f32.mrf.mxu1  ;;  %3191 = vmatprep.mubr.bf16.mxu0 %v20400_v31 }
 0x2b9   : > { %20427 = vst [vmem:[#allocation13_spill] sm:$0xff] %v15676_v7  ;;  %v2534_v52 = vpop.f32.mrf.mxu0  ;;  %v15679_v15 = vadd.f32 %v2518_v20, %v2342_v62 }
 0x2ba   : > { %v2227_v43 = vpop.f32.mrf.mxu1 }
 0x2bb   : > { %20428 = vst [vmem:[#allocation39_spill] sm:$0xff] %v15679_v15  ;;  %v2536_v10 = vpop.f32.mrf.mxu0 }
 0x2bc   : > { %v2230_v22 = vpop.f32.mrf.mxu1  ;;  %2874 = vmatmul.mubr.bf16.gmra.mxu1 %v20429_v54 }
 0x2bd   : > { %v2343_v12 = vadd.f32 %v2230_v22, %v15453_v42  ;;  %v2537_v46 = vpop.f32.mrf.mxu0  ;;  %2881 = vmatprep.mubr.bf16.mxu1 %v20400_v31 }
 0x2be   : > { %v2232_v11 = vpop.f32.mrf.mxu1 }
 0x2bf   : > { %v2344_v17 = vadd.f32 %v2232_v11, %v15456_v40  ;;  %v2540_v27 = vpop.f32.mrf.mxu0  ;;  %3192 = vmatmul.mubr.bf16.gmra.mxu0 %v15000_v37  ;;  %v15686_v39 = vadd.f32 %v2524_v6, %v2343_v12  ;;  %v14383_v37 = vld [vmem:[%s14532_s17] sm:$0xff]  ;;  %v20433_v6 = vld [vmem:[#allocation4_spill] sm:$0xff] }
 0x2c0   : > { %v2234_v20 = vpop.f32.mrf.mxu1  ;;  %3199 = vmatprep.mubr.bf16.mxu0 %v20400_v31  ;;  %v3674_v62 = vrot.slane %v14383_v37, %v20433_v6 }
 0x2c1   : > { %20430 = vst [vmem:[#allocation14_spill] sm:$0xff] %v15686_v39  ;;  %v2542_v50 = vpop.f32.mrf.mxu0  ;;  %v15689_v47 = vadd.f32 %v2526_v60, %v2344_v17  ;;  %v20436_v20 = vld [vmem:[#allocation23_spill] sm:$0xff] }
 0x2c2   : > { %v2235_v51 = vpop.f32.mrf.mxu1  ;;  %v3682_v46 = vcombine.high %v3674_v62, %v3674_v62 }
 0x2c3   : > { %20431 = vst [vmem:[#allocation40_spill] sm:$0xff] %v15689_v47  ;;  %v2544_v42 = vpop.f32.mrf.mxu0 }
 0x2c4   : > { %v2238_v19 = vpop.f32.mrf.mxu1  ;;  %2882 = vmatmul.mubr.bf16.gmra.mxu1 %v20432_v34  ;;  %v15708_v42 = vrot.slane %v3674_v62, %v20433_v6 }
 0x2c5   : > { %v2345_v8 = vadd.f32 %v2238_v19, %v15463_v9  ;;  %v2545_v40 = vpop.f32.mrf.mxu0  ;;  %2889 = vmatprep.mubr.bf16.mxu1 %v20400_v31  ;;  %v3667_v9 = vcombine.high %v14383_v37, %v14383_v37 }
 0x2c6   : > { %v2240_v35 = vpop.f32.mrf.mxu1 }
 0x2c7   : > { %v2346_v32 = vadd.f32 %v2240_v35, %v15466_v25  ;;  %v2548_v43 = vpop.f32.mrf.mxu0  ;;  %3200 = vmatmul.mubr.bf16.gmra.mxu0 %v15505_v1  ;;  %v15698_v60 = vadd.f32 %v2532_v18, %v2345_v8  ;;  %v3681_v1 = vrot.slane %v3667_v9, %v20433_v6 }
 0x2c8   : > { %v2242_v10 = vpop.f32.mrf.mxu1  ;;  %3207 = vmatprep.mubr.bf16.mxu0 %v20400_v31 }
 0x2c9   : > { %20434 = vst [vmem:[#allocation15_spill] sm:$0xff] %v15698_v60  ;;  %v2550_v22 = vpop.f32.mrf.mxu0  ;;  %v15701_v54 = vadd.f32 %v2534_v52, %v2346_v32  ;;  %v15711_v52 = vrot.slane %v3682_v46, %v20433_v6  ;;  %v3683_v37 = vcombine.high %v3681_v1, %v3681_v1  ;;  %v15725_v62 = vrot.slane %v3681_v1, %v20433_v6  ;;  %v14384_v10 = vld [vmem:[%s14532_s17 + $0x10] sm:$0xff]  ;;  %v20439_v46 = vld [vmem:[#allocation24_spill] sm:$0xff] }
 0x2ca   : > { %v2243_v12 = vpop.f32.mrf.mxu1  ;;  %v3715_v9 = vcombine.high %v14384_v10, %v14384_v10 }
 0x2cb   : > { %20435 = vst [vmem:[#allocation41_spill] sm:$0xff] %v15701_v54  ;;  %v2552_v11 = vpop.f32.mrf.mxu0 }
 0x2cc   : > { %v2246_v17 = vpop.f32.mrf.mxu1  ;;  %2890 = vmatmul.mubr.bf16.gmra.mxu1 %v20436_v20  ;;  %v15737_v20 = vrot.slane %v3683_v37, %v20433_v6  ;;  %v3729_v37 = vrot.slane %v3715_v9, %v20433_v6 }
 0x2cd   : > { %v2347_v25 = vadd.f32 %v2246_v17, %v15480_v28  ;;  %v2553_v51 = vpop.f32.mrf.mxu0  ;;  %2897 = vmatprep.mubr.bf16.mxu1 %v20400_v31 }
 0x2ce   : > { %v2248_v18 = vpop.f32.mrf.mxu1  ;;  %v15779_v9 = vrot.slane %v3729_v37, %v20433_v6 }
 0x2cf   : > { %v2348_v19 = vadd.f32 %v2248_v18, %v15483_v33  ;;  %v15714_v34 = vpop.f32.mrf.mxu0  ;;  %3208 = vmatmul.mubr.bf16.gmra.mxu0 %v15523_v45  ;;  %v15717_v28 = vadd.f32 %v2540_v27, %v2347_v25  ;;  %v3712_v33 = vcombine.high %v15708_v42, %v15708_v42  ;;  %v3714_v45 = vcombine.high %v15711_v52, %v15711_v52 }
 0x2d0   : > { %v2250_v8 = vpop.f32.mrf.mxu1  ;;  %3215 = vmatprep.mubr.bf16.mxu0 %v20400_v31  ;;  %v15741_v25 = vcombine.high %v15725_v62, %v15725_v62 }
 0x2d1   : > { %20437 = vst [vmem:[#allocation16_spill] sm:$0xff] %v15717_v28  ;;  %v15720_v40 = vpop.f32.mrf.mxu0  ;;  %v15722_v35 = vadd.f32 %v2542_v50, %v2348_v19  ;;  %v3722_v50 = vrot.slane %v14384_v10, %v20433_v6  ;;  %v15744_v1 = vcombine.low %v15711_v52, %v3712_v33  ;;  %v15747_v18 = vcombine.low %v3714_v45, %v15725_v62  ;;  %v14386_v45 = vld [vmem:[%s14532_s17 + $0x30] sm:$0xff] }
 0x2d2   : > { %v2251_v32 = vpop.f32.mrf.mxu1 }
 0x2d3   : > { %20438 = vst [vmem:[#allocation17_spill] sm:$0xff] %v15722_v35  ;;  %v2560_v27 = vpop.f32.mrf.mxu0  ;;  %v14385_v32 = vld [vmem:[%s14532_s17 + $0x20] sm:$0xff]  ;;  %v3811_v35 = vcombine.high %v14386_v45, %v14386_v45 }
 0x2d4   : > { %v2254_v12 = vpop.f32.mrf.mxu1  ;;  %2898 = vmatmul.mubr.bf16.gmra.mxu1 %v20439_v46  ;;  %v3763_v27 = vcombine.high %v14385_v32, %v14385_v32  ;;  %v3770_v33 = vrot.slane %v14385_v32, %v20433_v6  ;;  %v15771_v32 = vrot.slane %v3722_v50, %v20433_v6 }
 0x2d5   : > { %v2349_v11 = vadd.f32 %v2254_v12, %v15498_v58  ;;  %v2561_v17 = vpop.f32.mrf.mxu0  ;;  %2905 = vmatprep.mubr.bf16.mxu1 %v20400_v31  ;;  %v3730_v12 = vcombine.high %v3722_v50, %v3722_v50 }
 0x2d6   : > { %v2256_v51 = vpop.f32.mrf.mxu1  ;;  %20442 = vst [vmem:[#allocation18_spill] sm:$0xff] %v15771_v32 }
 0x2d7   : > { %v2350_v58 = vadd.f32 %v2256_v51, %v15501_v5  ;;  %v15750_v19 = vpop.f32.mrf.mxu0  ;;  %v15752_v8 = vadd.f32 %v2548_v43, %v2349_v11  ;;  %v15782_v11 = vrot.slane %v3730_v12, %v20433_v6  ;;  %v14387_v51 = vld [vmem:[%s14532_s17 + $0x40] sm:$0xff] }
 0x2d8   : > { %v2258_v10 = vpop.f32.mrf.mxu1 }
 0x2d9   : > { %20440 = vst [vmem:[#allocation42_spill] sm:$0xff] %v15752_v8  ;;  %v15756_v46 = vpop.f32.mrf.mxu0  ;;  %v15758_v17 = vadd.f32 %v2550_v22, %v2350_v58  ;;  %v3731_v58 = vcombine.high %v3729_v37, %v3729_v37  ;;  %v15774_v10 = vrot.slane %v3763_v27, %v20433_v6  ;;  %20443 = vst [vmem:[#allocation19_spill] sm:$0xff] %v15782_v11 }
 0x2da   : > { %v2259_v5 = vpop.f32.mrf.mxu1  ;;  %v3778_v27 = vcombine.high %v3770_v33, %v3770_v33  ;;  %v15788_v8 = vrot.slane %v3770_v33, %v20433_v6 }
 0x2db   : > { %20441 = vst [vmem:[#allocation43_spill] sm:$0xff] %v15758_v17  ;;  %v2568_v22 = vpop.f32.mrf.mxu0  ;;  %v3818_v5 = vrot.slane %v14386_v45, %v20433_v6  ;;  %v15791_v45 = vrot.slane %v3811_v35, %v20433_v6  ;;  %v15808_v33 = vrot.slane %v15774_v10, %v20433_v6 }
 0x2dc   : > { %v2262_v43 = vpop.f32.mrf.mxu1  ;;  %2906 = vmatmul.mubr.bf16.gmra.mxu1 %v15239_v49  ;;  %v3859_v22 = vcombine.high %v14387_v51, %v14387_v51  ;;  %20444 = vst [vmem:[#allocation20_spill] sm:$0xff] %v15788_v8  ;;  %v3866_v49 = vrot.slane %v14387_v51, %v20433_v6 }
 0x2dd   : > { %v2351_v17 = vadd.f32 %v2262_v43, %v15516_v44  ;;  %v2569_v50 = vpop.f32.mrf.mxu0  ;;  %2913 = vmatprep.mubr.bf16.mxu1 %v20400_v31  ;;  %v2973_v43 = vshrl.u32 %v15476_v63, 16  ;;  %20446 = vst [vmem:[#allocation22_spill] sm:$0xff] %v15808_v33  ;;  %v3826_v51 = vcombine.high %v3818_v5, %v3818_v5 }
 0x2de   : > { %v2264_v37 = vpop.f32.mrf.mxu1  ;;  %v15802_v50 = vrot.slane %v3731_v58, %v20433_v6  ;;  %v15820_v58 = vrot.slane %v3778_v27, %v20433_v6  ;;  %v3874_v35 = vcombine.high %v3866_v49, %v3866_v49  ;;  %v15835_v27 = vrot.slane %v15791_v45, %v20433_v6 }
 0x2df   : > { %v2352_v12 = vadd.f32 %v2264_v37, %v15519_v53  ;;  %v15795_v28 = vpop.f32.mrf.mxu0  ;;  %v15798_v44 = vadd.f32 %v15714_v34, %v2351_v17  ;;  %v15811_v53 = vrot.slane %v3859_v22, %v20433_v6  ;;  %v2975_v17 = vor.u32 %v2973_v43, %v15514_v3 }
 0x2e0   : > { %v2266_v54 = vpop.f32.mrf.mxu1  ;;  %v3808_v22 = vcombine.high %v15788_v8, %v15788_v8 }
 0x2e1   : > { %20445 = vst [vmem:[#allocation21_spill] sm:$0xff] %v15798_v44  ;;  %v15813_v37 = vpop.f32.mrf.mxu0  ;;  %v15816_v34 = vadd.f32 %v15720_v40, %v2352_v12  ;;  %v14388_v44 = vld [vmem:[%s14532_s17 + $0x50] sm:$0xff]  ;;  %v15831_v12 = vrot.slane %v3818_v5, %v20433_v6  ;;  %v15848_v5 = vrot.slane %v15811_v53, %v20433_v6 }
 0x2e2   : > { %v3907_v60 = vcombine.high %v14388_v44, %v14388_v44  ;;  %v15824_v21 = vrot.slane %v14388_v44, %v20433_v6  ;;  %v2267_v54 = vpop.f32.mrf.mxu1 }
 0x2e3   : > { %20447 = vst [vmem:[#allocation4_spill] sm:$0xff] %v15816_v34  ;;  %v2576_v43 = vpop.f32.mrf.mxu0  ;;  %v15838_v34 = vrot.slane %v3826_v51, %v20433_v6  ;;  %v15843_v54 = vrot.slane %v3866_v49, %v20433_v6  ;;  %20449 = vst [vmem:[#allocation24_spill] sm:$0xff] %v15848_v5  ;;  %v2980_v51 = vsel %vm800_vm1, %v2975_v17, %v15514_v3 }
 0x2e4   : > { %v2270_v47 = vpop.f32.mrf.mxu1  ;;  %2914 = vmatmul.mubr.bf16.gmra.mxu1 %v15476_v63  ;;  %v14389_v43 = vld [vmem:[%s14532_s17 + $0x60] sm:$0xff]  ;;  %v15856_v49 = vrot.slane %v3874_v35, %v20433_v6  ;;  %v15859_v44 = vrot.slane %v3907_v60, %v20433_v6  ;;  %3216 = vmatmul.mubr.bf16.gmra.mxu0 %v2980_v51  ;;  %v20452_v3 = vcombine.high %v15737_v20, %v15737_v20 }
 0x2e5   : > { %20448 = vst [vmem:[#allocation23_spill] sm:$0xff] %v15843_v54  ;;  %v3955_v40 = vcombine.high %v14389_v43, %v14389_v43  ;;  %v2353_v39 = vadd.f32 %v2270_v47, %v15530_v0  ;;  %v2577_v36 = vpop.f32.mrf.mxu0  ;;  %3389 = vmatprep.mubr.bf16.mxu1 %v20400_v31  ;;  %v3962_v15 = vrot.slane %v14389_v43, %v20433_v6 }
 0x2e6   : > { %20450 = vst [vmem:[#allocation47_spill] sm:$0xff] %v15856_v49  ;;  %v2272_v7 = vpop.f32.mrf.mxu1  ;;  %5566 = vmatprep.mubr.bf16.mxu0 %v20400_v31  ;;  %v5185_v60 = vcombine.low %v20452_v3, %v15782_v11  ;;  %v20453_v35 = vcombine.low %v15737_v20, %v15741_v25  ;;  %v5232_v51 = vcombine.low %v15779_v9, %v15802_v50 }
 0x2e7   : > { %v2354_v36 = vadd.f32 %v2272_v7, %v15536_v4  ;;  %v15865_v0 = vpop.f32.mrf.mxu0  ;;  %v15868_v47 = vadd.f32 %v15750_v19, %v2353_v39  ;;  %v20454_v4 = vrot.slane %v15747_v18, %v20433_v6  ;;  %v20455_v7 = vrot.slane %v15744_v1, %v20433_v6 }
 0x2e8   : > { %v5206_v17 = vrot.slane %v20453_v35, %v20433_v6  ;;  %v2274_v43 = vpop.f32.mrf.mxu1  ;;  %v13564_v19 = vcombine.high %v15771_v32, %v15782_v11  ;;  %v13565_v3 = vcombine.high %v15779_v9, %v15802_v50  ;;  %v15892_v63 = vrot.slane %v3955_v40, %v20433_v6 }
 0x2e9   : > { %20451 = vst [vmem:[#allocation48_spill] sm:$0xff] %v15868_v47  ;;  %v5214_v39 = vcombine.low %v20455_v7, %v20454_v4  ;;  %v15894_v35 = vpop.f32.mrf.mxu0  ;;  %v15897_v18 = vadd.f32 %v15756_v46, %v2354_v36  ;;  %v5213_v1 = vrot.slane %v5185_v60, %v20433_v6  ;;  %v5234_v43 = vcombine.low %v15820_v58, %v3808_v22 }
 0x2ea   : > { %v3970_v4 = vcombine.high %v3962_v15, %v3962_v15  ;;  %v2275_v7 = vpop.f32.mrf.mxu1  ;;  %v15902_v47 = vrot.slane %v13564_v19, %v20433_v6  ;;  %v15905_v2 = vrot.slane %v5232_v51, %v20433_v6  ;;  %v5255_v40 = vrot.slane %v13565_v3, %v20433_v6 }
 0x2eb   : > { %20456 = vst [vmem:[#allocation49_spill] sm:$0xff] %v15897_v18  ;;  %v15910_v24 = vrot.slane %v15824_v21, %v20433_v6  ;;  %v2584_v46 = vpop.f32.mrf.mxu0  ;;  %v5215_v36 = vcombine.low %v5206_v17, %v5213_v1  ;;  %v5222_v60 = vrot.slane %v5214_v39, %v20433_v6  ;;  %v15914_v22 = vrot.slane %v5234_v43, %v20433_v6  ;;  %v20462_v18 = vld [vmem:[#allocation25_spill] sm:$0xff] }
 0x2ec   : > { %20457 = vst [vmem:[#allocation50_spill] sm:$0xff] %v15902_v47  ;;  %20458 = vst [vmem:[#allocation51_spill] sm:$0xff] %v15905_v2  ;;  %v15920_v51 = vrot.slane %v15859_v44, %v20433_v6  ;;  %v15923_v3 = vrot.slane %v3962_v15, %v20433_v6  ;;  %v2278_v7 = vpop.f32.mrf.mxu1  ;;  %3390 = vmatmul.mubr.bf16.vlgmr.msra.gmra.mxu1 %v20462_v18  ;;  %v5263_v17 = vcombine.low %v15902_v47, %v15905_v2 }
 0x2ed   : > { %20459 = vst [vmem:[#allocation52_spill] sm:$0xff] %v15910_v24  ;;  %20460 = vst [vmem:[#allocation53_spill] sm:$0xff] %v15914_v22  ;;  %v2355_v1 = vadd.f32 %v2278_v7, %v15552_v14  ;;  %v2585_v43 = vpop.f32.mrf.mxu0  ;;  %3397 = vmatprep.mubr.bf16.mxu1 %v20400_v31  ;;  %v5229_v46 = vrot.slane %v5215_v36, %v20433_v6  ;;  %v5264_v19 = vcombine.low %v5255_v40, %v15914_v22 }
 0x2ee   : > { %20461 = vst [vmem:[#allocation54_spill] sm:$0xff] %v15923_v3  ;;  %v15936_v15 = vrot.slane %v15892_v63, %v20433_v6  ;;  %v15939_v18 = vrot.slane %v3970_v4, %v20433_v6  ;;  %v2280_v2 = vpop.f32.mrf.mxu1  ;;  %v5271_v47 = vrot.slane %v5263_v17, %v20433_v6  ;;  %v20465_v14 = vcombine.high %v15774_v10, %v15774_v10 }
 0x2ef   : > { %v2356_v36 = vadd.f32 %v2280_v2, %v15558_v38  ;;  %v15949_v43 = vpop.f32.mrf.mxu0  ;;  %v5230_v40 = vcombine.low %v5222_v60, %v5229_v46  ;;  %v5278_v39 = vrot.slane %v5264_v19, %v20433_v6  ;;  %v15953_v48 = vadd.f32 %v15795_v28, %v2355_v1 }
 0x2f0   : > { %20463 = vst [vmem:[#allocation25_spill] sm:$0xff] %v15936_v15  ;;  %20464 = vst [vmem:[#allocation55_spill] sm:$0xff] %v15939_v18  ;;  %v15946_v7 = vrot.slane %v20465_v14, %v20433_v6  ;;  %v2282_v4 = vpop.f32.mrf.mxu1  ;;  %v15957_v17 = vcombine.high %v15808_v33, %v15808_v33  ;;  %v3810_v10 = vcombine.high %v15820_v58, %v15820_v58 }
 0x2f1   : > { %20466 = vst [vmem:[#allocation56_spill] sm:$0xff] %v15953_v48  ;;  %v20468_v2 = vcombine.high %v15791_v45, %v15791_v45  ;;  %v3904_v60 = vcombine.high %v15843_v54, %v15843_v54  ;;  %v15969_v19 = vpop.f32.mrf.mxu0  ;;  %v5279_v28 = vcombine.low %v5271_v47, %v5278_v39  ;;  %v15972_v1 = vadd.f32 %v15813_v37, %v2356_v36  ;;  %v20471_v54 = vld [vmem:[#allocation26_spill] sm:$0xff] }
 0x2f2   : > { %20467 = vst [vmem:[#allocation57_spill] sm:$0xff] %v15957_v17  ;;  %v3906_v46 = vcombine.high %v15856_v49, %v15856_v49  ;;  %v5177_v14 = vcombine.high %v15946_v7, %v15946_v7  ;;  %v2283_v4 = vpop.f32.mrf.mxu1  ;;  %v5280_v45 = vcombine.low %v3810_v10, %v15808_v33  ;;  %v13566_v48 = vcombine.high %v15831_v12, %v15838_v34 }
 0x2f3   : > { %v15965_v38 = vrot.slane %v20468_v2, %v20433_v6  ;;  %20470 = vst [vmem:[#allocation59_spill] sm:$0xff] %v15972_v1  ;;  %v5281_v2 = vcombine.low %v15946_v7, %v15957_v17  ;;  %v2592_v37 = vpop.f32.mrf.mxu0  ;;  %v15985_v39 = vpack.c.bf16 %v5279_v28, %v5230_v40  ;;  %v5331_v4 = vcombine.low %v15856_v49, %v3904_v60 }
 0x2f4   : > { %v5282_v36 = vcombine.low %v5177_v14, %v15838_v34  ;;  %v2286_v10 = vpop.f32.mrf.mxu1  ;;  %3398 = vmatmul.mubr.bf16.gmra.mxu1 %v20471_v54  ;;  %v15993_v17 = vrot.slane %v5280_v45, %v20433_v6  ;;  %v15999_v37 = vrot.slane %v13566_v48, %v20433_v6  ;;  %v5332_v40 = vcombine.low %v3906_v46, %v15848_v5 }
 0x2f5   : > { %20469 = vst [vmem:[#allocation58_spill] sm:$0xff] %v15965_v38  ;;  %v5329_v47 = vcombine.low %v15835_v27, %v15965_v38  ;;  %v13567_v1 = vcombine.high %v15835_v27, %v15965_v38  ;;  %v15996_v33 = vrot.slane %v5281_v2, %v20433_v6  ;;  %v2357_v28 = vadd.f32 %v2286_v10, %v15574_v23  ;;  %v2593_v14 = vpop.f32.mrf.mxu0 }
 0x2f6   : > { %20472 = vst [vmem:[#allocation26_spill] sm:$0xff] %v15993_v17  ;;  %20474 = vst [vmem:[#allocation61_spill] sm:$0xff] %v15999_v37  ;;  %3405 = vmatprep.mubr.bf16.mxu1 %v20400_v31  ;;  %13577 = vmatmul.mubr.msk.bf16.vlgmr.msra.gmra.mxu0 %vm474_vm0, %v15985_v39  ;;  %v5304_v54 = vrot.slane %v5282_v36, %v20433_v6  ;;  %v2288_v45 = vpop.f32.mrf.mxu1  ;;  %v16015_v23 = vrot.slane %v5331_v4, %v20433_v6 }
 0x2f7   : > { %20473 = vst [vmem:[#allocation60_spill] sm:$0xff] %v15996_v33  ;;  %v16008_v60 = vrot.slane %v5329_v47, %v20433_v6  ;;  %5576 = vmatprep.mubr.bf16.mxu0 %v20400_v31  ;;  %v5312_v48 = vcombine.low %v15993_v17, %v15996_v33  ;;  %v5346_v46 = vrot.slane %v13567_v1, %v20433_v6  ;;  %v16021_v36 = vpop.f32.mrf.mxu0 }
 0x2f8   : > { %20476 = vst [vmem:[#allocation63_spill] sm:$0xff] %v16015_v23  ;;  %v16018_v2 = vrot.slane %v5332_v40, %v20433_v6  ;;  %v2358_v10 = vadd.f32 %v2288_v45, %v15580_v61  ;;  %v5313_v47 = vcombine.low %v5304_v54, %v15999_v37  ;;  %v9730_v14 = vcombine.low %v15831_v12, %v15838_v34  ;;  %v2290_v38 = vpop.f32.mrf.mxu1 }
 0x2f9   : > { %20475 = vst [vmem:[#allocation62_spill] sm:$0xff] %v16008_v60  ;;  %v5320_v1 = vrot.slane %v5312_v48, %v20433_v6  ;;  %v5361_v4 = vcombine.low %v16008_v60, %v5346_v46  ;;  %v16033_v61 = vadd.f32 %v15865_v0, %v2357_v28  ;;  %v20478_v54 = vcombine.high %v15824_v21, %v15824_v21  ;;  %v16041_v37 = vpop.f32.mrf.mxu0 }
 0x2fa   : > { %20477 = vst [vmem:[#allocation64_spill] sm:$0xff] %v16018_v2  ;;  %v5362_v40 = vcombine.low %v16015_v23, %v16018_v2  ;;  %v5327_v38 = vrot.slane %v5313_v47, %v20433_v6  ;;  %v16045_v48 = vrot.slane %v9730_v14, %v20433_v6  ;;  %v16048_v46 = vadd.f32 %v15894_v35, %v2358_v10  ;;  %v2291_v49 = vpop.f32.mrf.mxu1 }
 0x2fb   : > { %v16039_v45 = vrot.slane %v20478_v54, %v20433_v6  ;;  %v5369_v0 = vrot.slane %v5361_v4, %v20433_v6  ;;  %v20482_v21 = vcombine.high %v15811_v53, %v15811_v53  ;;  %v16060_v47 = vcombine.high %v15848_v5, %v15848_v5  ;;  %v2600_v14 = vpop.f32.mrf.mxu0 }
 0x2fc   : > { %20480 = vst [vmem:[#allocation66_spill] sm:$0xff] %v16045_v48  ;;  %20481 = vst [vmem:[#allocation67_spill] sm:$0xff] %v16048_v46  ;;  %v5376_v28 = vrot.slane %v5362_v40, %v20433_v6  ;;  %v5328_v23 = vcombine.low %v5320_v1, %v5327_v38  ;;  %v20484_v49 = vcombine.high %v15859_v44, %v15859_v44  ;;  %v2294_v40 = vpop.f32.mrf.mxu1 }
 0x2fd   : > { %20479 = vst [vmem:[#allocation65_spill] sm:$0xff] %v16039_v45  ;;  %v16056_v54 = vrot.slane %v20482_v21, %v20433_v6  ;;  %v20486_v53 = vcombine.high %v15892_v63, %v15892_v63  ;;  %v20488_v21 = vld [vmem:[#allocation27_spill] sm:$0xff]  ;;  %v4000_v1 = vcombine.high %v15923_v3, %v15923_v3  ;;  %v16081_v38 = vcombine.high %v15936_v15, %v15936_v15  ;;  %v2601_v35 = vpop.f32.mrf.mxu0 }
 0x2fe   : > { %v16068_v10 = vrot.slane %v20484_v49, %v20433_v6  ;;  %3406 = vmatmul.mubr.bf16.gmra.mxu1 %v20488_v21  ;;  %v5377_v14 = vcombine.low %v5369_v0, %v5376_v28  ;;  %v4002_v44 = vcombine.high %v15939_v18, %v15939_v18  ;;  %v2359_v49 = vadd.f32 %v2294_v40, %v15596_v55  ;;  %v2296_v28 = vpop.f32.mrf.mxu1 }
 0x2ff   : > { %20483 = vst [vmem:[#allocation68_spill] sm:$0xff] %v16056_v54  ;;  %v16074_v4 = vrot.slane %v20486_v53, %v20433_v6  ;;  %3413 = vmatprep.mubr.bf16.mxu1 %v20400_v31  ;;  %v5179_v63 = vcombine.high %v16056_v54, %v16056_v54  ;;  %v5378_v0 = vcombine.low %v16056_v54, %v16060_v47  ;;  %v2604_v40 = vpop.f32.mrf.mxu0 }
 0x300   : > { %20485 = vst [vmem:[#allocation69_spill] sm:$0xff] %v16068_v10  ;;  %v16091_v53 = vpack.c.bf16 %v5377_v14, %v5328_v23  ;;  %v13568_v21 = vcombine.high %v15910_v24, %v16039_v45  ;;  %v5381_v2 = vcombine.low %v15920_v51, %v16068_v10  ;;  %v13569_v55 = vcombine.high %v15920_v51, %v16068_v10  ;;  %v2298_v14 = vpop.f32.mrf.mxu1 }
 0x301   : > { %20487 = vst [vmem:[#allocation70_spill] sm:$0xff] %v16074_v4  ;;  %v2360_v35 = vadd.f32 %v2296_v28, %v15602_v41  ;;  %v5379_v60 = vcombine.low %v5179_v63, %v16039_v45  ;;  %v16102_v48 = vrot.slane %v5378_v0, %v20433_v6  ;;  %v5428_v23 = vcombine.low %v15939_v18, %v4000_v1  ;;  %v2606_v28 = vpop.f32.mrf.mxu0 }
 0x302   : > { %13578 = vmatmul.mubr.msk.bf16.gmra.mxu0 %vm474_vm0, %v16091_v53  ;;  %v16108_v33 = vrot.slane %v13568_v21, %v20433_v6  ;;  %v16111_v17 = vrot.slane %v5381_v2, %v20433_v6  ;;  %v5429_v41 = vcombine.low %v4002_v44, %v15936_v15  ;;  %v5430_v63 = vcombine.low %v16074_v4, %v16081_v38  ;;  %v2299_v2 = vpop.f32.mrf.mxu1 }
 0x303   : > { %20489 = vst [vmem:[#allocation27_spill] sm:$0xff] %v16102_v48  ;;  %5586 = vmatprep.mubr.bf16.mxu0 %v20400_v31  ;;  %v5395_v1 = vrot.slane %v5379_v60, %v20433_v6  ;;  %v5437_v0 = vrot.slane %v13569_v55, %v20433_v6  ;;  %v16120_v14 = vrot.slane %v5428_v23, %v20433_v6  ;;  %v14289_v55 = vld [vmem:[%s20102_s7 + $0x20] ss:$12 sps:$4 sm:$0xff]   ;;  %v2608_v23 = vpop.f32.mrf.mxu0 }
 0x304   : > { %20490 = vst [vmem:[#allocation71_spill] sm:$0xff] %v16108_v33  ;;  %20491 = vst [vmem:[#allocation72_spill] sm:$0xff] %v16111_v17  ;;  %v16123_v21 = vadd.f32 %v15949_v43, %v2359_v49  ;;  %v5411_v44 = vcombine.low %v16108_v33, %v16111_v17  ;;  %v16128_v22 = vrot.slane %v5429_v41, %v20433_v6  ;;  %v2302_v2 = vpop.f32.mrf.mxu1  ;;  %v20497_v17 = vld [vmem:[#allocation28_spill] sm:$0xff]  ;;  %13980 = vmatprep.subr.bf16.mxu0 %v14289_v55 }
 0x305   : > { %20492 = vst [vmem:[#allocation73_spill] sm:$0xff] %v16120_v14  ;;  %v16131_v46 = vrot.slane %v5430_v63, %v20433_v6  ;;  %v16134_v60 = vadd.f32 %v15969_v19, %v2360_v35  ;;  %v5410_v43 = vcombine.low %v16102_v48, %v5395_v1  ;;  %v5459_v49 = vcombine.low %v5437_v0, %v16120_v14  ;;  %v2609_v33 = vpop.f32.mrf.mxu0 }
 0x306   : > { %20493 = vst [vmem:[#allocation74_spill] sm:$0xff] %v16123_v21  ;;  %20494 = vst [vmem:[#allocation75_spill] sm:$0xff] %v16128_v22  ;;  %3414 = vmatmul.mubr.bf16.gmra.mxu1 %v20497_v17  ;;  %v5425_v41 = vrot.slane %v5411_v44, %v20433_v6  ;;  %v5181_v19 = vcombine.high %v16074_v4, %v16074_v4  ;;  %v2361_v35 = vadd.f32 %v2302_v2, %v15615_v57  ;;  %v2304_v23 = vpop.f32.mrf.mxu1  ;;  %v20498_v21 = vld [vmem:[#allocation29_spill] sm:$0xff] }
 0x307   : > { %20495 = vst [vmem:[#allocation76_spill] sm:$0xff] %v16131_v46  ;;  %20496 = vst [vmem:[#allocation77_spill] sm:$0xff] %v16134_v60  ;;  %v5460_v63 = vcombine.low %v16128_v22, %v16131_v46  ;;  %3421 = vmatprep.mubr.bf16.mxu1 %v20400_v31  ;;  %v5418_v1 = vrot.slane %v5410_v43, %v20433_v6  ;;  %v5467_v0 = vrot.slane %v5459_v49, %v20433_v6  ;;  %v2612_v46 = vpop.f32.mrf.mxu0 }
 0x308   : > { %13981 = vmatpush3.bf16.msra.mxu0 %v14289_v55  ;;  %v2362_v44 = vadd.f32 %v2304_v23, %v15618_v30  ;;  %v16154_v22 = vadd.f32 %v16021_v36, %v2361_v35  ;;  %v2306_v48 = vpop.f32.mrf.mxu1  ;;  %v5482_v33 = vrot.slane %v5181_v19, %v20433_v6  ;;  %v13556_v35 = vcombine.high %v15708_v42, %v15711_v52 }
 0x309   : > { %v5474_v17 = vrot.slane %v5460_v63, %v20433_v6  ;;  %v5426_v14 = vcombine.low %v5418_v1, %v5425_v41  ;;  %v2614_v2 = vpop.f32.mrf.mxu0 }
 0x30a   : > { %v16158_v43 = vadd.f32 %v16041_v37, %v2362_v44  ;;  %v2307_v49 = vpop.f32.mrf.mxu1  ;;  %v5489_v30 = vrot.slane %v5482_v33, %v20433_v6 }
 0x30b   : > { %v5475_v57 = vcombine.low %v5467_v0, %v5474_v17  ;;  %v2616_v63 = vpop.f32.mrf.mxu0  ;;  %v20499_v49 = vld [vmem:[#allocation30_spill] sm:$0xff] }
 0x30c   : > { %v2310_v55 = vpop.f32.mrf.mxu1 }
 0x30d   : > { %v16160_v60 = vpack.c.bf16 %v5475_v57, %v5426_v14  ;;  %v2363_v36 = vadd.f32 %v2310_v55, %v15626_v13  ;;  %v2617_v48 = vpop.f32.mrf.mxu0  ;;  %v16178_v13 = vpack.c.bf16 %v5489_v30, %v5489_v30 }
 0x30e   : > { %3422 = vmatmul.mubr.bf16.gmra.mxu1 %v20498_v21  ;;  %v2312_v37 = vpop.f32.mrf.mxu1  ;;  %v4003_v21 = vcombine.low %v15708_v42, %v15711_v52  ;;  %v4020_v42 = vrot.slane %v13556_v35, %v20433_v6  ;;  %v3760_v52 = vcombine.high %v15771_v32, %v15771_v32  ;;  %v16206_v48 = vcombine.high %v15779_v9, %v15779_v9 }
 0x30f   : > { %13579 = vmatmul.mubr.msk.bf16.gmra.mxu0 %vm474_vm0, %v16160_v60  ;;  %3429 = vmatprep.mubr.bf16.mxu1 %v20400_v31  ;;  %v2364_v14 = vadd.f32 %v2312_v37, %v15629_v26  ;;  %v16170_v41 = vpop.f32.mrf.mxu0  ;;  %v16172_v19 = vadd.f32 %v2604_v40, %v2363_v36  ;;  %v4005_v26 = vcombine.low %v15725_v62, %v15737_v20  ;;  %v14292_v40 = vld [vmem:[%s20102_s7 + $0x4] ss:$12 sps:$4 sm:$0xff]  }
 0x310   : > { %5596 = vmatprep.mubr.bf16.mxu0 %v20400_v31  ;;  %v2314_v1 = vpop.f32.mrf.mxu1  ;;  %v4013_v57 = vrot.slane %v4003_v21, %v20433_v6  ;;  %5711 = vmatprep.subr.bf16.mxu0 %v14292_v40  ;;  %20500 = vst [vmem:[#allocation28_spill] sm:$0xff] %v16206_v48  ;;  %v4052_v21 = vcombine.low %v15782_v11, %v3760_v52  ;;  %v14290_v40 = vld [vmem:[%s20102_s7] ss:$12 sps:$4 sm:$0xff]  }
 0x311   : > { %v16180_v0 = vpop.f32.mrf.mxu0  ;;  %v16182_v23 = vadd.f32 %v2606_v28, %v2364_v14  ;;  %v4027_v28 = vrot.slane %v4005_v26, %v20433_v6  ;;  %v4054_v26 = vcombine.low %v15802_v50, %v16206_v48 }
 0x312   : > { %v2315_v17 = vpop.f32.mrf.mxu1  ;;  %v4035_v14 = vcombine.low %v4013_v57, %v4020_v42 }
 0x313   : > { %v2624_v44 = vpop.f32.mrf.mxu0  ;;  %v16228_v52 = vrot.slane %v4054_v26, %v20433_v6 }
 0x314   : > { %v2318_v33 = vpop.f32.mrf.mxu1  ;;  %v4062_v44 = vrot.slane %v4052_v21, %v20433_v6 }
 0x315   : > { %v2365_v62 = vadd.f32 %v2318_v33, %v15636_v16  ;;  %v2625_v20 = vpop.f32.mrf.mxu0  ;;  %v3762_v16 = vcombine.high %v15782_v11, %v15782_v11  ;;  %v20501_v33 = vld [vmem:[#allocation31_spill] sm:$0xff] }
 0x316   : > { %3430 = vmatmul.mubr.bf16.gmra.mxu1 %v20499_v49  ;;  %v2320_v63 = vpop.f32.mrf.mxu1 }
 0x317   : > { %13580 = vmatmul.mubr.msk.bf16.gmra.mxu0 %vm474_vm0, %v16178_v13  ;;  %3437 = vmatprep.mubr.bf16.mxu1 %v20400_v31  ;;  %v2366_v55 = vadd.f32 %v2320_v63, %v15639_v56  ;;  %v2628_v30 = vpop.f32.mrf.mxu0  ;;  %v16202_v36 = vadd.f32 %v2612_v46, %v2365_v62  ;;  %v4055_v56 = vcombine.low %v15788_v8, %v15820_v58 }
 0x318   : > { %13982 = vmatprep.mubr.msk.bf16.mxu0 %vm474_vm0, %v15985_v39  ;;  %v2322_v37 = vpop.f32.mrf.mxu1  ;;  %v4006_v39 = vcombine.low %v15741_v25, %v15771_v32  ;;  %v4053_v1 = vcombine.low %v3762_v16, %v15779_v9  ;;  %v4043_v62 = vrot.slane %v4035_v14, %v20433_v6 }
 0x319   : > { %v2629_v35 = vpop.f32.mrf.mxu0  ;;  %v16215_v46 = vadd.f32 %v2614_v2, %v2366_v55  ;;  %v4083_v57 = vrot.slane %v4055_v56, %v20433_v6  ;;  %v3856_v56 = vcombine.high %v15831_v12, %v15831_v12 }
 0x31a   : > { %v2323_v17 = vpop.f32.mrf.mxu1  ;;  %v4034_v25 = vrot.slane %v4006_v39, %v20433_v6  ;;  %v4069_v2 = vrot.slane %v4053_v1, %v20433_v6  ;;  %v16254_v35 = vcombine.high %v15835_v27, %v15835_v27 }
 0x31b   : > { %v2630_v42 = vpop.f32.mrf.mxu0  ;;  %v4085_v30 = vcombine.low %v16228_v52, %v4083_v57  ;;  %v20504_v57 = vld [vmem:[#allocation57_spill] sm:$0xff] }
 0x31c   : > { %v2326_v9 = vpop.f32.mrf.mxu1  ;;  %v4036_v49 = vcombine.low %v4027_v28, %v4034_v25  ;;  %v4084_v55 = vcombine.low %v4062_v44, %v4069_v2  ;;  %20502 = vst [vmem:[#allocation29_spill] sm:$0xff] %v16254_v35  ;;  %v4103_v42 = vcombine.low %v20504_v57, %v15831_v12  ;;  %v4104_v2 = vcombine.low %v15838_v34, %v3856_v56 }
 0x31d   : > { %v2367_v20 = vadd.f32 %v2326_v9, %v15652_v29  ;;  %v2631_v63 = vpop.f32.mrf.mxu0  ;;  %v4099_v29 = vrot.slane %v4085_v30, %v20433_v6  ;;  %v20507_v30 = vld [vmem:[#allocation23_spill] sm:$0xff] }
 0x31e   : > { %3438 = vmatmul.mubr.bf16.gmra.mxu1 %v20501_v33  ;;  %v2328_v16 = vpop.f32.mrf.mxu1  ;;  %v4050_v37 = vrot.slane %v4036_v49, %v20433_v6  ;;  %v16244_v39 = vrot.slane %v4084_v55, %v20433_v6  ;;  %v20505_v33 = vld [vmem:[#allocation58_spill] sm:$0xff]  ;;  %v20506_v55 = vld [vmem:[#allocation47_spill] sm:$0xff]  ;;  %v4132_v12 = vrot.slane %v4104_v2, %v20433_v6 }
 0x31f   : > { %13983 = vmatmul.mubr.msk.bf16.vlgmr.msra.gmra.mxu0 %vm474_vm0, %v16091_v53  ;;  %3445 = vmatprep.mubr.bf16.mxu1 %v20400_v31  ;;  %v2368_v53 = vadd.f32 %v2328_v16, %v15655_v59  ;;  %v16241_v28 = vpop.f32.mrf.mxu0  ;;  %v16248_v14 = vadd.f32 %v16170_v41, %v2367_v20  ;;  %v3858_v59 = vcombine.high %v15838_v34, %v15838_v34 }
 0x320   : > { %13986 = vmatprep.mubr.msk.bf16.mxu0 %vm474_vm0, %v16160_v60  ;;  %5712 = vmatpush1.bf16.msra.mxu0 %v14290_v40  ;;  %v2330_v60 = vpop.f32.mrf.mxu1  ;;  %v4051_v21 = vcombine.low %v4043_v62, %v4050_v37  ;;  %v4100_v26 = vcombine.low %v16244_v39, %v4099_v29  ;;  %v13557_v41 = vcombine.high %v15788_v8, %v15820_v58  ;;  %v20503_v40 = vld [vmem:[#allocation22_spill] sm:$0xff] }
 0x321   : > { %v16258_v1 = vpop.f32.mrf.mxu0  ;;  %v16262_v17 = vadd.f32 %v16180_v0, %v2368_v53  ;;  %v4102_v25 = vcombine.low %v20503_v40, %v15946_v7  ;;  %v4150_v9 = vcombine.low %v3858_v59, %v15835_v27  ;;  %v4151_v49 = vcombine.low %v20505_v33, %v16254_v35  ;;  %v20508_v53 = vld [vmem:[#allocation32_spill] sm:$0xff] }
 0x322   : > { %v2331_v44 = vpop.f32.mrf.mxu1  ;;  %v16274_v0 = vpack.c.bf16 %v4100_v26, %v4051_v21  ;;  %v4111_v20 = vrot.slane %v13557_v41, %v20433_v6  ;;  %v4152_v16 = vcombine.low %v20507_v30, %v20506_v55  ;;  %v4125_v34 = vrot.slane %v4103_v42, %v20433_v6 }
 0x323   : > { %v3101_v62 = vpop.f32.mrf.mxu0  ;;  %v4118_v63 = vrot.slane %v4102_v25, %v20433_v6  ;;  %v13558_v27 = vcombine.high %v20507_v30, %v20506_v55  ;;  %v4160_v21 = vrot.slane %v4150_v9, %v20433_v6  ;;  %v4167_v56 = vrot.slane %v4151_v49, %v20433_v6  ;;  %v14293_v44 = vld [vmem:[%s20105_s10 + $0x98] sm:$0xff]  }
 0x324   : > { %v2334_v37 = vpop.f32.mrf.mxu1  ;;  %v4134_v26 = vcombine.low %v4125_v34, %v4132_v12  ;;  %v5176_v25 = vcombine.high %v15802_v50, %v15802_v50  ;;  %v13845_v9 = vcombine.high %v20503_v40, %v15946_v7  ;;  %v3952_v49 = vcombine.high %v15910_v24, %v15910_v24  ;;  %6390 = vmatpush1.bf16.msra.mxu1 %v14293_v44 }
 0x325   : > { %v3102_v29 = vpop.f32.mrf.mxu0  ;;  %v4133_v60 = vcombine.low %v4111_v20, %v4118_v63  ;;  %v16293_v41 = vrot.slane %v13558_v27, %v20433_v6  ;;  %v4182_v2 = vcombine.low %v4160_v21, %v4167_v56  ;;  %v3954_v40 = vcombine.high %v16039_v45, %v16039_v45  ;;  %6391 = vmatprep.subr.bf16.mxu1 %v20400_v31 }
 0x326   : > { %3446 = vmatmul.mubr.bf16.gmra.mxu1 %v20508_v53  ;;  %v2335_v59 = vpop.f32.mrf.mxu1  ;;  %v4148_v20 = vrot.slane %v4134_v26, %v20433_v6  ;;  %v10648_v63 = vcombine.low %v5176_v25, %v15820_v58  ;;  %v10672_v7 = vrot.slane %v13845_v9, %v20433_v6  ;;  %v4199_v34 = vcombine.low %v15848_v5, %v16056_v54  ;;  %v14391_v54 = vld [vmem:[%s14532_s17 + $0x28] sm:$0xff] }
 0x327   : > { %13987 = vmatmul.mubr.msk.bf16.gmra.mxu0 %vm474_vm0, %v16178_v13  ;;  %3453 = vmatprep.mubr.bf16.mxu1 %v20400_v31  ;;  %v4174_v13 = vrot.slane %v4152_v16, %v20433_v6  ;;  %20509 = vst [vmem:[#allocation30_spill] sm:$0xff] %v16293_v41  ;;  %v16300_v57 = vpop.f32.mrf.mxu0  ;;  %v4141_v42 = vrot.slane %v4133_v60, %v20433_v6 }
 0x328   : > { %5729 = vmatprep.mubr.bf16.mxu0 %v20400_v31  ;;  %v2336_v62 = vpop.f32.mrf.mxu1  ;;  %v16312_v16 = vcombine.high %v15920_v51, %v15920_v51  ;;  %v16317_v53 = vrot.slane %v4182_v2, %v20433_v6  ;;  %v10655_v60 = vrot.slane %v10648_v63, %v20433_v6  ;;  %v4200_v21 = vcombine.low %v16060_v47, %v15910_v24  ;;  %v20513_v2 = vld [vmem:[#allocation33_spill] sm:$0xff] }
 0x329   : > { %v4183_v50 = vcombine.low %v4174_v13, %v16293_v41  ;;  %v16314_v37 = vpop.f32.mrf.mxu0  ;;  %v4149_v27 = vcombine.low %v4141_v42, %v4148_v20  ;;  %v10673_v59 = vcombine.low %v10672_v7, %v4132_v12  ;;  %v4201_v26 = vcombine.low %v16039_v45, %v3952_v49  ;;  %v20514_v12 = vld [vmem:[#allocation12_spill] sm:$0xff] }
 0x32a   : > { %20510 = vst [vmem:[#allocation31_spill] sm:$0xff] %v16312_v16  ;;  %20511 = vst [vmem:[#allocation22_spill] sm:$0xff] %v16317_v53  ;;  %v2337_v58 = vpop.f32.mrf.mxu1  ;;  %v4202_v13 = vcombine.low %v3954_v40, %v15920_v51  ;;  %v16332_v25 = vrot.slane %v4199_v34, %v20433_v6  ;;  %v10656_v62 = vcombine.low %v16228_v52, %v10655_v60  ;;  %v20515_v34 = vld [vmem:[#allocation38_spill] sm:$0xff] }
 0x32b   : > { %v4197_v29 = vrot.slane %v4183_v50, %v20433_v6  ;;  %v3109_v56 = vpop.f32.mrf.mxu0  ;;  %v4216_v47 = vrot.slane %v4200_v21, %v20433_v6  ;;  %v10680_v51 = vrot.slane %v10673_v59, %v20433_v6  ;;  %v4223_v50 = vrot.slane %v4201_v26, %v20433_v6 }
 0x32c   : > { %20512 = vst [vmem:[#allocation57_spill] sm:$0xff] %v16332_v25  ;;  %v2795_v44 = vpop.f32.mrf.mxu1  ;;  %v10663_v7 = vrot.slane %v10656_v62, %v20433_v6  ;;  %v4230_v40 = vrot.slane %v4202_v13, %v20433_v6  ;;  %v4248_v21 = vcombine.low %v16068_v10, %v16312_v16  ;;  %v4249_v56 = vcombine.low %v15923_v3, %v15939_v18  ;;  %v20545_v10 = vld [vmem:[#allocation77_spill] sm:$0xff] }
 0x32d   : > { %v4198_v9 = vcombine.low %v16317_v53, %v4197_v29  ;;  %v2920_v20 = vadd.f32 %v2795_v44, %v20514_v12  ;;  %v3110_v49 = vpop.f32.mrf.mxu0  ;;  %v4231_v52 = vcombine.low %v16332_v25, %v4216_v47  ;;  %v10681_v60 = vcombine.low %v4141_v42, %v10680_v51 }
 0x32e   : > { %3454 = vmatmul.mubr.bf16.gmra.mxu1 %v20513_v2  ;;  %v2797_v63 = vpop.f32.mrf.mxu1  ;;  %v10664_v26 = vcombine.low %v16244_v39, %v10663_v7  ;;  %v4232_v2 = vcombine.low %v4223_v50, %v4230_v40  ;;  %v13559_v13 = vcombine.high %v15923_v3, %v15939_v18  ;;  %v4251_v47 = vcombine.low %v15936_v15, %v16074_v4  ;;  %v20542_v15 = vld [vmem:[#allocation45_spill] sm:$0xff] }
 0x32f   : > { %13588 = vmatmul.mubr.msk.bf16.vlgmr.msra.gmra.mxu0 %vm474_vm0, %v16274_v0  ;;  %3461 = vmatprep.mubr.bf16.mxu1 %v20400_v31  ;;  %v2921_v58 = vadd.f32 %v2797_v63, %v20515_v34  ;;  %v3113_v29 = vpop.f32.mrf.mxu0  ;;  %v16353_v44 = vpack.c.bf16 %v4198_v9, %v4149_v27  ;;  %v16361_v42 = vrot.slane %v4248_v21, %v20433_v6 }
 0x330   : > { %5739 = vmatprep.mubr.bf16.mxu0 %v20400_v31  ;;  %v2799_v59 = vpop.f32.mrf.mxu1  ;;  %v4265_v12 = vrot.slane %v4249_v56, %v20433_v6  ;;  %v16365_v49 = vadd.f32 %v16241_v28, %v2920_v20  ;;  %v16367_v9 = vpack.c.bf16 %v10681_v60, %v10664_v26  ;;  %v4239_v39 = vrot.slane %v4231_v52, %v20433_v6  ;;  %v20519_v20 = vld [vmem:[#allocation34_spill] sm:$0xff]  ;;  %v20520_v52 = vld [vmem:[#allocation13_spill] sm:$0xff] }
 0x331   : > { %v3115_v62 = vpop.f32.mrf.mxu0  ;;  %20516 = vst [vmem:[#allocation32_spill] sm:$0xff] %v16361_v42  ;;  %v4272_v51 = vrot.slane %v13559_v13, %v20433_v6  ;;  %v16372_v63 = vrot.slane %v4232_v2, %v20433_v6  ;;  %v4279_v7 = vrot.slane %v4251_v47, %v20433_v6  ;;  %v16377_v34 = vadd.f32 %v16258_v1, %v2921_v58  ;;  %v20521_v2 = vld [vmem:[#allocation39_spill] sm:$0xff] }
 0x332   : > { %v2800_v27 = vpop.f32.mrf.mxu1  ;;  %20517 = vst [vmem:[#allocation33_spill] sm:$0xff] %v16367_v9  ;;  %v4280_v40 = vcombine.low %v16361_v42, %v4265_v12  ;;  %v14309_v9 = vld [vmem:[%s20105_s10] sm:$0xff]   ;;  %v6732_v33 = vrot.slane %v14391_v54, %v20433_v6 }
 0x333   : > { %v3117_v50 = vpop.f32.mrf.mxu0  ;;  %20518 = vst [vmem:[#allocation12_spill] sm:$0xff] %v16372_v63  ;;  %v4281_v56 = vcombine.low %v4272_v51, %v4279_v7  ;;  %v4247_v13 = vcombine.low %v4239_v39, %v16372_v63  ;;  %v4303_v51 = vrot.slane %v16081_v38, %v20433_v6  ;;  %v20525_v38 = vld [vmem:[#allocation40_spill] sm:$0xff]  ;;  %v14313_v63 = vld [vmem:[%s20105_s10 + $0x50] sm:$0xff]  }
 0x334   : > { %v2803_v28 = vpop.f32.mrf.mxu1  ;;  %v4288_v59 = vrot.slane %v4280_v40, %v20433_v6 }
 0x335   : > { %v2922_v60 = vadd.f32 %v2803_v28, %v20520_v52  ;;  %v3118_v21 = vpop.f32.mrf.mxu0  ;;  %v16389_v47 = vrot.slane %v4281_v56, %v20433_v6  ;;  %v20524_v56 = vld [vmem:[#allocation14_spill] sm:$0xff] }
 0x336   : > { %3462 = vmatmul.mubr.bf16.gmra.mxu1 %v20519_v20  ;;  %v2805_v26 = vpop.f32.mrf.mxu1  ;;  %v20523_v21 = vld [vmem:[#allocation35_spill] sm:$0xff] }
 0x337   : > { %13589 = vmatmul.mubr.msk.bf16.gmra.mxu0 %vm474_vm0, %v16353_v44  ;;  %3469 = vmatprep.mubr.bf16.mxu1 %v20400_v31  ;;  %v2923_v1 = vadd.f32 %v2805_v26, %v20521_v2  ;;  %v3121_v58 = vpop.f32.mrf.mxu0  ;;  %20522 = vst [vmem:[#allocation38_spill] sm:$0xff] %v16389_v47  ;;  %v16392_v12 = vadd.f32 %v16300_v57, %v2922_v60 }
 0x338   : > { %5749 = vmatprep.mubr.bf16.mxu0 %v20400_v31  ;;  %v2807_v27 = vpop.f32.mrf.mxu1  ;;  %v4296_v28 = vcombine.low %v4288_v59, %v16389_v47  ;;  %v4310_v60 = vrot.slane %v4303_v51, %v20433_v6 }
 0x339   : > { %v3123_v50 = vpop.f32.mrf.mxu0  ;;  %v16398_v7 = vadd.f32 %v16314_v37, %v2923_v1  ;;  %v14295_v27 = vld [vmem:[%s20102_s7 + $0x8] ss:$12 sps:$4 sm:$0xff]  }
 0x33a   : > { %v2808_v40 = vpop.f32.mrf.mxu1  ;;  %v4320_v52 = vpack.c.bf16 %v4296_v28, %v4247_v13  ;;  %13990 = vmatprep.subr.bf16.mxu0 %v14295_v27 }
 0x33b   : > { %v3125_v20 = vpop.f32.mrf.mxu0  ;;  %v4321_v40 = vpack.c.bf16 %v4310_v60, %v4310_v60  ;;  %13991 = vmatpush3.bf16.msra.mxu0 %v14295_v27 }
 0x33c   : > { %v2811_v39 = vpop.f32.mrf.mxu1  ;;  %v14294_v20 = vld [vmem:[%s20105_s10 + $0x90] sm:$0xff]   ;;  %6537 = vmatprep.subr.bf16.mxu0 %v20400_v31 }
 0x33d   : > { %v2924_v26 = vadd.f32 %v2811_v39, %v20524_v56  ;;  %v3126_v57 = vpop.f32.mrf.mxu0  ;;  %6392 = vmatpush1.bf16.msra.mxu1 %v14294_v20  ;;  %v20526_v56 = vld [vmem:[#allocation36_spill] sm:$0xff] }
 0x33e   : > { %3470 = vmatmul.mubr.bf16.gmra.mxu1 %v20523_v21  ;;  %v2813_v59 = vpop.f32.mrf.mxu1  ;;  %6393 = vmatprep.subr.bf16.mxu1 %v20400_v31 }
 0x33f   : > { %3477 = vmatprep.mubr.bf16.mxu1 %v20400_v31  ;;  %13590 = vmatmul.mubr.msk.bf16.gmra.mxu0 %vm474_vm0, %v4320_v52  ;;  %v2925_v37 = vadd.f32 %v2813_v59, %v20525_v38  ;;  %v3129_v2 = vpop.f32.mrf.mxu0  ;;  %v16407_v1 = vadd.f32 %v3113_v29, %v2924_v26  ;;  %v20527_v26 = vld [vmem:[#allocation15_spill] sm:$0xff] }
 0x340   : > { %5759 = vmatprep.mubr.bf16.mxu0 %v20400_v31  ;;  %v2815_v13 = vpop.f32.mrf.mxu1 }
 0x341   : > { %v3131_v28 = vpop.f32.mrf.mxu0  ;;  %v16415_v51 = vadd.f32 %v3115_v62, %v2925_v37  ;;  %v20528_v62 = vld [vmem:[#allocation41_spill] sm:$0xff] }
 0x342   : > { %v2816_v39 = vpop.f32.mrf.mxu1 }
 0x343   : > { %v3133_v21 = vpop.f32.mrf.mxu0 }
 0x344   : > { %v2819_v29 = vpop.f32.mrf.mxu1 }
 0x345   : > { %v2926_v57 = vadd.f32 %v2819_v29, %v20527_v26  ;;  %v3134_v59 = vpop.f32.mrf.mxu0  ;;  %v14296_v29 = vld [vmem:[%s20105_s10 + $0x88] sm:$0xff]  }
 0x346   : > { %3478 = vmatmul.mubr.bf16.gmra.mxu1 %v20526_v56  ;;  %v2821_v60 = vpop.f32.mrf.mxu1  ;;  %v20529_v59 = vld [vmem:[#allocation37_spill] sm:$0xff] }
 0x347   : > { %3485 = vmatprep.mubr.bf16.mxu1 %v20400_v31  ;;  %13591 = vmatmul.mubr.msk.bf16.gmra.mxu0 %vm474_vm0, %v4321_v40  ;;  %v2927_v38 = vadd.f32 %v2821_v60, %v20528_v62  ;;  %v3137_v37 = vpop.f32.mrf.mxu0  ;;  %v16426_v13 = vadd.f32 %v3121_v58, %v2926_v57  ;;  %v20530_v60 = vld [vmem:[#allocation16_spill] sm:$0xff]  ;;  %v20531_v62 = vld [vmem:[#allocation17_spill] sm:$0xff] }
 0x348   : > { %13992 = vmatprep.mubr.msk.bf16.mxu0 %vm474_vm0, %v16274_v0  ;;  %v2823_v27 = vpop.f32.mrf.mxu1  ;;  %v14297_v0 = vld [vmem:[%s20105_s10 + $0x38] sm:$0xff]   ;;  %6394 = vmatpush1.bf16.msra.mxu1 %v14296_v29 }
 0x349   : > { %v3139_v20 = vpop.f32.mrf.mxu0  ;;  %v16428_v39 = vadd.f32 %v3123_v50, %v2927_v38  ;;  %6395 = vmatprep.subr.bf16.mxu1 %v20400_v31 }
 0x34a   : > { %v2824_v21 = vpop.f32.mrf.mxu1 }
 0x34b   : > { %v3141_v56 = vpop.f32.mrf.mxu0  ;;  %v14298_v21 = vld [vmem:[%s20105_s10 + $0x30] sm:$0xff]  }
 0x34c   : > { %v2827_v26 = vpop.f32.mrf.mxu1 }
 0x34d   : > { %v2928_v58 = vadd.f32 %v2827_v26, %v20530_v60  ;;  %v3142_v57 = vpop.f32.mrf.mxu0 }
 0x34e   : > { %3486 = vmatmul.mubr.bf16.gmra.mxu1 %v20529_v59  ;;  %v2829_v50 = vpop.f32.mrf.mxu1  ;;  %v20532_v57 = vld [vmem:[#allocation44_spill] sm:$0xff] }
 0x34f   : > { %3493 = vmatprep.mubr.bf16.mxu1 %v20400_v31  ;;  %13993 = vmatmul.mubr.msk.bf16.vlgmr.msra.gmra.mxu0 %vm474_vm0, %v16353_v44  ;;  %v2929_v38 = vadd.f32 %v2829_v50, %v20531_v62  ;;  %v3145_v27 = vpop.f32.mrf.mxu0  ;;  %v16447_v56 = vadd.f32 %v3129_v2, %v2928_v58  ;;  %v20533_v2 = vld [vmem:[#allocation42_spill] sm:$0xff]  ;;  %v14300_v62 = vld [vmem:[%s20105_s10 + $0x80] sm:$0xff]  }
 0x350   : > { %13996 = vmatprep.mubr.msk.bf16.mxu0 %vm474_vm0, %v4320_v52  ;;  %6538 = vmatpush1.bf16.msra.mxu0 %v14297_v0  ;;  %v2831_v26 = vpop.f32.mrf.mxu1  ;;  %v14299_v0 = vld [vmem:[%s20105_s10 + $0x28] sm:$0xff]  }
 0x351   : > { %6539 = vmatprep.subr.bf16.mxu0 %v20400_v31  ;;  %v3147_v44 = vpop.f32.mrf.mxu0  ;;  %v16450_v59 = vadd.f32 %v3131_v28, %v2929_v38  ;;  %v20534_v38 = vld [vmem:[#allocation43_spill] sm:$0xff]  ;;  %6396 = vmatpush1.bf16.msra.mxu1 %v14300_v62  ;;  %v20536_v62 = vld [vmem:[#allocation21_spill] sm:$0xff] }
 0x352   : > { %v2832_v29 = vpop.f32.mrf.mxu1  ;;  %6397 = vmatprep.subr.bf16.mxu1 %v20400_v31 }
 0x353   : > { %v3149_v52 = vpop.f32.mrf.mxu0  ;;  %v14301_v29 = vld [vmem:[%s20105_s10 + $0x20] sm:$0xff]  }
 0x354   : > { %6540 = vmatpush1.bf16.msra.mxu0 %v14298_v21  ;;  %v2835_v60 = vpop.f32.mrf.mxu1 }
 0x355   : > { %6541 = vmatprep.subr.bf16.mxu0 %v20400_v31  ;;  %v2930_v58 = vadd.f32 %v2835_v60, %v20533_v2  ;;  %v3150_v50 = vpop.f32.mrf.mxu0 }
 0x356   : > { %3494 = vmatmul.mubr.bf16.gmra.mxu1 %v20532_v57  ;;  %v2837_v28 = vpop.f32.mrf.mxu1  ;;  %v14302_v57 = vld [vmem:[%s20105_s10 + $0x78] sm:$0xff]  }
 0x357   : > { %3501 = vmatprep.mubr.bf16.mxu1 %v20400_v31  ;;  %13997 = vmatmul.mubr.msk.bf16.gmra.mxu0 %vm474_vm0, %v4321_v40  ;;  %v2931_v21 = vadd.f32 %v2837_v28, %v20534_v38  ;;  %v3153_v26 = vpop.f32.mrf.mxu0  ;;  %v16467_v52 = vadd.f32 %v3137_v37, %v2930_v58  ;;  %v14303_v37 = vld [vmem:[%s20105_s10 + $0x18] sm:$0xff]   ;;  %v20535_v28 = vld [vmem:[#allocation46_spill] sm:$0xff] }
 0x358   : > { %6542 = vmatpush1.bf16.msra.mxu0 %v14299_v0  ;;  %v2839_v60 = vpop.f32.mrf.mxu1  ;;  %6398 = vmatpush1.bf16.msra.mxu1 %v14302_v57 }
 0x359   : > { %6543 = vmatprep.subr.bf16.mxu0 %v20400_v31  ;;  %v3155_v40 = vpop.f32.mrf.mxu0  ;;  %v16474_v2 = vadd.f32 %v3139_v20, %v2931_v21  ;;  %6399 = vmatprep.subr.bf16.mxu1 %v20400_v31  ;;  %v14304_v21 = vld [vmem:[%s20105_s10 + $0x70] sm:$0xff]  }
 0x35a   : > { %v2840_v0 = vpop.f32.mrf.mxu1 }
 0x35b   : > { %v3157_v50 = vpop.f32.mrf.mxu0 }
 0x35c   : > { %6544 = vmatpush1.bf16.msra.mxu0 %v14301_v29  ;;  %v2843_v58 = vpop.f32.mrf.mxu1  ;;  %v20537_v29 = vld [vmem:[#allocation4_spill] sm:$0xff]  ;;  %6400 = vmatpush1.bf16.msra.mxu1 %v14304_v21 }
 0x35d   : > { %6545 = vmatprep.subr.bf16.mxu0 %v20400_v31  ;;  %v2932_v38 = vadd.f32 %v2843_v58, %v20536_v62  ;;  %v3158_v60 = vpop.f32.mrf.mxu0  ;;  %6401 = vmatprep.subr.bf16.mxu1 %v20400_v31 }
 0x35e   : > { %3502 = vmatmul.mubr.bf16.gmra.mxu1 %v20535_v28  ;;  %v2845_v20 = vpop.f32.mrf.mxu1  ;;  %v14305_v28 = vld [vmem:[%s20105_s10 + $0x10] sm:$0xff]  }
 0x35f   : > { %3509 = vmatprep.mubr.bf16.mxu1 %v20400_v31  ;;  %v2933_v0 = vadd.f32 %v2845_v20, %v20537_v29  ;;  %v3161_v50 = vpop.f32.mrf.mxu0  ;;  %v16491_v58 = vadd.f32 %v3145_v27, %v2932_v38  ;;  %v14307_v27 = vld [vmem:[%s20105_s10 + $0x8] sm:$0xff]   ;;  %v20538_v29 = vld [vmem:[#allocation48_spill] sm:$0xff] }
 0x360   : > { %6546 = vmatpush1.bf16.msra.mxu0 %v14303_v37  ;;  %v2847_v57 = vpop.f32.mrf.mxu1  ;;  %v14306_v37 = vld [vmem:[%s20105_s10 + $0x68] sm:$0xff]  }
 0x361   : > { %6547 = vmatprep.subr.bf16.mxu0 %v20400_v31  ;;  %v3163_v62 = vpop.f32.mrf.mxu0  ;;  %v16494_v60 = vadd.f32 %v3147_v44, %v2933_v0  ;;  %6402 = vmatpush1.bf16.msra.mxu1 %v14306_v37  ;;  %v14308_v0 = vld [vmem:[%s20105_s10 + $0x60] sm:$0xff]  }
 0x362   : > { %v2848_v47 = vpop.f32.mrf.mxu1  ;;  %6403 = vmatprep.subr.bf16.mxu1 %v20400_v31  ;;  %v20539_v57 = vld [vmem:[#allocation49_spill] sm:$0xff] }
 0x363   : > { %v3165_v20 = vpop.f32.mrf.mxu0 }
 0x364   : > { %6548 = vmatpush1.bf16.msra.mxu0 %v14305_v28  ;;  %v2851_v38 = vpop.f32.mrf.mxu1 }
 0x365   : > { %6549 = vmatprep.subr.bf16.mxu0 %v20400_v31  ;;  %v2934_v21 = vadd.f32 %v2851_v38, %v20538_v29  ;;  %v3166_v44 = vpop.f32.mrf.mxu0  ;;  %6404 = vmatpush1.bf16.msra.mxu1 %v14308_v0 }
 0x366   : > { %v2853_v47 = vpop.f32.mrf.mxu1  ;;  %6413 = vmatprep.subr.bf16.mxu1 %v20400_v31 }
 0x367   : > { %v2935_v28 = vadd.f32 %v2853_v47, %v20539_v57  ;;  %v3169_v20 = vpop.f32.mrf.mxu0  ;;  %v16513_v53 = vadd.f32 %v3153_v26, %v2934_v21  ;;  %v14311_v26 = vld [vmem:[%s20105_s10 + $0x58] sm:$0xff]  }
 0x368   : > { %6550 = vmatpush1.bf16.msra.mxu0 %v14307_v27  ;;  %v2855_v38 = vpop.f32.mrf.mxu1  ;;  %v14310_v27 = vld [vmem:[%s20105_s10 + $0xb8] sm:$0xff]  }
 0x369   : > { %6551 = vmatprep.subr.bf16.mxu0 %v20400_v31  ;;  %v3171_v37 = vpop.f32.mrf.mxu0  ;;  %v16516_v29 = vadd.f32 %v3155_v40, %v2935_v28  ;;  %v20540_v57 = vld [vmem:[#allocation56_spill] sm:$0xff]  ;;  %6414 = vmatpush2.bf16.msra.mxu1 %v14310_v27  ;;  %v14312_v38 = vld [vmem:[%s20105_s10 + $0xb0] sm:$0xff]  }
 0x36a   : > { %v2856_v44 = vpop.f32.mrf.mxu1  ;;  %6415 = vmatprep.subr.bf16.mxu1 %v20400_v31 }
 0x36b   : > { %v3173_v47 = vpop.f32.mrf.mxu0  ;;  %v20541_v44 = vld [vmem:[#allocation59_spill] sm:$0xff] }
 0x36c   : > { %6552 = vmatpush1.bf16.msra.mxu0 %v14309_v9  ;;  %v2859_v21 = vpop.f32.mrf.mxu1 }
 0x36d   : > { %6561 = vmatprep.subr.bf16.mxu0 %v20400_v31  ;;  %v2936_v0 = vadd.f32 %v2859_v21, %v20540_v57  ;;  %v3174_v40 = vpop.f32.mrf.mxu0  ;;  %6416 = vmatpush2.bf16.msra.mxu1 %v14312_v38 }
 0x36e   : > { %v2861_v28 = vpop.f32.mrf.mxu1  ;;  %6417 = vmatprep.subr.bf16.mxu1 %v20400_v31 }
 0x36f   : > { %v2937_v9 = vadd.f32 %v2861_v28, %v20541_v44  ;;  %v3177_v47 = vpop.f32.mrf.mxu0  ;;  %v16535_v42 = vadd.f32 %v3161_v50, %v2936_v0  ;;  %v3274_v28 = vsel %vm1461_vm2, %v20542_v15, %v20542_v15  ;;  %v14315_v0 = vld [vmem:[%s20105_s10 + $0x48] sm:$0xff]  }
 0x370   : > { %6562 = vmatpush2.bf16.msra.mxu0 %v14311_v26  ;;  %v2863_v21 = vpop.f32.mrf.mxu1  ;;  %v14314_v26 = vld [vmem:[%s20105_s10 + $0xa8] sm:$0xff]   ;;  %3510 = vmatmul.mubr.bf16.gmra.mxu1 %v3274_v28  ;;  %v14317_v28 = vld [vmem:[%s20105_s10 + $0x40] sm:$0xff]  }
 0x371   : > { %6563 = vmatprep.subr.bf16.mxu0 %v20400_v31  ;;  %v3179_v27 = vpop.f32.mrf.mxu0  ;;  %v16538_v57 = vadd.f32 %v3163_v62, %v2937_v9  ;;  %6418 = vmatpush2.bf16.msra.mxu1 %v14314_v26  ;;  %v14316_v9 = vld [vmem:[%s20105_s10 + $0xa0] sm:$0xff]  }
 0x372   : > { %v2864_v40 = vpop.f32.mrf.mxu1  ;;  %6419 = vmatprep.subr.bf16.mxu1 %v20400_v31 }
 0x373   : > { %v3181_v50 = vpop.f32.mrf.mxu0 }
 0x374   : > { %6564 = vmatpush2.bf16.msra.mxu0 %v14313_v63  ;;  %v2867_v62 = vpop.f32.mrf.mxu1  ;;  %v20543_v63 = vld [vmem:[#allocation67_spill] sm:$0xff] }
 0x375   : > { %6565 = vmatprep.subr.bf16.mxu0 %v20400_v31  ;;  %v2938_v38 = vadd.f32 %v2867_v62, %v16033_v61  ;;  %v3182_v44 = vpop.f32.mrf.mxu0  ;;  %6420 = vmatpush2.bf16.msra.mxu1 %v14316_v9 }
 0x376   : > { %v2869_v15 = vpop.f32.mrf.mxu1  ;;  %8379 = vmatprep.subr.bf16.mxu1 %v20400_v31 }
 0x377   : > { %v2939_v21 = vadd.f32 %v2869_v15, %v20543_v63  ;;  %v3185_v40 = vpop.f32.mrf.mxu0  ;;  %v16560_v50 = vadd.f32 %v3169_v20, %v2938_v38 }
 0x378   : > { %6566 = vmatpush2.bf16.msra.mxu0 %v14315_v0  ;;  %v2871_v61 = vpop.f32.mrf.mxu1  ;;  %v20544_v0 = vld [vmem:[#allocation74_spill] sm:$0xff] }
 0x379   : > { %6567 = vmatprep.subr.bf16.mxu0 %v20400_v31  ;;  %v3187_v26 = vpop.f32.mrf.mxu0  ;;  %v16563_v62 = vadd.f32 %v3171_v37, %v2939_v21 }
 0x37a   : > { %v2872_v44 = vpop.f32.mrf.mxu1 }
 0x37b   : > { %v3189_v4 = vpop.f32.mrf.mxu0 }
 0x37c   : > { %6568 = vmatpush2.bf16.msra.mxu0 %v14317_v28  ;;  %v2875_v15 = vpop.f32.mrf.mxu1 }
 0x37d   : > { %v2940_v63 = vadd.f32 %v2875_v15, %v20544_v0  ;;  %v3190_v18 = vpop.f32.mrf.mxu0 }
 0x37e   : > { %v2877_v41 = vpop.f32.mrf.mxu1 }
 0x37f   : > { %v2941_v20 = vadd.f32 %v2877_v41, %v20545_v10  ;;  %v3193_v38 = vpop.f32.mrf.mxu0  ;;  %v16568_v61 = vadd.f32 %v3177_v47, %v2940_v63 }
 0x380   : > { %v2879_v25 = vpop.f32.mrf.mxu1 }
 0x381   : > { %v3195_v55 = vpop.f32.mrf.mxu0  ;;  %v16570_v9 = vadd.f32 %v3179_v27, %v2941_v20 }
 0x382   : > { %v2880_v37 = vpop.f32.mrf.mxu1 }
 0x383   : > { %v3197_v21 = vpop.f32.mrf.mxu0 }
 0x384   : > { %v2883_v44 = vpop.f32.mrf.mxu1 }
 0x385   : > { %v2942_v4 = vadd.f32 %v2883_v44, %v16154_v22  ;;  %v3198_v28 = vpop.f32.mrf.mxu0 }
 0x386   : > { %v2885_v5 = vpop.f32.mrf.mxu1 }
 0x387   : > { %v2943_v15 = vadd.f32 %v2885_v5, %v16158_v43  ;;  %v3201_v18 = vpop.f32.mrf.mxu0  ;;  %v16574_v0 = vadd.f32 %v3185_v40, %v2942_v4 }
 0x388   : > { %v2887_v10 = vpop.f32.mrf.mxu1 }
 0x389   : > { %v3203_v41 = vpop.f32.mrf.mxu0  ;;  %v16576_v47 = vadd.f32 %v3187_v26, %v2943_v15 }
 0x38a   : > { %v2888_v25 = vpop.f32.mrf.mxu1 }
 0x38b   : > { %v3205_v63 = vpop.f32.mrf.mxu0 }
 0x38c   : > { %v2891_v27 = vpop.f32.mrf.mxu1 }
 0x38d   : > { %v2944_v20 = vadd.f32 %v2891_v27, %v16172_v19  ;;  %v3206_v37 = vpop.f32.mrf.mxu0 }
 0x38e   : > { %v2893_v21 = vpop.f32.mrf.mxu1 }
 0x38f   : > { %v2945_v22 = vadd.f32 %v2893_v21, %v16182_v23  ;;  %v3209_v44 = vpop.f32.mrf.mxu0  ;;  %v16580_v28 = vadd.f32 %v3193_v38, %v2944_v20 }
 0x390   : > { %v2895_v5 = vpop.f32.mrf.mxu1 }
 0x391   : > { %v3211_v43 = vpop.f32.mrf.mxu0  ;;  %v16582_v40 = vadd.f32 %v3195_v55, %v2945_v22 }
 0x392   : > { %v2896_v4 = vpop.f32.mrf.mxu1 }
 0x393   : > { %v3213_v10 = vpop.f32.mrf.mxu0 }
 0x394   : > { %v2899_v26 = vpop.f32.mrf.mxu1 }
 0x395   : > { %v2946_v15 = vadd.f32 %v2899_v26, %v16202_v36  ;;  %v3214_v25 = vpop.f32.mrf.mxu0 }
 0x396   : > { %v2901_v63 = vpop.f32.mrf.mxu1 }
 0x397   : > { %v2947_v19 = vadd.f32 %v2901_v63, %v16215_v46  ;;  %v16586_v27 = vadd.f32 %v3201_v18, %v2946_v15  ;;  %v20549_v15 = vld [vmem:[#allocation3_spill] sm:$0xff] }
 0x398   : > { %v2903_v37 = vpop.f32.mrf.mxu1 }
 0x399   : > { %v16588_v23 = vadd.f32 %v3203_v41, %v2947_v19  ;;  %v16597_v41 = vsub.s32 0, %v20549_v15 }
 0x39a   : > { %v2904_v38 = vpop.f32.mrf.mxu1 }
 0x39b   : > { %20546 = vst [vmem:[#allocation34_spill] sm:$0xff] %v16588_v23  ;;  %20550 = vst [vmem:[#allocation35_spill] sm:$0xff] %v16597_v41  ;;  %v14390_v38 = vld [vmem:[%s14532_s17 + $0x18] sm:$0xff] }
 0x39c   : > { %v2907_v20 = vpop.f32.mrf.mxu1 }
 0x39d   : > { %v2948_v21 = vadd.f32 %v2907_v20, %v16248_v14  ;;  %v3546_v14 = vld [vmem:[%s20100_s5] sm:$0x3]  ;;  %v6677_v20 = vcombine.high %v14390_v38, %v14390_v38 }
 0x39e   : > { %v2909_v55 = vpop.f32.mrf.mxu1  ;;  %v16609_v37 = vrot.slane %v3546_v14, %v16597_v41 }
 0x39f   : > { %v2949_v22 = vadd.f32 %v2909_v55, %v16262_v17  ;;  %v16592_v5 = vadd.f32 %v3209_v44, %v2948_v21  ;;  %v16603_v17 = vsub.s32 1, %v20549_v15  ;;  %v6691_v15 = vrot.slane %v6677_v20, %v20433_v6 }
 0x3a0   : > { %v2911_v36 = vpop.f32.mrf.mxu1 }
 0x3a1   : > { %20547 = vst [vmem:[#allocation13_spill] sm:$0xff] %v16592_v5  ;;  %v16594_v4 = vadd.f32 %v3211_v43, %v2949_v22  ;;  %20551 = vst [vmem:[#allocation14_spill] sm:$0xff] %v16603_v17  ;;  %v3588_v43 = vld [vmem:[%s20101_s6] sm:$0x3] }
 0x3a2   : > { %v2912_v10 = vpop.f32.mrf.mxu1  ;;  %v16614_v36 = vrot.slane %v3588_v43, %v16597_v41 }
 0x3a3   : > { %20548 = vst [vmem:[#allocation39_spill] sm:$0xff] %v16594_v4  ;;  %v16617_v10 = vrot.slane %v3546_v14, %v16603_v17  ;;  %v6684_v14 = vrot.slane %v14390_v38, %v20433_v6 }
 0x3a4   : > { %v2915_v46 = vpop.f32.mrf.mxu1  ;;  %v3217_v26 = vpop.f32.mrf.mxu0 }
 0x3a5   : > { %v20552_v46 = vld [vmem:[#allocation7_spill] sm:$0xff]  ;;  %v16653_v38 = vrot.slane %v6684_v14, %v20433_v6 }
 0x3a6   : > { %v2916_v18 = vpop.f32.mrf.mxu1  ;;  %v3218_v63 = vpop.f32.mrf.mxu0 }
 0x3a7   : > { %v20553_v18 = vld [vmem:[#allocation5_spill] sm:$0xff]  ;;  %20560 = vst [vmem:[#allocation41_spill] sm:$0xff] %v16653_v38 }
 0x3a8   : > { %v2917_v25 = vpop.f32.mrf.mxu1  ;;  %v3219_v19 = vpop.f32.mrf.mxu0  ;;  %v6965_v26 = vcombine.low %v20553_v18, %v20552_v46  ;;  %v13658_v63 = vcombine.high %v20553_v18, %v20552_v46 }
 0x3aa   : > { %v2918_v44 = vpop.f32.mrf.mxu1  ;;  %v3220_v55 = vpop.f32.mrf.mxu0  ;;  %v16640_v18 = vrot.slane %v13658_v63, %v20433_v6 }
 0x3ab   : > { %v16626_v55 = vrot.slane %v3588_v43, %v16603_v17  ;;  %v16637_v43 = vrot.slane %v6965_v26, %v20433_v6 }
 0x3ac   : > { %v3391_v21 = vpop.f32.mrf.mxu1  ;;  %20557 = vst [vmem:[#allocation36_spill] sm:$0xff] %v16640_v18 }
 0x3ad   : > { %v3516_v22 = vadd.f32 %v3391_v21, %v16365_v49  ;;  %v20554_v49 = vld [vmem:[#allocation8_spill] sm:$0xff]  ;;  %v20555_v21 = vld [vmem:[#allocation6_spill] sm:$0xff]  ;;  %20556 = vst [vmem:[#allocation40_spill] sm:$0xff] %v16637_v43 }
 0x3ae   : > { %v3393_v25 = vpop.f32.mrf.mxu1  ;;  %v6967_v41 = vcombine.low %v20555_v21, %v20554_v49  ;;  %v6693_v21 = vcombine.high %v6691_v15, %v6691_v15 }
 0x3af   : > { %v3558_v44 = vmul.f32 %v16609_v37, %v3516_v22  ;;  %v3517_v19 = vadd.f32 %v3393_v25, %v16377_v34 }
 0x3b0   : > { %v3395_v16 = vpop.f32.mrf.mxu1  ;;  %v16646_v25 = vrot.slane %v6967_v41, %v20433_v6  ;;  %v16673_v45 = vrot.slane %v6693_v21, %v20433_v6 }
 0x3b1   : > { %v3600_v46 = vadd.f32 %v16614_v36, %v3558_v44  ;;  %v3559_v22 = vmul.f32 %v16617_v10, %v3517_v19  ;;  %v6692_v16 = vcombine.high %v6684_v14, %v6684_v14  ;;  %v6740_v44 = vcombine.high %v6732_v33, %v6732_v33  ;;  %v14392_v19 = vld [vmem:[%s14532_s17 + $0x38] sm:$0xff] }
 0x3b2   : > { %v3396_v34 = vpop.f32.mrf.mxu1  ;;  %20558 = vst [vmem:[#allocation15_spill] sm:$0xff] %v16646_v25  ;;  %v16659_v41 = vrot.slane %v14392_v19, %v20433_v6  ;;  %v16667_v14 = vrot.slane %v6732_v33, %v20433_v6  ;;  %20566 = vst [vmem:[#allocation43_spill] sm:$0xff] %v16673_v45 }
 0x3b3   : > { %v3601_v20 = vadd.f32 %v16626_v55, %v3559_v22  ;;  %v6773_v34 = vcombine.high %v14392_v19, %v14392_v19  ;;  %v3630_v3 = vmax.f32 %v3600_v46, 0.0  ;;  %v16656_v22 = vrot.slane %v6691_v15, %v20433_v6 }
 0x3b4   : > { %v3399_v17 = vpop.f32.mrf.mxu1  ;;  %20562 = vst [vmem:[#allocation16_spill] sm:$0xff] %v16659_v41  ;;  %20564 = vst [vmem:[#allocation44_spill] sm:$0xff] %v16667_v14  ;;  %v16670_v15 = vrot.slane %v6740_v44, %v20433_v6 }
 0x3b5   : > { %v3631_v26 = vmax.f32 %v3601_v20, 0.0  ;;  %v3518_v24 = vadd.f32 %v3399_v17, %v16392_v12  ;;  %20561 = vst [vmem:[#allocation37_spill] sm:$0xff] %v16656_v22  ;;  %v16664_v17 = vrot.slane %v6692_v16, %v20433_v6  ;;  %v6725_v20 = vcombine.high %v14391_v54, %v14391_v54  ;;  %v14393_v16 = vld [vmem:[%s14532_s17 + $0x48] sm:$0xff] }
 0x3b6   : > { %v3401_v35 = vpop.f32.mrf.mxu1  ;;  %20565 = vst [vmem:[#allocation42_spill] sm:$0xff] %v16670_v15  ;;  %v16686_v44 = vrot.slane %v14393_v16, %v20433_v6  ;;  %v6821_v8 = vcombine.high %v14393_v16, %v14393_v16 }
 0x3b7   : > { %v4340_v30 = vcombine.low %v3630_v3, %v3631_v26  ;;  %v4341_v48 = vcombine.high %v3630_v3, %v3631_v26  ;;  %v3560_v46 = vmul.f32 %v16609_v37, %v3518_v24  ;;  %v3519_v12 = vadd.f32 %v3401_v35, %v16398_v7  ;;  %20563 = vst [vmem:[#allocation17_spill] sm:$0xff] %v16664_v17 }
 0x3b8   : > { %v3403_v19 = vpop.f32.mrf.mxu1  ;;  %v16676_v3 = vrot.slane %v6773_v34, %v20433_v6  ;;  %20569 = vst [vmem:[#allocation21_spill] sm:$0xff] %v16686_v44  ;;  %v6788_v34 = vcombine.high %v16659_v41, %v16659_v41  ;;  %v16696_v54 = vrot.slane %v6725_v20, %v20433_v6 }
 0x3b9   : > { %v4348_v24 = vrot.slane %v4340_v30, %v20433_v6  ;;  %v3561_v35 = vmul.f32 %v16617_v10, %v3519_v12  ;;  %v3602_v21 = vadd.f32 %v16614_v36, %v3560_v46  ;;  %v4355_v30 = vrot.slane %v4341_v48, %v20433_v6 }
 0x3ba   : > { %20567 = vst [vmem:[#allocation46_spill] sm:$0xff] %v16676_v3  ;;  %v3404_v26 = vpop.f32.mrf.mxu1  ;;  %20570 = vst [vmem:[#allocation4_spill] sm:$0xff] %v16696_v54  ;;  %v16706_v48 = vrot.slane %v16676_v3, %v20433_v6  ;;  %v16717_v54 = vpop.f32.mrf.mxu0 }
 0x3bb   : > { %v4356_v12 = vcombine.high %v4348_v24, %v4348_v24  ;;  %v16693_v19 = vrot.slane %v4348_v24, %v20433_v6  ;;  %v3603_v32 = vadd.f32 %v16626_v55, %v3561_v35  ;;  %v14324_v26 = vld [vmem:[%s20102_s7 + $0x34] ss:$12 sps:$4 sm:$0xff]   ;;  %v14394_v24 = vld [vmem:[%s14532_s17 + $0x58] sm:$0xff]  ;;  %v6836_v35 = vcombine.high %v16686_v44, %v16686_v44  ;;  %20572 = vst [vmem:[#allocation49_spill] sm:$0xff] %v16717_v54 }
 0x3bc   : > { %20571 = vst [vmem:[#allocation48_spill] sm:$0xff] %v16706_v48  ;;  %v6869_v11 = vcombine.high %v14394_v24, %v14394_v24  ;;  %v3632_v16 = vmax.f32 %v3602_v21, 0.0  ;;  %7331 = vmatprep.subr.bf16.mxu0 %v14324_v26  ;;  %v16720_v48 = vrot.slane %v6788_v34, %v20433_v6  ;;  %v16726_v3 = vrot.slane %v4355_v30, %v20433_v6 }
 0x3bd   : > { %v16710_v20 = vrot.slane %v4356_v12, %v20433_v6  ;;  %v4386_v7 = vcombine.high %v16693_v19, %v16693_v19  ;;  %v3633_v63 = vmax.f32 %v3603_v32, 0.0  ;;  %v16723_v12 = vrot.slane %v14394_v24, %v20433_v6 }
 0x3be   : > { %v3407_v46 = vpop.f32.mrf.mxu1  ;;  %20573 = vst [vmem:[#allocation56_spill] sm:$0xff] %v16720_v48  ;;  %v16731_v32 = vrot.slane %v6821_v8, %v20433_v6  ;;  %v16735_v34 = vrot.slane %v6869_v11, %v20433_v6  ;;  %v16741_v15 = vrot.slane %v6836_v35, %v20433_v6  ;;  %v4357_v8 = vcombine.high %v4355_v30, %v4355_v30 }
 0x3bf   : > { %v3520_v49 = vadd.f32 %v3407_v46, %v16407_v1  ;;  %20574 = vst [vmem:[#allocation59_spill] sm:$0xff] %v16723_v12  ;;  %v4388_v44 = vcombine.high %v16710_v20, %v16710_v20  ;;  %v7487_v1 = vcombine.low %v3632_v16, %v3633_v63  ;;  %v7488_v21 = vcombine.high %v3632_v16, %v3633_v63  ;;  %v16745_v16 = vpop.f32.mrf.mxu0 }
 0x3c0   : > { %v3409_v41 = vpop.f32.mrf.mxu1  ;;  %20575 = vst [vmem:[#allocation45_spill] sm:$0xff] %v16731_v32  ;;  %20576 = vst [vmem:[#allocation67_spill] sm:$0xff] %v16735_v34  ;;  %v5839_v48 = vcombine.low %v16710_v20, %v4386_v7  ;;  %v6884_v11 = vcombine.high %v16723_v12, %v16723_v12  ;;  %v14395_v7 = vld [vmem:[%s14532_s17 + $0x68] sm:$0xff] }
 0x3c1   : > { %v3562_v46 = vmul.f32 %v16609_v37, %v3520_v49  ;;  %v5840_v24 = vcombine.low %v4388_v44, %v16726_v3  ;;  %v3521_v54 = vadd.f32 %v3409_v41, %v16415_v51  ;;  %20577 = vst [vmem:[#allocation74_spill] sm:$0xff] %v16741_v15  ;;  %v7495_v32 = vrot.slane %v7487_v1, %v20433_v6 }
 0x3c2   : > { %v3411_v26 = vpop.f32.mrf.mxu1  ;;  %20578 = vst [vmem:[#allocation77_spill] sm:$0xff] %v16745_v16  ;;  %v16751_v51 = vrot.slane %v5839_v48, %v20433_v6  ;;  %v6917_v30 = vcombine.high %v14395_v7, %v14395_v7  ;;  %v16758_v35 = vrot.slane %v14395_v7, %v20433_v6  ;;  %v7502_v1 = vrot.slane %v7488_v21, %v20433_v6 }
 0x3c3   : > { %v3604_v63 = vadd.f32 %v16614_v36, %v3562_v46  ;;  %v3563_v44 = vmul.f32 %v16617_v10, %v3521_v54  ;;  %v16754_v41 = vrot.slane %v5840_v24, %v20433_v6  ;;  %v7503_v46 = vcombine.high %v7495_v32, %v7495_v32 }
 0x3c4   : > { %v3412_v49 = vpop.f32.mrf.mxu1  ;;  %20579 = vst [vmem:[#allocation7_spill] sm:$0xff] %v16758_v35  ;;  %v16770_v16 = vrot.slane %v4357_v8, %v20433_v6  ;;  %v16774_v7 = vcombine.high %v16726_v3, %v16726_v3  ;;  %v16786_v24 = vrot.slane %v6884_v11, %v20433_v6  ;;  %v6932_v15 = vcombine.high %v16758_v35, %v16758_v35 }
 0x3c5   : > { %v16763_v49 = vrot.slane %v16735_v34, %v20433_v6  ;;  %v3605_v54 = vadd.f32 %v16626_v55, %v3563_v44  ;;  %v16777_v21 = vrot.slane %v7503_v46, %v20433_v6  ;;  %v3634_v12 = vmax.f32 %v3604_v63, 0.0 }
 0x3c6   : > { %v3415_v26 = vpop.f32.mrf.mxu1  ;;  %v5872_v8 = vcombine.high %v16751_v51, %v16754_v41  ;;  %20583 = vst [vmem:[#allocation79_spill] sm:$0xff] %v16786_v24  ;;  %v16791_v46 = vrot.slane %v7502_v1, %v20433_v6  ;;  %v16798_v14 = vrot.slane %v6917_v30, %v20433_v6  ;;  %v5841_v30 = vcombine.low %v16770_v16, %v16774_v7 }
 0x3c7   : > { %20580 = vst [vmem:[#allocation5_spill] sm:$0xff] %v16763_v49  ;;  %v3522_v48 = vadd.f32 %v3415_v26, %v16426_v13  ;;  %20581 = vst [vmem:[#allocation6_spill] sm:$0xff] %v16777_v21  ;;  %v16779_v49 = vpop.f32.mrf.mxu0  ;;  %v3635_v44 = vmax.f32 %v3605_v54, 0.0  ;;  %v7535_v63 = vcombine.high %v16777_v21, %v16777_v21 }
 0x3c8   : > { %v3417_v34 = vpop.f32.mrf.mxu1  ;;  %20582 = vst [vmem:[#allocation78_spill] sm:$0xff] %v16779_v49  ;;  %20584 = vst [vmem:[#allocation80_spill] sm:$0xff] %v16791_v46 }
 0x3c9   : > { %v3564_v13 = vmul.f32 %v16609_v37, %v3522_v48  ;;  %v3523_v26 = vadd.f32 %v3417_v34, %v16428_v39  ;;  %v4683_v48 = vcombine.low %v16693_v19, %v16710_v20  ;;  %v7504_v39 = vcombine.high %v7502_v1, %v7502_v1  ;;  %20585 = vst [vmem:[#allocation81_spill] sm:$0xff] %v16798_v14  ;;  %v16805_v45 = vpop.f32.mrf.mxu0 }
 0x3ca   : > { %v3419_v54 = vpop.f32.mrf.mxu1  ;;  %v4389_v34 = vcombine.low %v3634_v12, %v3635_v44  ;;  %v4390_v49 = vcombine.high %v3634_v12, %v3635_v44  ;;  %v16801_v11 = vcombine.low %v7535_v63, %v16791_v46  ;;  %20587 = vst [vmem:[#allocation83_spill] sm:$0xff] %v16805_v45  ;;  %v16815_v44 = vrot.slane %v6932_v15, %v20433_v6 }
 0x3cb   : > { %v3606_v35 = vadd.f32 %v16614_v36, %v3564_v13  ;;  %v3565_v24 = vmul.f32 %v16617_v10, %v3523_v26  ;;  %v16808_v54 = vrot.slane %v7495_v32, %v20433_v6  ;;  %v13560_v13 = vcombine.high %v16693_v19, %v16710_v20 }
 0x3cc   : > { %20586 = vst [vmem:[#allocation82_spill] sm:$0xff] %v16801_v11  ;;  %v3420_v25 = vpop.f32.mrf.mxu1  ;;  %v4397_v1 = vrot.slane %v4389_v34, %v20433_v6  ;;  %v4404_v12 = vrot.slane %v4390_v49, %v20433_v6  ;;  %20589 = vst [vmem:[#allocation85_spill] sm:$0xff] %v16815_v44  ;;  %v5832_v63 = vcombine.high %v16770_v16, %v16770_v16 }
 0x3cd   : > { %20588 = vst [vmem:[#allocation84_spill] sm:$0xff] %v16808_v54  ;;  %v4685_v25 = vcombine.low %v16726_v3, %v16770_v16  ;;  %v3607_v26 = vadd.f32 %v16626_v55, %v3565_v24  ;;  %v16825_v49 = vrot.slane %v7504_v39, %v20433_v6  ;;  %v16828_v45 = vrot.slane %v4683_v48, %v20433_v6  ;;  %v16831_v3 = vpop.f32.mrf.mxu0 }
 0x3ce   : > { %v3423_v32 = vpop.f32.mrf.mxu1  ;;  %v4405_v34 = vcombine.high %v4397_v1, %v4397_v1  ;;  %v4406_v15 = vcombine.high %v4404_v12, %v4404_v12  ;;  %v3636_v11 = vmax.f32 %v3606_v35, 0.0  ;;  %20591 = vst [vmem:[#allocation87_spill] sm:$0xff] %v16831_v3  ;;  %v7830_v16 = vcombine.low %v16808_v54, %v16777_v21 }
 0x3cf   : > { %20590 = vst [vmem:[#allocation86_spill] sm:$0xff] %v16825_v49  ;;  %v3637_v44 = vmax.f32 %v3607_v26, 0.0  ;;  %v3524_v19 = vadd.f32 %v3423_v32, %v16447_v56  ;;  %v16841_v48 = vrot.slane %v5841_v30, %v20433_v6  ;;  %v16847_v3 = vcombine.high %v16791_v46, %v16791_v46 }
 0x3d0   : > { %v3425_v20 = vpop.f32.mrf.mxu1  ;;  %v16838_v39 = vrot.slane %v4405_v34, %v20433_v6  ;;  %v13677_v24 = vcombine.high %v16808_v54, %v16777_v21  ;;  %v16854_v30 = vrot.slane %v4404_v12, %v20433_v6  ;;  %v20595_v12 = vcombine.low %v16751_v51, %v16754_v41 }
 0x3d1   : > { %v7536_v14 = vcombine.low %v3636_v11, %v3637_v44  ;;  %v7537_v35 = vcombine.high %v3636_v11, %v3637_v44  ;;  %v3566_v26 = vmul.f32 %v16609_v37, %v3524_v19  ;;  %v3525_v56 = vadd.f32 %v3425_v20, %v16450_v59  ;;  %20593 = vst [vmem:[#allocation89_spill] sm:$0xff] %v16847_v3 }
 0x3d2   : > { %20592 = vst [vmem:[#allocation88_spill] sm:$0xff] %v16838_v39  ;;  %v3427_v32 = vpop.f32.mrf.mxu1  ;;  %v16857_v11 = vrot.slane %v4406_v15, %v20433_v6  ;;  %v5842_v21 = vcombine.low %v5832_v63, %v16838_v39  ;;  %v16871_v34 = vrot.slane %v20595_v12, %v20433_v6  ;;  %v16874_v15 = vrot.slane %v5872_v8, %v20433_v6 }
 0x3d3   : > { %v16860_v44 = vrot.slane %v7536_v14, %v20433_v6  ;;  %v3608_v59 = vadd.f32 %v16614_v36, %v3566_v26  ;;  %v3567_v19 = vmul.f32 %v16617_v10, %v3525_v56  ;;  %v16864_v32 = vpop.f32.mrf.mxu0  ;;  %v16877_v14 = vrot.slane %v13560_v13, %v20433_v6 }
 0x3d4   : > { %v3428_v20 = vpop.f32.mrf.mxu1  ;;  %20594 = vst [vmem:[#allocation90_spill] sm:$0xff] %v16864_v32  ;;  %v16880_v26 = vrot.slane %v4397_v1, %v20433_v6  ;;  %v16892_v41 = vrot.slane %v7830_v16, %v20433_v6  ;;  %v16897_v1 = vrot.slane %v5842_v21, %v20433_v6  ;;  %v16900_v12 = vrot.slane %v13677_v24, %v20433_v6 }
 0x3d5   : > { %v16884_v56 = vrot.slane %v16860_v44, %v20433_v6  ;;  %v16887_v20 = vrot.slane %v4685_v25, %v20433_v6  ;;  %v16889_v51 = vpop.f32.mrf.mxu0  ;;  %v3609_v8 = vadd.f32 %v16626_v55, %v3567_v19  ;;  %v16904_v32 = vcombine.high %v16854_v30, %v16854_v30 }
 0x3d6   : > { %20596 = vst [vmem:[#allocation91_spill] sm:$0xff] %v16880_v26  ;;  %v3431_v63 = vpop.f32.mrf.mxu1  ;;  %20598 = vst [vmem:[#allocation93_spill] sm:$0xff] %v16889_v51  ;;  %v13596_v25 = vcombine.high %v16880_v26, %v16838_v39  ;;  %v5906_v16 = vcombine.low %v16854_v30, %v16857_v11  ;;  %v3638_v51 = vmax.f32 %v3608_v59, 0.0  ;;  %v7551_v43 = vrot.slane %v7537_v35, %v20433_v6 }
 0x3d7   : > { %20597 = vst [vmem:[#allocation92_spill] sm:$0xff] %v16884_v56  ;;  %20599 = vst [vmem:[#allocation94_spill] sm:$0xff] %v16892_v41  ;;  %v3526_v13 = vadd.f32 %v3431_v63, %v16467_v52  ;;  %v16910_v54 = vpop.f32.mrf.mxu0  ;;  %v3639_v21 = vmax.f32 %v3609_v8, 0.0  ;;  %v5874_v38 = vcombine.high %v16841_v48, %v16897_v1  ;;  %v5873_v49 = vcombine.low %v16841_v48, %v16897_v1 }
 0x3d8   : > { %20600 = vst [vmem:[#allocation95_spill] sm:$0xff] %v16900_v12  ;;  %20601 = vst [vmem:[#allocation96_spill] sm:$0xff] %v16904_v32  ;;  %v3433_v19 = vpop.f32.mrf.mxu1  ;;  %v16931_v35 = vrot.slane %v13596_v25, %v20433_v6  ;;  %v7553_v25 = vcombine.high %v7551_v43, %v7551_v43 }
 0x3d9   : > { %20602 = vst [vmem:[#allocation97_spill] sm:$0xff] %v16910_v54  ;;  %v3568_v24 = vmul.f32 %v16609_v37, %v3526_v13  ;;  %v3527_v63 = vadd.f32 %v3433_v19, %v16474_v2  ;;  %v16923_v33 = vpop.f32.mrf.mxu0  ;;  %v4438_v13 = vcombine.low %v3638_v51, %v3639_v21  ;;  %v4439_v52 = vcombine.high %v3638_v51, %v3639_v21 }
 0x3da   : > { %v3435_v18 = vpop.f32.mrf.mxu1  ;;  %20603 = vst [vmem:[#allocation98_spill] sm:$0xff] %v16923_v33  ;;  %20604 = vst [vmem:[#allocation99_spill] sm:$0xff] %v16931_v35  ;;  %v16935_v54 = vrot.slane %v5874_v38, %v20433_v6  ;;  %v16938_v33 = vrot.slane %v5906_v16, %v20433_v6  ;;  %v13597_v38 = vcombine.high %v16854_v30, %v16857_v11 }
 0x3db   : > { %v3569_v2 = vmul.f32 %v16617_v10, %v3527_v63  ;;  %v3610_v19 = vadd.f32 %v16614_v36, %v3568_v24  ;;  %v4446_v8 = vrot.slane %v4438_v13, %v20433_v6  ;;  %v4453_v51 = vrot.slane %v4439_v52, %v20433_v6 }
 0x3dc   : > { %v3436_v59 = vpop.f32.mrf.mxu1  ;;  %20605 = vst [vmem:[#allocation100_spill] sm:$0xff] %v16938_v33  ;;  %v7552_v63 = vcombine.high %v16860_v44, %v16860_v44  ;;  %v16952_v16 = vrot.slane %v7551_v43, %v20433_v6  ;;  %v4686_v24 = vcombine.low %v16774_v7, %v16880_v26 }
 0x3dd   : > { %v3611_v21 = vadd.f32 %v16626_v55, %v3569_v2  ;;  %v16949_v59 = vpop.f32.mrf.mxu0  ;;  %v4454_v13 = vcombine.high %v4446_v8, %v4446_v8  ;;  %v4455_v52 = vcombine.high %v4453_v51, %v4453_v51  ;;  %v16955_v2 = vrot.slane %v4446_v8, %v20433_v6 }
 0x3de   : > { %v3439_v18 = vpop.f32.mrf.mxu1  ;;  %20606 = vst [vmem:[#allocation101_spill] sm:$0xff] %v16949_v59  ;;  %20607 = vst [vmem:[#allocation102_spill] sm:$0xff] %v16952_v16  ;;  %v3640_v17 = vmax.f32 %v3610_v19, 0.0  ;;  %v16963_v59 = vrot.slane %v4453_v51, %v20433_v6 }
 0x3df   : > { %20608 = vst [vmem:[#allocation103_spill] sm:$0xff] %v16955_v2  ;;  %v3641_v44 = vmax.f32 %v3611_v21, 0.0  ;;  %v3528_v22 = vadd.f32 %v3439_v18, %v16491_v58  ;;  %v16960_v12 = vpop.f32.mrf.mxu0  ;;  %v16966_v43 = vrot.slane %v4454_v13, %v20433_v6  ;;  %v16969_v3 = vrot.slane %v4455_v52, %v20433_v6 }
 0x3e0   : > { %v3441_v41 = vpop.f32.mrf.mxu1  ;;  %20609 = vst [vmem:[#allocation104_spill] sm:$0xff] %v16960_v12  ;;  %v4484_v8 = vcombine.high %v16955_v2, %v16955_v2 }
 0x3e1   : > { %v7585_v19 = vcombine.low %v3640_v17, %v3641_v44  ;;  %v7586_v58 = vcombine.high %v3640_v17, %v3641_v44  ;;  %v3570_v18 = vmul.f32 %v16609_v37, %v3528_v22  ;;  %v3529_v7 = vadd.f32 %v3441_v41, %v16494_v60  ;;  %v16975_v12 = vpop.f32.mrf.mxu0 }
 0x3e2   : > { %v3443_v21 = vpop.f32.mrf.mxu1  ;;  %20610 = vst [vmem:[#allocation105_spill] sm:$0xff] %v16975_v12  ;;  %v4486_v13 = vcombine.high %v16966_v43, %v16966_v43  ;;  %v16986_v17 = vrot.slane %v7552_v63, %v20433_v6  ;;  %v5908_v60 = vcombine.low %v16966_v43, %v4484_v8  ;;  %v5938_v44 = vcombine.high %v16931_v35, %v16938_v33 }
 0x3e3   : > { %v3571_v22 = vmul.f32 %v16617_v10, %v3529_v7  ;;  %v16993_v21 = vrot.slane %v7553_v25, %v20433_v6  ;;  %v3612_v48 = vadd.f32 %v16614_v36, %v3570_v18  ;;  %v16999_v1 = vpop.f32.mrf.mxu0  ;;  %v17005_v8 = vcombine.high %v16963_v59, %v16963_v59 }
 0x3e4   : > { %20611 = vst [vmem:[#allocation106_spill] sm:$0xff] %v16986_v17  ;;  %v3444_v41 = vpop.f32.mrf.mxu1  ;;  %v5971_v51 = vcombine.low %v4486_v13, %v16963_v59  ;;  %20613 = vst [vmem:[#allocation108_spill] sm:$0xff] %v16999_v1  ;;  %v17008_v25 = vrot.slane %v13597_v38, %v20433_v6  ;;  %v7593_v13 = vrot.slane %v7585_v19, %v20433_v6 }
 0x3e5   : > { %20612 = vst [vmem:[#allocation107_spill] sm:$0xff] %v16993_v21  ;;  %v17011_v41 = vrot.slane %v4686_v24, %v20433_v6  ;;  %v3613_v18 = vadd.f32 %v16626_v55, %v3571_v22  ;;  %v17017_v1 = vrot.slane %v5873_v49, %v20433_v6  ;;  %v7600_v63 = vrot.slane %v7586_v58, %v20433_v6  ;;  %v17028_v49 = vpop.f32.mrf.mxu0 }
 0x3e6   : > { %v3447_v7 = vpop.f32.mrf.mxu1  ;;  %v17021_v21 = vrot.slane %v5908_v60, %v20433_v6  ;;  %v5954_v38 = vrot.slane %v5938_v44, %v20433_v6  ;;  %v4437_v24 = vcombine.high %v16838_v39, %v16838_v39  ;;  %v3642_v16 = vmax.f32 %v3612_v48, 0.0  ;;  %20615 = vst [vmem:[#allocation110_spill] sm:$0xff] %v17028_v49 }
 0x3e7   : > { %v3530_v52 = vadd.f32 %v3447_v7, %v16513_v53  ;;  %v3643_v19 = vmax.f32 %v3613_v18, 0.0  ;;  %v4718_v60 = vcombine.high %v16887_v20, %v17011_v41  ;;  %v20616_v44 = vcombine.low %v16828_v45, %v16877_v14  ;;  %v5602_v58 = vpop.f32.mrf.mxu0 }
 0x3e8   : > { %v3449_v12 = vpop.f32.mrf.mxu1  ;;  %20614 = vst [vmem:[#allocation109_spill] sm:$0xff] %v17021_v21  ;;  %v7602_v56 = vcombine.high %v7600_v63, %v7600_v63  ;;  %v4717_v4 = vcombine.low %v16887_v20, %v17011_v41 }
 0x3e9   : > { %v3572_v22 = vmul.f32 %v16609_v37, %v3530_v52  ;;  %v3531_v53 = vadd.f32 %v3449_v12, %v16516_v29  ;;  %v17038_v48 = vrot.slane %v20616_v44, %v20433_v6  ;;  %v20617_v29 = vcombine.high %v16828_v45, %v16877_v14 }
 0x3ea   : > { %v3451_v7 = vpop.f32.mrf.mxu1  ;;  %v7601_v52 = vcombine.high %v7593_v13, %v7593_v13  ;;  %v4487_v18 = vcombine.low %v3642_v16, %v3643_v19  ;;  %v4488_v49 = vcombine.high %v3642_v16, %v3643_v19  ;;  %v5940_v44 = vcombine.high %v17008_v25, %v17021_v21 }
 0x3eb   : > { %v17044_v12 = vrot.slane %v20617_v29, %v20433_v6  ;;  %v3614_v7 = vadd.f32 %v16614_v36, %v3572_v22  ;;  %v3573_v46 = vmul.f32 %v16617_v10, %v3531_v53  ;;  %v17053_v45 = vrot.slane %v7593_v13, %v20433_v6  ;;  %v5603_v22 = vpop.f32.mrf.mxu0 }
 0x3ec   : > { %v3452_v17 = vpop.f32.mrf.mxu1  ;;  %v17056_v14 = vrot.slane %v7600_v63, %v20433_v6  ;;  %v4495_v16 = vrot.slane %v4487_v18, %v20433_v6  ;;  %v4502_v19 = vrot.slane %v4488_v49, %v20433_v6  ;;  %v17061_v53 = vrot.slane %v5971_v51, %v20433_v6 }
 0x3ed   : > { %20618 = vst [vmem:[#allocation111_spill] sm:$0xff] %v17053_v45  ;;  %v3615_v17 = vadd.f32 %v16626_v55, %v3573_v46  ;;  %v5968_v58 = vrot.slane %v5940_v44, %v20433_v6  ;;  %v17066_v20 = vrot.slane %v4718_v60, %v20433_v6  ;;  %v17069_v13 = vrot.slane %v7601_v52, %v20433_v6 }
 0x3ee   : > { %20619 = vst [vmem:[#allocation112_spill] sm:$0xff] %v17056_v14  ;;  %20620 = vst [vmem:[#allocation113_spill] sm:$0xff] %v17061_v53  ;;  %v3455_v41 = vpop.f32.mrf.mxu1  ;;  %v4503_v63 = vcombine.high %v4495_v16, %v4495_v16  ;;  %v17072_v29 = vrot.slane %v4495_v16, %v20433_v6  ;;  %v3644_v49 = vmax.f32 %v3614_v7, 0.0  ;;  %v4750_v46 = vcombine.low %v4437_v24, %v16854_v30 }
 0x3ef   : > { %20621 = vst [vmem:[#allocation114_spill] sm:$0xff] %v17069_v13  ;;  %v3645_v18 = vmax.f32 %v3615_v17, 0.0  ;;  %v5970_v22 = vcombine.low %v5954_v38, %v5968_v58  ;;  %v17078_v60 = vrot.slane %v7602_v56, %v20433_v6  ;;  %v17082_v52 = vcombine.high %v17056_v14, %v17056_v14 }
 0x3f0   : > { %20622 = vst [vmem:[#allocation115_spill] sm:$0xff] %v17072_v29  ;;  %v3457_v44 = vpop.f32.mrf.mxu1  ;;  %v4504_v5 = vcombine.high %v4502_v19, %v4502_v19  ;;  %v20625_v16 = vcombine.high %v16880_v26, %v16880_v26  ;;  %v20626_v58 = vcombine.low %v16874_v15, %v16935_v54  ;;  %v4752_v56 = vcombine.low %v16955_v2, %v16966_v43 }
 0x3f1   : > { %20623 = vst [vmem:[#allocation116_spill] sm:$0xff] %v17078_v60  ;;  %20624 = vst [vmem:[#allocation117_spill] sm:$0xff] %v17082_v52  ;;  %v7634_v38 = vcombine.low %v3644_v49, %v3645_v18  ;;  %v7635_v17 = vcombine.high %v3644_v49, %v3645_v18  ;;  %v17098_v26 = vrot.slane %v4502_v19, %v20433_v6 }
 0x3f2   : > { %v4749_v7 = vcombine.low %v16838_v39, %v20625_v16  ;;  %v6272_v30 = vpack.c.bf16 %v5970_v22, %v20626_v58  ;;  %v3459_v24 = vpop.f32.mrf.mxu1  ;;  %v5939_v49 = vcombine.low %v17008_v25, %v17021_v21  ;;  %v17103_v18 = vrot.slane %v4503_v63, %v20433_v6  ;;  %v17133_v21 = vpop.f32.mrf.mxu0 }
 0x3f3   : > { %v4533_v54 = vcombine.high %v17072_v29, %v17072_v29  ;;  %v17108_v15 = vrot.slane %v7634_v38, %v20433_v6  ;;  %v4766_v22 = vrot.slane %v4750_v46, %v20433_v6  ;;  %v17113_v19 = vrot.slane %v4504_v5, %v20433_v6  ;;  %20632 = vst [vmem:[#allocation122_spill] sm:$0xff] %v17133_v21 }
 0x3f4   : > { %20627 = vst [vmem:[#allocation118_spill] sm:$0xff] %v17103_v18  ;;  %13638 = vmatprep.mubr.msk.bf16.mxu1 %vm6376_vm3, %v6272_v30  ;;  %v3460_v16 = vpop.f32.mrf.mxu1  ;;  %v4759_v58 = vrot.slane %v4749_v7, %v20433_v6  ;;  %v20629_v25 = vcombine.low %v16857_v11, %v16904_v32  ;;  %v4780_v24 = vrot.slane %v4752_v56, %v20433_v6  ;;  %v17165_v52 = vpop.f32.mrf.mxu0 }
 0x3f5   : > { %20628 = vst [vmem:[#allocation119_spill] sm:$0xff] %v17113_v19  ;;  %v17127_v46 = vrot.slane %v17108_v15, %v20433_v6  ;;  %v4739_v5 = vrot.slane %v4717_v4, %v20433_v6  ;;  %v3532_v30 = vadd.f32 %v3455_v41, %v16535_v42  ;;  %v17137_v56 = vcombine.high %v17098_v26, %v17098_v26 }
 0x3f6   : > { %v17120_v63 = vrot.slane %v20629_v25, %v20433_v6  ;;  %v3463_v7 = vpop.f32.mrf.mxu1  ;;  %v4781_v16 = vcombine.low %v4759_v58, %v4766_v22  ;;  %v4782_v23 = vcombine.high %v4759_v58, %v4766_v22  ;;  %v17140_v38 = vcombine.low %v17103_v18, %v4533_v54  ;;  %20635 = vst [vmem:[#allocation125_spill] sm:$0xff] %v17165_v52 }
 0x3f7   : > { %20631 = vst [vmem:[#allocation121_spill] sm:$0xff] %v17127_v46  ;;  %20633 = vst [vmem:[#allocation123_spill] sm:$0xff] %v17137_v56  ;;  %v13598_v4 = vcombine.high %v17072_v29, %v17103_v18  ;;  %v5961_v42 = vrot.slane %v5939_v49, %v20433_v6  ;;  %v6037_v22 = vcombine.low %v17098_v26, %v17113_v19 }
 0x3f8   : > { %20630 = vst [vmem:[#allocation120_spill] sm:$0xff] %v17120_v63  ;;  %v4783_v51 = vcombine.low %v17120_v63, %v4780_v24  ;;  %v4784_v25 = vcombine.high %v17120_v63, %v4780_v24  ;;  %v3465_v41 = vpop.f32.mrf.mxu1  ;;  %v17150_v24 = vrot.slane %v4781_v16, %v20433_v6  ;;  %v17154_v54 = vrot.slane %v4782_v23, %v20433_v6 }
 0x3f9   : > { %v3574_v39 = vmul.f32 %v16609_v37, %v3532_v30  ;;  %v5903_v49 = vcombine.low %v16871_v34, %v17017_v1  ;;  %v5937_v14 = vcombine.low %v16931_v35, %v16938_v33  ;;  %v4747_v58 = vcombine.low %v17038_v48, %v4739_v5 }
 0x3fa   : > { %v4805_v21 = vrot.slane %v4783_v51, %v20433_v6  ;;  %20634 = vst [vmem:[#allocation124_spill] sm:$0xff] %v17154_v54  ;;  %v4812_v32 = vrot.slane %v4784_v25, %v20433_v6  ;;  %v3467_v60 = vpop.f32.mrf.mxu1  ;;  %v3533_v51 = vadd.f32 %v3457_v44, %v16538_v57  ;;  %v17168_v23 = vrot.slane %v7635_v17, %v20433_v6 }
 0x3fb   : > { %v3534_v25 = vadd.f32 %v3463_v7, %v16560_v50  ;;  %v3535_v34 = vadd.f32 %v3465_v41, %v16563_v62  ;;  %v3616_v60 = vadd.f32 %v16614_v36, %v3574_v39  ;;  %v5947_v48 = vrot.slane %v5937_v14, %v20433_v6  ;;  %v14322_v39 = vld [vmem:[%s20102_s7 + $0x30] ss:$12 sps:$4 sm:$0xff]   ;;  %v17187_v14 = vpop.f32.mrf.mxu0 }
 0x3fc   : > { %v4813_v16 = vcombine.low %v17150_v24, %v4805_v21  ;;  %v4814_v30 = vcombine.low %v17154_v54, %v4812_v32  ;;  %v3468_v1 = vpop.f32.mrf.mxu1  ;;  %v3575_v21 = vmul.f32 %v16617_v10, %v3533_v51  ;;  %v17177_v57 = vrot.slane %v13598_v4, %v20433_v6  ;;  %20638 = vst [vmem:[#allocation127_spill] sm:$0xff] %v17187_v14 }
 0x3fd   : > { %v20637_v44 = vcombine.low %v17044_v12, %v17066_v20  ;;  %v3576_v32 = vmul.f32 %v16609_v37, %v3534_v25  ;;  %v3577_v50 = vmul.f32 %v16617_v10, %v3535_v34  ;;  %v17190_v7 = vrot.slane %v6037_v22, %v20433_v6 }
 0x3fe   : > { %v5115_v5 = vpack.c.bf16 %v4813_v16, %v4747_v58  ;;  %20636 = vst [vmem:[#allocation126_spill] sm:$0xff] %v17177_v57  ;;  %v3471_v62 = vpop.f32.mrf.mxu1  ;;  %v5969_v4 = vcombine.low %v5947_v48, %v5961_v42  ;;  %v3617_v41 = vadd.f32 %v16626_v55, %v3575_v21  ;;  %v13561_v12 = vcombine.high %v16955_v2, %v16966_v43  ;;  %v14318_v42 = vld [vmem:[%s20105_s10 + $0xf8] sm:$0xff]  }
 0x3ff   : > { %v5116_v17 = vpack.c.bf16 %v4814_v30, %v20637_v44  ;;  %20639 = vst [vmem:[#allocation128_spill] sm:$0xff] %v17190_v7  ;;  %v3618_v20 = vadd.f32 %v16614_v36, %v3576_v32  ;;  %v3619_v58 = vadd.f32 %v16626_v55, %v3577_v50  ;;  %v3536_v16 = vadd.f32 %v3471_v62, %v16568_v61  ;;  %v17208_v48 = vld [vmem:[%s20102_s7 + $0x38] ss:$12 sps:$4 sm:$0xff]  }
 0x400   : > { %v3473_v51 = vpop.f32.mrf.mxu1  ;;  %v4816_v30 = vcombine.low %v16963_v59, %v16969_v3  ;;  %v3646_v22 = vmax.f32 %v3616_v60, 0.0  ;;  %v6271_v25 = vpack.c.bf16 %v5969_v4, %v5903_v49  ;;  %v3647_v34 = vmax.f32 %v3617_v41, 0.0  ;;  %20640 = vst [vmem:[#allocation129_spill] sm:$0xff] %v17208_v48  ;;  %v17216_v49 = vpop.f32.mrf.mxu0 }
 0x401   : > { %13654 = vmatprep.mubr.msk.bf16.mxu0 %vm6376_vm3, %v5116_v17  ;;  %v3537_v1 = vadd.f32 %v3473_v51, %v16570_v9  ;;  %v3648_v61 = vmax.f32 %v3618_v20, 0.0  ;;  %v3649_v21 = vmax.f32 %v3619_v58, 0.0  ;;  %v17211_v17 = vrot.slane %v13561_v12, %v20433_v6  ;;  %20641 = vst [vmem:[#allocation130_spill] sm:$0xff] %v17216_v49 }
 0x402   : > { %6570 = vmatmul.mubr.bf16.vlgmr.msra.gmra.mxu0 %v5115_v5  ;;  %v3475_v44 = vpop.f32.mrf.mxu1  ;;  %v17214_v32 = vrot.slane %v4816_v30, %v20433_v6  ;;  %v7650_v9 = vcombine.high %v17108_v15, %v17108_v15  ;;  %v7651_v60 = vcombine.high %v17168_v23, %v17168_v23  ;;  %6422 = vmatmul.mubr.bf16.vlgmr.msra.gmra.mxu1 %v6271_v25  ;;  %v14319_v15 = vld [vmem:[%s20105_s10 + $0xf0] sm:$0xff]   ;;  %v17241_v25 = vpop.f32.mrf.mxu0 }
 0x403   : > { %7332 = vmatpush1.bf16.msra.mxu0 %v14322_v39  ;;  %v4536_v5 = vcombine.low %v3646_v22, %v3647_v34  ;;  %v4537_v50 = vcombine.high %v3646_v22, %v3647_v34  ;;  %v17224_v62 = vrot.slane %v17168_v23, %v20433_v6  ;;  %v7683_v4 = vcombine.low %v3648_v61, %v3649_v21 }
 0x404   : > { %v7684_v41 = vcombine.high %v3648_v61, %v3649_v21  ;;  %v3578_v12 = vmul.f32 %v16609_v37, %v3536_v16  ;;  %v3476_v39 = vpop.f32.mrf.mxu1  ;;  %8380 = vmatpush1.bf16.msra.mxu1 %v14318_v42  ;;  %v4817_v51 = vcombine.low %v17005_v8, %v17072_v29  ;;  %14000 = vmatprep.subr.bf16.mxu0 %v17208_v48 }
 0x405   : > { %20642 = vst [vmem:[#allocation131_spill] sm:$0xff] %v17224_v62  ;;  %v4544_v20 = vrot.slane %v4536_v5, %v20433_v6  ;;  %v4551_v58 = vrot.slane %v4537_v50, %v20433_v6  ;;  %8381 = vmatprep.subr.bf16.mxu1 %v20400_v31  ;;  %v7691_v23 = vrot.slane %v7683_v4, %v20433_v6  ;;  %20643 = vst [vmem:[#allocation132_spill] sm:$0xff] %v17241_v25  ;;  %v14320_v39 = vld [vmem:[%s20105_s10 + $0xe8] sm:$0xff]  }
 0x406   : > { %v7698_v16 = vrot.slane %v7684_v41, %v20433_v6  ;;  %v3579_v30 = vmul.f32 %v16617_v10, %v3537_v1  ;;  %v3479_v42 = vpop.f32.mrf.mxu1  ;;  %v17250_v5 = vrot.slane %v7650_v9, %v20433_v6  ;;  %v3620_v1 = vadd.f32 %v16614_v36, %v3578_v12  ;;  %v17270_v12 = vpop.f32.mrf.mxu0 }
 0x407   : > { %v4552_v34 = vcombine.high %v4544_v20, %v4544_v20  ;;  %v4553_v61 = vcombine.high %v4551_v58, %v4551_v58  ;;  %v17244_v21 = vrot.slane %v4544_v20, %v20433_v6  ;;  %v17247_v44 = vrot.slane %v4551_v58, %v20433_v6  ;;  %20650 = vst [vmem:[#allocation139_spill] sm:$0xff] %v17270_v12 }
 0x408   : > { %20646 = vst [vmem:[#allocation135_spill] sm:$0xff] %v17250_v5  ;;  %v7699_v50 = vcombine.high %v7691_v23, %v7691_v23  ;;  %v3481_v4 = vpop.f32.mrf.mxu1  ;;  %v17255_v41 = vrot.slane %v17140_v38, %v20433_v6  ;;  %8382 = vmatpush1.bf16.msra.mxu1 %v14319_v15  ;;  %v17261_v20 = vrot.slane %v7651_v60, %v20433_v6 }
 0x409   : > { %20644 = vst [vmem:[#allocation133_spill] sm:$0xff] %v17244_v21  ;;  %20645 = vst [vmem:[#allocation134_spill] sm:$0xff] %v17247_v44  ;;  %v17264_v58 = vrot.slane %v4552_v34, %v20433_v6  ;;  %v7700_v9 = vcombine.high %v7698_v16, %v7698_v16  ;;  %v17267_v22 = vrot.slane %v7698_v16, %v20433_v6  ;;  %8383 = vmatprep.subr.bf16.mxu1 %v20400_v31  ;;  %v14321_v16 = vld [vmem:[%s20105_s10 + $0xe0] sm:$0xff]  }
 0x40a   : > { %20647 = vst [vmem:[#allocation136_spill] sm:$0xff] %v17255_v41  ;;  %20648 = vst [vmem:[#allocation137_spill] sm:$0xff] %v17261_v20  ;;  %v17275_v15 = vrot.slane %v7699_v50, %v20433_v6  ;;  %v3621_v60 = vadd.f32 %v16626_v55, %v3579_v30  ;;  %v3483_v25 = vpop.f32.mrf.mxu1  ;;  %v17279_v34 = vrot.slane %v4817_v51, %v20433_v6  ;;  %v13989_v50 = vpop.f32.mrf.mxu0 }
 0x40b   : > { %20649 = vst [vmem:[#allocation138_spill] sm:$0xff] %v17264_v58  ;;  %v17284_v49 = vrot.slane %v4553_v61, %v20433_v6  ;;  %v4582_v12 = vcombine.high %v17244_v21, %v17244_v21  ;;  %v17290_v38 = vcombine.high %v17247_v44, %v17247_v44  ;;  %v3650_v25 = vmax.f32 %v3620_v1, 0.0 }
 0x40c   : > { %20651 = vst [vmem:[#allocation140_spill] sm:$0xff] %v17275_v15  ;;  %v7731_v30 = vcombine.high %v17275_v15, %v17275_v15  ;;  %v3484_v51 = vpop.f32.mrf.mxu1  ;;  %v4535_v14 = vcombine.high %v17103_v18, %v17103_v18  ;;  %v4850_v61 = vcombine.high %v17279_v34, %v17255_v41  ;;  %8384 = vmatpush1.bf16.msra.mxu1 %v14320_v39  ;;  %v17314_v39 = vpop.f32.mrf.mxu0  ;;  %v3651_v35 = vmax.f32 %v3621_v60, 0.0 }
 0x40d   : > { %20652 = vst [vmem:[#allocation141_spill] sm:$0xff] %v17284_v49  ;;  %v13562_v52 = vcombine.high %v17244_v21, %v17264_v58  ;;  %v17304_v50 = vrot.slane %v7691_v23, %v20433_v6  ;;  %v17307_v1 = vrot.slane %v7700_v9, %v20433_v6  ;;  %v17311_v51 = vcombine.high %v17267_v22, %v17267_v22 }
 0x40e   : > { %8385 = vmatprep.subr.bf16.mxu1 %v20400_v31  ;;  %20654 = vst [vmem:[#allocation143_spill] sm:$0xff] %v17314_v39  ;;  %v4584_v54 = vcombine.high %v17264_v58, %v17264_v58  ;;  %v17319_v33 = vcombine.low %v7731_v30, %v17267_v22  ;;  %v3538_v23 = vadd.f32 %v3479_v42, %v16574_v0  ;;  %v3487_v29 = vpop.f32.mrf.mxu1  ;;  %v14325_v0 = vld [vmem:[%s20105_s10 + $0xd8] sm:$0xff]   ;;  %v17337_v42 = vpop.f32.mrf.mxu0 }
 0x40f   : > { %20653 = vst [vmem:[#allocation142_spill] sm:$0xff] %v17311_v51  ;;  %v4947_v9 = vcombine.low %v17247_v44, %v17284_v49  ;;  %v17325_v2 = vcombine.low %v17264_v58, %v4582_v12  ;;  %v3539_v39 = vadd.f32 %v3481_v4, %v16576_v47  ;;  %v4585_v20 = vcombine.low %v3650_v25, %v3651_v35 }
 0x410   : > { %20655 = vst [vmem:[#allocation144_spill] sm:$0xff] %v17319_v33  ;;  %v4586_v62 = vcombine.high %v3650_v25, %v3651_v35  ;;  %v3580_v30 = vmul.f32 %v16609_v37, %v3538_v23  ;;  %v4881_v60 = vcombine.low %v4535_v14, %v17098_v26  ;;  %v17332_v33 = vpop.f32.mrf.mxu1  ;;  %8386 = vmatpush1.bf16.msra.mxu1 %v14321_v16  ;;  %20656 = vst [vmem:[#allocation145_spill] sm:$0xff] %v17337_v42 }
 0x411   : > { %v17340_v12 = vrot.slane %v13562_v52, %v20433_v6  ;;  %v3581_v47 = vmul.f32 %v16617_v10, %v3539_v39  ;;  %v4882_v35 = vcombine.low %v17113_v19, %v17137_v56  ;;  %v4883_v14 = vcombine.low %v17244_v21, %v17264_v58  ;;  %8387 = vmatprep.subr.bf16.mxu1 %v20400_v31 }
 0x412   : > { %v4593_v4 = vrot.slane %v4585_v20, %v20433_v6  ;;  %v4600_v16 = vrot.slane %v4586_v62, %v20433_v6  ;;  %v3622_v25 = vadd.f32 %v16614_v36, %v3580_v30  ;;  %v17352_v23 = vrot.slane %v4881_v60, %v20433_v6  ;;  %v3491_v52 = vpop.f32.mrf.mxu1 }
 0x413   : > { %20657 = vst [vmem:[#allocation146_spill] sm:$0xff] %v17340_v12  ;;  %v3623_v48 = vadd.f32 %v16626_v55, %v3581_v47  ;;  %v17358_v42 = vrot.slane %v4882_v35, %v20433_v6  ;;  %v17361_v58 = vrot.slane %v4883_v14, %v20433_v6  ;;  %v3540_v30 = vadd.f32 %v3487_v29, %v16580_v28  ;;  %v14326_v52 = vld [vmem:[%s20105_s10 + $0xd0] sm:$0xff]   ;;  %v17370_v47 = vpop.f32.mrf.mxu0 }
 0x414   : > { %v4601_v20 = vcombine.high %v4593_v4, %v4593_v4  ;;  %v4602_v56 = vcombine.high %v4600_v16, %v4600_v16  ;;  %v17364_v62 = vrot.slane %v4600_v16, %v20433_v6  ;;  %v3492_v60 = vpop.f32.mrf.mxu1  ;;  %8388 = vmatpush1.bf16.msra.mxu1 %v14325_v0  ;;  %20658 = vst [vmem:[#allocation147_spill] sm:$0xff] %v17370_v47  ;;  %v3652_v35 = vmax.f32 %v3622_v25, 0.0 }
 0x415   : > { %v3653_v39 = vmax.f32 %v3623_v48, 0.0  ;;  %v4914_v14 = vcombine.high %v17352_v23, %v17358_v42  ;;  %v4916_v21 = vcombine.high %v17361_v58, %v17340_v12  ;;  %8389 = vmatprep.subr.bf16.mxu1 %v20400_v31  ;;  %v6040_v28 = vcombine.low %v4584_v54, %v17247_v44  ;;  %v17387_v48 = vpop.f32.mrf.mxu0 }
 0x416   : > { %v17379_v29 = vrot.slane %v4593_v4, %v20433_v6  ;;  %v17382_v0 = vrot.slane %v4601_v20, %v20433_v6  ;;  %v4878_v16 = vrot.slane %v4850_v61, %v20433_v6  ;;  %v17385_v25 = vpop.f32.mrf.mxu1  ;;  %20661 = vst [vmem:[#allocation150_spill] sm:$0xff] %v17387_v48  ;;  %v17394_v54 = vrot.slane %v4602_v56, %v20433_v6  ;;  %v14327_v56 = vld [vmem:[%s20105_s10 + $0xc8] sm:$0xff]  }
 0x417   : > { %v7732_v60 = vcombine.low %v3652_v35, %v3653_v39  ;;  %v7733_v47 = vcombine.high %v3652_v35, %v3653_v39  ;;  %v17390_v46 = vrot.slane %v4914_v14, %v20433_v6  ;;  %v4944_v5 = vrot.slane %v4916_v21, %v20433_v6  ;;  %v17412_v21 = vpop.f32.mrf.mxu0 }
 0x418   : > { %20659 = vst [vmem:[#allocation148_spill] sm:$0xff] %v17379_v29  ;;  %20660 = vst [vmem:[#allocation149_spill] sm:$0xff] %v17382_v0  ;;  %v17398_v4 = vcombine.high %v17364_v62, %v17364_v62  ;;  %v20665_v61 = vcombine.high %v17211_v17, %v17214_v32  ;;  %v3582_v39 = vmul.f32 %v16609_v37, %v3540_v30  ;;  %v17407_v35 = vpop.f32.mrf.mxu1  ;;  %8390 = vmatpush1.bf16.msra.mxu1 %v14326_v52 }
 0x419   : > { %20662 = vst [vmem:[#allocation151_spill] sm:$0xff] %v17390_v46  ;;  %20663 = vst [vmem:[#allocation152_spill] sm:$0xff] %v17394_v54  ;;  %v13600_v14 = vcombine.high %v17379_v29, %v17382_v0  ;;  %v17417_v48 = vrot.slane %v7732_v60, %v20433_v6  ;;  %v4847_v30 = vcombine.low %v17211_v17, %v17214_v32  ;;  %8391 = vmatprep.subr.bf16.mxu1 %v20400_v31  ;;  %v17431_v45 = vpop.f32.mrf.mxu0  ;;  %v14328_v17 = vld [vmem:[%s20105_s10 + $0xc0] sm:$0xff]  }
 0x41a   : > { %20664 = vst [vmem:[#allocation153_spill] sm:$0xff] %v17398_v4  ;;  %v17404_v20 = vrot.slane %v20665_v61, %v20433_v6  ;;  %20667 = vst [vmem:[#allocation155_spill] sm:$0xff] %v17412_v21  ;;  %v4946_v61 = vcombine.low %v17390_v46, %v4944_v5  ;;  %v17424_v52 = vrot.slane %v4947_v9, %v20433_v6  ;;  %v3499_v60 = vpop.f32.mrf.mxu1 }
 0x41b   : > { %v4849_v13 = vcombine.low %v17279_v34, %v17255_v41  ;;  %20669 = vst [vmem:[#allocation157_spill] sm:$0xff] %v17431_v45  ;;  %v17434_v5 = vrot.slane %v6040_v28, %v20433_v6  ;;  %v17440_v32 = vrot.slane %v17417_v48, %v20433_v6  ;;  %v17443_v9 = vadd.f32 %v16614_v36, %v3582_v39  ;;  %v17454_v45 = vpop.f32.mrf.mxu0 }
 0x41c   : > { %20666 = vst [vmem:[#allocation154_spill] sm:$0xff] %v17404_v20  ;;  %20668 = vst [vmem:[#allocation156_spill] sm:$0xff] %v17424_v52  ;;  %v4880_v21 = vcombine.low %v17404_v20, %v4878_v16  ;;  %v17448_v60 = vrot.slane %v4847_v30, %v20433_v6  ;;  %v3500_v44 = vpop.f32.mrf.mxu1  ;;  %8392 = vmatpush1.bf16.msra.mxu1 %v14327_v56  ;;  %v4913_v56 = vcombine.low %v17352_v23, %v17358_v42 }
 0x41d   : > { %20670 = vst [vmem:[#allocation158_spill] sm:$0xff] %v17434_v5  ;;  %v4871_v28 = vrot.slane %v4849_v13, %v20433_v6  ;;  %20671 = vst [vmem:[#allocation159_spill] sm:$0xff] %v17454_v45  ;;  %8393 = vmatprep.subr.bf16.mxu1 %v20400_v31  ;;  %v4915_v30 = vcombine.low %v17361_v58, %v17340_v12  ;;  %v17477_v39 = vpop.f32.mrf.mxu0  ;;  %v20674_v13 = vcombine.high %v16857_v11, %v16857_v11 }
 0x41e   : > { %v5118_v34 = vpack.c.bf16 %v4946_v61, %v4880_v21  ;;  %v17461_v21 = vrot.slane %v13600_v14, %v20433_v6  ;;  %v17464_v61 = vrot.slane %v7733_v47, %v20433_v6  ;;  %v17475_v14 = vpop.f32.mrf.mxu1  ;;  %20673 = vst [vmem:[#allocation161_spill] sm:$0xff] %v17477_v39  ;;  %v5834_v58 = vcombine.high %v16969_v3, %v16969_v3 }
 0x41f   : > { %v4879_v44 = vcombine.low %v17448_v60, %v4871_v28  ;;  %v10997_v16 = vcombine.low %v20674_v13, %v16966_v43  ;;  %v17493_v42 = vrot.slane %v4913_v56, %v20433_v6  ;;  %v4937_v23 = vrot.slane %v4915_v30, %v20433_v6  ;;  %v14329_v13 = vld [vmem:[%s20105_s10 + $0x118] sm:$0xff]   ;;  %v17509_v56 = vpop.f32.mrf.mxu0 }
 0x420   : > { %20672 = vst [vmem:[#allocation160_spill] sm:$0xff] %v17461_v21  ;;  %13655 = vmatprep.mubr.msk.bf16.mxu0 %vm6376_vm3, %v5118_v34  ;;  %v20675_v34 = vcombine.high %v16963_v59, %v16969_v3  ;;  %v20678_v47 = vcombine.low %v16969_v3, %v17005_v8  ;;  %v13599_v43 = vcombine.high %v17098_v26, %v17113_v19  ;;  %v17504_v59 = vpop.f32.mrf.mxu1  ;;  %20680 = vst [vmem:[#allocation165_spill] sm:$0xff] %v17509_v56 }
 0x421   : > { %20677 = vst [vmem:[#allocation163_spill] sm:$0xff] %v17493_v42  ;;  %8394 = vmatpush1.bf16.msra.mxu1 %v14328_v17  ;;  %v17512_v30 = vrot.slane %v10997_v16, %v20433_v6  ;;  %v5973_v8 = vcombine.low %v5834_v58, %v17103_v18  ;;  %v17519_v26 = vrot.slane %v17325_v2, %v20433_v6  ;;  %v17528_v39 = vpop.f32.mrf.mxu0 }
 0x422   : > { %v17488_v28 = vrot.slane %v20675_v34, %v20433_v6  ;;  %v17500_v11 = vrot.slane %v20678_v47, %v20433_v6  ;;  %8403 = vmatprep.subr.bf16.mxu1 %v20400_v31  ;;  %v4945_v17 = vcombine.low %v17493_v42, %v4937_v23  ;;  %v6054_v34 = vrot.slane %v13599_v43, %v20433_v6  ;;  %v3507_v56 = vpop.f32.mrf.mxu1 }
 0x423   : > { %20681 = vst [vmem:[#allocation166_spill] sm:$0xff] %v17512_v30  ;;  %20682 = vst [vmem:[#allocation167_spill] sm:$0xff] %v17519_v26  ;;  %v3541_v16 = vadd.f32 %v17332_v33, %v16582_v40  ;;  %v11005_v58 = vcombine.low %v17120_v63, %v17512_v30  ;;  %v5995_v45 = vrot.slane %v5973_v8, %v20433_v6  ;;  %v14330_v56 = vld [vmem:[%s20105_s10 + $0x110] sm:$0xff]  }
 0x424   : > { %20676 = vst [vmem:[#allocation162_spill] sm:$0xff] %v17488_v28  ;;  %20679 = vst [vmem:[#allocation164_spill] sm:$0xff] %v17500_v11  ;;  %v11031_v3 = vcombine.low %v17488_v28, %v17255_v41  ;;  %v6004_v47 = vcombine.high %v17061_v53, %v17500_v11  ;;  %v6072_v23 = vcombine.high %v17519_v26, %v17434_v5  ;;  %v3508_v33 = vpop.f32.mrf.mxu1 }
 0x425   : > { %20683 = vst [vmem:[#allocation168_spill] sm:$0xff] %v17528_v39  ;;  %v5117_v42 = vpack.c.bf16 %v4945_v17, %v4879_v44  ;;  %v6070_v43 = vcombine.high %v17190_v7, %v6054_v34  ;;  %v3583_v40 = vmul.f32 %v16617_v10, %v3541_v16  ;;  %8404 = vmatpush2.bf16.msra.mxu1 %v14329_v13  ;;  %v17542_v39 = vpop.f32.mrf.mxu0 }
 0x426   : > { %v11039_v2 = vrot.slane %v11031_v3, %v20433_v6  ;;  %v6020_v46 = vrot.slane %v6004_v47, %v20433_v6  ;;  %20684 = vst [vmem:[#allocation169_spill] sm:$0xff] %v17542_v39  ;;  %v11013_v3 = vrot.slane %v11005_v58, %v20433_v6  ;;  %v6006_v44 = vcombine.high %v5995_v45, %v17177_v57 }
 0x427   : > { %v6100_v17 = vrot.slane %v6072_v23, %v20433_v6  ;;  %8405 = vmatprep.subr.bf16.mxu1 %v20400_v31  ;;  %6578 = vmatmul.mubr.bf16.gmra.mxu0 %v5117_v42  ;;  %v6086_v47 = vrot.slane %v6070_v43, %v20433_v6  ;;  %v3625_v13 = vadd.f32 %v16626_v55, %v3583_v40  ;;  %v17554_v39 = vpop.f32.mrf.mxu0 }
 0x428   : > { %v11047_v8 = vcombine.low %v17448_v60, %v11039_v2  ;;  %v6003_v16 = vcombine.low %v17061_v53, %v17500_v11  ;;  %v6005_v33 = vcombine.low %v5995_v45, %v17177_v57  ;;  %20685 = vst [vmem:[#allocation170_spill] sm:$0xff] %v17554_v39  ;;  %v11021_v60 = vcombine.low %v17150_v24, %v11013_v3  ;;  %v14331_v45 = vld [vmem:[%s20105_s10 + $0x108] sm:$0xff]   ;;  %v20759_v57 = vld [vmem:[#allocation121_spill] sm:$0xff] }
 0x429   : > { %v6034_v58 = vrot.slane %v6006_v44, %v20433_v6  ;;  %v6069_v2 = vcombine.low %v17190_v7, %v6054_v34  ;;  %v6071_v42 = vcombine.low %v17519_v26, %v17434_v5  ;;  %v6102_v23 = vcombine.low %v6086_v47, %v6100_v17  ;;  %8406 = vmatpush2.bf16.msra.mxu1 %v14330_v56  ;;  %v17566_v39 = vpop.f32.mrf.mxu0 }
 0x42a   : > { %v3655_v43 = vmax.f32 %v3625_v13, 0.0  ;;  %v6013_v40 = vrot.slane %v6003_v16, %v20433_v6  ;;  %v6027_v12 = vrot.slane %v6005_v33, %v20433_v6  ;;  %20686 = vst [vmem:[#allocation171_spill] sm:$0xff] %v17566_v39  ;;  %v17568_v24 = vpack.c.bf16 %v11047_v8, %v11021_v60  ;;  %8407 = vmatprep.subr.bf16.mxu1 %v20400_v31  ;;  %v20691_v60 = vld [vmem:[#allocation34_spill] sm:$0xff] }
 0x42b   : > { %v6036_v3 = vcombine.low %v6020_v46, %v6034_v58  ;;  %v6079_v34 = vrot.slane %v6069_v2, %v20433_v6  ;;  %v6093_v44 = vrot.slane %v6071_v42, %v20433_v6  ;;  %v20688_v17 = vmax.f32 %v17443_v9, 0.0  ;;  %v17579_v39 = vpop.f32.mrf.mxu0  ;;  %v20692_v2 = vld [vmem:[#allocation13_spill] sm:$0xff] }
 0x42c   : > { %20687 = vst [vmem:[#allocation172_spill] sm:$0xff] %v17568_v24  ;;  %v6035_v16 = vcombine.low %v6013_v40, %v6027_v12  ;;  %v3542_v33 = vadd.f32 %v17385_v25, %v16586_v27  ;;  %20690 = vst [vmem:[#allocation173_spill] sm:$0xff] %v17579_v39  ;;  %v3543_v58 = vadd.f32 %v17407_v35, %v20691_v60  ;;  %v20693_v12 = vld [vmem:[#allocation39_spill] sm:$0xff]  ;;  %v14332_v27 = vld [vmem:[%s20105_s10 + $0x100] sm:$0xff]  }
 0x42d   : > { %v4634_v47 = vcombine.low %v20688_v17, %v3655_v43  ;;  %v20689_v56 = vmov %v20688_v17  ;;  %v6274_v8 = vpack.c.bf16 %v6102_v23, %v6036_v3  ;;  %v6101_v46 = vcombine.low %v6079_v34, %v6093_v44  ;;  %8408 = vmatpush2.bf16.msra.mxu1 %v14331_v45  ;;  %v17593_v25 = vpop.f32.mrf.mxu0 }
 0x42e   : > { %v4635_v13 = vcombine.high %v20689_v56, %v3655_v43  ;;  %v3544_v42 = vadd.f32 %v17475_v14, %v20692_v2  ;;  %v3584_v9 = vmul.f32 %v16609_v37, %v3542_v33  ;;  %v3545_v43 = vadd.f32 %v17504_v59, %v20693_v12  ;;  %20694 = vst [vmem:[#allocation34_spill] sm:$0xff] %v17593_v25 }
 0x42f   : > { %v4642_v24 = vrot.slane %v4634_v47, %v20433_v6  ;;  %v7748_v35 = vcombine.high %v17417_v48, %v17417_v48  ;;  %13639 = vmatprep.mubr.msk.bf16.mxu1 %vm6376_vm3, %v6274_v8  ;;  %v6273_v14 = vpack.c.bf16 %v6101_v46, %v6035_v16  ;;  %v3585_v23 = vmul.f32 %v16617_v10, %v3543_v58  ;;  %v5765_v44 = vpop.f32.mrf.mxu0 }
 0x430   : > { %v4649_v17 = vrot.slane %v4635_v13, %v20433_v6  ;;  %v3586_v40 = vmul.f32 %v16609_v37, %v3544_v42  ;;  %v20695_v59 = vcombine.low %v17364_v62, %v17394_v54  ;;  %v7749_v3 = vcombine.high %v17464_v61, %v17464_v61  ;;  %8409 = vmatprep.subr.bf16.mxu1 %v20400_v31 }
 0x431   : > { %v17610_v34 = vrot.slane %v17464_v61, %v20433_v6  ;;  %v4650_v48 = vcombine.high %v4642_v24, %v4642_v24  ;;  %6430 = vmatmul.mubr.bf16.gmra.mxu1 %v6273_v14  ;;  %v3626_v37 = vadd.f32 %v16614_v36, %v3584_v9  ;;  %v3627_v47 = vadd.f32 %v16626_v55, %v3585_v23  ;;  %v5766_v46 = vpop.f32.mrf.mxu0 }
 0x432   : > { %v17604_v45 = vrot.slane %v20695_v59, %v20433_v6  ;;  %v3628_v56 = vadd.f32 %v16614_v36, %v3586_v40  ;;  %v3587_v13 = vmul.f32 %v16617_v10, %v3545_v43  ;;  %v4651_v16 = vcombine.high %v4649_v17, %v4649_v17  ;;  %8410 = vmatpush2.bf16.msra.mxu1 %v14332_v27 }
 0x433   : > { %20697 = vst [vmem:[#allocation39_spill] sm:$0xff] %v17610_v34  ;;  %v17618_v33 = vrot.slane %v4642_v24, %v20433_v6  ;;  %v17621_v61 = vrot.slane %v4650_v48, %v20433_v6  ;;  %v4633_v8 = vcombine.high %v17382_v0, %v17382_v0  ;;  %v17626_v60 = vrot.slane %v7748_v35, %v20433_v6  ;;  %v17637_v12 = vpop.f32.mrf.mxu0 }
 0x434   : > { %20696 = vst [vmem:[#allocation13_spill] sm:$0xff] %v17604_v45  ;;  %v3656_v58 = vmax.f32 %v3626_v37, 0.0  ;;  %v3657_v2 = vmax.f32 %v3627_v47, 0.0  ;;  %v3629_v36 = vadd.f32 %v16626_v55, %v3587_v13  ;;  %9556 = vmatprep.subr.bf16.mxu1 %v20400_v31  ;;  %v17631_v10 = vrot.slane %v4649_v17, %v20433_v6  ;;  %20701 = vst [vmem:[#allocation177_spill] sm:$0xff] %v17637_v12  ;;  %v3511_v13 = vpop.f32.mrf.mxu1 }
 0x435   : > { %20698 = vst [vmem:[#allocation174_spill] sm:$0xff] %v17618_v33  ;;  %20699 = vst [vmem:[#allocation175_spill] sm:$0xff] %v17621_v61  ;;  %v4682_v24 = vcombine.high %v17621_v61, %v17621_v61  ;;  %v3658_v42 = vmax.f32 %v3628_v56, 0.0  ;;  %v4948_v9 = vcombine.low %v17290_v38, %v17379_v29  ;;  %v20702_v55 = vcombine.high %v17379_v29, %v17379_v29  ;;  %v17654_v56 = vpop.f32.mrf.mxu0 }
 0x436   : > { %20700 = vst [vmem:[#allocation176_spill] sm:$0xff] %v17631_v10  ;;  %v7781_v43 = vcombine.low %v3656_v58, %v3657_v2  ;;  %v7782_v27 = vcombine.high %v3656_v58, %v3657_v2  ;;  %v3659_v35 = vmax.f32 %v3629_v36, 0.0  ;;  %v17644_v17 = vrot.slane %v4651_v16, %v20433_v6  ;;  %20704 = vst [vmem:[#allocation179_spill] sm:$0xff] %v17654_v56 }
 0x437   : > { %v4949_v14 = vcombine.low %v17382_v0, %v20702_v55  ;;  %v4680_v23 = vcombine.high %v17618_v33, %v17618_v33  ;;  %v4950_v40 = vcombine.low %v4633_v8, %v17364_v62  ;;  %v17650_v59 = vrot.slane %v4948_v9, %v20433_v6 }
 0x438   : > { %20703 = vst [vmem:[#allocation178_spill] sm:$0xff] %v17644_v17  ;;  %v7789_v48 = vrot.slane %v7781_v43, %v20433_v6  ;;  %v7796_v44 = vrot.slane %v7782_v27, %v20433_v6  ;;  %v10087_v37 = vcombine.low %v3658_v42, %v3659_v35  ;;  %v10088_v47 = vcombine.high %v3658_v42, %v3659_v35  ;;  %v17668_v43 = vpop.f32.mrf.mxu0  ;;  %v3512_v27 = vpop.f32.mrf.mxu1 }
 0x439   : > { %v17658_v16 = vcombine.high %v17631_v10, %v17631_v10  ;;  %v6171_v46 = vcombine.low %v4682_v24, %v17631_v10  ;;  %v4971_v8 = vrot.slane %v4949_v14, %v20433_v6  ;;  %v4978_v58 = vrot.slane %v4950_v40, %v20433_v6  ;;  %20706 = vst [vmem:[#allocation181_spill] sm:$0xff] %v17668_v43 }
 0x43a   : > { %v17664_v2 = vrot.slane %v7749_v3, %v20433_v6  ;;  %v7797_v42 = vcombine.high %v7789_v48, %v7789_v48  ;;  %v7798_v9 = vcombine.high %v7796_v44, %v7796_v44  ;;  %v17671_v35 = vrot.slane %v10087_v37, %v20433_v6  ;;  %v3513_v37 = vpop.f32.mrf.mxu1 }
 0x43b   : > { %v17674_v24 = vrot.slane %v10088_v47, %v20433_v6  ;;  %v4980_v55 = vcombine.high %v17424_v52, %v17650_v59  ;;  %v4982_v14 = vcombine.high %v4971_v8, %v4978_v58  ;;  %v6170_v40 = vcombine.low %v17621_v61, %v4680_v23  ;;  %v17696_v23 = vpop.f32.mrf.mxu0 }
 0x43c   : > { %20705 = vst [vmem:[#allocation180_spill] sm:$0xff] %v17664_v2  ;;  %20707 = vst [vmem:[#allocation182_spill] sm:$0xff] %v17671_v35  ;;  %v17682_v13 = vrot.slane %v7797_v42, %v20433_v6  ;;  %v5014_v27 = vcombine.low %v17618_v33, %v17621_v61  ;;  %v6172_v47 = vcombine.low %v17644_v17, %v17658_v16  ;;  %v3514_v12 = vpop.f32.mrf.mxu1 }
 0x43d   : > { %20708 = vst [vmem:[#allocation183_spill] sm:$0xff] %v17674_v24  ;;  %v17689_v36 = vrot.slane %v6171_v46, %v20433_v6  ;;  %v17692_v43 = vrot.slane %v7798_v9, %v20433_v6  ;;  %v10103_v3 = vcombine.high %v17671_v35, %v17671_v35  ;;  %20712 = vst [vmem:[#allocation187_spill] sm:$0xff] %v17696_v23  ;;  %v17739_v19 = vpop.f32.mrf.mxu0 }
 0x43e   : > { %20709 = vst [vmem:[#allocation184_spill] sm:$0xff] %v17682_v13  ;;  %v17699_v42 = vrot.slane %v7789_v48, %v20433_v6  ;;  %v17702_v56 = vrot.slane %v7796_v44, %v20433_v6  ;;  %v7829_v37 = vcombine.high %v17682_v13, %v17682_v13  ;;  %v13563_v46 = vcombine.high %v17618_v33, %v17621_v61 }
 0x43f   : > { %20710 = vst [vmem:[#allocation185_spill] sm:$0xff] %v17689_v36  ;;  %20711 = vst [vmem:[#allocation186_spill] sm:$0xff] %v17692_v43  ;;  %v17710_v9 = vrot.slane %v17674_v24, %v20433_v6  ;;  %v17713_v25 = vrot.slane %v10103_v3, %v20433_v6  ;;  %v4996_v48 = vrot.slane %v4980_v55, %v20433_v6 }
 0x440   : > { %v17717_v23 = vrot.slane %v4982_v14, %v20433_v6  ;;  %v17720_v44 = vcombine.low %v7829_v37, %v17702_v56  ;;  %v5016_v39 = vcombine.low %v17631_v10, %v17644_v17  ;;  %v20717_v12 = vcombine.low %v17394_v54, %v17398_v4  ;;  %20719 = vst [vmem:[#allocation193_spill] sm:$0xff] %v17739_v19 }
 0x441   : > { %20713 = vst [vmem:[#allocation188_spill] sm:$0xff] %v17710_v9  ;;  %20714 = vst [vmem:[#allocation189_spill] sm:$0xff] %v17713_v25  ;;  %v5030_v3 = vrot.slane %v5014_v27, %v20433_v6  ;;  %v10135_v10 = vcombine.high %v17713_v25, %v17713_v25  ;;  %v4979_v14 = vcombine.low %v17424_v52, %v17650_v59 }
 0x442   : > { %20715 = vst [vmem:[#allocation190_spill] sm:$0xff] %v17717_v23  ;;  %20716 = vst [vmem:[#allocation191_spill] sm:$0xff] %v17720_v44  ;;  %v17728_v61 = vrot.slane %v20717_v12, %v20433_v6  ;;  %v5012_v20 = vcombine.low %v4996_v48, %v17717_v23  ;;  %v5037_v12 = vrot.slane %v13563_v46, %v20433_v6  ;;  %v17754_v48 = vpop.f32.mrf.mxu0 }
 0x443   : > { %v5044_v27 = vrot.slane %v5016_v39, %v20433_v6  ;;  %v17746_v55 = vcombine.low %v10135_v10, %v17710_v9  ;;  %v4981_v37 = vcombine.low %v4971_v8, %v4978_v58  ;;  %v5836_v46 = vcombine.high %v17284_v49, %v17284_v49  ;;  %20721 = vst [vmem:[#allocation195_spill] sm:$0xff] %v17754_v48 }
 0x444   : > { %20718 = vst [vmem:[#allocation192_spill] sm:$0xff] %v17728_v61  ;;  %v5046_v28 = vcombine.high %v17728_v61, %v5030_v3  ;;  %v5045_v41 = vcombine.low %v17728_v61, %v5030_v3  ;;  %v4989_v39 = vrot.slane %v4979_v14, %v20433_v6  ;;  %v20723_v59 = vcombine.low %v17284_v49, %v17290_v38 }
 0x445   : > { %20720 = vst [vmem:[#allocation194_spill] sm:$0xff] %v17746_v55  ;;  %v5048_v63 = vcombine.high %v5037_v12, %v5044_v27  ;;  %v5047_v30 = vcombine.low %v5037_v12, %v5044_v27  ;;  %v17758_v10 = vrot.slane %v4981_v37, %v20433_v6  ;;  %v6104_v3 = vcombine.low %v5836_v46, %v17382_v0  ;;  %v13999_v37 = vpop.f32.mrf.mxu0  ;;  %v20731_v55 = vld [vmem:[#allocation86_spill] sm:$0xff] }
 0x446   : > { %v5062_v19 = vrot.slane %v5046_v28, %v20433_v6  ;;  %v5055_v23 = vrot.slane %v5045_v41, %v20433_v6  ;;  %v17765_v8 = vrot.slane %v20723_v59, %v20433_v6  ;;  %v6138_v14 = vcombine.high %v17461_v21, %v17604_v45 }
 0x447   : > { %20722 = vst [vmem:[#allocation196_spill] sm:$0xff] %v17758_v10  ;;  %v17768_v28 = vrot.slane %v5048_v63, %v20433_v6  ;;  %v17771_v58 = vrot.slane %v5047_v30, %v20433_v6  ;;  %v5011_v41 = vcombine.low %v4989_v39, %v17758_v10  ;;  %v13601_v12 = vcombine.high %v17364_v62, %v17394_v54  ;;  %v20730_v54 = vld [vmem:[#allocation80_spill] sm:$0xff] }
 0x448   : > { %20724 = vst [vmem:[#allocation197_spill] sm:$0xff] %v17765_v8  ;;  %v17780_v38 = vrot.slane %v6170_v40, %v20433_v6  ;;  %v17783_v63 = vrot.slane %v6172_v47, %v20433_v6  ;;  %v6120_v46 = vrot.slane %v6104_v3, %v20433_v6  ;;  %v6166_v59 = vrot.slane %v6138_v14, %v20433_v6 }
 0x449   : > { %20725 = vst [vmem:[#allocation198_spill] sm:$0xff] %v17768_v28  ;;  %20726 = vst [vmem:[#allocation199_spill] sm:$0xff] %v17771_v58  ;;  %v5078_v30 = vcombine.low %v5062_v19, %v17768_v28  ;;  %v5077_v27 = vcombine.low %v5055_v23, %v17771_v58  ;;  %v6179_v37 = vrot.slane %v13601_v12, %v20433_v6 }
 0x44a   : > { %20727 = vst [vmem:[#allocation200_spill] sm:$0xff] %v17780_v38  ;;  %20728 = vst [vmem:[#allocation201_spill] sm:$0xff] %v17783_v63  ;;  %v6204_v39 = vcombine.high %v17689_v36, %v17783_v63  ;;  %v5085_v62 = vrot.slane %v17658_v16, %v20433_v6  ;;  %v6137_v40 = vcombine.low %v17461_v21, %v17604_v45  ;;  %v20754_v21 = vld [vmem:[#allocation15_spill] sm:$0xff] }
 0x44b   : > { %v5120_v47 = vpack.c.bf16 %v5078_v30, %v5012_v20  ;;  %v5119_v48 = vpack.c.bf16 %v5077_v27, %v5011_v41  ;;  %v6136_v19 = vcombine.high %v17765_v8, %v6120_v46  ;;  %v6135_v23 = vcombine.low %v17765_v8, %v6120_v46 }
 0x44c   : > { %v6202_v3 = vcombine.high %v6179_v37, %v17780_v38  ;;  %v6232_v14 = vrot.slane %v6204_v39, %v20433_v6  ;;  %v5086_v12 = vcombine.high %v5085_v62, %v5085_v62  ;;  %v6159_v58 = vrot.slane %v6137_v40, %v20433_v6 }
 0x44d   : > { %13656 = vmatprep.mubr.msk.bf16.mxu0 %vm6376_vm3, %v5120_v47  ;;  %v6152_v16 = vrot.slane %v6136_v19, %v20433_v6  ;;  %v6145_v28 = vrot.slane %v6135_v23, %v20433_v6  ;;  %v6201_v20 = vcombine.low %v6179_v37, %v17780_v38  ;;  %v6203_v41 = vcombine.low %v17689_v36, %v17783_v63  ;;  %v20748_v63 = vld [vmem:[#allocation41_spill] sm:$0xff] }
 0x44e   : > { %6586 = vmatmul.mubr.bf16.gmra.mxu0 %v5119_v48  ;;  %v6218_v30 = vrot.slane %v6202_v3, %v20433_v6  ;;  %v5100_v27 = vrot.slane %v5086_v12, %v20433_v6  ;;  %v5838_v46 = vcombine.high %v17644_v17, %v17644_v17  ;;  %v5093_v39 = vrot.slane %v5085_v62, %v20433_v6  ;;  %v20729_v3 = vld [vmem:[#allocation106_spill] sm:$0xff] }
 0x44f   : > { %v6168_v40 = vcombine.low %v6152_v16, %v6166_v59  ;;  %v6167_v47 = vcombine.low %v6145_v28, %v6159_v58  ;;  %v6211_v19 = vrot.slane %v6201_v20, %v20433_v6  ;;  %v6225_v23 = vrot.slane %v6203_v41, %v20433_v6  ;;  %v20733_v28 = vld [vmem:[#allocation89_spill] sm:$0xff]  ;;  %v20734_v58 = vld [vmem:[#allocation92_spill] sm:$0xff] }
 0x450   : > { %v6234_v37 = vcombine.low %v6218_v30, %v6232_v14  ;;  %v5122_v10 = vpack.c.bf16 %v5100_v27, %v5100_v27  ;;  %v6241_v61 = vrot.slane %v5838_v46, %v20433_v6  ;;  %v5121_v48 = vpack.c.bf16 %v5093_v39, %v5093_v39  ;;  %v20736_v30 = vld [vmem:[#allocation95_spill] sm:$0xff]  ;;  %v20737_v27 = vld [vmem:[#allocation94_spill] sm:$0xff] }
 0x451   : > { %v6233_v52 = vcombine.low %v6211_v19, %v6225_v23  ;;  %v7584_v12 = vcombine.high %v20729_v3, %v20729_v3  ;;  %v20732_v49 = vcombine.low %v20730_v54, %v20731_v55  ;;  %v20735_v59 = vcombine.low %v20733_v28, %v20734_v58 }
 0x452   : > { %v6276_v20 = vpack.c.bf16 %v6234_v37, %v6168_v40  ;;  %13657 = vmatprep.mubr.msk.bf16.mxu0 %vm6376_vm3, %v5122_v10  ;;  %v6242_v14 = vcombine.high %v6241_v61, %v6241_v61  ;;  %v6249_v41 = vrot.slane %v6241_v61, %v20433_v6  ;;  %v7862_v46 = vcombine.low %v20737_v27, %v20736_v30 }
 0x453   : > { %v7854_v62 = vrot.slane %v20732_v49, %v20433_v6  ;;  %v7861_v16 = vrot.slane %v20735_v59, %v20433_v6  ;;  %v6275_v39 = vpack.c.bf16 %v6233_v52, %v6167_v47  ;;  %v7863_v19 = vcombine.high %v20737_v27, %v20736_v30 }
 0x454   : > { %13640 = vmatprep.mubr.msk.bf16.mxu1 %vm6376_vm3, %v6276_v20  ;;  %v6256_v23 = vrot.slane %v6242_v14, %v20433_v6  ;;  %v6277_v59 = vpack.c.bf16 %v6249_v41, %v6249_v41  ;;  %v7872_v40 = vrot.slane %v7862_v46, %v20433_v6  ;;  %v20738_v10 = vcombine.high %v20734_v58, %v20734_v58  ;;  %v20741_v41 = vld [vmem:[#allocation107_spill] sm:$0xff] }
 0x455   : > { %v7864_v54 = vcombine.low %v7854_v62, %v7861_v16  ;;  %v7865_v49 = vcombine.high %v7854_v62, %v7861_v16  ;;  %6438 = vmatmul.mubr.bf16.gmra.mxu1 %v6275_v39  ;;  %v7879_v52 = vrot.slane %v7863_v19, %v20433_v6  ;;  %v20739_v62 = vld [vmem:[#allocation102_spill] sm:$0xff]  ;;  %v20742_v46 = vld [vmem:[#allocation111_spill] sm:$0xff]  ;;  %v20752_v38 = vcombine.high %v20748_v63, %v20748_v63 }
 0x456   : > { %v7896_v61 = vcombine.low %v20729_v3, %v20738_v10  ;;  %v7897_v16 = vcombine.low %v7584_v12, %v20739_v62  ;;  %v6278_v20 = vpack.c.bf16 %v6256_v23, %v6256_v23  ;;  %6594 = vmatmul.mubr.bf16.gmra.mxu0 %v5121_v48  ;;  %v20740_v14 = vcombine.high %v20739_v62, %v20739_v62  ;;  %v20743_v39 = vld [vmem:[#allocation114_spill] sm:$0xff]  ;;  %v20745_v12 = vld [vmem:[#allocation37_spill] sm:$0xff] }
 0x457   : > { %v7886_v47 = vrot.slane %v7864_v54, %v20433_v6  ;;  %v7893_v37 = vrot.slane %v7865_v49, %v20433_v6  ;;  %v20744_v10 = vcombine.low %v20742_v46, %v20743_v39  ;;  %7349 = vmatprep.mubr.bf16.mxu0 %v20400_v31  ;;  %v6723_v48 = vcombine.high %v20745_v12, %v20745_v12  ;;  %v20746_v49 = vld [vmem:[#allocation17_spill] sm:$0xff] }
 0x458   : > { %v7898_v30 = vcombine.low %v20741_v41, %v20740_v14  ;;  %v7906_v27 = vrot.slane %v7896_v61, %v20433_v6  ;;  %v7913_v54 = vrot.slane %v7897_v16, %v20433_v6  ;;  %v6724_v23 = vcombine.high %v20746_v49, %v20746_v49  ;;  %13641 = vmatprep.mubr.msk.bf16.mxu1 %vm6376_vm3, %v6278_v20  ;;  %v20747_v14 = vld [vmem:[#allocation9_spill] sm:$0xff]  ;;  %v20753_v20 = vld [vmem:[#allocation43_spill] sm:$0xff] }
 0x459   : > { %v7927_v19 = vrot.slane %v20744_v10, %v20433_v6  ;;  %v7895_v17 = vcombine.low %v7879_v52, %v7893_v37  ;;  %v20749_v45 = vcombine.low %v20747_v14, %v20748_v63  ;;  %v20750_v52 = vld [vmem:[#allocation36_spill] sm:$0xff]  ;;  %v7014_v36 = vcombine.low %v20746_v49, %v20752_v38  ;;  %v20781_v14 = vld [vmem:[#allocation74_spill] sm:$0xff] }
 0x45a   : > { %v7920_v61 = vrot.slane %v7898_v30, %v20433_v6  ;;  %v20751_v37 = vld [vmem:[#allocation40_spill] sm:$0xff]  ;;  %v7928_v4 = vcombine.low %v7906_v27, %v7913_v54  ;;  %v7929_v33 = vcombine.high %v7906_v27, %v7913_v54  ;;  %v7015_v9 = vcombine.low %v6724_v23, %v20745_v12  ;;  %v20756_v23 = vld [vmem:[#allocation42_spill] sm:$0xff] }
 0x45b   : > { %v6996_v10 = vrot.slane %v20749_v45, %v20433_v6  ;;  %v6997_v16 = vcombine.low %v20751_v37, %v20750_v52  ;;  %v7016_v25 = vcombine.low %v20753_v20, %v6723_v48  ;;  %v7024_v37 = vrot.slane %v7014_v36, %v20433_v6 }
 0x45c   : > { %v7930_v30 = vcombine.low %v7920_v61, %v7927_v19  ;;  %v7931_v35 = vcombine.high %v7920_v61, %v7927_v19  ;;  %v7938_v8 = vrot.slane %v7928_v4, %v20433_v6  ;;  %v7945_v52 = vrot.slane %v7929_v33, %v20433_v6 }
 0x45d   : > { %v6998_v5 = vcombine.low %v20754_v21, %v6996_v10  ;;  %v7005_v45 = vrot.slane %v6997_v16, %v20433_v6  ;;  %v7031_v38 = vrot.slane %v7015_v9, %v20433_v6  ;;  %v7038_v19 = vrot.slane %v7016_v25, %v20433_v6  ;;  %6446 = vmatmul.mubr.bf16.gmra.mxu1 %v6277_v59  ;;  %v20755_v21 = vld [vmem:[#allocation44_spill] sm:$0xff]  ;;  %v20758_v16 = vld [vmem:[#allocation135_spill] sm:$0xff] }
 0x45e   : > { %v7952_v27 = vrot.slane %v7930_v30, %v20433_v6  ;;  %v7959_v54 = vrot.slane %v7931_v35, %v20433_v6  ;;  %v20757_v61 = vcombine.low %v20755_v21, %v20756_v23  ;;  %v7894_v33 = vcombine.low %v7872_v40, %v7886_v47  ;;  %v20762_v40 = vld [vmem:[#allocation112_spill] sm:$0xff] }
 0x45f   : > { %v7012_v48 = vrot.slane %v6998_v5, %v20433_v6  ;;  %v7046_v10 = vcombine.low %v7024_v37, %v7031_v38  ;;  %v7682_v36 = vcombine.high %v20758_v16, %v20758_v16  ;;  %v20760_v35 = vcombine.high %v20759_v57, %v20759_v57  ;;  %v20763_v47 = vld [vmem:[#allocation116_spill] sm:$0xff] }
 0x460   : > { %v7045_v4 = vrot.slane %v20757_v61, %v20433_v6  ;;  %v7961_v9 = vcombine.low %v7945_v52, %v7959_v54  ;;  %v7960_v30 = vcombine.low %v7938_v8, %v7952_v27  ;;  %v20761_v61 = vcombine.high %v20742_v46, %v20743_v39  ;;  %v20765_v27 = vld [vmem:[#allocation117_spill] sm:$0xff] }
 0x461   : > { %v7013_v26 = vcombine.low %v7005_v45, %v7012_v48  ;;  %v7965_v5 = vcombine.low %v20758_v16, %v20760_v35  ;;  %v7054_v59 = vrot.slane %v7046_v10, %v20433_v6  ;;  %v20764_v52 = vcombine.low %v20762_v40, %v20763_v47  ;;  %v20767_v35 = vld [vmem:[#allocation131_spill] sm:$0xff] }
 0x462   : > { %v7047_v25 = vcombine.low %v7038_v19, %v7045_v4  ;;  %v17896_v37 = vrot.slane %v20761_v61, %v20433_v6  ;;  %v8263_v8 = vpack.c.bf16 %v7961_v9, %v7895_v17  ;;  %v8262_v38 = vpack.c.bf16 %v7960_v30, %v7894_v33  ;;  %v20769_v33 = vld [vmem:[#allocation137_spill] sm:$0xff]  ;;  %v14334_v30 = vld [vmem:[%s20105_s10 + $0x158] sm:$0xff]  }
 0x463   : > { %v17902_v45 = vrot.slane %v20764_v52, %v20433_v6  ;;  %v20766_v54 = vcombine.low %v20765_v27, %v20759_v57  ;;  %v17911_v19 = vrot.slane %v7965_v5, %v20433_v6  ;;  %v8028_v61 = vcombine.low %v7682_v36, %v20767_v35 }
 0x464   : > { %v7061_v4 = vrot.slane %v7047_v25, %v20433_v6  ;;  %v20768_v17 = vcombine.high %v20767_v35, %v20767_v35  ;;  %13717 = vmatprep.mubr.msk.bf16.mxu1 %vm6376_vm3, %v8263_v8  ;;  %v20770_v25 = vcombine.low %v17304_v50, %v17275_v15  ;;  %v20771_v36 = vcombine.high %v17304_v50, %v17275_v15  ;;  %v20772_v8 = vld [vmem:[#allocation4_spill] sm:$0xff]  ;;  %v20780_v15 = vld [vmem:[#allocation21_spill] sm:$0xff] }
 0x465   : > { %v17908_v48 = vrot.slane %v20766_v54, %v20433_v6  ;;  %v7995_v10 = vcombine.high %v17896_v37, %v17902_v45  ;;  %v17943_v0 = vrot.slane %v8028_v61, %v20433_v6  ;;  %8412 = vmatmul.mubr.bf16.vlgmr.msra.gmra.mxu1 %v8262_v38  ;;  %v17996_v35 = vrot.slane %v20780_v15, %v20433_v6 }
 0x466   : > { %v8029_v9 = vcombine.low %v20769_v33, %v20768_v17  ;;  %v17931_v52 = vrot.slane %v20770_v25, %v20433_v6  ;;  %v17937_v54 = vrot.slane %v20771_v36, %v20433_v6  ;;  %v6741_v17 = vcombine.high %v20772_v8, %v20772_v8  ;;  %9557 = vmatpush1.bf16.msra.mxu1 %v14334_v30  ;;  %v20778_v30 = vld [vmem:[#allocation129_spill] sm:$0xff] }
 0x467   : > { %v7997_v5 = vcombine.high %v17908_v48, %v17911_v19  ;;  %v7062_v7 = vcombine.low %v7054_v59, %v7061_v4  ;;  %v8011_v29 = vrot.slane %v7995_v10, %v20433_v6  ;;  %v17953_v36 = vrot.slane %v20772_v8, %v20433_v6  ;;  %v20773_v10 = vld [vmem:[#allocation46_spill] sm:$0xff]  ;;  %9558 = vmatprep.subr.bf16.mxu1 %v20400_v31 }
 0x468   : > { %v17946_v11 = vrot.slane %v8029_v9, %v20433_v6  ;;  %v8063_v53 = vcombine.high %v17931_v52, %v17937_v54  ;;  %v17956_v18 = vrot.slane %v6741_v17, %v20433_v6  ;;  %v6789_v61 = vcombine.high %v20773_v10, %v20773_v10  ;;  %v20774_v9 = vld [vmem:[#allocation16_spill] sm:$0xff] }
 0x469   : > { %v8025_v25 = vrot.slane %v7997_v5, %v20433_v6  ;;  %v17958_v59 = vpack.c.bf16 %v7062_v7, %v7013_v26  ;;  %v17966_v5 = vrot.slane %v20774_v9, %v20433_v6  ;;  %v14344_v8 = vld [vmem:[%s20102_s7 + $0x4c] ss:$12 sps:$4 sm:$0xff]   ;;  %v14335_v26 = vld [vmem:[%s20105_s10 + $0x150] sm:$0xff]   ;;  %v17977_v38 = vcombine.high %v17953_v36, %v17953_v36 }
 0x46a   : > { %v8061_v4 = vcombine.high %v17943_v0, %v17946_v11  ;;  %v8091_v7 = vrot.slane %v8063_v53, %v20433_v6  ;;  %v20776_v10 = vld [vmem:[#allocation48_spill] sm:$0xff]  ;;  %v17986_v53 = vrot.slane %v6789_v61, %v20433_v6  ;;  %v7064_v61 = vcombine.low %v17953_v36, %v17956_v18  ;;  %9559 = vmatpush1.bf16.msra.mxu1 %v14335_v26 }
 0x46b   : > { %20775 = vst [vmem:[#allocation106_spill] sm:$0xff] %v17966_v5  ;;  %v8027_v17 = vcombine.low %v8011_v29, %v8025_v25  ;;  %v6819_v9 = vcombine.high %v20776_v10, %v20776_v10  ;;  %13669 = vmatmul.mubr.msk.bf16.vlgmr.msra.gmra.mxu0 %vm474_vm0, %v17958_v59  ;;  %v6818_v29 = vcombine.high %v17966_v5, %v17966_v5  ;;  %v20779_v25 = vld [vmem:[#allocation56_spill] sm:$0xff] }
 0x46c   : > { %v8077_v24 = vrot.slane %v8061_v4, %v20433_v6  ;;  %20777 = vst [vmem:[#allocation80_spill] sm:$0xff] %v17986_v53  ;;  %14001 = vmatpush3.bf16.msra.mxu0 %v20778_v30  ;;  %7359 = vmatprep.mubr.bf16.mxu0 %v20400_v31  ;;  %v6820_v44 = vcombine.high %v20779_v25, %v20779_v25 }
 0x46d   : > { %v13659_v4 = vcombine.high %v20755_v21, %v20756_v23  ;;  %v7065_v27 = vcombine.low %v17977_v38, %v17966_v5  ;;  %v7066_v30 = vcombine.low %v20779_v25, %v6818_v29  ;;  %8858 = vmatprep.subr.bf16.mxu0 %v14344_v8  ;;  %v7113_v15 = vcombine.low %v17986_v53, %v6819_v9 }
 0x46e   : > { %v8093_v33 = vcombine.low %v8077_v24, %v8091_v7  ;;  %v7112_v20 = vcombine.low %v6820_v44, %v20776_v10  ;;  %v7114_v23 = vcombine.low %v17996_v35, %v20781_v14  ;;  %v14336_v24 = vld [vmem:[%s20105_s10 + $0x148] sm:$0xff]   ;;  %v7080_v5 = vrot.slane %v7064_v61, %v20433_v6  ;;  %9560 = vmatprep.subr.bf16.mxu1 %v20400_v31 }
 0x46f   : > { %v7073_v12 = vrot.slane %v13659_v4, %v20433_v6  ;;  %v7087_v29 = vrot.slane %v7065_v27, %v20433_v6  ;;  %v7094_v8 = vrot.slane %v7066_v30, %v20433_v6  ;;  %v13660_v44 = vcombine.high %v17996_v35, %v20781_v14  ;;  %9561 = vmatpush1.bf16.msra.mxu1 %v14336_v24 }
 0x470   : > { %v8265_v7 = vpack.c.bf16 %v8093_v33, %v8027_v17  ;;  %v7122_v26 = vrot.slane %v7112_v20, %v20433_v6  ;;  %v7129_v9 = vrot.slane %v7113_v15, %v20433_v6  ;;  %v7136_v4 = vrot.slane %v7114_v23, %v20433_v6  ;;  %9562 = vmatprep.subr.bf16.mxu1 %v20400_v31 }
 0x471   : > { %v7095_v33 = vcombine.low %v7073_v12, %v7080_v5  ;;  %v7096_v17 = vcombine.low %v7087_v29, %v7094_v8  ;;  %v7994_v27 = vcombine.low %v17896_v37, %v17902_v45  ;;  %v7996_v61 = vcombine.low %v17908_v48, %v17911_v19  ;;  %v14337_v12 = vld [vmem:[%s20105_s10 + $0x140] sm:$0xff]  }
 0x472   : > { %13718 = vmatprep.mubr.msk.bf16.mxu1 %vm6376_vm3, %v8265_v7  ;;  %v7143_v30 = vrot.slane %v13660_v44, %v20433_v6  ;;  %v7144_v10 = vcombine.low %v7122_v26, %v7129_v9  ;;  %v8060_v20 = vcombine.low %v17943_v0, %v17946_v11  ;;  %v8062_v15 = vcombine.low %v17931_v52, %v17937_v54 }
 0x473   : > { %v7103_v23 = vrot.slane %v7095_v33, %v20433_v6  ;;  %v7110_v37 = vrot.slane %v7096_v17, %v20433_v6  ;;  %v8004_v45 = vrot.slane %v7994_v27, %v20433_v6  ;;  %v8018_v48 = vrot.slane %v7996_v61, %v20433_v6  ;;  %9563 = vmatpush1.bf16.msra.mxu1 %v14337_v12 }
 0x474   : > { %v7145_v19 = vcombine.low %v7136_v4, %v7143_v30  ;;  %v7152_v0 = vrot.slane %v7144_v10, %v20433_v6  ;;  %v8070_v11 = vrot.slane %v8060_v20, %v20433_v6  ;;  %v8084_v52 = vrot.slane %v8062_v15, %v20433_v6  ;;  %9564 = vmatprep.subr.bf16.mxu1 %v20400_v31  ;;  %v14338_v20 = vld [vmem:[%s20105_s10 + $0x138] sm:$0xff]  }
 0x475   : > { %v7111_v54 = vcombine.low %v7103_v23, %v7110_v37  ;;  %v8026_v5 = vcombine.low %v8004_v45, %v8018_v48  ;;  %v7780_v24 = vcombine.high %v17626_v60, %v17626_v60  ;;  %v20782_v7 = vcombine.high %v17440_v32, %v17440_v32 }
 0x476   : > { %v7159_v8 = vrot.slane %v7145_v19, %v20433_v6  ;;  %v8092_v44 = vcombine.low %v8070_v11, %v8084_v52  ;;  %v20783_v10 = vcombine.low %v17267_v22, %v17307_v1  ;;  %v20784_v9 = vcombine.low %v17311_v51, %v17440_v32  ;;  %v20789_v52 = vld [vmem:[#allocation45_spill] sm:$0xff] }
 0x477   : > { %v8096_v29 = vcombine.low %v17626_v60, %v20782_v7  ;;  %v8097_v33 = vcombine.low %v7780_v24, %v17610_v34  ;;  %v20785_v27 = vcombine.high %v17610_v34, %v17610_v34  ;;  %v20786_v22 = vcombine.low %v17699_v42, %v17682_v13  ;;  %9565 = vmatpush1.bf16.msra.mxu1 %v14338_v20  ;;  %v20797_v34 = vld [vmem:[#allocation7_spill] sm:$0xff] }
 0x478   : > { %v18054_v26 = vrot.slane %v20783_v10, %v20433_v6  ;;  %v18060_v4 = vrot.slane %v20784_v9, %v20433_v6  ;;  %v7160_v15 = vcombine.low %v7152_v0, %v7159_v8  ;;  %v8264_v12 = vpack.c.bf16 %v8092_v44, %v8026_v5  ;;  %v20790_v8 = vld [vmem:[#allocation67_spill] sm:$0xff]  ;;  %9566 = vmatprep.subr.bf16.mxu1 %v20400_v31 }
 0x479   : > { %v18064_v17 = vrot.slane %v8096_v29, %v20433_v6  ;;  %v8160_v61 = vcombine.low %v17664_v2, %v20785_v27  ;;  %v18074_v30 = vrot.slane %v20786_v22, %v20433_v6  ;;  %v20787_v37 = vcombine.high %v17699_v42, %v17682_v13  ;;  %v14339_v27 = vld [vmem:[%s20105_s10 + $0x130] sm:$0xff]   ;;  %v20796_v13 = vld [vmem:[#allocation81_spill] sm:$0xff] }
 0x47a   : > { %v8127_v23 = vcombine.high %v18054_v26, %v18060_v4  ;;  %v18089_v48 = vrot.slane %v8097_v33, %v20433_v6  ;;  %v20788_v0 = vcombine.low %v17702_v56, %v17692_v43  ;;  %v6837_v5 = vcombine.high %v20789_v52, %v20789_v52  ;;  %8420 = vmatmul.mubr.bf16.gmra.mxu1 %v8264_v12  ;;  %v20791_v22 = vld [vmem:[#allocation59_spill] sm:$0xff] }
 0x47b   : > { %v18086_v45 = vrot.slane %v20787_v37, %v20433_v6  ;;  %v18092_v19 = vrot.slane %v8160_v61, %v20433_v6  ;;  %v18102_v24 = vpack.c.bf16 %v7160_v15, %v7111_v54  ;;  %v18107_v29 = vrot.slane %v20789_v52, %v20433_v6  ;;  %9567 = vmatpush1.bf16.msra.mxu1 %v14339_v27 }
 0x47c   : > { %v18098_v11 = vrot.slane %v20788_v0, %v20433_v6  ;;  %v8143_v7 = vrot.slane %v8127_v23, %v20433_v6  ;;  %v6885_v44 = vcombine.high %v20790_v8, %v20790_v8  ;;  %v8129_v10 = vcombine.high %v18064_v17, %v18089_v48  ;;  %v20794_v23 = vld [vmem:[#allocation5_spill] sm:$0xff]  ;;  %9568 = vmatprep.subr.bf16.mxu1 %v20400_v31 }
 0x47d   : > { %v8193_v9 = vcombine.high %v18092_v19, %v18074_v30  ;;  %v18118_v33 = vrot.slane %v6837_v5, %v20433_v6  ;;  %13670 = vmatmul.mubr.msk.bf16.gmra.mxu0 %vm474_vm0, %v18102_v24  ;;  %v18127_v61 = vcombine.high %v18107_v29, %v18107_v29  ;;  %v18131_v15 = vrot.slane %v20791_v22, %v20433_v6  ;;  %v20795_v5 = vld [vmem:[#allocation79_spill] sm:$0xff] }
 0x47e   : > { %v8195_v54 = vcombine.high %v18086_v45, %v18098_v11  ;;  %v18134_v12 = vrot.slane %v6885_v44, %v20433_v6  ;;  %v6915_v20 = vcombine.high %v20794_v23, %v20794_v23  ;;  %v8157_v37 = vrot.slane %v8129_v10, %v20433_v6  ;;  %7369 = vmatprep.mubr.bf16.mxu0 %v20400_v31 }
 0x47f   : > { %20792 = vst [vmem:[#allocation86_spill] sm:$0xff] %v18131_v15  ;;  %v8209_v0 = vrot.slane %v8193_v9, %v20433_v6  ;;  %v6916_v8 = vcombine.high %v20795_v5, %v20795_v5  ;;  %v6914_v22 = vcombine.high %v18131_v15, %v18131_v15  ;;  %v6933_v44 = vcombine.high %v20796_v13, %v20796_v13 }
 0x480   : > { %20793 = vst [vmem:[#allocation89_spill] sm:$0xff] %v18134_v12  ;;  %v8223_v52 = vrot.slane %v8195_v54, %v20433_v6  ;;  %v18150_v2 = vrot.slane %v20797_v34, %v20433_v6  ;;  %v18154_v10 = vrot.slane %v20796_v13, %v20433_v6  ;;  %v8159_v9 = vcombine.low %v8143_v7, %v8157_v37  ;;  %v14340_v7 = vld [vmem:[%s20105_s10 + $0x128] sm:$0xff]  }
 0x481   : > { %v7161_v51 = vcombine.low %v18107_v29, %v18118_v33  ;;  %v7162_v43 = vcombine.low %v18127_v61, %v18131_v15  ;;  %v18162_v53 = vrot.slane %v6933_v44, %v20433_v6  ;;  %v7163_v34 = vcombine.low %v20795_v5, %v6914_v22  ;;  %v14396_v22 = vld [vmem:[%s14532_s17] sm:$0xff]  ;;  %9569 = vmatpush1.bf16.msra.mxu1 %v14340_v7  ;;  %v14398_v7 = vld [vmem:[%s14532_s17 + $0x10] sm:$0xff] }
 0x482   : > { %v8225_v54 = vcombine.low %v8209_v0, %v8223_v52  ;;  %v7164_v13 = vcombine.low %v6916_v8, %v20794_v23  ;;  %v7210_v25 = vcombine.low %v18134_v12, %v6915_v20  ;;  %v20798_v52 = vld [vmem:[#allocation85_spill] sm:$0xff]  ;;  %5147 = vrot.lane.b32.xlu0 %v14396_v22, %s14438_s28  ;;  %v8128_v5 = vcombine.low %v18064_v17, %v18089_v48 }
 0x483   : > { %v7171_v0 = vrot.slane %v7161_v51, %v20433_v6  ;;  %v7178_v27 = vrot.slane %v7162_v43, %v20433_v6  ;;  %v7211_v44 = vcombine.low %v18150_v2, %v20798_v52  ;;  %v7185_v20 = vrot.slane %v7163_v34, %v20433_v6  ;;  %v14397_v51 = vld [vmem:[%s14532_s17 + $0x20] sm:$0xff]  ;;  %9570 = vmatprep.subr.bf16.mxu1 %v20400_v31 }
 0x484   : > { %v8267_v37 = vpack.c.bf16 %v8225_v54, %v8159_v9  ;;  %v7192_v8 = vrot.slane %v7164_v13, %v20433_v6  ;;  %v13661_v23 = vcombine.high %v18150_v2, %v20798_v52  ;;  %v7213_v9 = vcombine.low %v18154_v10, %v18162_v53  ;;  %5151 = vrot.lane.b32.xlu1 %v14397_v51, %s14438_s28 }
 0x485   : > { %v7193_v43 = vcombine.low %v7171_v0, %v7178_v27  ;;  %v7220_v54 = vrot.slane %v7210_v25, %v20433_v6  ;;  %v7227_v22 = vrot.slane %v7211_v44, %v20433_v6  ;;  %v8126_v34 = vcombine.low %v18054_v26, %v18060_v4 }
 0x486   : > { %13719 = vmatprep.mubr.msk.bf16.mxu1 %vm6376_vm3, %v8267_v37  ;;  %v7194_v13 = vcombine.low %v7185_v20, %v7192_v8  ;;  %v7234_v12 = vrot.slane %v13661_v23, %v20433_v6  ;;  %v7241_v15 = vrot.slane %v7213_v9, %v20433_v6  ;;  %v14341_v37 = vld [vmem:[%s20105_s10 + $0x120] sm:$0xff]   ;;  %v8192_v4 = vcombine.low %v18092_v19, %v18074_v30  ;;  %v20799_v8 = vld [vmem:[#allocation11_spill] sm:$0xff] }
 0x487   : > { %v7201_v25 = vrot.slane %v7193_v43, %v20433_v6  ;;  %v7242_v0 = vcombine.low %v7220_v54, %v7227_v22  ;;  %v8136_v26 = vrot.slane %v8126_v34, %v20433_v6  ;;  %v8150_v17 = vrot.slane %v8128_v5, %v20433_v6  ;;  %5149 = vrot.lane.b32.xlu0 %v14398_v7, %s14438_s28  ;;  %v14401_v7 = vld [vmem:[%s14532_s17 + $0x50] sm:$0xff] }
 0x488   : > { %v7208_v23 = vrot.slane %v7194_v13, %v20433_v6  ;;  %v7243_v27 = vcombine.low %v7234_v12, %v7241_v15  ;;  %v8194_v48 = vcombine.low %v18086_v45, %v18098_v11  ;;  %v8202_v20 = vrot.slane %v8192_v4, %v20433_v6  ;;  %v14399_v15 = vld [vmem:[%s14532_s17 + $0x30] sm:$0xff]  ;;  %9571 = vmatpush1.bf16.msra.mxu1 %v14341_v37  ;;  %v20800_v37 = vld [vmem:[#allocation84_spill] sm:$0xff]  ;;  %v14400_v4 = vld [vmem:[%s14532_s17 + $0x40] sm:$0xff] }
 0x489   : > { %v7250_v44 = vrot.slane %v7242_v0, %v20433_v6  ;;  %v18212_v30 = vcombine.high %v17702_v56, %v17702_v56  ;;  %v18216_v19 = vcombine.high %v18154_v10, %v18154_v10  ;;  %5153 = vrot.lane.b32.xlu1 %v14399_v15, %s14438_s28  ;;  %v8158_v12 = vcombine.low %v8136_v26, %v8150_v17  ;;  %v14345_v56 = vld [vmem:[%s20105_s10 + $0x178] sm:$0xff]   ;;  %v20802_v0 = vld [vmem:[#allocation6_spill] sm:$0xff] }
 0x48a   : > { %v7209_v45 = vcombine.low %v7201_v25, %v7208_v23  ;;  %v7257_v11 = vrot.slane %v7243_v27, %v20433_v6  ;;  %v8216_v5 = vrot.slane %v8194_v48, %v20433_v6  ;;  %v8509_v9 = vrot.slane %v20799_v8, %v20433_v6  ;;  %9580 = vmatprep.subr.bf16.mxu1 %v20400_v31 }
 0x48b   : > { %v13721_v51 = vcombine.high %v20748_v63, %v20746_v49  ;;  %v8232_v43 = vrot.slane %v18212_v30, %v20433_v6  ;;  %v7265_v54 = vrot.slane %v18216_v19, %v20433_v6  ;;  %v9000_v22 = vcombine.high %v20731_v55, %v20731_v55  ;;  %5155 = vrot.lane.b32.xlu0 %v14400_v4, %s14438_s28 }
 0x48c   : > { %v7258_v34 = vcombine.low %v7250_v44, %v7257_v11  ;;  %v8224_v13 = vcombine.low %v8202_v20, %v8216_v5  ;;  %v20801_v25 = vcombine.high %v20800_v37, %v20800_v37  ;;  %v13742_v23 = vcombine.high %v20734_v58, %v20729_v3  ;;  %9581 = vmatpush2.bf16.msra.mxu1 %v14345_v56  ;;  %v14346_v58 = vld [vmem:[%s20105_s10 + $0x170] sm:$0xff]  }
 0x48d   : > { %v7631_v27 = vcombine.high %v20742_v46, %v20742_v46  ;;  %v8233_v17 = vcombine.high %v8232_v43, %v8232_v43  ;;  %v9009_v48 = vcombine.low %v20731_v55, %v20733_v28  ;;  %5157 = vrot.lane.b32.xlu1 %v14401_v7, %s14438_s28  ;;  %v7272_v15 = vrot.slane %v7265_v54, %v20433_v6  ;;  %v20803_v28 = vld [vmem:[#allocation82_spill] sm:$0xff] }
 0x48e   : > { %v9007_v26 = vcombine.low %v20802_v0, %v20801_v25  ;;  %v18250_v44 = vpack.c.bf16 %v7258_v34, %v7209_v45  ;;  %v8266_v20 = vpack.c.bf16 %v8224_v13, %v8158_v12  ;;  %v9010_v11 = vcombine.low %v9000_v22, %v20729_v3  ;;  %9582 = vmatprep.subr.bf16.mxu1 %v20400_v31 }
 0x48f   : > { %v8247_v46 = vrot.slane %v8233_v17, %v20433_v6  ;;  %v8240_v5 = vrot.slane %v8232_v43, %v20433_v6  ;;  %v9024_v45 = vrot.slane %v20803_v28, %v20433_v6  ;;  %v9031_v3 = vrot.slane %v9009_v48, %v20433_v6 }
 0x490   : > { %v9017_v55 = vrot.slane %v9007_v26, %v20433_v6  ;;  %13671 = vmatmul.mubr.msk.bf16.gmra.mxu0 %vm474_vm0, %v18250_v44  ;;  %8428 = vmatmul.mubr.bf16.gmra.mxu1 %v8266_v20  ;;  %v9038_v12 = vrot.slane %v9010_v11, %v20433_v6  ;;  %v9074_v56 = vcombine.low %v20739_v62, %v20741_v41  ;;  %v14347_v26 = vld [vmem:[%s20105_s10 + $0x168] sm:$0xff]  }
 0x491   : > { %v8269_v54 = vpack.c.bf16 %v8247_v46, %v8247_v46  ;;  %7379 = vmatprep.mubr.bf16.mxu0 %v20400_v31  ;;  %v13743_v34 = vcombine.high %v20739_v62, %v20741_v41  ;;  %v9076_v25 = vcombine.low %v20743_v39, %v7631_v27  ;;  %v9083_v0 = vrot.slane %v13742_v23, %v20433_v6 }
 0x492   : > { %v9039_v43 = vcombine.low %v9017_v55, %v9024_v45  ;;  %v9040_v22 = vcombine.high %v9017_v55, %v9024_v45  ;;  %v9041_v13 = vcombine.low %v9031_v3, %v9038_v12  ;;  %v9042_v37 = vcombine.high %v9031_v3, %v9038_v12  ;;  %9583 = vmatpush2.bf16.msra.mxu1 %v14346_v58  ;;  %v14403_v58 = vld [vmem:[%s14532_s17 + $0x60] sm:$0xff] }
 0x493   : > { %v6770_v4 = vcombine.high %v20755_v21, %v20755_v21  ;;  %v7633_v17 = vcombine.high %v20743_v39, %v20743_v39  ;;  %13720 = vmatprep.mubr.msk.bf16.mxu1 %vm6376_vm3, %v8269_v54  ;;  %v18282_v62 = vpack.c.bf16 %v7272_v15, %v7272_v15  ;;  %v9090_v41 = vrot.slane %v9074_v56, %v20433_v6  ;;  %v18291_v21 = vld [vmem:[%s14532_s17 + $0x70] sm:$0xff]  ;;  %v14348_v3 = vld [vmem:[%s20105_s10 + $0x160] sm:$0xff]  }
 0x494   : > { %v9056_v23 = vrot.slane %v9040_v22, %v20433_v6  ;;  %v9070_v27 = vrot.slane %v9042_v37, %v20433_v6  ;;  %v9097_v48 = vrot.slane %v13743_v34, %v20433_v6  ;;  %v9104_v7 = vrot.slane %v9076_v25, %v20433_v6  ;;  %9584 = vmatprep.subr.bf16.mxu1 %v20400_v31 }
 0x495   : > { %v9649_v39 = vcombine.high %v18291_v21, %v18291_v21  ;;  %v18297_v20 = vrot.slane %v18291_v21, %v20433_v6  ;;  %v9105_v15 = vcombine.low %v9083_v0, %v9090_v41  ;;  %v9106_v11 = vcombine.high %v9083_v0, %v9090_v41  ;;  %5159 = vrot.lane.b32.xlu0 %v14403_v58, %s14438_s28 }
 0x496   : > { %v8268_v46 = vpack.c.bf16 %v8240_v5, %v8240_v5  ;;  %v9072_v55 = vcombine.low %v9056_v23, %v9070_v27  ;;  %v9107_v28 = vcombine.low %v9097_v48, %v9104_v7  ;;  %v9108_v45 = vcombine.high %v9097_v48, %v9104_v7  ;;  %9585 = vmatpush2.bf16.msra.mxu1 %v14347_v26  ;;  %v20806_v23 = vld [vmem:[#allocation9_spill] sm:$0xff]  ;;  %v20808_v48 = vld [vmem:[#allocation10_spill] sm:$0xff] }
 0x497   : > { %v9002_v12 = vcombine.high %v20763_v47, %v20763_v47  ;;  %v9139_v56 = vcombine.low %v7633_v17, %v20762_v40  ;;  %v13744_v54 = vcombine.high %v20759_v57, %v20758_v16  ;;  %v7729_v22 = vcombine.high %v17304_v50, %v17304_v50  ;;  %9586 = vmatprep.subr.bf16.mxu1 %v20400_v31  ;;  %v20817_v50 = vld [vmem:[#allocation144_spill] sm:$0xff] }
 0x498   : > { %13672 = vmatmul.mubr.msk.bf16.gmra.mxu0 %vm474_vm0, %v18282_v62  ;;  %8436 = vmatmul.mubr.bf16.gmra.mxu1 %v8268_v46  ;;  %v9063_v5 = vrot.slane %v9041_v13, %v20433_v6  ;;  %v9122_v34 = vrot.slane %v9106_v11, %v20433_v6  ;;  %v9136_v37 = vrot.slane %v9108_v45, %v20433_v6  ;;  %v20804_v13 = vld [vmem:[#allocation8_spill] sm:$0xff]  ;;  %v20811_v11 = vld [vmem:[#allocation37_spill] sm:$0xff] }
 0x499   : > { %v9004_v40 = vcombine.high %v17307_v1, %v17307_v1  ;;  %v9049_v57 = vrot.slane %v9039_v43, %v20433_v6  ;;  %v9115_v25 = vrot.slane %v9105_v15, %v20433_v6  ;;  %v9129_v0 = vrot.slane %v9107_v28, %v20433_v6  ;;  %14002 = vmatprep.mubr.msk.bf16.mxu0 %vm474_vm0, %v17958_v59  ;;  %v20810_v59 = vld [vmem:[#allocation43_spill] sm:$0xff]  ;;  %v20812_v28 = vld [vmem:[#allocation42_spill] sm:$0xff] }
 0x49a   : > { %v9138_v26 = vcombine.low %v9122_v34, %v9136_v37  ;;  %9587 = vmatpush2.bf16.msra.mxu1 %v14348_v3  ;;  %v20805_v17 = vcombine.high %v20804_v13, %v20804_v13  ;;  %v20807_v27 = vcombine.low %v20804_v13, %v20806_v23  ;;  %v20809_v7 = vrot.slane %v20808_v48, %v20433_v6  ;;  %v14404_v13 = vld [vmem:[%s14532_s17 + $0x8] sm:$0xff]  ;;  %v14405_v23 = vld [vmem:[%s14532_s17 + $0x18] sm:$0xff] }
 0x49b   : > { %v8542_v58 = vcombine.low %v20811_v11, %v20810_v59  ;;  %v13722_v46 = vcombine.high %v20811_v11, %v20810_v59  ;;  %v8544_v45 = vcombine.low %v20812_v28, %v6770_v4  ;;  %v8551_v3 = vrot.slane %v13721_v51, %v20433_v6  ;;  %10565 = vmatprep.subr.bf16.mxu1 %v20400_v31  ;;  %v14342_v4 = vld [vmem:[%s20102_s7 + $0x48] ss:$12 sps:$4 sm:$0xff]   ;;  %v14350_v59 = vld [vmem:[%s20105_s10 + $0x1b8] sm:$0xff]  }
 0x49c   : > { %v8495_v41 = vcombine.low %v20805_v17, %v20746_v49  ;;  %v8516_v43 = vrot.slane %v20807_v27, %v20433_v6  ;;  %v8524_v15 = vcombine.low %v20809_v7, %v8509_v9  ;;  %v13746_v8 = vcombine.high %v17440_v32, %v17626_v60  ;;  %8450 = vrot.lane.b32.xlu1 %v14404_v13, %s14438_s28  ;;  %v20815_v11 = vld [vmem:[#allocation131_spill] sm:$0xff] }
 0x49d   : > { %v9440_v9 = vpack.c.bf16 %v9138_v26, %v9072_v55  ;;  %v9071_v37 = vcombine.low %v9049_v57, %v9063_v5  ;;  %v8558_v17 = vrot.slane %v8542_v58, %v20433_v6  ;;  %v8565_v63 = vrot.slane %v13722_v46, %v20433_v6  ;;  %8452 = vrot.lane.b32.xlu0 %v14405_v23, %s14438_s28  ;;  %v18365_v55 = vld [vmem:[%s20102_s7 + $0x50] ss:$12 sps:$4 sm:$0xff]   ;;  %v20813_v26 = vld [vmem:[#allocation117_spill] sm:$0xff] }
 0x49e   : > { %v8523_v34 = vrot.slane %v8495_v41, %v20433_v6  ;;  %v8572_v49 = vrot.slane %v8544_v45, %v20433_v6  ;;  %v9137_v51 = vcombine.low %v9115_v25, %v9129_v0  ;;  %v8532_v57 = vrot.slane %v8524_v15, %v20433_v6  ;;  %v14351_v13 = vld [vmem:[%s20105_s10 + $0x1b0] sm:$0xff]  }
 0x49f   : > { %13784 = vmatprep.mubr.msk.bf16.mxu1 %vm6376_vm3, %v9440_v9  ;;  %v9140_v41 = vcombine.low %v20763_v47, %v20813_v26  ;;  %v9141_v27 = vcombine.low %v9002_v12, %v20758_v16  ;;  %v8573_v48 = vcombine.low %v8551_v3, %v8558_v17  ;;  %v18372_v7 = vrot.slane %v9139_v56, %v20433_v6  ;;  %v20816_v9 = vld [vmem:[#allocation140_spill] sm:$0xff] }
 0x4a0   : > { %v8525_v5 = vcombine.low %v8516_v43, %v8523_v34  ;;  %v8574_v25 = vcombine.low %v8565_v63, %v8572_v49  ;;  %v9439_v0 = vpack.c.bf16 %v9137_v51, %v9071_v37  ;;  %14003 = vmatmul.mubr.msk.bf16.vlgmr.msra.gmra.mxu0 %vm474_vm0, %v18102_v24  ;;  %v18387_v47 = vrot.slane %v13744_v54, %v20433_v6  ;;  %v20814_v24 = vld [vmem:[#allocation137_spill] sm:$0xff] }
 0x4a1   : > { %v18381_v15 = vrot.slane %v9140_v41, %v20433_v6  ;;  %v18384_v16 = vrot.slane %v9141_v27, %v20433_v6  ;;  %8859 = vmatpush1.bf16.msra.mxu0 %v14342_v4  ;;  %14006 = vmatprep.mubr.msk.bf16.mxu0 %vm474_vm0, %v18250_v44  ;;  %v8581_v12 = vrot.slane %v8573_v48, %v20433_v6 }
 0x4a2   : > { %v8539_v43 = vrot.slane %v8525_v5, %v20433_v6  ;;  %v8588_v56 = vrot.slane %v8574_v25, %v20433_v6  ;;  %v9205_v58 = vcombine.low %v20815_v11, %v20814_v24  ;;  %14010 = vmatprep.subr.bf16.mxu0 %v18365_v55  ;;  %9589 = vmatmul.mubr.bf16.vlgmr.msra.gmra.mxu1 %v9439_v0  ;;  %v14407_v25 = vld [vmem:[%s14532_s17 + $0x38] sm:$0xff] }
 0x4a3   : > { %v9172_v45 = vcombine.high %v18372_v7, %v18381_v15  ;;  %v9174_v54 = vcombine.high %v18384_v16, %v18387_v47  ;;  %v13745_v44 = vcombine.high %v20815_v11, %v20814_v24  ;;  %v9207_v34 = vcombine.low %v20816_v9, %v7729_v22  ;;  %10566 = vmatpush1.bf16.msra.mxu1 %v14350_v59  ;;  %v20819_v24 = vld [vmem:[#allocation106_spill] sm:$0xff] }
 0x4a4   : > { %v8540_v46 = vcombine.low %v8532_v57, %v8539_v43  ;;  %v8589_v3 = vcombine.low %v8581_v12, %v8588_v56  ;;  %v18407_v37 = vrot.slane %v9205_v58, %v20433_v6  ;;  %v7827_v4 = vcombine.high %v17699_v42, %v17699_v42  ;;  %10567 = vmatprep.subr.bf16.mxu1 %v20400_v31  ;;  %v14406_v57 = vld [vmem:[%s14532_s17 + $0x28] sm:$0xff]  ;;  %v20818_v12 = vld [vmem:[#allocation56_spill] sm:$0xff] }
 0x4a5   : > { %v9188_v17 = vrot.slane %v9172_v45, %v20433_v6  ;;  %v9202_v63 = vrot.slane %v9174_v54, %v20433_v6  ;;  %v18418_v49 = vrot.slane %v20817_v50, %v20433_v6  ;;  %v18424_v51 = vrot.slane %v13745_v44, %v20433_v6  ;;  %8454 = vrot.lane.b32.xlu1 %v14406_v57, %s14438_s28  ;;  %v14352_v43 = vld [vmem:[%s20105_s10 + $0x1a8] sm:$0xff]   ;;  %v20820_v58 = vld [vmem:[#allocation80_spill] sm:$0xff] }
 0x4a6   : > { %v18421_v22 = vpack.c.bf16 %v8589_v3, %v8540_v46  ;;  %v18427_v23 = vrot.slane %v9207_v34, %v20433_v6  ;;  %v6772_v5 = vcombine.high %v20812_v28, %v20812_v28  ;;  %v6866_v41 = vcombine.high %v17996_v35, %v17996_v35  ;;  %8456 = vrot.lane.b32.xlu0 %v14407_v25, %s14438_s28  ;;  %v20821_v46 = vld [vmem:[#allocation48_spill] sm:$0xff] }
 0x4a7   : > { %v9204_v26 = vcombine.low %v9188_v17, %v9202_v63  ;;  %v6868_v27 = vcombine.high %v20781_v14, %v20781_v14  ;;  %v8487_v48 = vcombine.high %v17956_v18, %v17956_v18  ;;  %v9238_v0 = vcombine.high %v18407_v37, %v18424_v51  ;;  %10568 = vmatpush1.bf16.msra.mxu1 %v14351_v13 }
 0x4a8   : > { %v9240_v28 = vcombine.high %v18427_v23, %v18418_v49  ;;  %v8590_v59 = vcombine.low %v6772_v5, %v17953_v36  ;;  %v8591_v35 = vcombine.low %v17956_v18, %v17977_v38  ;;  %14007 = vmatmul.mubr.msk.bf16.gmra.mxu0 %vm474_vm0, %v18282_v62  ;;  %v13723_v11 = vcombine.high %v20819_v24, %v20818_v12  ;;  %v20823_v24 = vld [vmem:[#allocation142_spill] sm:$0xff] }
 0x4a9   : > { %v8592_v56 = vcombine.low %v8487_v48, %v20818_v12  ;;  %v8639_v45 = vcombine.low %v20821_v46, %v20820_v58  ;;  %v13724_v36 = vcombine.high %v20821_v46, %v20820_v58  ;;  %8876 = vmatprep.mubr.bf16.mxu0 %v20400_v31  ;;  %v9254_v18 = vrot.slane %v9238_v0, %v20433_v6  ;;  %v14408_v0 = vld [vmem:[%s14532_s17 + $0x48] sm:$0xff]  ;;  %v14360_v58 = vld [vmem:[%s20102_s7 + $0x64] ss:$12 sps:$4 sm:$0xff]  }
 0x4aa   : > { %v9268_v38 = vrot.slane %v9240_v28, %v20433_v6  ;;  %v8600_v54 = vrot.slane %v8590_v59, %v20433_v6  ;;  %v8607_v62 = vrot.slane %v8591_v35, %v20433_v6  ;;  %v8621_v44 = vrot.slane %v13723_v11, %v20433_v6  ;;  %10569 = vmatprep.subr.bf16.mxu1 %v20400_v31  ;;  %v20822_v28 = vld [vmem:[#allocation186_spill] sm:$0xff] }
 0x4ab   : > { %v8614_v3 = vrot.slane %v8592_v56, %v20433_v6  ;;  %v8641_v9 = vcombine.low %v20781_v14, %v6866_v41  ;;  %v8642_v34 = vcombine.low %v6868_v27, %v18107_v29  ;;  %v8649_v63 = vrot.slane %v8639_v45, %v20433_v6  ;;  %10570 = vmatpush1.bf16.msra.mxu1 %v14352_v43 }
 0x4ac   : > { %v9270_v13 = vcombine.low %v9254_v18, %v9268_v38  ;;  %v8622_v17 = vcombine.low %v8600_v54, %v8607_v62  ;;  %v8656_v50 = vrot.slane %v13724_v36, %v20433_v6  ;;  %v9171_v14 = vcombine.low %v18372_v7, %v18381_v15  ;;  %10571 = vmatprep.subr.bf16.mxu1 %v20400_v31  ;;  %v14353_v15 = vld [vmem:[%s20105_s10 + $0x1a0] sm:$0xff]   ;;  %v20824_v36 = vld [vmem:[#allocation180_spill] sm:$0xff]  ;;  %v20825_v18 = vld [vmem:[#allocation39_spill] sm:$0xff] }
 0x4ad   : > { %v8623_v5 = vcombine.low %v8614_v3, %v8621_v44  ;;  %v8663_v57 = vrot.slane %v8641_v9, %v20433_v6  ;;  %v8670_v48 = vrot.slane %v8642_v34, %v20433_v6  ;;  %v9173_v25 = vcombine.low %v18384_v16, %v18387_v47  ;;  %8458 = vrot.lane.b32.xlu1 %v14408_v0, %s14438_s28  ;;  %v20826_v44 = vld [vmem:[#allocation184_spill] sm:$0xff]  ;;  %v20827_v9 = vld [vmem:[#allocation191_spill] sm:$0xff] }
 0x4ae   : > { %v9442_v29 = vpack.c.bf16 %v9270_v13, %v9204_v26  ;;  %v8630_v41 = vrot.slane %v8622_v17, %v20433_v6  ;;  %v8671_v27 = vcombine.low %v8649_v63, %v8656_v50  ;;  %v9340_v59 = vcombine.low %v20822_v28, %v18212_v30  ;;  %v14409_v26 = vld [vmem:[%s14532_s17 + $0x58] sm:$0xff]  ;;  %v14410_v50 = vld [vmem:[%s14532_s17 + $0x68] sm:$0xff] }
 0x4af   : > { %v8637_v35 = vrot.slane %v8623_v5, %v20433_v6  ;;  %v8672_v43 = vcombine.low %v8663_v57, %v8670_v48  ;;  %v9237_v7 = vcombine.low %v18407_v37, %v18424_v51  ;;  %8460 = vrot.lane.b32.xlu0 %v14409_v26, %s14438_s28  ;;  %v9181_v47 = vrot.slane %v9171_v14, %v20433_v6 }
 0x4b0   : > { %13785 = vmatprep.mubr.msk.bf16.mxu1 %vm6376_vm3, %v9442_v29  ;;  %v8679_v16 = vrot.slane %v8671_v27, %v20433_v6  ;;  %v9195_v30 = vrot.slane %v9173_v25, %v20433_v6  ;;  %v9239_v12 = vcombine.low %v18427_v23, %v18418_v49  ;;  %13734 = vmatmul.mubr.msk.bf16.vlgmr.msra.gmra.mxu0 %vm474_vm0, %v18421_v22  ;;  %v14355_v25 = vld [vmem:[%s20105_s10 + $0x190] sm:$0xff]  }
 0x4b1   : > { %v8638_v37 = vcombine.low %v8630_v41, %v8637_v35  ;;  %v8686_v51 = vrot.slane %v8672_v43, %v20433_v6  ;;  %v9247_v56 = vrot.slane %v9237_v7, %v20433_v6  ;;  %v9271_v11 = vcombine.low %v17307_v1, %v20823_v24  ;;  %14011 = vmatpush3.bf16.msra.mxu0 %v18365_v55  ;;  %v14354_v1 = vld [vmem:[%s20105_s10 + $0x198] sm:$0xff]   ;;  %v20828_v7 = vld [vmem:[#allocation79_spill] sm:$0xff] }
 0x4b2   : > { %8886 = vmatprep.mubr.bf16.mxu0 %v20400_v31  ;;  %v9203_v49 = vcombine.low %v9181_v47, %v9195_v30  ;;  %v9261_v23 = vrot.slane %v9239_v12, %v20433_v6  ;;  %v9272_v46 = vcombine.low %v9004_v40, %v17626_v60  ;;  %v9274_v38 = vcombine.low %v20825_v18, %v20824_v36  ;;  %v20831_v47 = vld [vmem:[#allocation5_spill] sm:$0xff] }
 0x4b3   : > { %v8687_v45 = vcombine.low %v8679_v16, %v8686_v51  ;;  %v18517_v54 = vrot.slane %v9271_v11, %v20433_v6  ;;  %v18523_v55 = vrot.slane %v13746_v8, %v20433_v6  ;;  %10572 = vmatpush1.bf16.msra.mxu1 %v14353_v15  ;;  %v13747_v3 = vcombine.high %v20825_v18, %v20824_v36  ;;  %v20829_v15 = vld [vmem:[#allocation86_spill] sm:$0xff]  ;;  %v20830_v16 = vld [vmem:[#allocation89_spill] sm:$0xff] }
 0x4b4   : > { %v9269_v40 = vcombine.low %v9247_v56, %v9261_v23  ;;  %v18529_v62 = vrot.slane %v9272_v46, %v20433_v6  ;;  %v9338_v32 = vcombine.low %v20826_v44, %v7827_v4  ;;  %10573 = vmatprep.subr.bf16.mxu1 %v20400_v31  ;;  %v18541_v8 = vrot.slane %v9274_v38, %v20433_v6 }
 0x4b5   : > { %v18538_v60 = vpack.c.bf16 %v8687_v45, %v8638_v37  ;;  %v18545_v34 = vrot.slane %v20827_v9, %v20433_v6  ;;  %v18548_v13 = vrot.slane %v9340_v59, %v20433_v6  ;;  %9943 = vmatprep.subr.bf16.mxu0 %v14360_v58  ;;  %v18553_v4 = vrot.slane %v13747_v3, %v20433_v6 }
 0x4b6   : > { %v9441_v17 = vpack.c.bf16 %v9269_v40, %v9203_v49  ;;  %v9304_v42 = vcombine.high %v18517_v54, %v18529_v62  ;;  %v9354_v63 = vrot.slane %v9338_v32, %v20433_v6  ;;  %8462 = vrot.lane.b32.xlu1 %v14410_v50, %s14438_s28  ;;  %v18562_v5 = vrot.slane %v9649_v39, %v20433_v6  ;;  %v20833_v50 = vld [vmem:[#allocation26_spill] sm:$0xff] }
 0x4b7   : > { %v9664_v57 = vcombine.high %v18297_v20, %v18297_v20  ;;  %v9306_v48 = vcombine.high %v18523_v55, %v18541_v8  ;;  %v9372_v14 = vcombine.high %v18545_v34, %v18548_v13  ;;  %10574 = vmatpush1.bf16.msra.mxu1 %v14354_v1  ;;  %v8740_v29 = vcombine.low %v18162_v53, %v18216_v19 }
 0x4b8   : > { %9597 = vmatmul.mubr.bf16.gmra.mxu1 %v9441_v17  ;;  %v9320_v41 = vrot.slane %v9304_v42, %v20433_v6  ;;  %v9370_v27 = vcombine.high %v18553_v4, %v9354_v63  ;;  %v6962_v39 = vcombine.high %v18150_v2, %v18150_v2  ;;  %13735 = vmatmul.mubr.msk.bf16.gmra.mxu0 %vm474_vm0, %v18538_v60 }
 0x4b9   : > { %v9334_v0 = vrot.slane %v9306_v48, %v20433_v6  ;;  %v9400_v59 = vrot.slane %v9372_v14, %v20433_v6  ;;  %v6964_v19 = vcombine.high %v20798_v52, %v20798_v52  ;;  %v8489_v35 = vcombine.high %v18118_v33, %v18118_v33  ;;  %8896 = vmatprep.mubr.bf16.mxu0 %v20400_v31 }
 0x4ba   : > { %v9386_v43 = vrot.slane %v9370_v27, %v20433_v6  ;;  %v8688_v2 = vcombine.low %v18118_v33, %v18127_v61  ;;  %v13725_v26 = vcombine.high %v20829_v15, %v20828_v7  ;;  %v8691_v30 = vcombine.low %v20831_v47, %v20830_v16  ;;  %10575 = vmatprep.subr.bf16.mxu1 %v20400_v31  ;;  %v20835_v27 = vld [vmem:[#allocation183_spill] sm:$0xff] }
 0x4bb   : > { %v9336_v12 = vcombine.low %v9320_v41, %v9334_v0  ;;  %v8689_v37 = vcombine.low %v8489_v35, %v20828_v7  ;;  %v13726_v51 = vcombine.high %v20831_v47, %v20830_v16  ;;  %v8738_v56 = vcombine.low %v20798_v52, %v6962_v39  ;;  %10576 = vmatpush1.bf16.msra.mxu1 %v14355_v25  ;;  %v14356_v52 = vld [vmem:[%s20105_s10 + $0x188] sm:$0xff]   ;;  %v20837_v35 = vld [vmem:[#allocation91_spill] sm:$0xff]  ;;  %v20839_v7 = vld [vmem:[#allocation96_spill] sm:$0xff] }
 0x4bc   : > { %v9402_v24 = vcombine.low %v9386_v43, %v9400_v59  ;;  %v8698_v11 = vrot.slane %v8688_v2, %v20433_v6  ;;  %v8712_v33 = vrot.slane %v13725_v26, %v20433_v6  ;;  %v8719_v61 = vrot.slane %v8691_v30, %v20433_v6  ;;  %10577 = vmatprep.subr.bf16.mxu1 %v20400_v31  ;;  %v20838_v2 = vld [vmem:[#allocation103_spill] sm:$0xff]  ;;  %v20840_v26 = vld [vmem:[#allocation118_spill] sm:$0xff] }
 0x4bd   : > { %v8705_v58 = vrot.slane %v8689_v37, %v20433_v6  ;;  %v8739_v49 = vcombine.low %v6964_v19, %v18154_v10  ;;  %v8747_v23 = vrot.slane %v13726_v51, %v20433_v6  ;;  %v8754_v46 = vrot.slane %v8738_v56, %v20433_v6  ;;  %10636 = vrot.lane.b32.xlu0 %v18291_v21, %s14438_s28  ;;  %v20836_v19 = vld [vmem:[#allocation88_spill] sm:$0xff]  ;;  %v20841_v16 = vld [vmem:[#allocation115_spill] sm:$0xff] }
 0x4be   : > { %v9444_v45 = vpack.c.bf16 %v9402_v24, %v9336_v12  ;;  %v8721_v36 = vcombine.low %v8712_v33, %v8719_v61  ;;  %v8768_v18 = vrot.slane %v8740_v29, %v20433_v6  ;;  %v9303_v38 = vcombine.low %v18517_v54, %v18529_v62  ;;  %v14361_v33 = vld [vmem:[%s20105_s10 + $0x1d8] sm:$0xff]  }
 0x4bf   : > { %v8720_v10 = vcombine.low %v8698_v11, %v8705_v58  ;;  %v8761_v1 = vrot.slane %v8739_v49, %v20433_v6  ;;  %v8769_v40 = vcombine.low %v8747_v23, %v8754_v46  ;;  %v9305_v3 = vcombine.low %v18523_v55, %v18541_v8  ;;  %10578 = vmatpush1.bf16.msra.mxu1 %v14356_v52  ;;  %v14357_v55 = vld [vmem:[%s20105_s10 + $0x180] sm:$0xff]   ;;  %v20842_v61 = vld [vmem:[#allocation60_spill] sm:$0xff]  ;;  %v20843_v58 = vld [vmem:[#allocation66_spill] sm:$0xff] }
 0x4c0   : > { %13786 = vmatprep.mubr.msk.bf16.mxu1 %vm6376_vm3, %v9444_v45  ;;  %v8735_v44 = vrot.slane %v8721_v36, %v20433_v6  ;;  %v9313_v32 = vrot.slane %v9303_v38, %v20433_v6  ;;  %v9369_v9 = vcombine.low %v18553_v4, %v9354_v63  ;;  %v9371_v54 = vcombine.low %v18545_v34, %v18548_v13  ;;  %v20832_v13 = vld [vmem:[#allocation53_spill] sm:$0xff] }
 0x4c1   : > { %v8728_v21 = vrot.slane %v8720_v10, %v20433_v6  ;;  %v8770_v62 = vcombine.low %v8761_v1, %v8768_v18  ;;  %v8777_v17 = vrot.slane %v8769_v40, %v20433_v6  ;;  %v9327_v42 = vrot.slane %v9305_v3, %v20433_v6  ;;  %10579 = vmatprep.subr.bf16.mxu1 %v20400_v31  ;;  %v20845_v45 = vld [vmem:[#allocation113_spill] sm:$0xff]  ;;  %v20847_v10 = vld [vmem:[#allocation99_spill] sm:$0xff]  ;;  %v20848_v3 = vld [vmem:[#allocation100_spill] sm:$0xff] }
 0x4c2   : > { %v18632_v8 = vrot.slane %v9664_v57, %v20433_v6  ;;  %v9379_v4 = vrot.slane %v9369_v9, %v20433_v6  ;;  %v9393_v63 = vrot.slane %v9371_v54, %v20433_v6  ;;  %v9006_v34 = vcombine.high %v20822_v28, %v20822_v28  ;;  %v20846_v36 = vld [vmem:[#allocation109_spill] sm:$0xff]  ;;  %v18687_v9 = vpop.f32.mrf.mxu0 }
 0x4c3   : > { %v20834_v48 = vcombine.low %v20832_v13, %v20833_v50  ;;  %v8736_v29 = vcombine.low %v8728_v21, %v8735_v44  ;;  %v8784_v41 = vrot.slane %v8770_v62, %v20433_v6  ;;  %v9335_v57 = vcombine.low %v9313_v32, %v9327_v42  ;;  %10580 = vmatpush1.bf16.msra.mxu1 %v14357_v55  ;;  %v20849_v21 = vld [vmem:[#allocation164_spill] sm:$0xff] }
 0x4c4   : > { %v10104_v39 = vcombine.high %v20835_v27, %v20835_v27  ;;  %v9401_v25 = vcombine.low %v9379_v4, %v9393_v63  ;;  %v9409_v0 = vrot.slane %v9006_v34, %v20433_v6  ;;  %v8491_v28 = vcombine.high %v18162_v53, %v18162_v53  ;;  %10589 = vmatprep.subr.bf16.mxu1 %v20400_v31  ;;  %v14362_v34 = vld [vmem:[%s20105_s10 + $0x1d0] sm:$0xff]   ;;  %v20851_v27 = vld [vmem:[#allocation18_spill] sm:$0xff] }
 0x4c5   : > { %v18643_v14 = vrot.slane %v20834_v48, %v20433_v6  ;;  %v8785_v59 = vcombine.low %v8777_v17, %v8784_v41  ;;  %v10136_v43 = vcombine.low %v20837_v35, %v20836_v19  ;;  %v10137_v15 = vcombine.low %v20839_v7, %v20838_v2  ;;  %v20854_v2 = vld [vmem:[#allocation133_spill] sm:$0xff]  ;;  %v20855_v7 = vld [vmem:[#allocation123_spill] sm:$0xff] }
 0x4c6   : > { %v10186_v47 = vcombine.low %v20841_v16, %v20840_v26  ;;  %v9443_v30 = vpack.c.bf16 %v9401_v25, %v9335_v57  ;;  %v9410_v12 = vcombine.high %v9409_v0, %v9409_v0  ;;  %v8792_v37 = vrot.slane %v8491_v28, %v20433_v6  ;;  %v20850_v57 = vld [vmem:[#allocation19_spill] sm:$0xff]  ;;  %v20852_v25 = vld [vmem:[#allocation20_spill] sm:$0xff]  ;;  %v18719_v26 = vpop.f32.mrf.mxu1 }
 0x4c7   : > { %v9417_v51 = vrot.slane %v9409_v0, %v20433_v6  ;;  %v18660_v53 = vpack.c.bf16 %v8785_v59, %v8736_v29  ;;  %v10144_v56 = vrot.slane %v10136_v43, %v20433_v6  ;;  %v10151_v24 = vrot.slane %v10137_v15, %v20433_v6  ;;  %10590 = vmatpush2.bf16.msra.mxu1 %v14361_v33  ;;  %v18706_v29 = vpop.f32.mrf.mxu0  ;;  %v20853_v0 = vld [vmem:[#allocation28_spill] sm:$0xff] }
 0x4c8   : > { %v10193_v11 = vrot.slane %v10186_v47, %v20433_v6  ;;  %v20844_v49 = vcombine.low %v20842_v61, %v20843_v58  ;;  %9605 = vmatmul.mubr.bf16.gmra.mxu1 %v9443_v30  ;;  %v9424_v46 = vrot.slane %v9410_v12, %v20433_v6  ;;  %v8799_v52 = vrot.slane %v8792_v37, %v20433_v6  ;;  %v14363_v30 = vld [vmem:[%s20105_s10 + $0x1c8] sm:$0xff]   ;;  %v6425_v58 = vpop.f32.mrf.mxu1 }
 0x4c9   : > { %v10195_v18 = vcombine.high %v20846_v36, %v20845_v45  ;;  %v18679_v38 = vrot.slane %v10104_v39, %v20433_v6  ;;  %13736 = vmatmul.mubr.msk.bf16.gmra.mxu0 %vm474_vm0, %v18660_v53  ;;  %v10152_v1 = vcombine.low %v10144_v56, %v20847_v10  ;;  %v10153_v40 = vcombine.high %v10144_v56, %v20847_v10  ;;  %v6573_v16 = vpop.f32.mrf.mxu0  ;;  %v20857_v56 = vld [vmem:[#allocation148_spill] sm:$0xff]  ;;  %v20861_v10 = vld [vmem:[#allocation126_spill] sm:$0xff] }
 0x4ca   : > { %v18672_v23 = vrot.slane %v20844_v49, %v20433_v6  ;;  %v10155_v44 = vcombine.high %v20848_v3, %v10151_v24  ;;  %v9446_v32 = vpack.c.bf16 %v9424_v46, %v9424_v46  ;;  %8906 = vmatprep.mubr.bf16.mxu0 %v20400_v31  ;;  %v9445_v54 = vpack.c.bf16 %v9417_v51, %v9417_v51  ;;  %v20856_v51 = vld [vmem:[#allocation149_spill] sm:$0xff]  ;;  %v20858_v46 = vld [vmem:[#allocation50_spill] sm:$0xff] }
 0x4cb   : > { %v10196_v62 = vcombine.low %v20849_v21, %v10193_v11  ;;  %v10197_v17 = vcombine.high %v20849_v21, %v10193_v11  ;;  %v18691_v42 = vpack.c.bf16 %v8799_v52, %v8799_v52  ;;  %v10154_v55 = vcombine.low %v20848_v3, %v10151_v24  ;;  %10591 = vmatprep.subr.bf16.mxu1 %v20400_v31  ;;  %v18732_v49 = vpop.f32.mrf.mxu0  ;;  %v20864_v21 = vld [vmem:[#allocation158_spill] sm:$0xff]  ;;  %v20871_v16 = vld [vmem:[#allocation65_spill] sm:$0xff] }
 0x4cc   : > { %v18695_v4 = vrot.slane %v10152_v1, %v20433_v6  ;;  %v10183_v63 = vrot.slane %v10155_v44, %v20433_v6  ;;  %13787 = vmatprep.mubr.msk.bf16.mxu1 %vm6376_vm3, %v9446_v32  ;;  %v10169_v13 = vrot.slane %v10153_v40, %v20433_v6  ;;  %v10211_v50 = vrot.slane %v10195_v18, %v20433_v6  ;;  %v20860_v18 = vld [vmem:[#allocation128_spill] sm:$0xff]  ;;  %v20862_v44 = vld [vmem:[#allocation167_spill] sm:$0xff] }
 0x4cd   : > { %v10225_v48 = vrot.slane %v10197_v17, %v20433_v6  ;;  %v10218_v41 = vrot.slane %v10196_v62, %v20433_v6  ;;  %v9697_v39 = vcombine.low %v20851_v27, %v20850_v57  ;;  %v9698_v28 = vcombine.low %v20853_v0, %v20852_v25  ;;  %10592 = vmatpush2.bf16.msra.mxu1 %v14362_v34  ;;  %v18747_v17 = vpop.f32.mrf.mxu1  ;;  %v20868_v27 = vld [vmem:[#allocation182_spill] sm:$0xff] }
 0x4ce   : > { %v9754_v59 = vcombine.low %v18643_v14, %v18672_v23  ;;  %v10185_v19 = vcombine.low %v10169_v13, %v10183_v63  ;;  %v10194_v43 = vcombine.low %v20846_v36, %v20845_v45  ;;  %v10228_v15 = vcombine.low %v20855_v7, %v20854_v2  ;;  %10593 = vmatprep.subr.bf16.mxu1 %v20400_v31  ;;  %v20859_v45 = vld [vmem:[#allocation51_spill] sm:$0xff]  ;;  %v14364_v63 = vld [vmem:[%s20105_s10 + $0x1c0] sm:$0xff]   ;;  %v20869_v2 = vld [vmem:[#allocation62_spill] sm:$0xff] }
 0x4cf   : > { %v10227_v35 = vcombine.low %v10211_v50, %v10225_v48  ;;  %v10176_v47 = vrot.slane %v10154_v55, %v20433_v6  ;;  %v9705_v12 = vrot.slane %v9697_v39, %v20433_v6  ;;  %v9712_v37 = vrot.slane %v9698_v28, %v20433_v6  ;;  %v6576_v55 = vpop.f32.mrf.mxu0  ;;  %v20866_v48 = vld [vmem:[#allocation23_spill] sm:$0xff]  ;;  %v20870_v7 = vld [vmem:[#allocation61_spill] sm:$0xff] }
 0x4d0   : > { %v10270_v24 = vcombine.low %v20857_v56, %v20856_v51  ;;  %9613 = vmatmul.mubr.bf16.gmra.mxu1 %v9445_v54  ;;  %v10204_v33 = vrot.slane %v10194_v43, %v20433_v6  ;;  %v10235_v61 = vrot.slane %v10228_v15, %v20433_v6  ;;  %v10237_v1 = vcombine.high %v20861_v10, %v20860_v18  ;;  %v20863_v54 = vld [vmem:[#allocation197_spill] sm:$0xff] }
 0x4d1   : > { %v10449_v11 = vpack.c.bf16 %v10227_v35, %v10185_v19  ;;  %13737 = vmatmul.mubr.msk.bf16.gmra.mxu0 %vm474_vm0, %v18691_v42  ;;  %v9713_v52 = vcombine.low %v9705_v12, %v20858_v46  ;;  %v9714_v36 = vcombine.low %v20859_v45, %v9712_v37  ;;  %v10279_v62 = vcombine.high %v20864_v21, %v20863_v54  ;;  %v6428_v19 = vpop.f32.mrf.mxu1  ;;  %v20873_v37 = vld [vmem:[#allocation189_spill] sm:$0xff] }
 0x4d2   : > { %v10277_v40 = vrot.slane %v10270_v24, %v20433_v6  ;;  %14012 = vmatprep.mubr.msk.bf16.mxu0 %vm474_vm0, %v18421_v22  ;;  %v10226_v3 = vcombine.low %v10204_v33, %v10218_v41  ;;  %v10239_v32 = vcombine.high %v10235_v61, %v20862_v44  ;;  %10594 = vmatpush2.bf16.msra.mxu1 %v14363_v30  ;;  %v20865_v22 = vld [vmem:[#allocation160_spill] sm:$0xff]  ;;  %v20867_v41 = vld [vmem:[#allocation29_spill] sm:$0xff]  ;;  %v18790_v33 = vld [vmem:[%s20102_s7 + $0x68] ss:$12 sps:$4 sm:$0xff]  }
 0x4d3   : > { %13841 = vmatprep.mubr.msk.bf16.mxu1 %vm6376_vm3, %v10449_v11  ;;  %v18753_v34 = vrot.slane %v9713_v52, %v20433_v6  ;;  %v18756_v13 = vrot.slane %v9714_v36, %v20433_v6  ;;  %v9755_v57 = vcombine.low %v20867_v41, %v20866_v48  ;;  %v18763_v39 = vrot.slane %v20868_v27, %v20433_v6  ;;  %v20872_v30 = vld [vmem:[#allocation52_spill] sm:$0xff]  ;;  %v14358_v24 = vld [vmem:[%s20102_s7 + $0x60] ss:$12 sps:$4 sm:$0xff]  }
 0x4d4   : > { %v10281_v50 = vcombine.high %v10277_v40, %v20865_v22  ;;  %10595 = vmatprep.subr.bf16.mxu1 %v20400_v31  ;;  %v10184_v25 = vcombine.low %v18695_v4, %v10176_v47  ;;  %v10267_v0 = vrot.slane %v10239_v32, %v20433_v6  ;;  %v10295_v28 = vrot.slane %v10279_v62, %v20433_v6  ;;  %v20874_v47 = vld [vmem:[#allocation188_spill] sm:$0xff]  ;;  %v20875_v32 = vld [vmem:[#allocation27_spill] sm:$0xff] }
 0x4d5   : > { %v18771_v43 = vrot.slane %v9755_v57, %v20433_v6  ;;  %v9763_v15 = vcombine.low %v20870_v7, %v20869_v2  ;;  %v9780_v12 = vcombine.low %v20872_v30, %v20871_v16  ;;  %v10354_v51 = vcombine.low %v18763_v39, %v20873_v37  ;;  %v20876_v62 = vld [vmem:[#allocation64_spill] sm:$0xff]  ;;  %v20883_v30 = vld [vmem:[#allocation13_spill] sm:$0xff] }
 0x4d6   : > { %v10309_v35 = vrot.slane %v10281_v50, %v20433_v6  ;;  %v13804_v4 = vcombine.high %v18763_v39, %v20873_v37  ;;  %v10356_v56 = vcombine.low %v20874_v47, %v18679_v38  ;;  %v10253_v11 = vrot.slane %v10237_v1, %v20433_v6  ;;  %10596 = vmatpush2.bf16.msra.mxu1 %v14364_v63  ;;  %v14366_v1 = vld [vmem:[%s20105_s10 + $0x218] sm:$0xff]  }
 0x4d7   : > { %v9729_v58 = vcombine.low %v18753_v34, %v18756_v13  ;;  %v10448_v46 = vpack.c.bf16 %v10226_v3, %v10184_v25  ;;  %v10236_v45 = vcombine.low %v20861_v10, %v20860_v18  ;;  %11346 = vmatprep.subr.bf16.mxu1 %v20400_v31  ;;  %v9788_v55 = vcombine.low %v20876_v62, %v20875_v32  ;;  %v20877_v3 = vld [vmem:[#allocation63_spill] sm:$0xff] }
 0x4d8   : > { %v10311_v52 = vcombine.low %v10295_v28, %v10309_v35  ;;  %v10269_v36 = vcombine.low %v10253_v11, %v10267_v0  ;;  %v10238_v63 = vcombine.low %v10235_v61, %v20862_v44  ;;  %v10278_v50 = vcombine.low %v20864_v21, %v20863_v54  ;;  %v20878_v54 = vld [vmem:[#allocation174_spill] sm:$0xff]  ;;  %v20879_v21 = vld [vmem:[#allocation153_spill] sm:$0xff]  ;;  %v20881_v28 = vld [vmem:[#allocation200_spill] sm:$0xff] }
 0x4d9   : > { %14013 = vmatmul.mubr.msk.bf16.vlgmr.msra.gmra.mxu0 %vm474_vm0, %v18538_v60  ;;  %v9764_v18 = vcombine.low %v18771_v43, %v20877_v3  ;;  %v18810_v10 = vrot.slane %v9763_v15, %v20433_v6  ;;  %v9787_v48 = vrot.slane %v9780_v12, %v20433_v6  ;;  %v10280_v41 = vcombine.low %v10277_v40, %v20865_v22  ;;  %v20880_v0 = vld [vmem:[#allocation185_spill] sm:$0xff]  ;;  %v20882_v15 = vld [vmem:[#allocation71_spill] sm:$0xff] }
 0x4da   : > { %9944 = vmatpush1.bf16.msra.mxu0 %v14358_v24  ;;  %14016 = vmatprep.mubr.msk.bf16.mxu0 %vm474_vm0, %v18660_v53  ;;  %v10451_v61 = vpack.c.bf16 %v10311_v52, %v10269_v36  ;;  %v10260_v44 = vrot.slane %v10238_v63, %v20433_v6  ;;  %v10312_v60 = vcombine.low %v20879_v21, %v20878_v54  ;;  %v14367_v53 = vld [vmem:[%s20105_s10 + $0x210] sm:$0xff]  }
 0x4db   : > { %14020 = vmatprep.subr.bf16.mxu0 %v18790_v33  ;;  %10598 = vmatmul.mubr.bf16.vlgmr.msra.gmra.mxu1 %v10448_v46  ;;  %v10246_v57 = vrot.slane %v10236_v45, %v20433_v6  ;;  %v10288_v27 = vrot.slane %v10278_v50, %v20433_v6  ;;  %v10302_v25 = vrot.slane %v10280_v41, %v20433_v6  ;;  %v20884_v45 = vld [vmem:[#allocation201_spill] sm:$0xff]  ;;  %v20886_v63 = vld [vmem:[#allocation31_spill] sm:$0xff] }
 0x4dc   : > { %13842 = vmatprep.mubr.msk.bf16.mxu1 %vm6376_vm3, %v10451_v61  ;;  %11347 = vmatpush1.bf16.msra.mxu1 %v14366_v1  ;;  %v18828_v40 = vrot.slane %v9788_v55, %v20433_v6  ;;  %v10319_v22 = vrot.slane %v10312_v60, %v20433_v6  ;;  %v10323_v19 = vcombine.high %v20881_v28, %v20880_v0  ;;  %v20885_v55 = vld [vmem:[#allocation54_spill] sm:$0xff]  ;;  %v20887_v13 = vld [vmem:[#allocation75_spill] sm:$0xff] }
 0x4dd   : > { %11348 = vmatprep.subr.bf16.mxu1 %v20400_v31  ;;  %v10268_v35 = vcombine.low %v10246_v57, %v10260_v44  ;;  %v10310_v43 = vcombine.low %v10288_v27, %v10302_v25  ;;  %v10363_v2 = vrot.slane %v10354_v51, %v20433_v6  ;;  %v10370_v7 = vrot.slane %v13804_v4, %v20433_v6 }
 0x4de   : > { %v9789_v16 = vcombine.low %v9787_v48, %v20882_v15  ;;  %v10321_v12 = vcombine.high %v20883_v30, %v10319_v22  ;;  %v10377_v24 = vrot.slane %v10356_v56, %v20433_v6  ;;  %v18841_v11 = vadd.f32 %v18706_v29, %v18719_v26  ;;  %v14368_v56 = vld [vmem:[%s20105_s10 + $0x208] sm:$0xff]  }
 0x4df   : > { %v10450_v46 = vpack.c.bf16 %v10310_v43, %v10268_v35  ;;  %v10351_v52 = vrot.slane %v10323_v19, %v20433_v6  ;;  %v10379_v36 = vcombine.high %v20884_v45, %v10363_v2  ;;  %v9665_v51 = vcombine.high %v18562_v5, %v18562_v5  ;;  %v20888_v19 = vld [vmem:[#allocation73_spill] sm:$0xff]  ;;  %v14376_v35 = vld [vmem:[%s20102_s7 + $0x7c] ss:$12 sps:$4 sm:$0xff]  }
 0x4e0   : > { %11349 = vmatpush1.bf16.msra.mxu1 %v14367_v53  ;;  %v10337_v4 = vrot.slane %v10321_v12, %v20433_v6  ;;  %v10381_v1 = vcombine.high %v10370_v7, %v10377_v24  ;;  %v18853_v29 = vrot.slane %v18297_v20, %v20433_v6  ;;  %v18857_v26 = vrot.slane %v18562_v5, %v20433_v6 }
 0x4e1   : > { %14017 = vmatmul.mubr.msk.bf16.gmra.mxu0 %vm474_vm0, %v18691_v42  ;;  %11350 = vmatprep.subr.bf16.mxu1 %v20400_v31  ;;  %v10395_v32 = vrot.slane %v10379_v36, %v20433_v6  ;;  %v18864_v62 = vrot.slane %v9665_v51, %v20433_v6  ;;  %v9805_v50 = vcombine.low %v20886_v63, %v20885_v55  ;;  %v20892_v36 = vld [vmem:[#allocation120_spill] sm:$0xff]  ;;  %v20894_v55 = vld [vmem:[#allocation162_spill] sm:$0xff] }
 0x4e2   : > { %9961 = vmatprep.mubr.bf16.mxu0 %v20400_v31  ;;  %v9778_v20 = vrot.slane %v9764_v18, %v20433_v6  ;;  %v9803_v5 = vrot.slane %v9789_v16, %v20433_v6  ;;  %v10409_v3 = vrot.slane %v10381_v1, %v20433_v6  ;;  %v9830_v42 = vcombine.low %v18853_v29, %v18632_v8  ;;  %v14369_v18 = vld [vmem:[%s20105_s10 + $0x200] sm:$0xff]  }
 0x4e3   : > { %10606 = vmatmul.mubr.bf16.gmra.mxu1 %v10450_v46  ;;  %v10353_v48 = vcombine.low %v10337_v4, %v10351_v52  ;;  %v13788_v41 = vcombine.high %v18853_v29, %v18632_v8  ;;  %v9832_v61 = vcombine.low %v18857_v26, %v18864_v62  ;;  %v9812_v54 = vrot.slane %v9805_v50, %v20433_v6 }
 0x4e4   : > { %v10411_v44 = vcombine.low %v10395_v32, %v10409_v3  ;;  %11351 = vmatpush1.bf16.msra.mxu1 %v14368_v56  ;;  %v10320_v21 = vcombine.low %v20883_v30, %v10319_v22  ;;  %v10322_v60 = vcombine.low %v20881_v28, %v20880_v0  ;;  %v18891_v57 = vpack.c.bf16 %v9754_v59, %v9729_v58  ;;  %v14371_v56 = vld [vmem:[%s20105_s10 + $0x1f0] sm:$0xff]   ;;  %v20893_v32 = vld [vmem:[#allocation136_spill] sm:$0xff] }
 0x4e5   : > { %11352 = vmatprep.subr.bf16.mxu1 %v20400_v31  ;;  %v9839_v27 = vrot.slane %v9830_v42, %v20433_v6  ;;  %v9846_v25 = vrot.slane %v13788_v41, %v20433_v6  ;;  %v9853_v53 = vrot.slane %v9832_v61, %v20433_v6  ;;  %v9779_v22 = vcombine.low %v18810_v10, %v9778_v20  ;;  %v20889_v10 = vld [vmem:[#allocation72_spill] sm:$0xff]  ;;  %v14372_v61 = vld [vmem:[%s20105_s10 + $0x1e8] sm:$0xff]  }
 0x4e6   : > { %v9804_v0 = vcombine.low %v18828_v40, %v9803_v5  ;;  %v10453_v28 = vpack.c.bf16 %v10411_v44, %v10353_v48  ;;  %v10378_v34 = vcombine.low %v20884_v45, %v10363_v2  ;;  %v9814_v14 = vcombine.low %v20888_v19, %v20887_v13  ;;  %v20891_v45 = vld [vmem:[#allocation166_spill] sm:$0xff]  ;;  %v20895_v44 = vld [vmem:[#allocation124_spill] sm:$0xff]  ;;  %v20897_v13 = vld [vmem:[#allocation119_spill] sm:$0xff] }
 0x4e7   : > { %v10344_v23 = vrot.slane %v10322_v60, %v20433_v6  ;;  %v10380_v59 = vcombine.low %v10370_v7, %v10377_v24  ;;  %v18905_v58 = vcombine.high %v20874_v47, %v20874_v47  ;;  %v9813_v40 = vcombine.low %v20889_v10, %v9812_v54  ;;  %v14370_v7 = vld [vmem:[%s20105_s10 + $0x1f8] sm:$0xff]   ;;  %v20896_v54 = vld [vmem:[#allocation154_spill] sm:$0xff] }
 0x4e8   : > { %13843 = vmatprep.mubr.msk.bf16.mxu1 %vm6376_vm3, %v10453_v28  ;;  %11353 = vmatpush1.bf16.msra.mxu1 %v14369_v18  ;;  %v10330_v43 = vrot.slane %v10320_v21, %v20433_v6  ;;  %v10388_v2 = vrot.slane %v10378_v34, %v20433_v6  ;;  %v20890_v47 = vld [vmem:[#allocation76_spill] sm:$0xff]  ;;  %v9855_v16 = vcombine.low %v9846_v25, %v9853_v53  ;;  %v6579_v53 = vpop.f32.mrf.mxu0  ;;  %v14373_v34 = vld [vmem:[%s20105_s10 + $0x1e0] sm:$0xff]  }
 0x4e9   : > { %13796 = vmatmul.mubr.msk.bf16.vlgmr.msra.gmra.mxu0 %vm474_vm0, %v18891_v57  ;;  %v9854_v15 = vcombine.low %v20890_v47, %v9839_v27  ;;  %v10402_v30 = vrot.slane %v10380_v59, %v20433_v6  ;;  %11354 = vmatprep.subr.bf16.mxu1 %v20400_v31  ;;  %v10418_v12 = vrot.slane %v18905_v58, %v20433_v6 }
 0x4ea   : > { %14021 = vmatpush3.bf16.msra.mxu0 %v18790_v33  ;;  %9971 = vmatprep.mubr.bf16.mxu0 %v20400_v31  ;;  %v18928_v24 = vadd.f32 %v18732_v49, %v18747_v17  ;;  %v10352_v46 = vcombine.low %v10330_v43, %v10344_v23  ;;  %v11006_v51 = vcombine.high %v20892_v36, %v20891_v45  ;;  %v6581_v28 = vpop.f32.mrf.mxu0  ;;  %v20900_v43 = vld [vmem:[#allocation176_spill] sm:$0xff] }
 0x4eb   : > { %v10410_v52 = vcombine.low %v10388_v2, %v10402_v30  ;;  %10854 = vmatprep.subr.bf16.mxu0 %v14376_v35  ;;  %v9821_v4 = vrot.slane %v9813_v40, %v20433_v6  ;;  %v9828_v1 = vrot.slane %v9814_v14, %v20433_v6  ;;  %v10419_v33 = vcombine.high %v10418_v12, %v10418_v12  ;;  %v20898_v35 = vld [vmem:[#allocation138_spill] sm:$0xff] }
 0x4ec   : > { %11355 = vmatpush1.bf16.msra.mxu1 %v14370_v7  ;;  %v11032_v49 = vcombine.high %v20894_v55, %v20893_v32  ;;  %v18939_v17 = vpack.c.bf16 %v9804_v0, %v9779_v22  ;;  %v9862_v63 = vrot.slane %v9854_v15, %v20433_v6  ;;  %v9869_v50 = vrot.slane %v9855_v16, %v20433_v6  ;;  %v6582_v59 = vpop.f32.mrf.mxu0  ;;  %v20899_v40 = vld [vmem:[#allocation178_spill] sm:$0xff]  ;;  %v20901_v15 = vld [vmem:[#allocation141_spill] sm:$0xff]  ;;  %v14378_v55 = vld [vmem:[%s20105_s10 + $0x230] sm:$0xff]  }
 0x4ed   : > { %v10452_v20 = vpack.c.bf16 %v10410_v52, %v10352_v46  ;;  %11356 = vmatprep.subr.bf16.mxu1 %v20400_v31  ;;  %v10433_v5 = vrot.slane %v10419_v33, %v20433_v6  ;;  %v11020_v3 = vrot.slane %v11006_v51, %v20433_v6  ;;  %v9829_v48 = vcombine.low %v9821_v4, %v9828_v1  ;;  %v20902_v16 = vld [vmem:[#allocation134_spill] sm:$0xff]  ;;  %v14377_v46 = vld [vmem:[%s20105_s10 + $0x238] sm:$0xff]  }
 0x4ee   : > { %v11046_v42 = vrot.slane %v11032_v49, %v20433_v6  ;;  %v9870_v60 = vcombine.low %v9862_v63, %v9869_v50  ;;  %v18956_v27 = vcombine.high %v18857_v26, %v18857_v26  ;;  %v10426_v25 = vrot.slane %v10418_v12, %v20433_v6  ;;  %v6584_v12 = vpop.f32.mrf.mxu0  ;;  %v20903_v4 = vld [vmem:[#allocation194_spill] sm:$0xff] }
 0x4ef   : > { %10614 = vmatmul.mubr.bf16.gmra.mxu1 %v10452_v20  ;;  %v10455_v41 = vpack.c.bf16 %v10433_v5, %v10433_v5  ;;  %v11022_v18 = vcombine.low %v20895_v44, %v11020_v3  ;;  %v10133_v22 = vcombine.high %v18763_v39, %v18763_v39  ;;  %v5835_v19 = vcombine.high %v20897_v13, %v20897_v13  ;;  %v20904_v20 = vld [vmem:[#allocation58_spill] sm:$0xff]  ;;  %v20906_v44 = vld [vmem:[#allocation152_spill] sm:$0xff] }
 0x4f0   : > { %11357 = vmatpush1.bf16.msra.mxu1 %v14371_v56  ;;  %v11048_v21 = vcombine.low %v20896_v54, %v11046_v42  ;;  %v18969_v14 = vpack.c.bf16 %v9870_v60, %v9829_v48  ;;  %v9877_v23 = vrot.slane %v18956_v27, %v20433_v6  ;;  %v10454_v39 = vpack.c.bf16 %v10426_v25, %v10426_v25  ;;  %v20905_v48 = vld [vmem:[#allocation146_spill] sm:$0xff]  ;;  %v20909_v13 = vld [vmem:[#allocation24_spill] sm:$0xff] }
 0x4f1   : > { %13797 = vmatmul.mubr.msk.bf16.gmra.mxu0 %vm474_vm0, %v18939_v17  ;;  %11358 = vmatprep.subr.bf16.mxu1 %v20400_v31  ;;  %v11049_v10 = vcombine.low %v5835_v19, %v20898_v35  ;;  %v13865_v2 = vcombine.high %v20900_v43, %v20899_v40  ;;  %v11128_v7 = vcombine.low %v20873_v37, %v10133_v22 }
 0x4f2   : > { %9981 = vmatprep.mubr.bf16.mxu0 %v20400_v31  ;;  %13844 = vmatprep.mubr.msk.bf16.mxu1 %vm6376_vm3, %v10455_v41  ;;  %v11230_v0 = vpack.c.bf16 %v11048_v21, %v11022_v18  ;;  %v11130_v47 = vcombine.low %v18679_v38, %v18905_v58  ;;  %v13864_v30 = vcombine.high %v20902_v16, %v20901_v15  ;;  %v6431_v58 = vpop.f32.mrf.mxu1  ;;  %v20907_v21 = vld [vmem:[#allocation156_spill] sm:$0xff] }
 0x4f3   : > { %v9884_v37 = vrot.slane %v9877_v23, %v20433_v6  ;;  %v18994_v45 = vrot.slane %v11049_v10, %v20433_v6  ;;  %v11137_v36 = vrot.slane %v13865_v2, %v20433_v6  ;;  %v11144_v51 = vrot.slane %v11128_v7, %v20433_v6  ;;  %v20910_v23 = vld [vmem:[#allocation175_spill] sm:$0xff] }
 0x4f4   : > { %11359 = vmatpush1.bf16.msra.mxu1 %v14372_v61  ;;  %v18986_v52 = vpop.permute.xlu0 %5147  ;;  %v11151_v1 = vrot.slane %v20903_v4, %v20433_v6  ;;  %v19000_v33 = vadd.f32 %v6579_v53, %v6431_v58  ;;  %v11082_v56 = vrot.slane %v13864_v30, %v20433_v6  ;;  %v11158_v32 = vrot.slane %v11130_v47, %v20433_v6  ;;  %v6433_v49 = vpop.f32.mrf.mxu1  ;;  %v14380_v30 = vld [vmem:[%s20105_s10 + $0x220] sm:$0xff]   ;;  %v20912_v58 = vld [vmem:[#allocation190_spill] sm:$0xff] }
 0x4f5   : > { %11360 = vmatprep.subr.bf16.mxu1 %v20400_v31  ;;  %v11160_v63 = vcombine.high %v11137_v36, %v11144_v51  ;;  %v19007_v50 = vpack.c.bf16 %v9884_v37, %v9884_v37  ;;  %v5178_v5 = vcombine.high %v20904_v20, %v20904_v20  ;;  %v11058_v41 = vcombine.high %v18994_v45, %v20905_v48 }
 0x4f6   : > { %v11162_v3 = vcombine.high %v11151_v1, %v11158_v32  ;;  %v19012_v42 = vpop.permute.xlu1 %5151  ;;  %v6434_v61 = vpop.f32.mrf.mxu1  ;;  %v5837_v18 = vcombine.high %v20906_v44, %v20906_v44  ;;  %v11084_v60 = vcombine.high %v20907_v21, %v11082_v56  ;;  %v11159_v35 = vcombine.low %v11137_v36, %v11144_v51 }
 0x4f7   : > { %10622 = vmatmul.mubr.bf16.gmra.mxu1 %v10454_v39  ;;  %v19019_v25 = vadd.f32 %v6582_v59, %v6434_v61  ;;  %v19022_v53 = vrot.slane %v11160_v63, %v20433_v6  ;;  %v20911_v59 = vld [vmem:[#allocation47_spill] sm:$0xff]  ;;  %v11161_v43 = vcombine.low %v11151_v1, %v11158_v32  ;;  %v11072_v2 = vrot.slane %v11058_v41, %v20433_v6  ;;  %v19074_v32 = vld [vmem:[%s20102_s7 + $0x80] ss:$12 sps:$4 sm:$0xff]  }
 0x4f8   : > { %13902 = vmatprep.mubr.msk.bf16.mxu1 %vm6376_vm3, %v11230_v0  ;;  %11361 = vmatpush1.bf16.msra.mxu1 %v14373_v34  ;;  %v19025_v22 = vrot.slane %v11162_v3, %v20433_v6  ;;  %v14379_v0 = vld [vmem:[%s20105_s10 + $0x228] sm:$0xff]   ;;  %v6436_v28 = vpop.f32.mrf.mxu1  ;;  %v20908_v34 = vld [vmem:[#allocation68_spill] sm:$0xff]  ;;  %v11101_v39 = vcombine.low %v5837_v18, %v20910_v23  ;;  %v10682_v10 = vcombine.low %v5178_v5, %v20911_v59  ;;  %v20914_v63 = vld [vmem:[#allocation57_spill] sm:$0xff] }
 0x4f9   : > { %13798 = vmatmul.mubr.msk.bf16.gmra.mxu0 %vm474_vm0, %v18969_v14  ;;  %11370 = vmatprep.subr.bf16.mxu1 %v20400_v31  ;;  %v5150_v54 = vpop.permute.xlu0 %5149  ;;  %v13846_v19 = vcombine.high %v20909_v13, %v20908_v34  ;;  %v11098_v7 = vrot.slane %v11084_v60, %v20433_v6  ;;  %v19044_v47 = vrot.slane %v11159_v35, %v20433_v6  ;;  %v20916_v3 = vld [vmem:[#allocation69_spill] sm:$0xff]  ;;  %v20917_v61 = vld [vmem:[#allocation30_spill] sm:$0xff]  ;;  %v20918_v23 = vld [vmem:[#allocation172_spill] sm:$0xff] }
 0x4fa   : > { %9991 = vmatprep.mubr.bf16.mxu0 %v20400_v31  ;;  %v11192_v40 = vcombine.low %v19022_v53, %v19025_v22  ;;  %v19047_v15 = vrot.slane %v11161_v43, %v20433_v6  ;;  %v10689_v51 = vrot.slane %v10682_v10, %v20433_v6  ;;  %v11083_v4 = vcombine.low %v20907_v21, %v11082_v56  ;;  %v20915_v56 = vld [vmem:[#allocation192_spill] sm:$0xff]  ;;  %v14411_v28 = vld [vmem:[%s14532_s17] sm:$0xff]  ;;  %v20920_v43 = vld [vmem:[#allocation55_spill] sm:$0xff] }
 0x4fb   : > { %v19049_v16 = vpop.permute.xlu1 %5153  ;;  %v10706_v12 = vrot.slane %v13846_v19, %v20433_v6  ;;  %v11100_v36 = vcombine.low %v11098_v7, %v20912_v58  ;;  %v5168_v34 = vmax.f32 %v14411_v28, %v18986_v52  ;;  %v6601_v13 = vrot.slane %v14411_v28, 1  ;;  %v20923_v58 = vld [vmem:[#allocation25_spill] sm:$0xff]  ;;  %v19158_v53 = vld [vmem:[%s14532_s17 + $0x30] sm:$0xff] }
 0x4fc   : > { %11371 = vmatpush2.bf16.msra.mxu1 %v14377_v46  ;;  %v19058_v46 = vrot.slane %v11101_v39, %v20433_v6  ;;  %v11191_v1 = vcombine.low %v19044_v47, %v19047_v15  ;;  %v19085_v44 = vcombine.low %v10689_v51, %v20917_v61  ;;  %v11091_v21 = vrot.slane %v11083_v4, %v20433_v6  ;;  %v20919_v39 = vld [vmem:[#allocation196_spill] sm:$0xff]  ;;  %v14414_v61 = vld [vmem:[%s14532_s17 + $0x8] sm:$0xff] }
 0x4fd   : > { %11372 = vmatprep.subr.bf16.mxu1 %v20400_v31  ;;  %v19060_v37 = vpop.permute.xlu0 %5155  ;;  %v10707_v20 = vcombine.low %v20914_v63, %v10706_v12  ;;  %v10736_v52 = vcombine.low %v18864_v62, %v18956_v27  ;;  %v20921_v12 = vld [vmem:[#allocation163_spill] sm:$0xff]  ;;  %v6615_v4 = vmax.f32 %v5168_v34, %v6601_v13  ;;  %v6604_v22 = vrot.slane %v19158_v53, 1 }
 0x4fe   : > { %v11110_v5 = vcombine.high %v20915_v56, %v19058_v46  ;;  %v11099_v35 = vcombine.low %v11091_v21, %v20919_v39  ;;  %v10697_v7 = vrot.slane %v19085_v44, %v20433_v6 }
 0x4ff   : > { %v19089_v60 = vpop.permute.xlu1 %5157 }
 0x500   : > { %11373 = vmatpush2.bf16.msra.mxu1 %v14378_v55  ;;  %v20913_v55 = vld [vmem:[#allocation151_spill] sm:$0xff]  ;;  %v11124_v10 = vrot.slane %v11110_v5, %v20433_v6 }
 0x501   : > { %13799 = vmatmul.mubr.msk.bf16.gmra.mxu0 %vm474_vm0, %v19007_v50  ;;  %11374 = vmatprep.subr.bf16.mxu1 %v20400_v31  ;;  %v11074_v49 = vcombine.low %v20913_v55, %v11072_v2 }
 0x502   : > { %14022 = vmatprep.mubr.msk.bf16.mxu0 %vm474_vm0, %v18891_v57  ;;  %v11057_v57 = vcombine.low %v18994_v45, %v20905_v48  ;;  %v14374_v45 = vld [vmem:[%s20102_s7 + $0x78] ss:$12 sps:$4 sm:$0xff]   ;;  %v5180_v48 = vcombine.high %v20916_v3, %v20916_v3 }
 0x503   : > { %v11232_v41 = vpack.c.bf16 %v11100_v36, %v11074_v49 }
 0x504   : > { %11375 = vmatpush2.bf16.msra.mxu1 %v14379_v0  ;;  %v11065_v18 = vrot.slane %v11057_v57, %v20433_v6  ;;  %v9694_v0 = vcombine.high %v18853_v29, %v18853_v29  ;;  %v19107_v29 = vld [vmem:[%s14532_s17 + $0x10] sm:$0xff]  ;;  %v10716_v2 = vcombine.low %v5180_v48, %v20920_v43  ;;  %v20924_v48 = vld [vmem:[#allocation198_spill] sm:$0xff] }
 0x505   : > { %11376 = vmatprep.subr.bf16.mxu1 %v20400_v31  ;;  %v19111_v59 = vmax.f32 %v19107_v29, %v5150_v54  ;;  %v20922_v54 = vld [vmem:[#allocation70_spill] sm:$0xff] }
 0x506   : > { %v11073_v57 = vcombine.low %v20921_v12, %v11065_v18  ;;  %v13847_v36 = vcombine.high %v20923_v58, %v20922_v54  ;;  %v10734_v27 = vcombine.low %v18632_v8, %v9694_v0  ;;  %v9627_v18 = vrot.slane %v14414_v61, 1 }
 0x507   : > { %v19099_v19 = vpop.permute.xlu0 %5159 }
 0x508   : > { %11377 = vmatpush2.bf16.msra.mxu1 %v14380_v30  ;;  %v19121_v30 = vrot.slane %v10707_v20, %v20433_v6  ;;  %v11231_v49 = vpack.c.bf16 %v11099_v35, %v11073_v57  ;;  %v11109_v20 = vcombine.low %v20915_v56, %v19058_v46  ;;  %v10764_v46 = vrot.slane %v10736_v52, %v20433_v6  ;;  %v14415_v56 = vld [vmem:[%s14532_s17 + $0x18] sm:$0xff] }
 0x509   : > { %14023 = vmatmul.mubr.msk.bf16.vlgmr.msra.gmra.mxu0 %vm474_vm0, %v18939_v17  ;;  %v10996_v17 = vcombine.high %v18679_v38, %v18679_v38  ;;  %v6602_v38 = vrot.slane %v19107_v29, 1  ;;  %v9628_v0 = vrot.slane %v14415_v56, 1  ;;  %v10750_v34 = vrot.slane %v10734_v27, %v20433_v6  ;;  %v20925_v52 = vld [vmem:[#allocation32_spill] sm:$0xff] }
 0x50a   : > { %10855 = vmatpush1.bf16.msra.mxu0 %v14374_v45  ;;  %14026 = vmatprep.mubr.msk.bf16.mxu0 %vm474_vm0, %v18969_v14  ;;  %v9696_v14 = vcombine.high %v18632_v8, %v18632_v8  ;;  %v14413_v45 = vld [vmem:[%s14532_s17 + $0x20] sm:$0xff]  ;;  %v11126_v8 = vcombine.low %v11124_v10, %v20924_v48  ;;  %v11117_v39 = vrot.slane %v11109_v20, %v20433_v6  ;;  %v20926_v57 = vld [vmem:[#allocation12_spill] sm:$0xff] }
 0x50b   : > { %14030 = vmatprep.subr.bf16.mxu0 %v19074_v32  ;;  %11379 = vmatmul.mubr.bf16.vlgmr.msra.gmra.mxu1 %v20918_v23  ;;  %v19128_v51 = vrot.slane %v10996_v17, %v20433_v6  ;;  %v6603_v55 = vrot.slane %v14413_v45, 1  ;;  %v6616_v5 = vmax.f32 %v19111_v59, %v6602_v38  ;;  %v5170_v35 = vmax.f32 %v14413_v45, %v19012_v42 }
 0x50c   : > { %13903 = vmatprep.mubr.msk.bf16.mxu1 %vm6376_vm3, %v11232_v41  ;;  %v10735_v63 = vcombine.low %v9696_v14, %v18857_v26  ;;  %v10723_v41 = vrot.slane %v10716_v2, %v20433_v6  ;;  %v10743_v26 = vrot.slane %v13847_v36, %v20433_v6  ;;  %v11234_v28 = vpack.c.bf16 %v11192_v40, %v11126_v8 }
 0x50d   : > { %v11200_v13 = vcombine.high %v19128_v51, %v19128_v51  ;;  %v19163_v40 = vmax.f32 %v19158_v53, %v19049_v16  ;;  %v10715_v54 = vcombine.low %v19121_v30, %v20926_v57  ;;  %v20928_v16 = vld [vmem:[#allocation22_spill] sm:$0xff] }
 0x50e   : > { %v8451_v3 = vpop.permute.xlu1 %8450  ;;  %v10757_v23 = vrot.slane %v10735_v63, %v20433_v6  ;;  %v10724_v10 = vcombine.low %v20925_v52, %v10723_v41  ;;  %v6587_v2 = vpop.f32.mrf.mxu0  ;;  %v10765_v42 = vcombine.low %v10743_v26, %v10750_v34  ;;  %v6617_v63 = vmax.f32 %v5170_v35, %v6603_v55 }
 0x50f   : > { %v8471_v44 = vmax.f32 %v14414_v61, %v8451_v3  ;;  %v8453_v21 = vpop.permute.xlu0 %8452  ;;  %v11214_v58 = vrot.slane %v11200_v13, %v20433_v6  ;;  %v6618_v30 = vmax.f32 %v19163_v40, %v6604_v22  ;;  %v14420_v13 = vld [vmem:[%s14532_s17 + $0x50] sm:$0xff] }
 0x510   : > { %v8472_v17 = vmax.f32 %v14415_v56, %v8453_v21  ;;  %v10766_v27 = vcombine.low %v10757_v23, %v10764_v46  ;;  %v10731_v3 = vrot.slane %v10724_v10, %v20433_v6  ;;  %v10773_v29 = vrot.slane %v10765_v42, %v20433_v6  ;;  %v14418_v46 = vld [vmem:[%s14532_s17 + $0x38] sm:$0xff] }
 0x511   : > { %14027 = vmatmul.mubr.msk.bf16.gmra.mxu0 %vm474_vm0, %v19007_v50  ;;  %v8478_v50 = vmax.f32 %v6615_v4, %v8471_v44  ;;  %v20927_v4 = vld [vmem:[#allocation199_spill] sm:$0xff]  ;;  %v9630_v56 = vrot.slane %v14418_v46, 1  ;;  %v5173_v23 = vmax.f32 %v14420_v13, %v19089_v60 }
 0x512   : > { %10872 = vmatprep.mubr.bf16.mxu0 %v20400_v31  ;;  %v8479_v14 = vmax.f32 %v6616_v5, %v8472_v17  ;;  %v11125_v45 = vcombine.low %v11117_v39, %v20927_v4  ;;  %v10698_v5 = vcombine.low %v20928_v16, %v10697_v7  ;;  %v14417_v7 = vld [vmem:[%s14532_s17 + $0x28] sm:$0xff]  ;;  %v10780_v47 = vrot.slane %v10766_v27, %v20433_v6 }
 0x513   : > { %11387 = vmatmul.mubr.bf16.gmra.mxu1 %v11231_v49  ;;  %v9641_v43 = vmax.f32 %v8478_v50, %v9627_v18  ;;  %v6589_v49 = vpop.f32.mrf.mxu0  ;;  %v9629_v44 = vrot.slane %v14417_v7, 1  ;;  %v6606_v50 = vrot.slane %v14420_v13, 1 }
 0x514   : > { %13904 = vmatprep.mubr.msk.bf16.mxu1 %vm6376_vm3, %v11234_v28  ;;  %v9642_v12 = vmax.f32 %v8479_v14, %v9628_v0  ;;  %v11233_v41 = vpack.c.bf16 %v11191_v1, %v11125_v45  ;;  %v14419_v1 = vld [vmem:[%s14532_s17 + $0x40] sm:$0xff] }
 0x515   : > { %v10640_v36 = vmax.f32 %v9641_v43, %v19111_v59  ;;  %v20929_v59 = vld [vmem:[#allocation33_spill] sm:$0xff]  ;;  %v6590_v61 = vpop.f32.mrf.mxu0  ;;  %v6605_v17 = vrot.slane %v14419_v1, 1  ;;  %v5172_v28 = vmax.f32 %v14419_v1, %v19060_v37  ;;  %v6439_v34 = vpop.f32.mrf.mxu1 }
 0x516   : > { %v10641_v20 = vmax.f32 %v9642_v12, %v5170_v35  ;;  %v19197_v35 = vpack.c.bf16 %v10715_v54, %v10698_v5  ;;  %v19199_v37 = vadd.f32 %v6587_v2, %v6439_v34  ;;  %v20930_v12 = vld [vmem:[#allocation38_spill] sm:$0xff]  ;;  %v6620_v2 = vmax.f32 %v5173_v23, %v6606_v50 }
 0x517   : > { %v8455_v48 = vpop.permute.xlu1 %8454  ;;  %v11419_v8 = vmax.f32 %v10640_v36, %v6602_v38  ;;  %v11236_v38 = vpack.c.bf16 %v11214_v58, %v11214_v58  ;;  %v6592_v15 = vpop.f32.mrf.mxu0  ;;  %v10732_v57 = vcombine.low %v10731_v3, %v20930_v12  ;;  %v6619_v58 = vmax.f32 %v5172_v28, %v6605_v17 }
 0x518   : > { %v8473_v18 = vmax.f32 %v14417_v7, %v8455_v48  ;;  %v8457_v21 = vpop.permute.xlu0 %8456  ;;  %v11420_v26 = vmax.f32 %v10641_v20, %v6603_v55  ;;  %v6441_v10 = vpop.f32.mrf.mxu1  ;;  %v10781_v36 = vcombine.low %v10773_v29, %v10780_v47  ;;  %v14421_v20 = vld [vmem:[%s14532_s17 + $0x48] sm:$0xff] }
 0x519   : > { %13855 = vmatmul.mubr.msk.bf16.vlgmr.msra.gmra.mxu0 %vm474_vm0, %v20929_v59  ;;  %v8474_v0 = vmax.f32 %v14418_v46, %v8457_v21  ;;  %13181 = vrot.lane.b32.xlu1 %v11419_v8, %s14439_s18  ;;  %v6595_v14 = vpop.f32.mrf.mxu0 }
 0x51a   : > { %14031 = vmatpush3.bf16.msra.mxu0 %v19074_v32  ;;  %10882 = vmatprep.mubr.bf16.mxu0 %v20400_v31  ;;  %v8480_v55 = vmax.f32 %v6617_v63, %v8473_v18  ;;  %v11207_v32 = vrot.slane %v19128_v51, %v20433_v6  ;;  %v10647_v51 = vcombine.high %v18864_v62, %v18864_v62  ;;  %v6442_v27 = vpop.f32.mrf.mxu1  ;;  %v9631_v62 = vrot.slane %v14421_v20, 1  ;;  %v14423_v18 = vld [vmem:[%s14532_s17 + $0x60] sm:$0xff] }
 0x51b   : > { %11395 = vmatmul.mubr.bf16.gmra.mxu1 %v11233_v41  ;;  %13183 = vrot.lane.b32.xlu0 %v11420_v26, %s14439_s18  ;;  %v8481_v39 = vmax.f32 %v6618_v30, %v8474_v0  ;;  %v6597_v42 = vpop.f32.mrf.mxu0  ;;  %v19207_v49 = vadd.f32 %v6590_v61, %v6442_v27  ;;  %v14422_v30 = vld [vmem:[%s14532_s17 + $0x58] sm:$0xff]  ;;  %v6607_v21 = vrot.slane %v14423_v18, 1  ;;  %v5174_v26 = vmax.f32 %v14423_v18, %v19099_v19 }
 0x51c   : > { %13905 = vmatprep.mubr.msk.bf16.mxu1 %vm6376_vm3, %v11236_v38  ;;  %v9643_v52 = vmax.f32 %v8480_v55, %v9629_v44  ;;  %v11235_v54 = vpack.c.bf16 %v11207_v32, %v11207_v32  ;;  %v6444_v3 = vpop.f32.mrf.mxu1  ;;  %v9632_v48 = vrot.slane %v14422_v30, 1  ;;  %v10788_v29 = vrot.slane %v10647_v51, %v20433_v6  ;;  %v14424_v55 = vld [vmem:[%s14532_s17 + $0x68] sm:$0xff] }
 0x51d   : > { %v9644_v43 = vmax.f32 %v8481_v39, %v9630_v56  ;;  %v6598_v63 = vpop.f32.mrf.mxu0  ;;  %v6621_v1 = vmax.f32 %v5174_v26, %v6607_v21 }
 0x51e   : > { %v10642_v60 = vmax.f32 %v9643_v52, %v19163_v40  ;;  %v6447_v44 = vpop.f32.mrf.mxu1  ;;  %v10795_v19 = vrot.slane %v10788_v29, %v20433_v6  ;;  %v9633_v52 = vrot.slane %v14424_v55, 1 }
 0x51f   : > { %v8459_v4 = vpop.permute.xlu1 %8458  ;;  %v10643_v45 = vmax.f32 %v9644_v43, %v5172_v28  ;;  %v6599_v7 = vpop.f32.mrf.mxu0  ;;  %v19219_v38 = vadd.f32 %v6595_v14, %v6447_v44 }
 0x520   : > { %v8475_v16 = vmax.f32 %v14421_v20, %v8459_v4  ;;  %v11421_v40 = vmax.f32 %v10642_v60, %v6604_v22  ;;  %v10805_v22 = vpack.c.bf16 %v10781_v36, %v10732_v57  ;;  %v6449_v56 = vpop.f32.mrf.mxu1  ;;  %v10806_v10 = vpack.c.bf16 %v10795_v19, %v10795_v19  ;;  %v14425_v60 = vld [vmem:[%s14532_s17 + $0x70] sm:$0xff] }
 0x521   : > { %13856 = vmatmul.mubr.msk.bf16.gmra.mxu0 %vm474_vm0, %v19197_v35  ;;  %v8461_v5 = vpop.permute.xlu0 %8460  ;;  %v11422_v41 = vmax.f32 %v10643_v45, %v6605_v17 }
 0x522   : > { %10892 = vmatprep.mubr.bf16.mxu0 %v20400_v31  ;;  %v8476_v8 = vmax.f32 %v14422_v30, %v8461_v5  ;;  %v8482_v61 = vmax.f32 %v6619_v58, %v8475_v16  ;;  %13185 = vrot.lane.b32.xlu1 %v11421_v40, %s14439_s18  ;;  %v6450_v15 = vpop.f32.mrf.mxu1 }
 0x523   : > { %11403 = vmatmul.mubr.bf16.gmra.mxu1 %v11235_v54  ;;  %13187 = vrot.lane.b32.xlu0 %v11422_v41, %s14439_s18  ;;  %v11417_v54 = vrot.slane %v14425_v60, 1 }
 0x524   : > { %v8483_v53 = vmax.f32 %v6620_v2, %v8476_v8  ;;  %v9645_v46 = vmax.f32 %v8482_v61, %v9631_v62  ;;  %v6451_v13 = vpop.f32.mrf.mxu1 }
 0x526   : > { %v9646_v0 = vmax.f32 %v8483_v53, %v9632_v48  ;;  %v10644_v47 = vmax.f32 %v9645_v46, %v5173_v23  ;;  %v8413_v14 = vpop.f32.mrf.mxu1 }
 0x527   : > { %v8443_v43 = vadd.f32 %v8413_v14, %v18841_v11  ;;  %v20931_v14 = vld [vmem:[#allocation49_spill] sm:$0xff] }
 0x528   : > { %v8463_v17 = vpop.permute.xlu1 %8462  ;;  %v10645_v28 = vmax.f32 %v9646_v0, %v5174_v26  ;;  %v11423_v34 = vmax.f32 %v10644_v47, %v6606_v50  ;;  %v8415_v12 = vpop.f32.mrf.mxu1 }
 0x529   : > { %13857 = vmatmul.mubr.msk.bf16.gmra.mxu0 %vm474_vm0, %v10805_v22  ;;  %v8477_v32 = vmax.f32 %v14424_v55, %v8463_v17  ;;  %v20934_v12 = vld [vmem:[#allocation147_spill] sm:$0xff] }
 0x52a   : > { %10902 = vmatprep.mubr.bf16.mxu0 %v20400_v31  ;;  %v11424_v39 = vmax.f32 %v10645_v28, %v6607_v21  ;;  %13189 = vrot.lane.b32.xlu1 %v11423_v34, %s14439_s18  ;;  %v8416_v57 = vpop.f32.mrf.mxu1 }
 0x52b   : > { %v8484_v23 = vmax.f32 %v6621_v1, %v8477_v32  ;;  %v7351_v50 = vpop.f32.mrf.mxu0  ;;  %v8444_v31 = vadd.f32 %v8416_v57, %v18928_v24 }
 0x52c   : > { %13191 = vrot.lane.b32.xlu0 %v11424_v39, %s14439_s18  ;;  %v8418_v58 = vpop.f32.mrf.mxu1 }
 0x52d   : > { %v9647_v51 = vmax.f32 %v8484_v23, %v9633_v52  ;;  %v7353_v2 = vpop.f32.mrf.mxu0  ;;  %v20932_v23 = vld [vmem:[#allocation145_spill] sm:$0xff]  ;;  %v20935_v58 = vld [vmem:[#allocation78_spill] sm:$0xff] }
 0x52e   : > { %v5732_v52 = vadd.f32 %v20932_v23, %v20931_v14 }
 0x52f   : > { %v10637_v42 = vpop.permute.xlu0 %10636  ;;  %v7355_v11 = vpop.f32.mrf.mxu0 }
 0x530   : > { %v10639_v36 = vmax.f32 %v14425_v60, %v10637_v42  ;;  %v20936_v60 = vld [vmem:[#allocation150_spill] sm:$0xff] }
 0x531   : > { %13858 = vmatmul.mubr.msk.bf16.gmra.mxu0 %vm474_vm0, %v10806_v10  ;;  %v7357_v24 = vpop.f32.mrf.mxu0 }
 0x532   : > { %14032 = vmatprep.mubr.msk.bf16.mxu0 %vm474_vm0, %v20929_v59  ;;  %v10646_v27 = vmax.f32 %v9647_v51, %v10639_v36  ;;  %v7452_v51 = vadd.f32 %v7351_v50, %v5732_v52 }
 0x534   : > { %v11425_v4 = vmax.f32 %v10646_v27, %v11417_v54 }
 0x536   : > { %13193 = vrot.lane.b32.xlu1 %v11425_v4, %s14439_s18  ;;  %v20937_v4 = vld [vmem:[#allocation83_spill] sm:$0xff] }
 0x539   : > { %14033 = vmatmul.mubr.msk.bf16.vlgmr.msra.gmra.mxu0 %vm474_vm0, %v19197_v35 }
 0x53a   : > { %14036 = vmatprep.mubr.msk.bf16.mxu0 %vm474_vm0, %v10805_v22  ;;  %v8421_v45 = vpop.f32.mrf.mxu1 }
 0x53b   : > { %v19238_v63 = vadd.f32 %v8421_v45, %v19000_v33  ;;  %v20938_v45 = vld [vmem:[#allocation155_spill] sm:$0xff] }
 0x53c   : > { %v8423_v59 = vpop.f32.mrf.mxu1 }
 0x53d   : > { %v7361_v20 = vpop.f32.mrf.mxu0  ;;  %v5738_v59 = vadd.f32 %v20938_v45, %v20937_v4  ;;  %v20947_v4 = vld [vmem:[#allocation98_spill] sm:$0xff]  ;;  %v20948_v45 = vld [vmem:[#allocation168_spill] sm:$0xff] }
 0x53e   : > { %v8424_v62 = vpop.f32.mrf.mxu1 }
 0x53f   : > { %v19242_v16 = vadd.f32 %v8424_v62, %v19019_v25  ;;  %v7363_v40 = vpop.f32.mrf.mxu0 }
 0x540   : > { %v8426_v5 = vpop.f32.mrf.mxu1 }
 0x541   : > { %14037 = vmatmul.mubr.msk.bf16.gmra.mxu0 %vm474_vm0, %v10806_v10  ;;  %v19244_v3 = vpop.f32.mrf.mxu0 }
 0x543   : > { %v19246_v35 = vpop.f32.mrf.mxu0 }
 0x550   : > { %v19248_v30 = vpop.f32.mrf.mxu0  ;;  %v8429_v48 = vpop.f32.mrf.mxu1 }
 0x551   : > { %v19251_v33 = vadd.f32 %v8429_v48, %v19199_v37 }
 0x552   : > { %v19253_v8 = vpop.f32.mrf.mxu0  ;;  %v8431_v41 = vpop.f32.mrf.mxu1 }
 0x553   : > { %v20939_v41 = vld [vmem:[#allocation87_spill] sm:$0xff] }
 0x554   : > { %v19255_v7 = vpop.f32.mrf.mxu0  ;;  %v8432_v61 = vpop.f32.mrf.mxu1 }
 0x555   : > { %v19258_v25 = vadd.f32 %v8432_v61, %v19207_v49  ;;  %v20940_v61 = vld [vmem:[#allocation157_spill] sm:$0xff] }
 0x556   : > { %v19260_v44 = vpop.f32.mrf.mxu0  ;;  %v8434_v18 = vpop.f32.mrf.mxu1 }
 0x557   : > { %v5742_v18 = vadd.f32 %v20940_v61, %v20939_v41 }
 0x558   : > { %v19262_v21 = vpop.f32.mrf.mxu0  ;;  %v8437_v26 = vpop.f32.mrf.mxu1 }
 0x559   : > { %v19265_v53 = vadd.f32 %v8437_v26, %v19219_v38  ;;  %v7456_v26 = vadd.f32 %v7357_v24, %v5738_v59  ;;  %v5752_v59 = vadd.f32 %v20948_v45, %v20947_v4 }
 0x55a   : > { %v19267_v37 = vpop.f32.mrf.mxu0  ;;  %v8439_v22 = vpop.f32.mrf.mxu1 }
 0x55b   : > { %v7464_v41 = vadd.f32 %v19248_v30, %v5752_v59 }
 0x55c   : > { %v7385_v29 = vpop.f32.mrf.mxu0  ;;  %v8440_v46 = vpop.f32.mrf.mxu1 }
 0x55d   : > { %v20941_v29 = vld [vmem:[#allocation90_spill] sm:$0xff]  ;;  %v20942_v46 = vld [vmem:[#allocation159_spill] sm:$0xff] }
 0x55e   : > { %v7386_v56 = vpop.f32.mrf.mxu0  ;;  %v8441_v0 = vpop.f32.mrf.mxu1 }
 0x55f   : > { %v7458_v56 = vadd.f32 %v7361_v20, %v5742_v18 }
 0x560   : > { %v19269_v47 = vpop.f32.mrf.mxu0 }
 0x562   : > { %v19271_v49 = vpop.f32.mrf.mxu0  ;;  %v9590_v15 = vpop.f32.mrf.mxu1 }
 0x563   : > { %v19273_v1 = vadd.f32 %v9590_v15, %v8443_v43  ;;  %v20933_v43 = vld [vmem:[#allocation77_spill] sm:$0xff] }
 0x564   : > { %v19275_v17 = vpop.f32.mrf.mxu0  ;;  %v9592_v28 = vpop.f32.mrf.mxu1  ;;  %v5734_v57 = vadd.f32 %v20934_v12, %v20933_v43  ;;  %v20945_v43 = vld [vmem:[#allocation97_spill] sm:$0xff] }
 0x565   : > { %v20946_v12 = vld [vmem:[#allocation165_spill] sm:$0xff] }
 0x566   : > { %v19277_v19 = vpop.f32.mrf.mxu0  ;;  %v9593_v38 = vpop.f32.mrf.mxu1  ;;  %v7453_v36 = vadd.f32 %v7353_v2, %v5734_v57  ;;  %v5744_v2 = vadd.f32 %v20942_v46, %v20941_v29  ;;  %v5748_v57 = vadd.f32 %v20946_v12, %v20945_v43 }
 0x567   : > { %v19279_v55 = vadd.f32 %v9593_v38, %v8444_v31  ;;  %v5736_v31 = vadd.f32 %v20936_v60, %v20935_v58  ;;  %v20943_v38 = vld [vmem:[#allocation93_spill] sm:$0xff] }
 0x568   : > { %v19281_v32 = vpop.f32.mrf.mxu0  ;;  %v9595_v34 = vpop.f32.mrf.mxu1  ;;  %v7459_v14 = vadd.f32 %v7363_v40, %v5744_v2  ;;  %v7462_v60 = vadd.f32 %v19246_v35, %v5748_v57  ;;  %v20951_v35 = vld [vmem:[#allocation104_spill] sm:$0xff] }
 0x569   : > { %v7455_v62 = vadd.f32 %v7355_v11, %v5736_v31  ;;  %v20944_v34 = vld [vmem:[#allocation161_spill] sm:$0xff] }
 0x56a   : > { %v19283_v13 = vpop.f32.mrf.mxu0 }
 0x56c   : > { %v14009_v39 = vpop.f32.mrf.mxu0 }
 0x56d   : > { %v5746_v39 = vadd.f32 %v20944_v34, %v20943_v38 }
 0x56e   : > { %v19287_v10 = vpop.f32.mrf.mxu0 }
 0x56f   : > { %v7461_v20 = vadd.f32 %v19244_v3, %v5746_v39  ;;  %v20950_v3 = vld [vmem:[#allocation169_spill] sm:$0xff] }
 0x570   : > { %v8878_v42 = vpop.f32.mrf.mxu0 }
 0x571   : > { %v19293_v54 = vadd.f32 %v8878_v42, %v7452_v51 }
 0x572   : > { %v8880_v27 = vpop.f32.mrf.mxu0 }
 0x573   : > { %v19297_v5 = vadd.f32 %v8880_v27, %v7453_v36 }
 0x574   : > { %v8882_v48 = vpop.f32.mrf.mxu0 }
 0x575   : > { %v19301_v50 = vadd.f32 %v8882_v48, %v7455_v62  ;;  %v20949_v62 = vld [vmem:[#allocation101_spill] sm:$0xff] }
 0x576   : > { %v8884_v22 = vpop.f32.mrf.mxu0  ;;  %v5754_v48 = vadd.f32 %v20950_v3, %v20949_v62 }
 0x577   : > { %v19305_v0 = vadd.f32 %v8884_v22, %v7456_v26  ;;  %v20952_v26 = vld [vmem:[#allocation170_spill] sm:$0xff] }
 0x578   : > { %v9598_v15 = vpop.f32.mrf.mxu1  ;;  %v8888_v28 = vpop.f32.mrf.mxu0  ;;  %v5756_v22 = vadd.f32 %v20952_v26, %v20951_v35  ;;  %v7465_v29 = vadd.f32 %v19253_v8, %v5754_v48 }
 0x579   : > { %v19308_v11 = vadd.f32 %v9598_v15, %v19238_v63  ;;  %v19312_v23 = vadd.f32 %v8888_v28, %v7458_v56  ;;  %v20953_v15 = vld [vmem:[#allocation105_spill] sm:$0xff]  ;;  %v20954_v28 = vld [vmem:[#allocation171_spill] sm:$0xff] }
 0x57a   : > { %v9600_v24 = vpop.f32.mrf.mxu1  ;;  %v8890_v52 = vpop.f32.mrf.mxu0  ;;  %v5758_v38 = vadd.f32 %v20954_v28, %v20953_v15  ;;  %v7467_v34 = vadd.f32 %v19255_v7, %v5756_v22  ;;  %v20961_v22 = vld [vmem:[#allocation125_spill] sm:$0xff] }
 0x57b   : > { %v19317_v51 = vadd.f32 %v8890_v52, %v7459_v14  ;;  %v20955_v24 = vld [vmem:[#allocation108_spill] sm:$0xff]  ;;  %v20956_v52 = vld [vmem:[#allocation173_spill] sm:$0xff] }
 0x57c   : > { %v9601_v42 = vpop.f32.mrf.mxu1  ;;  %v8892_v58 = vpop.f32.mrf.mxu0  ;;  %v5762_v43 = vadd.f32 %v20956_v52, %v20955_v24  ;;  %v7468_v8 = vadd.f32 %v19260_v44, %v5758_v38  ;;  %v20964_v15 = vld [vmem:[#allocation181_spill] sm:$0xff]  ;;  %v20965_v24 = vld [vmem:[#allocation130_spill] sm:$0xff]  ;;  %v20966_v52 = vld [vmem:[#allocation187_spill] sm:$0xff] }
 0x57d   : > { %v19320_v63 = vadd.f32 %v9601_v42, %v19242_v16  ;;  %v19323_v31 = vadd.f32 %v8892_v58, %v7461_v20  ;;  %v20957_v42 = vld [vmem:[#allocation110_spill] sm:$0xff] }
 0x57e   : > { %v9603_v40 = vpop.f32.mrf.mxu1  ;;  %v8894_v36 = vpop.f32.mrf.mxu0  ;;  %v20958_v58 = vld [vmem:[#allocation34_spill] sm:$0xff]  ;;  %v7470_v7 = vadd.f32 %v19262_v21, %v5762_v43  ;;  %v5806_v43 = vadd.f32 %v20966_v52, %v20965_v24 }
 0x57f   : > { %v19325_v27 = vadd.f32 %v8894_v36, %v7462_v60  ;;  %v5764_v60 = vadd.f32 %v20958_v58, %v20957_v42  ;;  %v20967_v58 = vld [vmem:[#allocation132_spill] sm:$0xff] }
 0x581   : > { %v7471_v45 = vadd.f32 %v19267_v37, %v5764_v60  ;;  %v20963_v37 = vld [vmem:[#allocation127_spill] sm:$0xff]  ;;  %v20968_v60 = vld [vmem:[#allocation193_spill] sm:$0xff] }
 0x582   : > { %v5814_v28 = vadd.f32 %v20964_v15, %v20963_v37 }
 0x588   : > { %v9606_v61 = vpop.f32.mrf.mxu1 }
 0x589   : > { %v8898_v18 = vpop.f32.mrf.mxu0  ;;  %v19333_v16 = vadd.f32 %v9606_v61, %v19251_v33  ;;  %v20959_v61 = vld [vmem:[#allocation122_spill] sm:$0xff] }
 0x58a   : > { %v19338_v46 = vadd.f32 %v8898_v18, %v7464_v41  ;;  %v9608_v2 = vpop.f32.mrf.mxu1  ;;  %v20960_v18 = vld [vmem:[#allocation177_spill] sm:$0xff] }
 0x58b   : > { %v8900_v56 = vpop.f32.mrf.mxu0  ;;  %v5811_v21 = vadd.f32 %v20960_v18, %v20959_v61 }
 0x58c   : > { %v19343_v30 = vadd.f32 %v8900_v56, %v7465_v29  ;;  %v9609_v39 = vpop.f32.mrf.mxu1  ;;  %v20962_v29 = vld [vmem:[#allocation179_spill] sm:$0xff] }
 0x58d   : > { %v8902_v14 = vpop.f32.mrf.mxu0  ;;  %v19346_v33 = vadd.f32 %v9609_v39, %v19258_v25  ;;  %v5803_v2 = vadd.f32 %v20962_v29, %v20961_v22  ;;  %v20971_v22 = vld [vmem:[#allocation143_spill] sm:$0xff] }
 0x58e   : > { %v19351_v12 = vadd.f32 %v8902_v14, %v7467_v34  ;;  %v9611_v57 = vpop.f32.mrf.mxu1  ;;  %v5822_v29 = vadd.f32 %v18687_v9, %v20971_v22 }
 0x58f   : > { %v8904_v20 = vpop.f32.mrf.mxu0  ;;  %v7454_v38 = vadd.f32 %v19271_v49, %v5803_v2  ;;  %v7457_v49 = vadd.f32 %v19277_v19, %v5806_v43 }
 0x590   : > { %v19356_v40 = vadd.f32 %v8904_v20, %v7468_v8  ;;  %v9614_v36 = vpop.f32.mrf.mxu1  ;;  %v7463_v8 = vadd.f32 %v19275_v17, %v5814_v28 }
 0x591   : > { %v8908_v4 = vpop.f32.mrf.mxu0  ;;  %v19359_v25 = vadd.f32 %v9614_v36, %v19265_v53  ;;  %v7460_v53 = vadd.f32 %v19269_v47, %v5811_v21 }
 0x592   : > { %v19362_v59 = vadd.f32 %v8908_v4, %v7470_v7  ;;  %v9616_v44 = vpop.f32.mrf.mxu1  ;;  %v5827_v7 = vadd.f32 %v20968_v60, %v20967_v58 }
 0x593   : > { %v8910_v62 = vpop.f32.mrf.mxu0  ;;  %v20969_v44 = vld [vmem:[#allocation139_spill] sm:$0xff] }
 0x594   : > { %v19364_v3 = vadd.f32 %v8910_v62, %v7471_v45  ;;  %v9617_v48 = vpop.f32.mrf.mxu1  ;;  %v20970_v62 = vld [vmem:[#allocation195_spill] sm:$0xff]  ;;  %v7472_v17 = vadd.f32 %v19281_v32, %v5827_v7 }
 0x595   : > { %v8912_v41 = vpop.f32.mrf.mxu0  ;;  %v5819_v48 = vadd.f32 %v20970_v62, %v20969_v44 }
 0x596   : > { %v9618_v35 = vpop.f32.mrf.mxu1 }
 0x597   : > { %v8913_v26 = vpop.f32.mrf.mxu0  ;;  %v7466_v21 = vadd.f32 %v19283_v13, %v5819_v48 }
 0x599   : > { %v14014_v56 = vpop.f32.mrf.mxu0 }
 0x59a   : > { %v19374_v34 = vadd.f32 %v14014_v56, %v7460_v53 }
 0x59b   : > { %v8949_v39 = vpop.f32.mrf.mxu0  ;;  %v10599_v14 = vpop.f32.mrf.mxu1 }
 0x59c   : > { %v19379_v57 = vadd.f32 %v8949_v39, %v7454_v38  ;;  %v19382_v20 = vadd.f32 %v10599_v14, %v19273_v1 }
 0x59d   : > { %v14015_v47 = vpop.f32.mrf.mxu0  ;;  %v10601_v42 = vpop.f32.mrf.mxu1 }
 0x59e   : > { %v19387_v36 = vadd.f32 %v14015_v47, %v7463_v8 }
 0x59f   : > { %v8952_v4 = vpop.f32.mrf.mxu0  ;;  %v10602_v45 = vpop.f32.mrf.mxu1 }
 0x5a0   : > { %v19392_v41 = vadd.f32 %v8952_v4, %v7457_v49  ;;  %v19395_v1 = vadd.f32 %v10602_v45, %v19279_v55  ;;  %v7469_v55 = vadd.f32 %v19287_v10, %v5822_v29 }
 0x5a1   : > { %v14018_v61 = vpop.f32.mrf.mxu0  ;;  %v10604_v18 = vpop.f32.mrf.mxu1 }
 0x5a2   : > { %v19398_v35 = vadd.f32 %v14018_v61, %v7472_v17 }
 0x5a3   : > { %v8965_v19 = vpop.f32.mrf.mxu0  ;;  %v10607_v26 = vpop.f32.mrf.mxu1 }
 0x5a4   : > { %v19402_v2 = vadd.f32 %v8965_v19, %v7466_v21  ;;  %v19405_v32 = vadd.f32 %v10607_v26, %v19308_v11 }
 0x5a5   : > { %v14019_v53 = vpop.f32.mrf.mxu0  ;;  %v10609_v56 = vpop.f32.mrf.mxu1 }
 0x5a7   : > { %v8968_v37 = vpop.f32.mrf.mxu0  ;;  %v10610_v15 = vpop.f32.mrf.mxu1 }
 0x5a8   : > { %v19408_v28 = vadd.f32 %v8968_v37, %v7469_v55  ;;  %v19411_v13 = vadd.f32 %v10610_v15, %v19320_v63 }
 0x5a9   : > { %v9963_v38 = vpop.f32.mrf.mxu0  ;;  %v10612_v39 = vpop.f32.mrf.mxu1 }
 0x5aa   : > { %v19414_v9 = vadd.f32 %v9963_v38, %v19293_v54 }
 0x5ab   : > { %v9965_v14 = vpop.f32.mrf.mxu0 }
 0x5ac   : > { %v19417_v11 = vadd.f32 %v9965_v14, %v19297_v5 }
 0x5ad   : > { %v9967_v24 = vpop.f32.mrf.mxu0 }
 0x5ae   : > { %v19420_v52 = vadd.f32 %v9967_v24, %v19301_v50 }
 0x5af   : > { %v9969_v10 = vpop.f32.mrf.mxu0  ;;  %v10615_v43 = vpop.f32.mrf.mxu1 }
 0x5b0   : > { %v19423_v8 = vadd.f32 %v9969_v10, %v19305_v0  ;;  %v19426_v63 = vadd.f32 %v10615_v43, %v19333_v16 }
 0x5b1   : > { %v9973_v47 = vpop.f32.mrf.mxu0  ;;  %v10617_v42 = vpop.f32.mrf.mxu1 }
 0x5b2   : > { %v19429_v54 = vadd.f32 %v9973_v47, %v19312_v23  ;;  %v11464_v42 = vld [vmem:[%s20104_s9] sm:$0x7] }
 0x5b3   : > { %v9975_v58 = vpop.f32.mrf.mxu0  ;;  %v10618_v5 = vpop.f32.mrf.mxu1 }
 0x5b4   : > { %v19432_v60 = vadd.f32 %v9975_v58, %v19317_v51  ;;  %v19435_v50 = vadd.f32 %v10618_v5, %v19346_v33 }
 0x5b5   : > { %v9977_v7 = vpop.f32.mrf.mxu0  ;;  %v10620_v49 = vpop.f32.mrf.mxu1 }
 0x5b6   : > { %v19438_v0 = vadd.f32 %v9977_v7, %v19323_v31  ;;  %v20972_v49 = vld [vmem:[#allocation3_spill] sm:$0xff] }
 0x5b7   : > { %v9979_v16 = vpop.f32.mrf.mxu0  ;;  %v10623_v4 = vpop.f32.mrf.mxu1 }
 0x5b8   : > { %v19441_v45 = vadd.f32 %v9979_v16, %v19325_v27  ;;  %v19444_v23 = vadd.f32 %v10623_v4, %v19359_v25 }
 0x5b9   : > { %v9983_v44 = vpop.f32.mrf.mxu0  ;;  %v10625_v62 = vpop.f32.mrf.mxu1 }
 0x5ba   : > { %v19447_v51 = vadd.f32 %v9983_v44, %v19338_v46 }
 0x5bb   : > { %v9985_v33 = vpop.f32.mrf.mxu0  ;;  %v10626_v48 = vpop.f32.mrf.mxu1 }
 0x5bc   : > { %v19450_v17 = vadd.f32 %v9985_v33, %v19343_v30  ;;  %v20973_v33 = vld [vmem:[#allocation35_spill] sm:$0xff] }
 0x5bd   : > { %v9987_v31 = vpop.f32.mrf.mxu0  ;;  %v10627_v61 = vpop.f32.mrf.mxu1 }
 0x5be   : > { %v19453_v18 = vadd.f32 %v9987_v31, %v19351_v12  ;;  %v19507_v31 = vrot.slane %v11464_v42, %v20973_v33  ;;  %v20974_v61 = vld [vmem:[#allocation14_spill] sm:$0xff] }
 0x5bf   : > { %v9989_v27 = vpop.f32.mrf.mxu0 }
 0x5c0   : > { %v19456_v21 = vadd.f32 %v9989_v27, %v19356_v40  ;;  %v19470_v40 = vld [vmem:[%s20106_s11] ss:$0 sm:$0xff] }
 0x5c1   : > { %v9993_v25 = vpop.f32.mrf.mxu0 }
 0x5c2   : > { %v19459_v19 = vadd.f32 %v9993_v25, %v19362_v59 }
 0x5c3   : > { %v9995_v46 = vpop.f32.mrf.mxu0 }
 0x5c4   : > { %v19462_v26 = vadd.f32 %v9995_v46, %v19364_v3  ;;  %v19476_v3 = vld [vmem:[%s20107_s12] ss:$0 sm:$0xff] }
 0x5c5   : > { %v9997_v22 = vpop.f32.mrf.mxu0 }
 0x5c7   : > { %v9998_v30 = vpop.f32.mrf.mxu0 }
 0x5c8   : > { %v19515_v30 = vrot.slane %v11464_v42, %v20974_v61 }
 0x5c9   : > { %v14024_v29 = vpop.f32.mrf.mxu0 }
 0x5ca   : > { %v19465_v53 = vadd.f32 %v14024_v29, %v19374_v34 }
 0x5cb   : > { %v10034_v12 = vpop.f32.mrf.mxu0  ;;  %v11380_v56 = vpop.f32.mrf.mxu1 }
 0x5cc   : > { %v11410_v59 = vadd.f32 %v11380_v56, %v19382_v20 }
 0x5cd   : > { %v14025_v55 = vpop.f32.mrf.mxu0  ;;  %v11382_v37 = vpop.f32.mrf.mxu1 }
 0x5ce   : > { %v19479_v15 = vadd.f32 %v14025_v55, %v19387_v36  ;;  %v12480_v34 = vmul.f32 %v19470_v40, %v11410_v59  ;;  %v11426_v36 = vld [vmem:[%s20103_s8] sm:$0x7] }
 0x5cf   : > { %v10037_v38 = vpop.f32.mrf.mxu0  ;;  %v11383_v39 = vpop.f32.mrf.mxu1  ;;  %v19504_v48 = vrot.slane %v11426_v36, %v20973_v33  ;;  %v19510_v27 = vrot.slane %v11426_v36, %v20974_v61 }
 0x5d0   : > { %v19483_v14 = vadd.f32 %v10037_v38, %v19392_v41  ;;  %v12494_v24 = vadd.f32 %v19476_v3, %v12480_v34  ;;  %v11411_v20 = vadd.f32 %v11383_v39, %v19395_v1  ;;  %v11438_v1 = vsub.s32 2, %v20972_v49 }
 0x5d1   : > { %v14028_v10 = vpop.f32.mrf.mxu0  ;;  %v11385_v43 = vpop.f32.mrf.mxu1 }
 0x5d2   : > { %v19488_v47 = vadd.f32 %v14028_v10, %v19398_v35  ;;  %v12501_v58 = vmax.f32 %v12494_v24, 0.0  ;;  %v12481_v41 = vmul.f32 %v19470_v40, %v11411_v20  ;;  %v19519_v34 = vrot.slane %v11426_v36, %v11438_v1 }
 0x5d3   : > { %v10050_v5 = vpop.f32.mrf.mxu0  ;;  %v11388_v7 = vpop.f32.mrf.mxu1  ;;  %v19521_v38 = vrot.slane %v11464_v42, %v11438_v1  ;;  %v19529_v10 = vadd.f32 %v10034_v12, %v19379_v57 }
 0x5d4   : > { %v19499_v16 = vadd.f32 %v10050_v5, %v19402_v2  ;;  %v12515_v35 = vcombine.high %v12501_v58, %v12501_v58  ;;  %v12522_v4 = vrot.slane %v12501_v58, %v20433_v6  ;;  %v12495_v44 = vadd.f32 %v19476_v3, %v12481_v41 }
 0x5d5   : > { %v14029_v62 = vpop.f32.mrf.mxu0  ;;  %v11412_v25 = vadd.f32 %v11388_v7, %v19405_v32  ;;  %v11390_v46 = vpop.f32.mrf.mxu1 }
 0x5d6   : > { %v12529_v2 = vrot.slane %v12515_v35, %v20433_v6  ;;  %v12530_v22 = vcombine.high %v12522_v4, %v12522_v4  ;;  %v12502_v29 = vmax.f32 %v12495_v44, 0.0  ;;  %v12538_v59 = vrot.slane %v12522_v4, %v20433_v6 }
 0x5d7   : > { %v10053_v56 = vpop.f32.mrf.mxu0  ;;  %v12482_v55 = vmul.f32 %v19470_v40, %v11412_v25  ;;  %v11391_v37 = vpop.f32.mrf.mxu1 }
 0x5d8   : > { %v19524_v32 = vadd.f32 %v10053_v56, %v19408_v28  ;;  %v12531_v39 = vcombine.high %v12529_v2, %v12529_v2  ;;  %v12545_v24 = vrot.slane %v12529_v2, %v20433_v6  ;;  %v12552_v20 = vrot.slane %v12530_v22, %v20433_v6 }
 0x5d9   : > { %v10874_v43 = vpop.f32.mrf.mxu0  ;;  %v12564_v58 = vcombine.high %v12502_v29, %v12502_v29  ;;  %v12571_v41 = vrot.slane %v12502_v29, %v20433_v6  ;;  %v19533_v36 = vadd.f32 %v11391_v37, %v19411_v13  ;;  %v11393_v42 = vpop.f32.mrf.mxu1  ;;  %v12496_v12 = vadd.f32 %v19476_v3, %v12482_v55 }
 0x5da   : > { %20975 = vst [vmem:[#allocation92_spill] sm:$0xff] %v19524_v32  ;;  %v10975_v5 = vadd.f32 %v10874_v43, %v19414_v9  ;;  %v12559_v28 = vrot.slane %v12531_v39, %v20433_v6  ;;  %v12561_v7 = vcombine.high %v12545_v24, %v12545_v24  ;;  %v12823_v49 = vcombine.low %v12538_v59, %v12552_v20 }
 0x5db   : > { %v13914_v1 = vcombine.high %v12538_v59, %v12552_v20  ;;  %v10876_v35 = vpop.f32.mrf.mxu0  ;;  %v12578_v4 = vrot.slane %v12564_v58, %v20433_v6  ;;  %v12579_v57 = vcombine.high %v12571_v41, %v12571_v41  ;;  %v19539_v44 = vpop.f32.mrf.mxu1  ;;  %v12587_v9 = vrot.slane %v12571_v41, %v20433_v6 }
 0x5dc   : > { %v11443_v62 = vmul.f32 %v19504_v48, %v10975_v5  ;;  %v12825_v13 = vcombine.low %v12545_v24, %v12559_v28  ;;  %v19543_v33 = vrot.slane %v12823_v49, %v20433_v6  ;;  %v10976_v25 = vadd.f32 %v10876_v35, %v19417_v11 }
 0x5dd   : > { %v19547_v61 = vrot.slane %v13914_v1, %v20433_v6  ;;  %v10878_v46 = vpop.f32.mrf.mxu0  ;;  %v12563_v2 = vcombine.high %v12559_v28, %v12559_v28  ;;  %v12580_v22 = vcombine.high %v12578_v4, %v12578_v4  ;;  %v11398_v29 = vpop.f32.mrf.mxu1  ;;  %v19555_v55 = vrot.slane %v12561_v7, %v20433_v6 }
 0x5de   : > { %20976 = vst [vmem:[#allocation95_spill] sm:$0xff] %v19543_v33  ;;  %v11481_v56 = vadd.f32 %v19507_v31, %v11443_v62  ;;  %v19552_v59 = vrot.slane %v12825_v13, %v20433_v6  ;;  %v10978_v37 = vadd.f32 %v10878_v46, %v19420_v52  ;;  %v11444_v39 = vmul.f32 %v19510_v27, %v10976_v25 }
 0x5df   : > { %20977 = vst [vmem:[#allocation94_spill] sm:$0xff] %v19547_v61  ;;  %20979 = vst [vmem:[#allocation107_spill] sm:$0xff] %v19555_v55  ;;  %v12594_v24 = vrot.slane %v12578_v4, %v20433_v6  ;;  %v12601_v11 = vrot.slane %v12579_v57, %v20433_v6  ;;  %v19562_v20 = vrot.slane %v12580_v22, %v20433_v6  ;;  %v10880_v43 = vpop.f32.mrf.mxu0  ;;  %v19564_v58 = vpop.f32.mrf.mxu1 }
 0x5e0   : > { %20978 = vst [vmem:[#allocation102_spill] sm:$0xff] %v19552_v59  ;;  %v11446_v42 = vmul.f32 %v19504_v48, %v10978_v37  ;;  %v12609_v5 = vcombine.high %v12587_v9, %v12587_v9  ;;  %v12871_v28 = vcombine.low %v12563_v2, %v12587_v9  ;;  %v11502_v52 = vmax.f32 %v11481_v56, 0.0 }
 0x5e1   : > { %v11482_v7 = vadd.f32 %v19515_v30, %v11444_v39  ;;  %v12611_v49 = vcombine.high %v12601_v11, %v12601_v11  ;;  %v13915_v1 = vcombine.high %v12594_v24, %v19562_v20  ;;  %v10884_v35 = vpop.f32.mrf.mxu0  ;;  %v11401_v4 = vpop.f32.mrf.mxu1  ;;  %v10979_v25 = vadd.f32 %v10880_v43, %v19423_v8 }
 0x5e2   : > { %v11484_v57 = vadd.f32 %v19507_v31, %v11446_v42  ;;  %v12872_v62 = vcombine.low %v12601_v11, %v12609_v5  ;;  %v12880_v13 = vrot.slane %v12871_v28, %v20433_v6  ;;  %v10981_v2 = vadd.f32 %v10884_v35, %v19429_v54 }
 0x5e3   : > { %v11503_v46 = vmax.f32 %v11482_v7, 0.0  ;;  %v19574_v22 = vcombine.low %v12611_v49, %v12594_v24  ;;  %v10886_v29 = vpop.f32.mrf.mxu0  ;;  %v19579_v56 = vpop.f32.mrf.mxu1  ;;  %v19583_v39 = vrot.slane %v13915_v1, %v20433_v6  ;;  %v11447_v11 = vmul.f32 %v19510_v27, %v10979_v25 }
 0x5e4   : > { %v12887_v37 = vrot.slane %v12872_v62, %v20433_v6  ;;  %v12503_v42 = vmax.f32 %v12496_v12, 0.0  ;;  %v11505_v24 = vmax.f32 %v11484_v57, 0.0  ;;  %v11449_v5 = vmul.f32 %v19504_v48, %v10981_v2 }
 0x5e5   : > { %v11544_v8 = vcombine.low %v11502_v52, %v11503_v46  ;;  %v11545_v43 = vcombine.high %v11502_v52, %v11503_v46  ;;  %v10888_v28 = vpop.f32.mrf.mxu0  ;;  %v11406_v7 = vpop.f32.mrf.mxu1  ;;  %v11485_v54 = vadd.f32 %v19515_v30, %v11447_v11  ;;  %v10982_v52 = vadd.f32 %v10886_v29, %v19432_v60 }
 0x5e6   : > { %v19587_v49 = vcombine.low %v12880_v13, %v12887_v37  ;;  %v12613_v35 = vcombine.high %v12503_v42, %v12503_v42  ;;  %v12620_v4 = vrot.slane %v12503_v42, %v20433_v6  ;;  %v11487_v46 = vadd.f32 %v19507_v31, %v11449_v5 }
 0x5e7   : > { %v19592_v1 = vrot.slane %v11544_v8, %v20433_v6  ;;  %v19595_v62 = vrot.slane %v11545_v43, %v20433_v6  ;;  %v10890_v57 = vpop.f32.mrf.mxu0  ;;  %v11407_v25 = vpop.f32.mrf.mxu1  ;;  %v11506_v13 = vmax.f32 %v11485_v54, 0.0  ;;  %v11450_v42 = vmul.f32 %v19510_v27, %v10982_v52 }
 0x5e8   : > { %v12627_v2 = vrot.slane %v12613_v35, %v20433_v6  ;;  %v12628_v37 = vcombine.high %v12620_v4, %v12620_v4  ;;  %v12636_v11 = vrot.slane %v12620_v4, %v20433_v6  ;;  %v10984_v8 = vadd.f32 %v10888_v28, %v19438_v0 }
 0x5e9   : > { %v12483_v43 = vmul.f32 %v19470_v40, %v19533_v36  ;;  %v10894_v7 = vpop.f32.mrf.mxu0  ;;  %v11408_v41 = vpop.f32.mrf.mxu1  ;;  %v11611_v60 = vcombine.low %v11505_v24, %v11506_v13  ;;  %v11612_v29 = vcombine.high %v11505_v24, %v11506_v13  ;;  %v11488_v35 = vadd.f32 %v19515_v30, %v11450_v42 }
 0x5ea   : > { %v12629_v25 = vcombine.high %v12627_v2, %v12627_v2  ;;  %v12643_v54 = vrot.slane %v12627_v2, %v20433_v6  ;;  %v12650_v5 = vrot.slane %v12628_v37, %v20433_v6  ;;  %v11452_v4 = vmul.f32 %v19504_v48, %v10984_v8 }
 0x5eb   : > { %v12497_v52 = vadd.f32 %v19476_v3, %v12483_v43  ;;  %v10896_v12 = vpop.f32.mrf.mxu0  ;;  %v19613_v0 = vrot.slane %v11611_v60, %v20433_v6  ;;  %v11508_v36 = vmax.f32 %v11487_v46, 0.0  ;;  %v19617_v24 = vrot.slane %v11612_v29, %v20433_v6 }
 0x5ec   : > { %v12657_v41 = vrot.slane %v12629_v25, %v20433_v6  ;;  %v12659_v28 = vcombine.high %v12643_v54, %v12643_v54  ;;  %v12920_v13 = vcombine.low %v12636_v11, %v12650_v5  ;;  %v13916_v2 = vcombine.high %v12636_v11, %v12650_v5 }
 0x5ed   : > { %v11509_v37 = vmax.f32 %v11488_v35, 0.0  ;;  %v10898_v9 = vpop.f32.mrf.mxu0  ;;  %v12949_v42 = vrot.slane %v12643_v54, %v20433_v6  ;;  %v11490_v43 = vadd.f32 %v19507_v31, %v11452_v4  ;;  %v12504_v32 = vmax.f32 %v12497_v52, 0.0 }
 0x5ee   : > { %v12967_v8 = vcombine.low %v12657_v41, %v12659_v28  ;;  %v19622_v60 = vrot.slane %v12920_v13, %v20433_v6  ;;  %v12942_v46 = vrot.slane %v13916_v2, %v20433_v6  ;;  %v12661_v59 = vcombine.high %v12657_v41, %v12657_v41 }
 0x5ef   : > { %v11678_v25 = vcombine.low %v11508_v36, %v11509_v37  ;;  %v11679_v61 = vcombine.high %v11508_v36, %v11509_v37  ;;  %v10900_v33 = vpop.f32.mrf.mxu0  ;;  %v11511_v29 = vmax.f32 %v11490_v43, 0.0  ;;  %v12662_v55 = vcombine.high %v12504_v32, %v12504_v32 }
 0x5f0   : > { %v12669_v11 = vrot.slane %v12504_v32, %v20433_v6  ;;  %v19628_v5 = vcombine.low %v12942_v46, %v12949_v42  ;;  %v12976_v4 = vrot.slane %v12967_v8, %v20433_v6  ;;  %v10985_v13 = vadd.f32 %v10890_v57, %v19441_v45 }
 0x5f1   : > { %v19631_v35 = vrot.slane %v11678_v25, %v20433_v6  ;;  %v19634_v52 = vpop.f32.mrf.mxu0  ;;  %v12676_v36 = vrot.slane %v12662_v55, %v20433_v6  ;;  %v10987_v32 = vadd.f32 %v10894_v7, %v19447_v51  ;;  %v11414_v2 = vadd.f32 %v19539_v44, %v19426_v63 }
 0x5f2   : > { %v12677_v28 = vcombine.high %v12669_v11, %v12669_v11  ;;  %v12685_v41 = vrot.slane %v12669_v11, %v20433_v6  ;;  %v10988_v37 = vadd.f32 %v10896_v12, %v19450_v17  ;;  %v10990_v42 = vadd.f32 %v10898_v9, %v19453_v18 }
 0x5f3   : > { %v19644_v43 = vpop.f32.mrf.mxu0  ;;  %v12678_v8 = vcombine.high %v12676_v36, %v12676_v36  ;;  %v12692_v46 = vrot.slane %v12676_v36, %v20433_v6  ;;  %v11453_v45 = vmul.f32 %v19510_v27, %v10985_v13  ;;  %v11455_v51 = vmul.f32 %v19504_v48, %v10987_v32 }
 0x5f4   : > { %v12699_v55 = vrot.slane %v12677_v28, %v20433_v6  ;;  %v12707_v25 = vcombine.high %v12685_v41, %v12685_v41  ;;  %v12968_v11 = vcombine.low %v12661_v59, %v12685_v41  ;;  %v12484_v57 = vmul.f32 %v19470_v40, %v11414_v2 }
 0x5f5   : > { %v10908_v63 = vpop.f32.mrf.mxu0  ;;  %v12706_v17 = vrot.slane %v12678_v8, %v20433_v6  ;;  %v11456_v9 = vmul.f32 %v19510_v27, %v10988_v37  ;;  %v11491_v7 = vadd.f32 %v19515_v30, %v11453_v45  ;;  %v11493_v59 = vadd.f32 %v19507_v31, %v11455_v51 }
 0x5f6   : > { %v12709_v44 = vcombine.high %v12699_v55, %v12699_v55  ;;  %v19652_v18 = vcombine.low %v12699_v55, %v12707_v25  ;;  %v12983_v12 = vrot.slane %v12968_v11, %v20433_v6  ;;  %v12498_v36 = vadd.f32 %v19476_v3, %v12484_v57 }
 0x5f7   : > { %v10909_v28 = vpop.f32.mrf.mxu0  ;;  %v19660_v41 = vrot.slane %v11679_v61, %v20433_v6  ;;  %v13015_v2 = vcombine.low %v12692_v46, %v12706_v17  ;;  %v13917_v8 = vcombine.high %v12692_v46, %v12706_v17  ;;  %v11512_v55 = vmax.f32 %v11491_v7, 0.0 }
 0x5f8   : > { %v19665_v32 = vrot.slane %v12709_v44, %v20433_v6  ;;  %v19667_v37 = vcombine.low %v12976_v4, %v12983_v12  ;;  %v12505_v25 = vmax.f32 %v12498_v36, 0.0  ;;  %v11514_v51 = vmax.f32 %v11493_v59, 0.0 }
 0x5f9   : > { %v14034_v11 = vpop.f32.mrf.mxu0  ;;  %v19670_v45 = vrot.slane %v13015_v2, %v20433_v6  ;;  %v11494_v61 = vadd.f32 %v19515_v30, %v11456_v9  ;;  %v11458_v57 = vmul.f32 %v19504_v48, %v10990_v42  ;;  %v11745_v63 = vcombine.low %v11511_v29, %v11512_v55 }
 0x5fa   : > { %v11746_v28 = vcombine.high %v11511_v29, %v11512_v55  ;;  %v12711_v13 = vcombine.high %v12505_v25, %v12505_v25  ;;  %v12718_v44 = vrot.slane %v12505_v25, %v20433_v6  ;;  %v11415_v17 = vadd.f32 %v19564_v58, %v19435_v50 }
 0x5fb   : > { %20980 = vst [vmem:[#allocation111_spill] sm:$0xff] %v19670_v45  ;;  %v19675_v54 = vpop.f32.mrf.mxu0  ;;  %v11515_v4 = vmax.f32 %v11494_v61, 0.0  ;;  %v11496_v46 = vadd.f32 %v19507_v31, %v11458_v57  ;;  %v10991_v12 = vadd.f32 %v10900_v33, %v19456_v21  ;;  %v19682_v7 = vrot.slane %v13917_v8, %v20433_v6 }
 0x5fc   : > { %v19685_v42 = vrot.slane %v11745_v63, %v20433_v6  ;;  %v12725_v29 = vrot.slane %v12711_v13, %v20433_v6  ;;  %v12726_v9 = vcombine.high %v12718_v44, %v12718_v44  ;;  %v19691_v36 = vrot.slane %v11746_v28, %v20433_v6 }
 0x5fd   : > { %20981 = vst [vmem:[#allocation114_spill] sm:$0xff] %v19682_v7  ;;  %v19688_v59 = vpop.f32.mrf.mxu0  ;;  %v12734_v2 = vrot.slane %v12718_v44, %v20433_v6  ;;  %v11812_v55 = vcombine.low %v11514_v51, %v11515_v4  ;;  %v11813_v50 = vcombine.high %v11514_v51, %v11515_v4  ;;  %v12485_v8 = vmul.f32 %v19470_v40, %v11415_v17 }
 0x5fe   : > { %v12727_v58 = vcombine.high %v12725_v29, %v12725_v29  ;;  %v12741_v21 = vrot.slane %v12725_v29, %v20433_v6  ;;  %v12748_v33 = vrot.slane %v12726_v9, %v20433_v6  ;;  %v11517_v57 = vmax.f32 %v11496_v46, 0.0 }
 0x5ff   : > { %v19697_v25 = vpop.f32.mrf.mxu0  ;;  %v12756_v13 = vcombine.high %v12734_v2, %v12734_v2  ;;  %v19700_v61 = vrot.slane %v11812_v55, %v20433_v6  ;;  %v11459_v63 = vmul.f32 %v19510_v27, %v10991_v12  ;;  %v19707_v29 = vrot.slane %v11813_v50, %v20433_v6 }
 0x600   : > { %v12755_v28 = vrot.slane %v12727_v58, %v20433_v6  ;;  %v12757_v44 = vcombine.high %v12741_v21, %v12741_v21  ;;  %v12758_v51 = vcombine.high %v12748_v33, %v12748_v33  ;;  %v13017_v4 = vcombine.low %v12734_v2, %v12748_v33 }
 0x601   : > { %v19704_v45 = vpop.f32.mrf.mxu0  ;;  %v12499_v17 = vadd.f32 %v19476_v3, %v12485_v8  ;;  %v11497_v9 = vadd.f32 %v19515_v30, %v11459_v63  ;;  %v10993_v55 = vadd.f32 %v19634_v52, %v19459_v19  ;;  %v19717_v12 = vrot.slane %v12756_v13, %v20433_v6 }
 0x602   : > { %v19714_v46 = vrot.slane %v13017_v4, %v20433_v6  ;;  %v19719_v58 = vcombine.low %v12758_v51, %v12741_v21  ;;  %v19721_v2 = vcombine.low %v12755_v28, %v12757_v44  ;;  %v11416_v63 = vadd.f32 %v19579_v56, %v19444_v23 }
 0x603   : > { %v19723_v33 = vpop.f32.mrf.mxu0  ;;  %v12506_v50 = vmax.f32 %v12499_v17, 0.0  ;;  %v11518_v7 = vmax.f32 %v11497_v9, 0.0  ;;  %v11461_v8 = vmul.f32 %v19504_v48, %v10993_v55  ;;  %v12759_v13 = vcombine.high %v12755_v28, %v12755_v28 }
 0x604   : > { %v13047_v19 = vcombine.low %v19714_v46, %v19717_v12  ;;  %v10994_v21 = vadd.f32 %v19644_v43, %v19462_v26  ;;  %v12486_v23 = vmul.f32 %v19470_v40, %v11416_v63  ;;  %v10983_v55 = vadd.f32 %v14034_v11, %v19465_v53 }
 0x605   : > { %v14039_v44 = vpop.f32.mrf.mxu0  ;;  %v12760_v51 = vcombine.high %v12506_v50, %v12506_v50  ;;  %v12767_v4 = vrot.slane %v12506_v50, %v20433_v6  ;;  %v11879_v17 = vcombine.low %v11517_v57, %v11518_v7  ;;  %v11880_v9 = vcombine.high %v11517_v57, %v11518_v7 }
 0x606   : > { %v11499_v48 = vadd.f32 %v19507_v31, %v11461_v8  ;;  %v11462_v56 = vmul.f32 %v19510_v27, %v10994_v21  ;;  %v13079_v28 = vrot.slane %v19721_v2, %v20433_v6  ;;  %v12500_v31 = vadd.f32 %v19476_v3, %v12486_v23 }
 0x607   : > { %v12774_v52 = vrot.slane %v12760_v51, %v20433_v6  ;;  %v12775_v26 = vcombine.high %v12767_v4, %v12767_v4  ;;  %v12783_v43 = vrot.slane %v12767_v4, %v20433_v6  ;;  %v19744_v50 = vrot.slane %v11879_v17, %v20433_v6 }
 0x608   : > { %v11520_v7 = vmax.f32 %v11499_v48, 0.0  ;;  %v11500_v40 = vadd.f32 %v19515_v30, %v11462_v56  ;;  %v12507_v8 = vmax.f32 %v12500_v31, 0.0  ;;  %v11451_v21 = vmul.f32 %v19519_v34, %v10983_v55 }
 0x609   : > { %v12776_v57 = vcombine.high %v12774_v52, %v12774_v52  ;;  %v12790_v27 = vrot.slane %v12774_v52, %v20433_v6  ;;  %v12797_v53 = vrot.slane %v12775_v26, %v20433_v6  ;;  %v13065_v11 = vcombine.low %v12759_v13, %v12783_v43 }
 0x60a   : > { %v11521_v63 = vmax.f32 %v11500_v40, 0.0  ;;  %v10977_v44 = vadd.f32 %v19675_v54, %v19529_v10  ;;  %v12815_v17 = vrot.slane %v12507_v8, %v20433_v6  ;;  %v11489_v13 = vadd.f32 %v19521_v38, %v11451_v21 }
 0x60b   : > { %v12804_v51 = vrot.slane %v12776_v57, %v20433_v6  ;;  %v13086_v4 = vrot.slane %v13065_v11, %v20433_v6  ;;  %v13093_v3 = vrot.slane %v12797_v53, %v20433_v6  ;;  %v13918_v30 = vcombine.high %v12783_v43, %v12797_v53 }
 0x60c   : > { %v19757_v52 = vcombine.low %v11520_v7, %v11521_v63  ;;  %v11445_v48 = vmul.f32 %v19519_v34, %v10977_v44  ;;  %v19764_v10 = vrot.slane %v11880_v9, %v20433_v6  ;;  %v12822_v26 = vrot.slane %v12815_v17, %v20433_v6 }
 0x60d   : > { %v19761_v23 = vcombine.low %v13086_v4, %v13093_v3  ;;  %v13112_v56 = vcombine.low %v12790_v27, %v12804_v51  ;;  %v13919_v55 = vcombine.high %v12790_v27, %v12804_v51  ;;  %v19767_v54 = vrot.slane %v13918_v30, %v20433_v6 }
 0x60e   : > { %v11510_v43 = vmax.f32 %v11489_v13, 0.0  ;;  %v11483_v7 = vadd.f32 %v19521_v38, %v11445_v48  ;;  %v10986_v57 = vadd.f32 %v19688_v59, %v19479_v15  ;;  %v10980_v9 = vadd.f32 %v19697_v25, %v19483_v14 }
 0x60f   : > { %v19772_v31 = vrot.slane %v13112_v56, %v20433_v6  ;;  %v19775_v40 = vrot.slane %v13919_v55, %v20433_v6  ;;  %v19782_v27 = vrot.slane %v12822_v26, %v20433_v6  ;;  %v11953_v21 = vrot.slane %v19757_v52, %v20433_v6 }
 0x610   : > { %v11680_v53 = vcombine.high %v11510_v43, %v11510_v43  ;;  %v11701_v11 = vrot.slane %v11510_v43, %v20433_v6  ;;  %v11504_v8 = vmax.f32 %v11483_v7, 0.0  ;;  %v11454_v44 = vmul.f32 %v19519_v34, %v10986_v57 }
 0x611   : > { %v11448_v15 = vmul.f32 %v19519_v34, %v10980_v9  ;;  %v19800_v17 = vadd.f32 %v19704_v45, %v19488_v47 }
 0x612   : > { %v11708_v59 = vrot.slane %v11680_v53, %v20433_v6  ;;  %v11709_v25 = vcombine.low %v19631_v35, %v11701_v11  ;;  %v11710_v51 = vcombine.high %v19631_v35, %v11701_v11  ;;  %v11546_v4 = vcombine.high %v11504_v8, %v11504_v8 }
 0x613   : > { %v11567_v3 = vrot.slane %v11504_v8, %v20433_v6  ;;  %v11492_v30 = vadd.f32 %v19521_v38, %v11454_v44  ;;  %v11486_v7 = vadd.f32 %v19521_v38, %v11448_v15 }
 0x614   : > { %v11711_v13 = vcombine.low %v19660_v41, %v11708_v59  ;;  %v11712_v48 = vcombine.high %v19660_v41, %v11708_v59  ;;  %v11719_v56 = vrot.slane %v11709_v25, %v20433_v6  ;;  %v11733_v55 = vrot.slane %v11710_v51, %v20433_v6 }
 0x615   : > { %v11574_v26 = vrot.slane %v11546_v4, %v20433_v6  ;;  %v11575_v35 = vcombine.low %v19592_v1, %v11567_v3  ;;  %v11576_v43 = vcombine.high %v19592_v1, %v11567_v3  ;;  %v11513_v9 = vmax.f32 %v11492_v30, 0.0 }
 0x616   : > { %v11726_v57 = vrot.slane %v11711_v13, %v20433_v6  ;;  %v12102_v47 = vcombine.low %v11719_v56, %v11733_v55  ;;  %v13908_v45 = vcombine.high %v11719_v56, %v11733_v55  ;;  %v11740_v44 = vrot.slane %v11712_v48, %v20433_v6 }
 0x617   : > { %v11577_v53 = vcombine.low %v19595_v62, %v11574_v26  ;;  %v11578_v41 = vcombine.high %v19595_v62, %v11574_v26  ;;  %v11585_v11 = vrot.slane %v11575_v35, %v20433_v6  ;;  %v11599_v8 = vrot.slane %v11576_v43, %v20433_v6 }
 0x618   : > { %v11742_v59 = vcombine.high %v11726_v57, %v11726_v57  ;;  %v19817_v1 = vrot.slane %v13908_v45, %v20433_v6  ;;  %v19820_v15 = vrot.slane %v11726_v57, %v20433_v6  ;;  %v19827_v3 = vrot.slane %v12102_v47, %v20433_v6 }
 0x619   : > { %v11592_v25 = vrot.slane %v11577_v53, %v20433_v6  ;;  %v19824_v51 = vrot.slane %v11578_v41, %v20433_v6  ;;  %v11969_v4 = vcombine.low %v11585_v11, %v11599_v8  ;;  %v13906_v62 = vcombine.high %v11585_v11, %v11599_v8 }
 0x61a   : > { %v12134_v30 = vcombine.low %v19817_v1, %v19820_v15  ;;  %v12135_v13 = vcombine.high %v19817_v1, %v19820_v15  ;;  %v12167_v48 = vcombine.low %v11740_v44, %v11742_v59  ;;  %v11744_v47 = vcombine.high %v11740_v44, %v11740_v44 }
 0x61b   : > { %v11608_v56 = vcombine.high %v11592_v25, %v11592_v25  ;;  %v11971_v55 = vcombine.low %v11592_v25, %v19824_v51  ;;  %v11978_v26 = vrot.slane %v11969_v4, %v20433_v6  ;;  %v11985_v35 = vrot.slane %v13906_v62, %v20433_v6 }
 0x61c   : > { %v19837_v43 = vrot.slane %v12134_v30, %v20433_v6  ;;  %v19840_v57 = vrot.slane %v12167_v48, %v20433_v6  ;;  %v11747_v45 = vcombine.high %v11513_v9, %v11513_v9  ;;  %v11768_v59 = vrot.slane %v11513_v9, %v20433_v6 }
 0x61d   : > { %v11992_v53 = vrot.slane %v11971_v55, %v20433_v6  ;;  %v11999_v41 = vrot.slane %v11608_v56, %v20433_v6  ;;  %v12000_v11 = vcombine.low %v11978_v26, %v11985_v35  ;;  %v12001_v8 = vcombine.high %v11978_v26, %v11985_v35 }
 0x61e   : > { %v11775_v25 = vrot.slane %v11747_v45, %v20433_v6  ;;  %v11507_v4 = vmax.f32 %v11486_v7, 0.0  ;;  %v11610_v62 = vcombine.high %v19824_v51, %v19824_v51  ;;  %v11776_v55 = vcombine.low %v19685_v42, %v11768_v59 }
 0x61f   : > { %v12002_v30 = vcombine.low %v11992_v53, %v11999_v41  ;;  %v12003_v14 = vcombine.high %v11992_v53, %v11999_v41  ;;  %v12010_v48 = vrot.slane %v12000_v11, %v20433_v6  ;;  %v12017_v44 = vrot.slane %v12001_v8, %v20433_v6 }
 0x620   : > { %v11777_v56 = vcombine.high %v19685_v42, %v11768_v59  ;;  %v11778_v26 = vcombine.low %v19691_v36, %v11775_v25  ;;  %v11779_v9 = vcombine.high %v19691_v36, %v11775_v25  ;;  %v11613_v51 = vcombine.high %v11507_v4, %v11507_v4 }
 0x621   : > { %v12024_v7 = vrot.slane %v12002_v30, %v20433_v6  ;;  %v12031_v35 = vrot.slane %v12003_v14, %v20433_v6  ;;  %v11634_v45 = vrot.slane %v11507_v4, %v20433_v6  ;;  %v11786_v53 = vrot.slane %v11776_v55, %v20433_v6 }
 0x622   : > { %v11793_v41 = vrot.slane %v11778_v26, %v20433_v6  ;;  %v11800_v11 = vrot.slane %v11777_v56, %v20433_v6  ;;  %v11807_v8 = vrot.slane %v11779_v9, %v20433_v6  ;;  %v11641_v36 = vrot.slane %v11613_v51, %v20433_v6 }
 0x623   : > { %v12032_v42 = vcombine.low %v12010_v48, %v12024_v7  ;;  %v12033_v59 = vcombine.high %v12010_v48, %v12024_v7  ;;  %v12034_v63 = vcombine.low %v12017_v44, %v12031_v35  ;;  %v11808_v14 = vcombine.high %v11786_v53, %v11786_v53 }
 0x624   : > { %v11810_v25 = vcombine.high %v11800_v11, %v11800_v11  ;;  %v12168_v4 = vcombine.low %v11744_v47, %v11786_v53  ;;  %v12233_v30 = vcombine.low %v11793_v41, %v11807_v8  ;;  %v13909_v55 = vcombine.high %v11793_v41, %v11807_v8 }
 0x625   : > { %12452 = vst [vmem:[%s19866_s14] sm:$0x7f] %v12032_v42  ;;  %12453 = vst [vmem:[%s19866_s14 + $0x8] sm:$0x7f] %v12034_v63  ;;  %v11642_v48 = vcombine.low %v19613_v0, %v11634_v45  ;;  %v11643_v44 = vcombine.high %v19613_v0, %v11634_v45  ;;  %v11644_v56 = vcombine.low %v19617_v24, %v11641_v36 }
 0x626   : > { %12454 = vst [vmem:[%s19866_s14 + $0x10] sm:$0x7f] %v12033_v59  ;;  %v12169_v26 = vcombine.low %v11800_v11, %v11808_v14  ;;  %v12183_v9 = vrot.slane %v12168_v4, %v20433_v6  ;;  %v12197_v7 = vrot.slane %v11810_v25, %v20433_v6  ;;  %v19877_v35 = vrot.slane %v12233_v30, %v20433_v6 }
 0x627   : > { %v19880_v47 = vrot.slane %v13909_v55, %v20433_v6  ;;  %v11645_v63 = vcombine.high %v19617_v24, %v11641_v36  ;;  %v11652_v51 = vrot.slane %v11642_v48, %v20433_v6  ;;  %v11659_v53 = vrot.slane %v11644_v56, %v20433_v6 }
 0x628   : > { %v12190_v0 = vrot.slane %v12169_v26, %v20433_v6  ;;  %v12198_v45 = vcombine.low %v19840_v57, %v12183_v9  ;;  %v12199_v41 = vcombine.high %v19840_v57, %v12183_v9  ;;  %v11666_v11 = vrot.slane %v11643_v44, %v20433_v6 }
 0x629   : > { %v12264_v8 = vcombine.low %v19877_v35, %v19880_v47  ;;  %v12265_v42 = vcombine.high %v19877_v35, %v19880_v47  ;;  %v11673_v24 = vrot.slane %v11645_v63, %v20433_v6  ;;  %v11674_v59 = vcombine.high %v11652_v51, %v11652_v51 }
 0x62a   : > { %v19898_v36 = vrot.slane %v12135_v13, %v20433_v6  ;;  %v12200_v14 = vcombine.low %v12190_v0, %v12197_v7  ;;  %v12201_v25 = vcombine.high %v12190_v0, %v12197_v7  ;;  %v12208_v57 = vrot.slane %v12198_v45, %v20433_v6 }
 0x62b   : > { %v12215_v4 = vrot.slane %v12199_v41, %v20433_v6  ;;  %v19903_v30 = vrot.slane %v12264_v8, %v20433_v6  ;;  %v11676_v55 = vcombine.high %v11666_v11, %v11666_v11  ;;  %v12035_v48 = vcombine.low %v11610_v62, %v11652_v51 }
 0x62c   : > { %v12222_v44 = vrot.slane %v12200_v14, %v20433_v6  ;;  %v12229_v56 = vrot.slane %v12201_v25, %v20433_v6  ;;  %v12036_v26 = vcombine.low %v11666_v11, %v11674_v59  ;;  %v12065_v1 = vrot.slane %v11673_v24, %v20433_v6 }
 0x62d   : > { %v12037_v15 = vcombine.low %v11676_v55, %v11659_v53  ;;  %v12044_v13 = vrot.slane %v12035_v48, %v20433_v6  ;;  %v13907_v9 = vcombine.high %v11659_v53, %v11673_v24  ;;  %v11463_v7 = vmul.f32 %v19519_v34, %v19800_v17 }
 0x62e   : > { %v12230_v63 = vcombine.low %v12208_v57, %v12222_v44  ;;  %v12231_v0 = vcombine.high %v12208_v57, %v12222_v44  ;;  %v12232_v62 = vcombine.low %v12215_v4, %v12229_v56  ;;  %v12051_v51 = vrot.slane %v12036_v26, %v20433_v6 }
 0x62f   : > { %v12058_v45 = vrot.slane %v12037_v15, %v20433_v6  ;;  %v12110_v41 = vrot.slane %v13907_v9, %v20433_v6  ;;  %v11501_v11 = vadd.f32 %v19521_v38, %v11463_v7  ;;  %v10989_v8 = vadd.f32 %v19723_v33, %v19499_v16  ;;  %v20985_v9 = vld [vmem:[#allocation102_spill] sm:$0xff] }
 0x630   : > { %12461 = vst [vmem:[%s19866_s14 + $0x60] sm:$0x7f] %v12230_v63  ;;  %12462 = vst [vmem:[%s19866_s14 + $0x68] sm:$0x7f] %v12232_v62  ;;  %v12066_v53 = vcombine.low %v12044_v13, %v12051_v51  ;;  %v12067_v17 = vcombine.high %v12044_v13, %v12051_v51  ;;  %v20982_v24 = vrot.slane %v19562_v20, %v20433_v6  ;;  %v20984_v13 = vld [vmem:[#allocation107_spill] sm:$0xff]  ;;  %v10964_v63 = vpop.f32.mrf.mxu0 }
 0x631   : > { %12463 = vst [vmem:[%s19866_s14 + $0x70] sm:$0x7f] %v12231_v0  ;;  %v20983_v59 = vrot.slane %v19574_v22, %v20433_v6  ;;  %v12910_v25 = vrot.slane %v19587_v49, %v20433_v6  ;;  %v12068_v57 = vcombine.low %v12058_v45, %v12065_v1  ;;  %v12069_v4 = vcombine.high %v12058_v45, %v12065_v1 }
 0x632   : > { %v12132_v16 = vcombine.low %v12110_v41, %v19827_v3  ;;  %v12133_v33 = vcombine.high %v12110_v41, %v19827_v3  ;;  %v12076_v55 = vrot.slane %v12066_v53, %v20433_v6  ;;  %v12083_v48 = vrot.slane %v12067_v17, %v20433_v6  ;;  %v13182_v41 = vpop.permute.xlu1 %13181 }
 0x633   : > { %v12903_v14 = vcombine.low %v20983_v59, %v20982_v24  ;;  %v11522_v44 = vmax.f32 %v11501_v11, 0.0  ;;  %v11457_v20 = vmul.f32 %v19519_v34, %v10989_v8  ;;  %v12090_v56 = vrot.slane %v12068_v57, %v20433_v6  ;;  %v13184_v24 = vpop.permute.xlu0 %13183  ;;  %v20987_v57 = vld [vmem:[#allocation94_spill] sm:$0xff] }
 0x634   : > { %v12097_v22 = vrot.slane %v12069_v4, %v20433_v6  ;;  %v12142_v26 = vrot.slane %v12132_v16, %v20433_v6  ;;  %v12149_v49 = vrot.slane %v12133_v33, %v20433_v6  ;;  %v12855_v7 = vcombine.low %v20985_v9, %v20984_v13  ;;  %v20989_v16 = vld [vmem:[#allocation92_spill] sm:$0xff]  ;;  %v20993_v9 = vld [vmem:[#allocation111_spill] sm:$0xff] }
 0x635   : > { %v11960_v1 = vrot.slane %v11522_v44, %v20433_v6  ;;  %v11495_v3 = vadd.f32 %v19521_v38, %v11457_v20  ;;  %v12917_v15 = vrot.slane %v12903_v14, %v20433_v6  ;;  %v12098_v0 = vcombine.low %v12076_v55, %v12090_v56  ;;  %v20986_v14 = vld [vmem:[#allocation95_spill] sm:$0xff] }
 0x636   : > { %v12099_v62 = vcombine.high %v12076_v55, %v12090_v56  ;;  %v12100_v51 = vcombine.low %v12083_v48, %v12097_v22  ;;  %v12164_v45 = vcombine.low %v12142_v26, %v19837_v43  ;;  %v12165_v11 = vcombine.high %v12142_v26, %v19837_v43 }
 0x637   : > { %v12166_v8 = vcombine.low %v12149_v49, %v19898_v36  ;;  %v19948_v53 = vcombine.low %v11953_v21, %v11960_v1  ;;  %v11516_v17 = vmax.f32 %v11495_v3, 0.0  ;;  %12455 = vst [vmem:[%s19866_s14 + $0x20] sm:$0x7f] %v12098_v0  ;;  %v12918_v59 = vcombine.low %v12910_v25, %v12917_v15  ;;  %v13188_v15 = vpop.permute.xlu0 %13187 }
 0x638   : > { %12456 = vst [vmem:[%s19866_s14 + $0x28] sm:$0x7f] %v12100_v51  ;;  %12457 = vst [vmem:[%s19866_s14 + $0x30] sm:$0x7f] %v12099_v62  ;;  %v20988_v4 = vcombine.low %v20986_v14, %v20987_v57  ;;  %v12869_v36 = vrot.slane %v12855_v7, %v20433_v6  ;;  %v10992_v33 = vadd.f32 %v10964_v63, %v20989_v16 }
 0x639   : > { %12458 = vst [vmem:[%s19866_s14 + $0x40] sm:$0x7f] %v12164_v45  ;;  %v19964_v52 = vrot.slane %v12265_v42, %v20433_v6  ;;  %12459 = vst [vmem:[%s19866_s14 + $0x48] sm:$0x7f] %v12166_v8  ;;  %v11814_v21 = vcombine.high %v11516_v17, %v11516_v17  ;;  %v11835_v25 = vrot.slane %v11516_v17, %v20433_v6 }
 0x63a   : > { %v12862_v43 = vrot.slane %v20988_v4, %v20433_v6  ;;  %12460 = vst [vmem:[%s19866_s14 + $0x50] sm:$0x7f] %v12165_v11  ;;  %v20990_v55 = vcombine.low %v19583_v39, %v19622_v60  ;;  %13168 = vst.msk [vmem:[%s19866_s14 + $0x38] sm:$0x7f] %vm13166_vm5, %v12918_v59  ;;  %v11460_v20 = vmul.f32 %v19519_v34, %v10992_v33 }
 0x63b   : > { %v12965_v35 = vrot.slane %v19628_v5, %v20433_v6  ;;  %v20991_v47 = vrot.slane %v19652_v18, %v20433_v6  ;;  %v11968_v56 = vrot.slane %v19948_v53, %v20433_v6  ;;  %v11842_v39 = vrot.slane %v11814_v21, %v20433_v6  ;;  %13204 = vst.msk [vmem:[%s19866_s14 + $0x38] sm:$0x7f] %vm13202_vm4, %v13184_v24  ;;  %v13186_v5 = vpop.permute.xlu1 %13185 }
 0x63c   : > { %v12958_v48 = vrot.slane %v20990_v55, %v20433_v6  ;;  %v12870_v44 = vcombine.low %v12862_v43, %v12869_v36  ;;  %v11843_v60 = vcombine.low %v19700_v61, %v11835_v25  ;;  %v11844_v22 = vcombine.high %v19700_v61, %v11835_v25 }
 0x63d   : > { %v12999_v42 = vcombine.low %v20991_v47, %v19665_v32  ;;  %v11498_v34 = vadd.f32 %v19521_v38, %v11460_v20  ;;  %v13006_v32 = vrot.slane %v19667_v37, %v20433_v6  ;;  %v11845_v49 = vcombine.low %v19707_v29, %v11842_v39  ;;  %v20992_v37 = vld [vmem:[#allocation114_spill] sm:$0xff] }
 0x63e   : > { %13167 = vst.msk [vmem:[%s19866_s14 + $0x18] sm:$0x7f] %vm13166_vm5, %v12870_v44  ;;  %v12966_v18 = vcombine.low %v12958_v48, %v12965_v35  ;;  %v11846_v1 = vcombine.high %v19707_v29, %v11842_v39  ;;  %v11853_v61 = vrot.slane %v11843_v60, %v20433_v6  ;;  %v11867_v3 = vrot.slane %v11844_v22, %v20433_v6 }
 0x63f   : > { %v13013_v26 = vrot.slane %v12999_v42, %v20433_v6  ;;  %13203 = vst.msk [vmem:[%s19866_s14 + $0x18] sm:$0x7f] %vm13202_vm4, %v13182_v41  ;;  %v11519_v38 = vmax.f32 %v11498_v34, 0.0  ;;  %v13046_v7 = vcombine.low %v20993_v9, %v20992_v37  ;;  %v13061_v29 = vrot.slane %v13047_v19, %v20433_v6  ;;  %v13190_v36 = vpop.permute.xlu1 %13189 }
 0x640   : > { %13169 = vst.msk [vmem:[%s19866_s14 + $0x58] sm:$0x7f] %vm13166_vm5, %v12966_v18  ;;  %v11860_v63 = vrot.slane %v11845_v49, %v20433_v6  ;;  %v11874_v0 = vrot.slane %v11846_v1, %v20433_v6  ;;  %v11875_v62 = vcombine.high %v11853_v61, %v11853_v61  ;;  %v11877_v51 = vcombine.high %v11867_v3, %v11867_v3 }
 0x641   : > { %v13014_v13 = vcombine.low %v13006_v32, %v13013_v26  ;;  %13205 = vst.msk [vmem:[%s19866_s14 + $0x58] sm:$0x7f] %vm13202_vm4, %v13186_v5  ;;  %v12235_v45 = vcombine.low %v11853_v61, %v11867_v3  ;;  %v11881_v41 = vcombine.high %v11519_v38, %v11519_v38  ;;  %v11902_v11 = vrot.slane %v11519_v38, %v20433_v6 }
 0x642   : > { %v13054_v8 = vrot.slane %v13046_v7, %v20433_v6  ;;  %v11876_v17 = vcombine.high %v11860_v63, %v11860_v63  ;;  %v12263_v46 = vrot.slane %v11875_v62, %v20433_v6  ;;  %v12299_v12 = vcombine.low %v11877_v51, %v11860_v63 }
 0x643   : > { %13170 = vst.msk [vmem:[%s19866_s14 + $0x78] sm:$0x7f] %vm13166_vm5, %v13014_v13  ;;  %v11878_v19 = vcombine.high %v11874_v0, %v11874_v0  ;;  %v12256_v24 = vrot.slane %v12235_v45, %v20433_v6  ;;  %v11909_v59 = vrot.slane %v11881_v41, %v20433_v6  ;;  %v11910_v14 = vcombine.low %v19744_v50, %v11902_v11  ;;  %v13194_v53 = vpop.permute.xlu1 %13193 }
 0x644   : > { %13206 = vst.msk [vmem:[%s19866_s14 + $0x78] sm:$0x7f] %vm13202_vm4, %v13188_v15  ;;  %v11911_v57 = vcombine.high %v19744_v50, %v11902_v11  ;;  %v12300_v4 = vcombine.low %v11874_v0, %v11876_v17  ;;  %v12308_v43 = vrot.slane %v12299_v12, %v20433_v6  ;;  %v13062_v16 = vcombine.low %v13054_v8, %v13061_v29 }
 0x645   : > { %v20994_v33 = vrot.slane %v19719_v58, %v20433_v6  ;;  %v12266_v25 = vcombine.low %v12256_v24, %v12263_v46  ;;  %v12267_v55 = vcombine.high %v12256_v24, %v12263_v46  ;;  %v11912_v48 = vcombine.low %v19764_v10, %v11909_v59 }
 0x646   : > { %v11913_v44 = vcombine.high %v19764_v10, %v11909_v59  ;;  %v12315_v50 = vrot.slane %v12300_v4, %v20433_v6  ;;  %v11920_v20 = vrot.slane %v11910_v14, %v20433_v6  ;;  %v11934_v35 = vrot.slane %v11911_v57, %v20433_v6  ;;  %13171 = vst.msk [vmem:[%s19866_s14 + $0x98] sm:$0x7f] %vm13166_vm5, %v13062_v16 }
 0x647   : > { %v13094_v21 = vcombine.low %v20994_v33, %v13079_v28  ;;  %v12288_v47 = vrot.slane %v12266_v25, %v20433_v6  ;;  %v12295_v58 = vrot.slane %v12267_v55, %v20433_v6  ;;  %v11927_v28 = vrot.slane %v11912_v48, %v20433_v6  ;;  %13207 = vst.msk [vmem:[%s19866_s14 + $0x98] sm:$0x7f] %vm13202_vm4, %v13190_v36 }
 0x648   : > { %v11941_v10 = vrot.slane %v11913_v44, %v20433_v6  ;;  %v12330_v42 = vcombine.low %v12308_v43, %v12315_v50  ;;  %v12331_v39 = vcombine.high %v12308_v43, %v12315_v50  ;;  %v12301_v60 = vcombine.low %v11878_v19, %v11920_v20 }
 0x649   : > { %v13102_v2 = vrot.slane %v13094_v21, %v20433_v6  ;;  %v12329_v22 = vrot.slane %v11934_v35, %v20433_v6  ;;  %v12296_v34 = vcombine.low %v19903_v30, %v12288_v47  ;;  %v12297_v5 = vcombine.high %v19903_v30, %v12288_v47 }
 0x64a   : > { %v12298_v18 = vcombine.low %v19964_v52, %v12295_v58  ;;  %v13910_v32 = vcombine.high %v11920_v20, %v11934_v35  ;;  %v12322_v26 = vrot.slane %v12301_v60, %v20433_v6  ;;  %v12340_v49 = vrot.slane %v12330_v42, %v20433_v6 }
 0x64b   : > { %v12347_v1 = vrot.slane %v12331_v39, %v20433_v6  ;;  %v12366_v61 = vcombine.low %v11927_v28, %v11941_v10  ;;  %12464 = vst [vmem:[%s19866_s14 + $0x80] sm:$0x7f] %v12296_v34  ;;  %12466 = vst [vmem:[%s19866_s14 + $0x90] sm:$0x7f] %v12297_v5  ;;  %v13911_v3 = vcombine.high %v11927_v28, %v11941_v10 }
 0x64c   : > { %12465 = vst [vmem:[%s19866_s14 + $0x88] sm:$0x7f] %v12298_v18  ;;  %v12374_v38 = vrot.slane %v13910_v32, %v20433_v6  ;;  %v13109_v15 = vrot.slane %v19761_v23, %v20433_v6  ;;  %v20995_v30 = vcombine.low %v19767_v54, %v19772_v31  ;;  %v12332_v13 = vcombine.low %v12322_v26, %v12329_v22  ;;  %v13192_v54 = vpop.permute.xlu0 %13191 }
 0x64d   : > { %v12333_v37 = vcombine.high %v12322_v26, %v12329_v22  ;;  %v12381_v9 = vrot.slane %v12366_v61, %v20433_v6  ;;  %v20996_v7 = vcombine.low %v19775_v40, %v19782_v27  ;;  %v12395_v23 = vrot.slane %v11968_v56, %v20433_v6 }
 0x64e   : > { %v13150_v52 = vrot.slane %v20995_v30, %v20433_v6  ;;  %v12388_v63 = vrot.slane %v13911_v3, %v20433_v6  ;;  %v13110_v31 = vcombine.low %v13102_v2, %v13109_v15  ;;  %v12354_v0 = vrot.slane %v12332_v13, %v20433_v6 }
 0x64f   : > { %v13157_v29 = vrot.slane %v20996_v7, %v20433_v6  ;;  %v12361_v62 = vrot.slane %v12333_v37, %v20433_v6  ;;  %v12396_v51 = vcombine.low %v12374_v38, %v12381_v9  ;;  %v12397_v45 = vcombine.high %v12374_v38, %v12381_v9 }
 0x650   : > { %v12398_v40 = vcombine.low %v12388_v63, %v12395_v23  ;;  %v12399_v27 = vcombine.high %v12388_v63, %v12395_v23  ;;  %13172 = vst.msk [vmem:[%s19866_s14 + $0xb8] sm:$0x7f] %vm13166_vm5, %v13110_v31  ;;  %v12362_v41 = vcombine.low %v12340_v49, %v12354_v0  ;;  %v12363_v11 = vcombine.high %v12340_v49, %v12354_v0 }
 0x651   : > { %v13158_v56 = vcombine.low %v13150_v52, %v13157_v29  ;;  %v12364_v8 = vcombine.low %v12347_v1, %v12361_v62  ;;  %v12406_v17 = vrot.slane %v12396_v51, %v20433_v6  ;;  %13208 = vst.msk [vmem:[%s19866_s14 + $0xb8] sm:$0x7f] %vm13202_vm4, %v13192_v54  ;;  %v12413_v46 = vrot.slane %v12397_v45, %v20433_v6 }
 0x652   : > { %v12420_v12 = vrot.slane %v12398_v40, %v20433_v6  ;;  %v12427_v19 = vrot.slane %v12399_v27, %v20433_v6  ;;  %12467 = vst [vmem:[%s19866_s14 + $0xa0] sm:$0x7f] %v12362_v41  ;;  %12469 = vst [vmem:[%s19866_s14 + $0xb0] sm:$0x7f] %v12363_v11 }
 0x653   : > { %13173 = vst.msk [vmem:[%s19866_s14 + $0xd8] sm:$0x7f] %vm13166_vm5, %v13158_v56  ;;  %12468 = vst [vmem:[%s19866_s14 + $0xa8] sm:$0x7f] %v12364_v8 }
 0x654   : > { %13209 = vst.msk [vmem:[%s19866_s14 + $0xd8] sm:$0x7f] %vm13202_vm4, %v13194_v53  ;;  %v12428_v24 = vcombine.low %v12406_v17, %v12420_v12  ;;  %v12429_v59 = vcombine.high %v12406_v17, %v12420_v12  ;;  %v12430_v14 = vcombine.low %v12413_v46, %v12427_v19 }
 0x656   : > { %12470 = vst [vmem:[%s19866_s14 + $0xc0] sm:$0x7f] %v12428_v24  ;;  %12471 = vst [vmem:[%s19866_s14 + $0xc8] sm:$0x7f] %v12430_v14 }
 0x657   : > { %12472 = vst [vmem:[%s19866_s14 + $0xd0] sm:$0x7f] %v12429_v59 }
 0x658 PF: > { %s23_s25 = sadd.s32 1, %s14432_s25  }
 0x659   : > { %p20_p4 = scmp.ge.s32.totalorder %s23_s25, 4  }
 0x65b   :  { %22 = sbr.rel (!%p20_p4) target bundleno = 1 (0x1), region = 121 }

</bundles_post_ra>
